<compile_context>
chip_gen: v7x
topology: tpu7x:2x2x1
jax: 0.10.0
libtpu: 0.0.40
codegen_flags: <defaults>
</compile_context>

<pallas_src>
import functools

import jax
import jax.numpy as jnp
import numpy as np
from jax import lax
from jax.experimental import pallas as pl
from jax.experimental.pallas import tpu as pltpu


def _round_up(x, m):
    return ((x + m - 1) // m) * m


@functools.lru_cache(maxsize=None)
def _vmem_limit():
    """Generation-aware scoped-VMEM limit: physical capacity minus headroom for
    Mosaic's internal scratch / double-buffers (v7x 64 MiB -> 48 MiB budget,
    v5e/v6e 128 MiB -> 112 MiB budget)."""
    cap = 64 * 1024 * 1024
    try:
        cap = int(pltpu.get_tpu_info().vmem_capacity_bytes)
    except Exception:
        pass
    return int(max(cap - 16 * 1024 * 1024, 32 * 1024 * 1024))


def _pick_row_tile(hw):
    """Largest row tile (multiple of 8) that divides hw and leaves >=2 grid steps."""
    for t in (1024, 512, 256, 128, 64, 32, 16, 8):
        if t < hw and hw % t == 0:
            return t
    return hw


def _pick_k_tile(cin_p, hp, wp, hw, cp, vmem_limit):
    """Largest Cin reduction tile whose per-step working set fits the VMEM budget."""
    best = 128
    for ck in (256, 512, 1024):
        if cin_p % ck:
            continue
        est = (2 * hp * wp * ck * 2           # xp block (bf16, double-buffered)
               + 2 * 28 * ck * cp * 2         # 1x1 + 3x(3x3) weights (bf16, 2 bufs)
               + 4 * hw * cp * 4              # f32 branch accumulators (scratch)
               + 2 * hw * 4 * cp * 2)         # concat output block (bf16, 2 bufs)
        if est <= int(0.8 * vmem_limit):
            best = ck
    return best


# ----------------------------- Pallas kernels -----------------------------

def _fused_branches_kernel(xp_ref, w0_ref, wd_ref, scale_ref, shift_ref,
                           cat_ref, csum_ref, acc_ref, *, H, W, dmax, rates):
    """One pass over a Cin tile of the shared max-dilation-padded image computes:
    branch 0 (1x1 conv), branches 1-3 (dilated 3x3 convs) and the GAP channel
    partial sum.  Conv results accumulate across the Cin grid axis in a VMEM f32
    scratch; the BN+ReLU epilogue writes the 4 branches as channel slices of the
    concat buffer on the last Cin step."""
    k = pl.program_id(1)
    nk = pl.num_programs(1)
    ck = xp_ref.shape[-1]
    Cp = w0_ref.shape[-1]
    HW = H * W

    @pl.when(k == 0)
    def _():
        acc_ref[...] = jnp.zeros_like(acc_ref)

    # Trace-time plan: unique padded-column offsets + union of row ranges needed.
    col_plan = {}

    def _need(off, lo, hi):
        l, h = col_plan.get(off, (lo, hi))
        col_plan[off] = (min(l, lo), max(h, hi))

    _need(dmax, dmax, dmax + H)                       # 1x1 branch / GAP window
    for d in rates:
        base = dmax - d
        for kx in range(3):
            _need(base + kx * d, base, base + 2 * d + H)

    # Materialize each unique column window ONCE (the W-offset slice is the only
    # strided VMEM copy); every tap reuses it via free leading-dim row slices and
    # a layout-preserving (H, W, ck) -> (H*W, ck) collapse when W % 8 == 0.
    col = {off: (lo, xp_ref[lo:hi, off:off + W, :])
           for off, (lo, hi) in col_plan.items()}

    def patch(off, row0):
        lo, win = col[off]
        return win[row0 - lo:row0 - lo + H].reshape(HW, ck)

    # Branch 0: 1x1 conv on the un-padded center window; piggyback the GAP sum
    # (per-(n, k) block of the channel-sum output -> no cross-step accumulator).
    xc = patch(dmax, dmax)
    acc_ref[0] = acc_ref[0] + jnp.dot(xc, w0_ref[...],
                                      preferred_element_type=jnp.float32)
    csum_ref[...] = jnp.sum(xc.astype(jnp.float32), axis=0).reshape(1, ck)

    # Branches 1-3: dilated 3x3 convs as 9 shifted matmuls each (shared windows).
    for b, d in enumerate(rates):
        base = dmax - d
        for ky in range(3):
            for kx in range(3):
                acc_ref[b + 1] = acc_ref[b + 1] + jnp.dot(
                    patch(base + kx * d, base + ky * d), wd_ref[b, ky * 3 + kx],
                    preferred_element_type=jnp.float32)

    # Epilogue: folded BN + ReLU, 4 branches stored as lane-aligned channel slices
    # of the concat buffer (the (N, HW, 4*Cp) concat never exists anywhere else).
    @pl.when(k == nk - 1)
    def _():
        for b in range(4):
            y = acc_ref[b] * scale_ref[b:b + 1] + shift_ref[b:b + 1]
            cat_ref[:, b * Cp:(b + 1) * Cp] = jnp.maximum(y, 0.0).astype(cat_ref.dtype)


def fused_branches(xp, w0, wd, scales, shifts, *, H, W, dmax, rates, ck, vmem_limit):
    """xp: (N, Hp, Wp, Cin_p) bf16 shared padded image.
    Returns ((N, HW, 4*Cp) bf16 concat of branches 0-3, (N, 1, Cin_p) f32 channel sums)."""
    N, Hp, Wp, Cin_p = xp.shape
    Cp = w0.shape[-1]
    nk = Cin_p // ck
    kernel = functools.partial(_fused_branches_kernel, H=H, W=W, dmax=dmax,
                               rates=tuple(rates))
    return pl.pallas_call(
        kernel,
        out_shape=(jax.ShapeDtypeStruct((N, H * W, 4 * Cp), jnp.bfloat16),
                   jax.ShapeDtypeStruct((N, 1, Cin_p), jnp.float32)),
        grid=(N, nk),
        in_specs=[
            pl.BlockSpec((None, Hp, Wp, ck), lambda n, k: (n, 0, 0, k)),
            pl.BlockSpec((ck, Cp), lambda n, k: (k, 0)),
            pl.BlockSpec((3, 9, ck, Cp), lambda n, k: (0, 0, k, 0)),
            pl.BlockSpec((4, Cp), lambda n, k: (0, 0)),
            pl.BlockSpec((4, Cp), lambda n, k: (0, 0)),
        ],
        out_specs=(
            pl.BlockSpec((None, H * W, 4 * Cp), lambda n, k: (n, 0, 0)),
            pl.BlockSpec((None, 1, ck), lambda n, k: (n, 0, k)),
        ),
        scratch_shapes=[pltpu.VMEM((4, H * W, Cp), jnp.float32)],
        compiler_params=pltpu.CompilerParams(
            dimension_semantics=("parallel", "arbitrary"),
            vmem_limit_bytes=vmem_limit),
    )(xp, w0, wd, scales, shifts)


def _project_kernel(cat_ref, pproj_ref, wp_ref, scale_ref, shift_ref, o_ref):
    """Projection 1x1 conv as ONE K=4*Cp matmul + pooled-branch row + BN + ReLU."""
    acc = jnp.dot(cat_ref[...], wp_ref[...], preferred_element_type=jnp.float32)
    acc = acc + pproj_ref[...]                        # (1, Cp) broadcasts over rows
    o_ref[...] = jnp.maximum(acc * scale_ref[...] + shift_ref[...], 0.0)


def project_bn_relu(cat, pproj, wp4, scale, shift, *, vmem_limit):
    """cat: (N, HW, 4*Cp) bf16; pproj: (N, 1, Cp) f32; wp4: (4*Cp, Cp) bf16."""
    N, HW, C4 = cat.shape
    Cp = wp4.shape[-1]
    tr = _pick_row_tile(HW)
    return pl.pallas_call(
        _project_kernel,
        out_shape=jax.ShapeDtypeStruct((N, HW, Cp), jnp.float32),
        grid=(N, HW // tr),
        in_specs=[
            pl.BlockSpec((None, tr, C4), lambda n, r: (n, r, 0)),
            pl.BlockSpec((None, 1, Cp), lambda n, r: (n, 0, 0)),
            pl.BlockSpec((C4, Cp), lambda n, r: (0, 0)),
            pl.BlockSpec((1, Cp), lambda n, r: (0, 0)),
            pl.BlockSpec((1, Cp), lambda n, r: (0, 0)),
        ],
        out_specs=pl.BlockSpec((None, tr, Cp), lambda n, r: (n, r, 0)),
        compiler_params=pltpu.CompilerParams(
            dimension_semantics=("parallel", "parallel"),
            vmem_limit_bytes=vmem_limit),
    )(cat, pproj, wp4, scale, shift)


# ----------------------------- parameter setup -----------------------------

def _fold_bn(gamma, beta, mean, var, eps=1e-5):
    scale = gamma / jnp.sqrt(var + eps)
    shift = beta - mean * scale
    return scale.astype(jnp.float32), shift.astype(jnp.float32)


def _bn_params(key, c):
    k1, k2, k3, k4 = jax.random.split(key, 4)
    gamma = 1.0 + 0.1 * jax.random.normal(k1, (c,), jnp.float32)
    beta = 0.1 * jax.random.normal(k2, (c,), jnp.float32)
    mean = 0.1 * jax.random.normal(k3, (c,), jnp.float32)
    var = jax.random.uniform(k4, (c,), jnp.float32, 0.5, 1.5)
    return _fold_bn(gamma, beta, mean, var)


def init_aspp_params(key, in_channels, out_channels=256):
    keys = jax.random.split(key, 12)
    p = {}
    p["w0"] = 0.1 * jax.random.normal(keys[0], (in_channels, out_channels), jnp.float32)
    p["bn0"] = _bn_params(keys[1], out_channels)
    for i in range(3):
        p[f"w{i+1}_hwio"] = 0.1 * jax.random.normal(
            keys[2 + 2 * i], (3, 3, in_channels, out_channels), jnp.float32)
        p[f"bn{i+1}"] = _bn_params(keys[3 + 2 * i], out_channels)
    p["w4"] = 0.1 * jax.random.normal(keys[8], (in_channels, out_channels), jnp.float32)
    p["bn4"] = _bn_params(keys[9], out_channels)
    p["wp"] = 0.1 * jax.random.normal(keys[10], (5 * out_channels, out_channels), jnp.float32)
    p["bnp"] = _bn_params(keys[11], out_channels)
    return p


# ------------------------------ ASPP forward -------------------------------

def aspp_forward(x_nchw, params, rates):
    """x_nchw: (N, Cin, H, W) f32; rates: static tuple of 3 ints -> (N, Cout, H, W) f32."""
    rates = tuple(int(r) for r in rates)                              # static python ints
    N, Cin, H, W = x_nchw.shape
    Cout = params["w0"].shape[-1]
    Cin_p = _round_up(Cin, 128)
    Cp = _round_up(Cout, 128)
    HW = H * W
    dmax = max(rates)
    vmem_limit = _vmem_limit()

    # Single data-massaging pass: cast to bf16 BEFORE the NCHW->NHWC transpose
    # (halves transpose traffic), then one shared pad (max-dilation halo + lane
    # padding of channels).  No separate x2d / per-branch padded copies.
    x = jnp.transpose(x_nchw.astype(jnp.bfloat16), (0, 2, 3, 1))
    xp = jnp.pad(x, ((0, 0), (dmax, dmax), (dmax, dmax), (0, Cin_p - Cin)))
    Hp, Wp = H + 2 * dmax, W + 2 * dmax

    def pad_vec(v):
        return jnp.pad(v, (0, Cp - Cout)).astype(jnp.float32)

    w0 = jnp.pad(params["w0"], ((0, Cin_p - Cin), (0, Cp - Cout))).astype(jnp.bfloat16)
    wd = jnp.stack([params[f"w{i+1}_hwio"].reshape(9, Cin, Cout) for i in range(3)])
    wd = jnp.pad(wd, ((0, 0), (0, 0), (0, Cin_p - Cin), (0, Cp - Cout))).astype(jnp.bfloat16)
    scales = jnp.stack([pad_vec(params[f"bn{i}"][0]) for i in range(4)])
    shifts = jnp.stack([pad_vec(params[f"bn{i}"][1]) for i in range(4)])

    ck = _pick_k_tile(Cin_p, Hp, Wp, HW, Cp, vmem_limit)
    cat, chan_sum = fused_branches(xp, w0, wd, scales, shifts, H=H, W=W, dmax=dmax,
                                   rates=rates, ck=ck, vmem_limit=vmem_limit)

    # Pooling branch: GAP -> 1x1 conv -> BN -> ReLU -> its projection slice.
    # ~N*Cin*Cout FLOPs, done in f32 with plain XLA ops: no extra pallas_call, no
    # cross-iteration scratch in the projection kernel, and better numerics.
    wp_r = params["wp"].reshape(5, Cout, Cout)
    sc4, sh4 = params["bn4"]
    means = chan_sum[:, 0, :Cin] * (1.0 / float(HW))                  # (N, Cin) f32
    y4 = jnp.maximum(means @ params["w4"] * sc4 + sh4, 0.0)           # (N, Cout)
    pproj = y4 @ wp_r[4]                                              # (N, Cout)
    pproj = jnp.pad(pproj, ((0, 0), (0, Cp - Cout)))[:, None, :].astype(jnp.float32)

    # Projection weights laid out to match the concat channel order [b0|b1|b2|b3].
    wp4 = jnp.pad(wp_r[:4], ((0, 0), (0, Cp - Cout), (0, Cp - Cout)))
    wp4 = wp4.reshape(4 * Cp, Cp).astype(jnp.bfloat16)

    scp, shp = params["bnp"]
    out = project_bn_relu(cat, pproj, wp4, pad_vec(scp)[None, :], pad_vec(shp)[None, :],
                          vmem_limit=vmem_limit)

    out = out[:, :, :Cout].reshape(N, H, W, Cout)
    # TODO(synk): nn.Dropout(0.1) is inference-mode identity.
    return jnp.transpose(out, (0, 3, 1, 2))                           # NCHW


# ------------------------------ pure-JAX ref --------------------------------

def aspp_reference(x_nchw, params, rates):
    x = jnp.transpose(x_nchw, (0, 2, 3, 1)).astype(jnp.float32)
    N, H, W, _ = x.shape
    dn = lax.conv_dimension_numbers(x.shape, (1, 1, 1, 1), ("NHWC", "HWIO", "NHWC"))

    def bn_relu(y, sc_sh):
        sc, sh = sc_sh
        return jnp.maximum(y * sc.reshape(1, 1, 1, -1) + sh.reshape(1, 1, 1, -1), 0.0)

    res = [bn_relu(lax.conv_general_dilated(
        x, params["w0"][None, None], (1, 1), "VALID", dimension_numbers=dn), params["bn0"])]
    for i, r in enumerate(rates):
        w = params[f"w{i+1}_hwio"]
        y = lax.conv_general_dilated(x, w, (1, 1), ((r, r), (r, r)),
                                     rhs_dilation=(r, r), dimension_numbers=dn)
        res.append(bn_relu(y, params[f"bn{i+1}"]))
    m = jnp.mean(x, axis=(1, 2), keepdims=True)
    yp = lax.conv_general_dilated(m, params["w4"][None, None], (1, 1), "VALID",
                                  dimension_numbers=dn)
    yp = bn_relu(yp, params["bn4"])
    res.append(jnp.broadcast_to(yp, (N, H, W, yp.shape[-1])))
    cat = jnp.concatenate(res, axis=-1)
    out = bn_relu(lax.conv_general_dilated(cat, params["wp"][None, None], (1, 1), "VALID",
                                           dimension_numbers=dn), params["bnp"])
    return jnp.transpose(out, (0, 3, 1, 2))


# ---------------------------------- main ------------------------------------

if __name__ == "__main__":
    key = jax.random.PRNGKey(0)
    kx, kp = jax.random.split(key)

    N, Cin, H, W = 2, 8, 16, 16
    Cout = 32
    atrous_rates = (1, 2, 3)

    x = jax.random.normal(kx, (N, Cin, H, W), jnp.float32)
    params = init_aspp_params(kp, Cin, out_channels=Cout)

    fwd = jax.jit(aspp_forward, static_argnums=2)
    out = jax.block_until_ready(fwd(x, params, atrous_rates))
    assert out.shape == (N, Cout, H, W), out.shape

    ref = jax.block_until_ready(aspp_reference(x, params, atrous_rates))
    # bf16 MXU inputs (f32 accumulation) -> loosened tolerance vs the f32 reference.
    np.testing.assert_allclose(np.asarray(out), np.asarray(ref), rtol=3e-2, atol=3e-2)

    print("KERNEL_OK")
</pallas_src>

<mosaic_0001>
module attributes {stable_mosaic.version = 11 : i64} {
  func.func @_fused_branches_kernel(%arg0: i32, %arg1: i32, %arg2: memref<1x22x22x128xbf16, #tpu.memory_space<vmem>>, %arg3: memref<128x128xbf16, #tpu.memory_space<vmem>>, %arg4: memref<3x9x128x128xbf16, #tpu.memory_space<vmem>>, %arg5: memref<4x128xf32, #tpu.memory_space<vmem>>, %arg6: memref<4x128xf32, #tpu.memory_space<vmem>>, %arg7: memref<1x256x512xbf16, #tpu.memory_space<vmem>>, %arg8: memref<1x1x128xf32, #tpu.memory_space<vmem>>, %arg9: memref<4x256x128xf32, #tpu.memory_space<vmem>>) attributes {dimension_semantics = [#tpu.dimension_semantics<parallel>, #tpu.dimension_semantics<arbitrary>], iteration_bounds = array<i64: 2, 1>, scalar_prefetch = 0 : i64, scratch_operands = 1 : i64, tpu.core_type = #tpu.core_type<tc>, window_params = [{transform_indices = @transform_0, window_bounds = array<i64: 1, 22, 22, 128>}, {transform_indices = @transform_1, window_bounds = array<i64: 128, 128>}, {transform_indices = @transform_2, window_bounds = array<i64: 3, 9, 128, 128>}, {pipeline_mode = #tpu.pipeline_mode<synchronous>, transform_indices = @transform_3, window_bounds = array<i64: 4, 128>}, {pipeline_mode = #tpu.pipeline_mode<synchronous>, transform_indices = @transform_4, window_bounds = array<i64: 4, 128>}, {transform_indices = @transform_5, window_bounds = array<i64: 1, 256, 512>}, {transform_indices = @transform_6, window_bounds = array<i64: 1, 1, 128>}]} {
    %c0_i32 = arith.constant 0 : i32
    %0 = arith.cmpi eq, %arg1, %c0_i32 : i32
    %1 = arith.extui %0 : i1 to i32
    %c0_i32_0 = arith.constant 0 : i32
    %2 = arith.cmpi ne, %1, %c0_i32_0 : i32
    scf.if %2 {
      %cst_331 = arith.constant 0.000000e+00 : f32
      %333 = vector.broadcast %cst_331 : f32 to vector<4x256x128xf32>
      %c0_332 = arith.constant 0 : index
      %c0_333 = arith.constant 0 : index
      %c0_334 = arith.constant 0 : index
      %334 = vector.load %arg9[%c0_332, %c0_333, %c0_334] : memref<4x256x128xf32, #tpu.memory_space<vmem>>, vector<4x256x128xf32>
      tpu.vector_store %arg9[%c0_332, %c0_333, %c0_334], %333 {strides = array<i32>} : memref<4x256x128xf32, #tpu.memory_space<vmem>>, vector<4x256x128xf32>,
    } else {
    }
    %c0 = arith.constant 0 : index
    %c0_1 = arith.constant 0 : index
    %c3 = arith.constant 3 : index
    %c0_2 = arith.constant 0 : index
    %3 = vector.load %arg2[%c0, %c0_1, %c3, %c0_2] : memref<1x22x22x128xbf16, #tpu.memory_space<vmem>>, vector<1x22x16x128xbf16>
    %4 = vector.shape_cast %3 : vector<1x22x16x128xbf16> to vector<22x16x128xbf16>
    %c0_3 = arith.constant 0 : index
    %c2 = arith.constant 2 : index
    %c2_4 = arith.constant 2 : index
    %c0_5 = arith.constant 0 : index
    %5 = vector.load %arg2[%c0_3, %c2, %c2_4, %c0_5] : memref<1x22x22x128xbf16, #tpu.memory_space<vmem>>, vector<1x18x16x128xbf16>
    %6 = vector.shape_cast %5 : vector<1x18x16x128xbf16> to vector<18x16x128xbf16>
    %c0_6 = arith.constant 0 : index
    %c2_7 = arith.constant 2 : index
    %c4 = arith.constant 4 : index
    %c0_8 = arith.constant 0 : index
    %7 = vector.load %arg2[%c0_6, %c2_7, %c4, %c0_8] : memref<1x22x22x128xbf16, #tpu.memory_space<vmem>>, vector<1x18x16x128xbf16>
    %8 = vector.shape_cast %7 : vector<1x18x16x128xbf16> to vector<18x16x128xbf16>
    %c0_9 = arith.constant 0 : index
    %c1 = arith.constant 1 : index
    %c1_10 = arith.constant 1 : index
    %c0_11 = arith.constant 0 : index
    %9 = vector.load %arg2[%c0_9, %c1, %c1_10, %c0_11] : memref<1x22x22x128xbf16, #tpu.memory_space<vmem>>, vector<1x20x16x128xbf16>
    %10 = vector.shape_cast %9 : vector<1x20x16x128xbf16> to vector<20x16x128xbf16>
    %c0_12 = arith.constant 0 : index
    %c1_13 = arith.constant 1 : index
    %c5 = arith.constant 5 : index
    %c0_14 = arith.constant 0 : index
    %11 = vector.load %arg2[%c0_12, %c1_13, %c5, %c0_14] : memref<1x22x22x128xbf16, #tpu.memory_space<vmem>>, vector<1x20x16x128xbf16>
    %12 = vector.shape_cast %11 : vector<1x20x16x128xbf16> to vector<20x16x128xbf16>
    %c0_15 = arith.constant 0 : index
    %c0_16 = arith.constant 0 : index
    %c0_17 = arith.constant 0 : index
    %c0_18 = arith.constant 0 : index
    %13 = vector.load %arg2[%c0_15, %c0_16, %c0_17, %c0_18] : memref<1x22x22x128xbf16, #tpu.memory_space<vmem>>, vector<1x22x16x128xbf16>
    %14 = vector.shape_cast %13 : vector<1x22x16x128xbf16> to vector<22x16x128xbf16>
    %c0_19 = arith.constant 0 : index
    %c0_20 = arith.constant 0 : index
    %c6 = arith.constant 6 : index
    %c0_21 = arith.constant 0 : index
    %15 = vector.load %arg2[%c0_19, %c0_20, %c6, %c0_21] : memref<1x22x22x128xbf16, #tpu.memory_space<vmem>>, vector<1x22x16x128xbf16>
    %16 = vector.shape_cast %15 : vector<1x22x16x128xbf16> to vector<22x16x128xbf16>
    %17 = vector.extract_strided_slice %4 {offsets = [3, 0, 0], sizes = [16, 16, 128], strides = [1, 1, 1]} : vector<22x16x128xbf16> to vector<16x16x128xbf16>
    %18 = vector.shape_cast %17 : vector<16x16x128xbf16> to vector<256x128xbf16>
    %c0_22 = arith.constant 0 : index
    %c0_23 = arith.constant 0 : index
    %c0_24 = arith.constant 0 : index
    %19 = vector.load %arg9[%c0_22, %c0_23, %c0_24] : memref<4x256x128xf32, #tpu.memory_space<vmem>>, vector<1x256x128xf32>
    %20 = vector.shape_cast %19 : vector<1x256x128xf32> to vector<256x128xf32>
    %c0_25 = arith.constant 0 : index
    %c0_26 = arith.constant 0 : index
    %21 = vector.load %arg3[%c0_25, %c0_26] : memref<128x128xbf16, #tpu.memory_space<vmem>>, vector<128x128xbf16>
    %cst = arith.constant dense<0.000000e+00> : vector<256x128xf32>
    %22 = tpu.matmul %18, %21, %cst {dimension_numbers = #tpu.dot_dimension_numbers<[1], [0], [0], [1], [0, 0, 1, 1], [], []>} : vector<256x128xbf16>, vector<128x128xbf16>, vector<256x128xf32> -> vector<256x128xf32>
    %23 = arith.addf %20, %22 : vector<256x128xf32>
    %c0_27 = arith.constant 0 : index
    %c0_28 = arith.constant 0 : index
    %c0_29 = arith.constant 0 : index
    %24 = vector.load %arg9[%c0_27, %c0_28, %c0_29] : memref<4x256x128xf32, #tpu.memory_space<vmem>>, vector<1x256x128xf32>
    %25 = vector.shape_cast %24 : vector<1x256x128xf32> to vector<256x128xf32>
    %26 = vector.shape_cast %23 : vector<256x128xf32> to vector<1x256x128xf32>
    tpu.vector_store %arg9[%c0_27, %c0_28, %c0_29], %26 {strides = array<i32>} : memref<4x256x128xf32, #tpu.memory_space<vmem>>, vector<1x256x128xf32>,
    %27 = arith.extf %18 : vector<256x128xbf16> to vector<256x128xf32>
    %cst_30 = arith.constant dense<0.000000e+00> : vector<128xf32>
    %28 = vector.multi_reduction <add>, %27, %cst_30 [0] : vector<256x128xf32> to vector<128xf32>
    %29 = vector.shape_cast %28 : vector<128xf32> to vector<1x128xf32>
    %c0_31 = arith.constant 0 : index
    %c0_32 = arith.constant 0 : index
    %c0_33 = arith.constant 0 : index
    %30 = vector.load %arg8[%c0_31, %c0_32, %c0_33] : memref<1x1x128xf32, #tpu.memory_space<vmem>>, vector<1x1x128xf32>
    %31 = vector.shape_cast %30 : vector<1x1x128xf32> to vector<1x128xf32>
    %32 = vector.shape_cast %29 : vector<1x128xf32> to vector<1x1x128xf32>
    tpu.vector_store %arg8[%c0_31, %c0_32, %c0_33], %32 {strides = array<i32>} : memref<1x1x128xf32, #tpu.memory_space<vmem>>, vector<1x1x128xf32>,
    %c1_34 = arith.constant 1 : index
    %c0_35 = arith.constant 0 : index
    %c0_36 = arith.constant 0 : index
    %33 = vector.load %arg9[%c1_34, %c0_35, %c0_36] : memref<4x256x128xf32, #tpu.memory_space<vmem>>, vector<1x256x128xf32>
    %34 = vector.shape_cast %33 : vector<1x256x128xf32> to vector<256x128xf32>
    %35 = vector.extract_strided_slice %6 {offsets = [0, 0, 0], sizes = [16, 16, 128], strides = [1, 1, 1]} : vector<18x16x128xbf16> to vector<16x16x128xbf16>
    %36 = vector.shape_cast %35 : vector<16x16x128xbf16> to vector<256x128xbf16>
    %c0_37 = arith.constant 0 : index
    %c0_38 = arith.constant 0 : index
    %c0_39 = arith.constant 0 : index
    %c0_40 = arith.constant 0 : index
    %37 = vector.load %arg4[%c0_37, %c0_38, %c0_39, %c0_40] : memref<3x9x128x128xbf16, #tpu.memory_space<vmem>>, vector<1x1x128x128xbf16>
    %38 = vector.shape_cast %37 : vector<1x1x128x128xbf16> to vector<128x128xbf16>
    %cst_41 = arith.constant dense<0.000000e+00> : vector<256x128xf32>
    %39 = tpu.matmul %36, %38, %cst_41 {dimension_numbers = #tpu.dot_dimension_numbers<[1], [0], [0], [1], [0, 0, 1, 1], [], []>} : vector<256x128xbf16>, vector<128x128xbf16>, vector<256x128xf32> -> vector<256x128xf32>
    %40 = arith.addf %34, %39 : vector<256x128xf32>
    %c1_42 = arith.constant 1 : index
    %c0_43 = arith.constant 0 : index
    %c0_44 = arith.constant 0 : index
    %41 = vector.load %arg9[%c1_42, %c0_43, %c0_44] : memref<4x256x128xf32, #tpu.memory_space<vmem>>, vector<1x256x128xf32>
    %42 = vector.shape_cast %41 : vector<1x256x128xf32> to vector<256x128xf32>
    %43 = vector.shape_cast %40 : vector<256x128xf32> to vector<1x256x128xf32>
    tpu.vector_store %arg9[%c1_42, %c0_43, %c0_44], %43 {strides = array<i32>} : memref<4x256x128xf32, #tpu.memory_space<vmem>>, vector<1x256x128xf32>,
    %c1_45 = arith.constant 1 : index
    %c0_46 = arith.constant 0 : index
    %c0_47 = arith.constant 0 : index
    %44 = vector.load %arg9[%c1_45, %c0_46, %c0_47] : memref<4x256x128xf32, #tpu.memory_space<vmem>>, vector<1x256x128xf32>
    %45 = vector.shape_cast %44 : vector<1x256x128xf32> to vector<256x128xf32>
    %46 = vector.extract_strided_slice %4 {offsets = [2, 0, 0], sizes = [16, 16, 128], strides = [1, 1, 1]} : vector<22x16x128xbf16> to vector<16x16x128xbf16>
    %47 = vector.shape_cast %46 : vector<16x16x128xbf16> to vector<256x128xbf16>
    %c0_48 = arith.constant 0 : index
    %c1_49 = arith.constant 1 : index
    %c0_50 = arith.constant 0 : index
    %c0_51 = arith.constant 0 : index
    %48 = vector.load %arg4[%c0_48, %c1_49, %c0_50, %c0_51] : memref<3x9x128x128xbf16, #tpu.memory_space<vmem>>, vector<1x1x128x128xbf16>
    %49 = vector.shape_cast %48 : vector<1x1x128x128xbf16> to vector<128x128xbf16>
    %cst_52 = arith.constant dense<0.000000e+00> : vector<256x128xf32>
    %50 = tpu.matmul %47, %49, %cst_52 {dimension_numbers = #tpu.dot_dimension_numbers<[1], [0], [0], [1], [0, 0, 1, 1], [], []>} : vector<256x128xbf16>, vector<128x128xbf16>, vector<256x128xf32> -> vector<256x128xf32>
    %51 = arith.addf %45, %50 : vector<256x128xf32>
    %c1_53 = arith.constant 1 : index
    %c0_54 = arith.constant 0 : index
    %c0_55 = arith.constant 0 : index
    %52 = vector.load %arg9[%c1_53, %c0_54, %c0_55] : memref<4x256x128xf32, #tpu.memory_space<vmem>>, vector<1x256x128xf32>
    %53 = vector.shape_cast %52 : vector<1x256x128xf32> to vector<256x128xf32>
    %54 = vector.shape_cast %51 : vector<256x128xf32> to vector<1x256x128xf32>
    tpu.vector_store %arg9[%c1_53, %c0_54, %c0_55], %54 {strides = array<i32>} : memref<4x256x128xf32, #tpu.memory_space<vmem>>, vector<1x256x128xf32>,
    %c1_56 = arith.constant 1 : index
    %c0_57 = arith.constant 0 : index
    %c0_58 = arith.constant 0 : index
    %55 = vector.load %arg9[%c1_56, %c0_57, %c0_58] : memref<4x256x128xf32, #tpu.memory_space<vmem>>, vector<1x256x128xf32>
    %56 = vector.shape_cast %55 : vector<1x256x128xf32> to vector<256x128xf32>
    %57 = vector.extract_strided_slice %8 {offsets = [0, 0, 0], sizes = [16, 16, 128], strides = [1, 1, 1]} : vector<18x16x128xbf16> to vector<16x16x128xbf16>
    %58 = vector.shape_cast %57 : vector<16x16x128xbf16> to vector<256x128xbf16>
    %c0_59 = arith.constant 0 : index
    %c2_60 = arith.constant 2 : index
    %c0_61 = arith.constant 0 : index
    %c0_62 = arith.constant 0 : index
    %59 = vector.load %arg4[%c0_59, %c2_60, %c0_61, %c0_62] : memref<3x9x128x128xbf16, #tpu.memory_space<vmem>>, vector<1x1x128x128xbf16>
    %60 = vector.shape_cast %59 : vector<1x1x128x128xbf16> to vector<128x128xbf16>
    %cst_63 = arith.constant dense<0.000000e+00> : vector<256x128xf32>
    %61 = tpu.matmul %58, %60, %cst_63 {dimension_numbers = #tpu.dot_dimension_numbers<[1], [0], [0], [1], [0, 0, 1, 1], [], []>} : vector<256x128xbf16>, vector<128x128xbf16>, vector<256x128xf32> -> vector<256x128xf32>
    %62 = arith.addf %56, %61 : vector<256x128xf32>
    %c1_64 = arith.constant 1 : index
    %c0_65 = arith.constant 0 : index
    %c0_66 = arith.constant 0 : index
    %63 = vector.load %arg9[%c1_64, %c0_65, %c0_66] : memref<4x256x128xf32, #tpu.memory_space<vmem>>, vector<1x256x128xf32>
    %64 = vector.shape_cast %63 : vector<1x256x128xf32> to vector<256x128xf32>
    %65 = vector.shape_cast %62 : vector<256x128xf32> to vector<1x256x128xf32>
    tpu.vector_store %arg9[%c1_64, %c0_65, %c0_66], %65 {strides = array<i32>} : memref<4x256x128xf32, #tpu.memory_space<vmem>>, vector<1x256x128xf32>,
    %c1_67 = arith.constant 1 : index
    %c0_68 = arith.constant 0 : index
    %c0_69 = arith.constant 0 : index
    %66 = vector.load %arg9[%c1_67, %c0_68, %c0_69] : memref<4x256x128xf32, #tpu.memory_space<vmem>>, vector<1x256x128xf32>
    %67 = vector.shape_cast %66 : vector<1x256x128xf32> to vector<256x128xf32>
    %68 = vector.extract_strided_slice %6 {offsets = [1, 0, 0], sizes = [16, 16, 128], strides = [1, 1, 1]} : vector<18x16x128xbf16> to vector<16x16x128xbf16>
    %69 = vector.shape_cast %68 : vector<16x16x128xbf16> to vector<256x128xbf16>
    %c0_70 = arith.constant 0 : index
    %c3_71 = arith.constant 3 : index
    %c0_72 = arith.constant 0 : index
    %c0_73 = arith.constant 0 : index
    %70 = vector.load %arg4[%c0_70, %c3_71, %c0_72, %c0_73] : memref<3x9x128x128xbf16, #tpu.memory_space<vmem>>, vector<1x1x128x128xbf16>
    %71 = vector.shape_cast %70 : vector<1x1x128x128xbf16> to vector<128x128xbf16>
    %cst_74 = arith.constant dense<0.000000e+00> : vector<256x128xf32>
    %72 = tpu.matmul %69, %71, %cst_74 {dimension_numbers = #tpu.dot_dimension_numbers<[1], [0], [0], [1], [0, 0, 1, 1], [], []>} : vector<256x128xbf16>, vector<128x128xbf16>, vector<256x128xf32> -> vector<256x128xf32>
    %73 = arith.addf %67, %72 : vector<256x128xf32>
    %c1_75 = arith.constant 1 : index
    %c0_76 = arith.constant 0 : index
    %c0_77 = arith.constant 0 : index
    %74 = vector.load %arg9[%c1_75, %c0_76, %c0_77] : memref<4x256x128xf32, #tpu.memory_space<vmem>>, vector<1x256x128xf32>
    %75 = vector.shape_cast %74 : vector<1x256x128xf32> to vector<256x128xf32>
    %76 = vector.shape_cast %73 : vector<256x128xf32> to vector<1x256x128xf32>
    tpu.vector_store %arg9[%c1_75, %c0_76, %c0_77], %76 {strides = array<i32>} : memref<4x256x128xf32, #tpu.memory_space<vmem>>, vector<1x256x128xf32>,
    %c1_78 = arith.constant 1 : index
    %c0_79 = arith.constant 0 : index
    %c0_80 = arith.constant 0 : index
    %77 = vector.load %arg9[%c1_78, %c0_79, %c0_80] : memref<4x256x128xf32, #tpu.memory_space<vmem>>, vector<1x256x128xf32>
    %78 = vector.shape_cast %77 : vector<1x256x128xf32> to vector<256x128xf32>
    %79 = vector.extract_strided_slice %4 {offsets = [3, 0, 0], sizes = [16, 16, 128], strides = [1, 1, 1]} : vector<22x16x128xbf16> to vector<16x16x128xbf16>
    %80 = vector.shape_cast %79 : vector<16x16x128xbf16> to vector<256x128xbf16>
    %c0_81 = arith.constant 0 : index
    %c4_82 = arith.constant 4 : index
    %c0_83 = arith.constant 0 : index
    %c0_84 = arith.constant 0 : index
    %81 = vector.load %arg4[%c0_81, %c4_82, %c0_83, %c0_84] : memref<3x9x128x128xbf16, #tpu.memory_space<vmem>>, vector<1x1x128x128xbf16>
    %82 = vector.shape_cast %81 : vector<1x1x128x128xbf16> to vector<128x128xbf16>
    %cst_85 = arith.constant dense<0.000000e+00> : vector<256x128xf32>
    %83 = tpu.matmul %80, %82, %cst_85 {dimension_numbers = #tpu.dot_dimension_numbers<[1], [0], [0], [1], [0, 0, 1, 1], [], []>} : vector<256x128xbf16>, vector<128x128xbf16>, vector<256x128xf32> -> vector<256x128xf32>
    %84 = arith.addf %78, %83 : vector<256x128xf32>
    %c1_86 = arith.constant 1 : index
    %c0_87 = arith.constant 0 : index
    %c0_88 = arith.constant 0 : index
    %85 = vector.load %arg9[%c1_86, %c0_87, %c0_88] : memref<4x256x128xf32, #tpu.memory_space<vmem>>, vector<1x256x128xf32>
    %86 = vector.shape_cast %85 : vector<1x256x128xf32> to vector<256x128xf32>
    %87 = vector.shape_cast %84 : vector<256x128xf32> to vector<1x256x128xf32>
    tpu.vector_store %arg9[%c1_86, %c0_87, %c0_88], %87 {strides = array<i32>} : memref<4x256x128xf32, #tpu.memory_space<vmem>>, vector<1x256x128xf32>,
    %c1_89 = arith.constant 1 : index
    %c0_90 = arith.constant 0 : index
    %c0_91 = arith.constant 0 : index
    %88 = vector.load %arg9[%c1_89, %c0_90, %c0_91] : memref<4x256x128xf32, #tpu.memory_space<vmem>>, vector<1x256x128xf32>
    %89 = vector.shape_cast %88 : vector<1x256x128xf32> to vector<256x128xf32>
    %90 = vector.extract_strided_slice %8 {offsets = [1, 0, 0], sizes = [16, 16, 128], strides = [1, 1, 1]} : vector<18x16x128xbf16> to vector<16x16x128xbf16>
    %91 = vector.shape_cast %90 : vector<16x16x128xbf16> to vector<256x128xbf16>
    %c0_92 = arith.constant 0 : index
    %c5_93 = arith.constant 5 : index
    %c0_94 = arith.constant 0 : index
    %c0_95 = arith.constant 0 : index
    %92 = vector.load %arg4[%c0_92, %c5_93, %c0_94, %c0_95] : memref<3x9x128x128xbf16, #tpu.memory_space<vmem>>, vector<1x1x128x128xbf16>
    %93 = vector.shape_cast %92 : vector<1x1x128x128xbf16> to vector<128x128xbf16>
    %cst_96 = arith.constant dense<0.000000e+00> : vector<256x128xf32>
    %94 = tpu.matmul %91, %93, %cst_96 {dimension_numbers = #tpu.dot_dimension_numbers<[1], [0], [0], [1], [0, 0, 1, 1], [], []>} : vector<256x128xbf16>, vector<128x128xbf16>, vector<256x128xf32> -> vector<256x128xf32>
    %95 = arith.addf %89, %94 : vector<256x128xf32>
    %c1_97 = arith.constant 1 : index
    %c0_98 = arith.constant 0 : index
    %c0_99 = arith.constant 0 : index
    %96 = vector.load %arg9[%c1_97, %c0_98, %c0_99] : memref<4x256x128xf32, #tpu.memory_space<vmem>>, vector<1x256x128xf32>
    %97 = vector.shape_cast %96 : vector<1x256x128xf32> to vector<256x128xf32>
    %98 = vector.shape_cast %95 : vector<256x128xf32> to vector<1x256x128xf32>
    tpu.vector_store %arg9[%c1_97, %c0_98, %c0_99], %98 {strides = array<i32>} : memref<4x256x128xf32, #tpu.memory_space<vmem>>, vector<1x256x128xf32>,
    %c1_100 = arith.constant 1 : index
    %c0_101 = arith.constant 0 : index
    %c0_102 = arith.constant 0 : index
    %99 = vector.load %arg9[%c1_100, %c0_101, %c0_102] : memref<4x256x128xf32, #tpu.memory_space<vmem>>, vector<1x256x128xf32>
    %100 = vector.shape_cast %99 : vector<1x256x128xf32> to vector<256x128xf32>
    %101 = vector.extract_strided_slice %6 {offsets = [2, 0, 0], sizes = [16, 16, 128], strides = [1, 1, 1]} : vector<18x16x128xbf16> to vector<16x16x128xbf16>
    %102 = vector.shape_cast %101 : vector<16x16x128xbf16> to vector<256x128xbf16>
    %c0_103 = arith.constant 0 : index
    %c6_104 = arith.constant 6 : index
    %c0_105 = arith.constant 0 : index
    %c0_106 = arith.constant 0 : index
    %103 = vector.load %arg4[%c0_103, %c6_104, %c0_105, %c0_106] : memref<3x9x128x128xbf16, #tpu.memory_space<vmem>>, vector<1x1x128x128xbf16>
    %104 = vector.shape_cast %103 : vector<1x1x128x128xbf16> to vector<128x128xbf16>
    %cst_107 = arith.constant dense<0.000000e+00> : vector<256x128xf32>
    %105 = tpu.matmul %102, %104, %cst_107 {dimension_numbers = #tpu.dot_dimension_numbers<[1], [0], [0], [1], [0, 0, 1, 1], [], []>} : vector<256x128xbf16>, vector<128x128xbf16>, vector<256x128xf32> -> vector<256x128xf32>
    %106 = arith.addf %100, %105 : vector<256x128xf32>
    %c1_108 = arith.constant 1 : index
    %c0_109 = arith.constant 0 : index
    %c0_110 = arith.constant 0 : index
    %107 = vector.load %arg9[%c1_108, %c0_109, %c0_110] : memref<4x256x128xf32, #tpu.memory_space<vmem>>, vector<1x256x128xf32>
    %108 = vector.shape_cast %107 : vector<1x256x128xf32> to vector<256x128xf32>
    %109 = vector.shape_cast %106 : vector<256x128xf32> to vector<1x256x128xf32>
    tpu.vector_store %arg9[%c1_108, %c0_109, %c0_110], %109 {strides = array<i32>} : memref<4x256x128xf32, #tpu.memory_space<vmem>>, vector<1x256x128xf32>,
    %c1_111 = arith.constant 1 : index
    %c0_112 = arith.constant 0 : index
    %c0_113 = arith.constant 0 : index
    %110 = vector.load %arg9[%c1_111, %c0_112, %c0_113] : memref<4x256x128xf32, #tpu.memory_space<vmem>>, vector<1x256x128xf32>
    %111 = vector.shape_cast %110 : vector<1x256x128xf32> to vector<256x128xf32>
    %112 = vector.extract_strided_slice %4 {offsets = [4, 0, 0], sizes = [16, 16, 128], strides = [1, 1, 1]} : vector<22x16x128xbf16> to vector<16x16x128xbf16>
    %113 = vector.shape_cast %112 : vector<16x16x128xbf16> to vector<256x128xbf16>
    %c0_114 = arith.constant 0 : index
    %c7 = arith.constant 7 : index
    %c0_115 = arith.constant 0 : index
    %c0_116 = arith.constant 0 : index
    %114 = vector.load %arg4[%c0_114, %c7, %c0_115, %c0_116] : memref<3x9x128x128xbf16, #tpu.memory_space<vmem>>, vector<1x1x128x128xbf16>
    %115 = vector.shape_cast %114 : vector<1x1x128x128xbf16> to vector<128x128xbf16>
    %cst_117 = arith.constant dense<0.000000e+00> : vector<256x128xf32>
    %116 = tpu.matmul %113, %115, %cst_117 {dimension_numbers = #tpu.dot_dimension_numbers<[1], [0], [0], [1], [0, 0, 1, 1], [], []>} : vector<256x128xbf16>, vector<128x128xbf16>, vector<256x128xf32> -> vector<256x128xf32>
    %117 = arith.addf %111, %116 : vector<256x128xf32>
    %c1_118 = arith.constant 1 : index
    %c0_119 = arith.constant 0 : index
    %c0_120 = arith.constant 0 : index
    %118 = vector.load %arg9[%c1_118, %c0_119, %c0_120] : memref<4x256x128xf32, #tpu.memory_space<vmem>>, vector<1x256x128xf32>
    %119 = vector.shape_cast %118 : vector<1x256x128xf32> to vector<256x128xf32>
    %120 = vector.shape_cast %117 : vector<256x128xf32> to vector<1x256x128xf32>
    tpu.vector_store %arg9[%c1_118, %c0_119, %c0_120], %120 {strides = array<i32>} : memref<4x256x128xf32, #tpu.memory_space<vmem>>, vector<1x256x128xf32>,
    %c1_121 = arith.constant 1 : index
    %c0_122 = arith.constant 0 : index
    %c0_123 = arith.constant 0 : index
    %121 = vector.load %arg9[%c1_121, %c0_122, %c0_123] : memref<4x256x128xf32, #tpu.memory_space<vmem>>, vector<1x256x128xf32>
    %122 = vector.shape_cast %121 : vector<1x256x128xf32> to vector<256x128xf32>
    %123 = vector.extract_strided_slice %8 {offsets = [2, 0, 0], sizes = [16, 16, 128], strides = [1, 1, 1]} : vector<18x16x128xbf16> to vector<16x16x128xbf16>
    %124 = vector.shape_cast %123 : vector<16x16x128xbf16> to vector<256x128xbf16>
    %c0_124 = arith.constant 0 : index
    %c8 = arith.constant 8 : index
    %c0_125 = arith.constant 0 : index
    %c0_126 = arith.constant 0 : index
    %125 = vector.load %arg4[%c0_124, %c8, %c0_125, %c0_126] : memref<3x9x128x128xbf16, #tpu.memory_space<vmem>>, vector<1x1x128x128xbf16>
    %126 = vector.shape_cast %125 : vector<1x1x128x128xbf16> to vector<128x128xbf16>
    %cst_127 = arith.constant dense<0.000000e+00> : vector<256x128xf32>
    %127 = tpu.matmul %124, %126, %cst_127 {dimension_numbers = #tpu.dot_dimension_numbers<[1], [0], [0], [1], [0, 0, 1, 1], [], []>} : vector<256x128xbf16>, vector<128x128xbf16>, vector<256x128xf32> -> vector<256x128xf32>
    %128 = arith.addf %122, %127 : vector<256x128xf32>
    %c1_128 = arith.constant 1 : index
    %c0_129 = arith.constant 0 : index
    %c0_130 = arith.constant 0 : index
    %129 = vector.load %arg9[%c1_128, %c0_129, %c0_130] : memref<4x256x128xf32, #tpu.memory_space<vmem>>, vector<1x256x128xf32>
    %130 = vector.shape_cast %129 : vector<1x256x128xf32> to vector<256x128xf32>
    %131 = vector.shape_cast %128 : vector<256x128xf32> to vector<1x256x128xf32>
    tpu.vector_store %arg9[%c1_128, %c0_129, %c0_130], %131 {strides = array<i32>} : memref<4x256x128xf32, #tpu.memory_space<vmem>>, vector<1x256x128xf32>,
    %c2_131 = arith.constant 2 : index
    %c0_132 = arith.constant 0 : index
    %c0_133 = arith.constant 0 : index
    %132 = vector.load %arg9[%c2_131, %c0_132, %c0_133] : memref<4x256x128xf32, #tpu.memory_space<vmem>>, vector<1x256x128xf32>
    %133 = vector.shape_cast %132 : vector<1x256x128xf32> to vector<256x128xf32>
    %134 = vector.extract_strided_slice %10 {offsets = [0, 0, 0], sizes = [16, 16, 128], strides = [1, 1, 1]} : vector<20x16x128xbf16> to vector<16x16x128xbf16>
    %135 = vector.shape_cast %134 : vector<16x16x128xbf16> to vector<256x128xbf16>
    %c1_134 = arith.constant 1 : index
    %c0_135 = arith.constant 0 : index
    %c0_136 = arith.constant 0 : index
    %c0_137 = arith.constant 0 : index
    %136 = vector.load %arg4[%c1_134, %c0_135, %c0_136, %c0_137] : memref<3x9x128x128xbf16, #tpu.memory_space<vmem>>, vector<1x1x128x128xbf16>
    %137 = vector.shape_cast %136 : vector<1x1x128x128xbf16> to vector<128x128xbf16>
    %cst_138 = arith.constant dense<0.000000e+00> : vector<256x128xf32>
    %138 = tpu.matmul %135, %137, %cst_138 {dimension_numbers = #tpu.dot_dimension_numbers<[1], [0], [0], [1], [0, 0, 1, 1], [], []>} : vector<256x128xbf16>, vector<128x128xbf16>, vector<256x128xf32> -> vector<256x128xf32>
    %139 = arith.addf %133, %138 : vector<256x128xf32>
    %c2_139 = arith.constant 2 : index
    %c0_140 = arith.constant 0 : index
    %c0_141 = arith.constant 0 : index
    %140 = vector.load %arg9[%c2_139, %c0_140, %c0_141] : memref<4x256x128xf32, #tpu.memory_space<vmem>>, vector<1x256x128xf32>
    %141 = vector.shape_cast %140 : vector<1x256x128xf32> to vector<256x128xf32>
    %142 = vector.shape_cast %139 : vector<256x128xf32> to vector<1x256x128xf32>
    tpu.vector_store %arg9[%c2_139, %c0_140, %c0_141], %142 {strides = array<i32>} : memref<4x256x128xf32, #tpu.memory_space<vmem>>, vector<1x256x128xf32>,
    %c2_142 = arith.constant 2 : index
    %c0_143 = arith.constant 0 : index
    %c0_144 = arith.constant 0 : index
    %143 = vector.load %arg9[%c2_142, %c0_143, %c0_144] : memref<4x256x128xf32, #tpu.memory_space<vmem>>, vector<1x256x128xf32>
    %144 = vector.shape_cast %143 : vector<1x256x128xf32> to vector<256x128xf32>
    %145 = vector.extract_strided_slice %4 {offsets = [1, 0, 0], sizes = [16, 16, 128], strides = [1, 1, 1]} : vector<22x16x128xbf16> to vector<16x16x128xbf16>
    %146 = vector.shape_cast %145 : vector<16x16x128xbf16> to vector<256x128xbf16>
    %c1_145 = arith.constant 1 : index
    %c1_146 = arith.constant 1 : index
    %c0_147 = arith.constant 0 : index
    %c0_148 = arith.constant 0 : index
    %147 = vector.load %arg4[%c1_145, %c1_146, %c0_147, %c0_148] : memref<3x9x128x128xbf16, #tpu.memory_space<vmem>>, vector<1x1x128x128xbf16>
    %148 = vector.shape_cast %147 : vector<1x1x128x128xbf16> to vector<128x128xbf16>
    %cst_149 = arith.constant dense<0.000000e+00> : vector<256x128xf32>
    %149 = tpu.matmul %146, %148, %cst_149 {dimension_numbers = #tpu.dot_dimension_numbers<[1], [0], [0], [1], [0, 0, 1, 1], [], []>} : vector<256x128xbf16>, vector<128x128xbf16>, vector<256x128xf32> -> vector<256x128xf32>
    %150 = arith.addf %144, %149 : vector<256x128xf32>
    %c2_150 = arith.constant 2 : index
    %c0_151 = arith.constant 0 : index
    %c0_152 = arith.constant 0 : index
    %151 = vector.load %arg9[%c2_150, %c0_151, %c0_152] : memref<4x256x128xf32, #tpu.memory_space<vmem>>, vector<1x256x128xf32>
    %152 = vector.shape_cast %151 : vector<1x256x128xf32> to vector<256x128xf32>
    %153 = vector.shape_cast %150 : vector<256x128xf32> to vector<1x256x128xf32>
    tpu.vector_store %arg9[%c2_150, %c0_151, %c0_152], %153 {strides = array<i32>} : memref<4x256x128xf32, #tpu.memory_space<vmem>>, vector<1x256x128xf32>,
    %c2_153 = arith.constant 2 : index
    %c0_154 = arith.constant 0 : index
    %c0_155 = arith.constant 0 : index
    %154 = vector.load %arg9[%c2_153, %c0_154, %c0_155] : memref<4x256x128xf32, #tpu.memory_space<vmem>>, vector<1x256x128xf32>
    %155 = vector.shape_cast %154 : vector<1x256x128xf32> to vector<256x128xf32>
    %156 = vector.extract_strided_slice %12 {offsets = [0, 0, 0], sizes = [16, 16, 128], strides = [1, 1, 1]} : vector<20x16x128xbf16> to vector<16x16x128xbf16>
    %157 = vector.shape_cast %156 : vector<16x16x128xbf16> to vector<256x128xbf16>
    %c1_156 = arith.constant 1 : index
    %c2_157 = arith.constant 2 : index
    %c0_158 = arith.constant 0 : index
    %c0_159 = arith.constant 0 : index
    %158 = vector.load %arg4[%c1_156, %c2_157, %c0_158, %c0_159] : memref<3x9x128x128xbf16, #tpu.memory_space<vmem>>, vector<1x1x128x128xbf16>
    %159 = vector.shape_cast %158 : vector<1x1x128x128xbf16> to vector<128x128xbf16>
    %cst_160 = arith.constant dense<0.000000e+00> : vector<256x128xf32>
    %160 = tpu.matmul %157, %159, %cst_160 {dimension_numbers = #tpu.dot_dimension_numbers<[1], [0], [0], [1], [0, 0, 1, 1], [], []>} : vector<256x128xbf16>, vector<128x128xbf16>, vector<256x128xf32> -> vector<256x128xf32>
    %161 = arith.addf %155, %160 : vector<256x128xf32>
    %c2_161 = arith.constant 2 : index
    %c0_162 = arith.constant 0 : index
    %c0_163 = arith.constant 0 : index
    %162 = vector.load %arg9[%c2_161, %c0_162, %c0_163] : memref<4x256x128xf32, #tpu.memory_space<vmem>>, vector<1x256x128xf32>
    %163 = vector.shape_cast %162 : vector<1x256x128xf32> to vector<256x128xf32>
    %164 = vector.shape_cast %161 : vector<256x128xf32> to vector<1x256x128xf32>
    tpu.vector_store %arg9[%c2_161, %c0_162, %c0_163], %164 {strides = array<i32>} : memref<4x256x128xf32, #tpu.memory_space<vmem>>, vector<1x256x128xf32>,
    %c2_164 = arith.constant 2 : index
    %c0_165 = arith.constant 0 : index
    %c0_166 = arith.constant 0 : index
    %165 = vector.load %arg9[%c2_164, %c0_165, %c0_166] : memref<4x256x128xf32, #tpu.memory_space<vmem>>, vector<1x256x128xf32>
    %166 = vector.shape_cast %165 : vector<1x256x128xf32> to vector<256x128xf32>
    %167 = vector.extract_strided_slice %10 {offsets = [2, 0, 0], sizes = [16, 16, 128], strides = [1, 1, 1]} : vector<20x16x128xbf16> to vector<16x16x128xbf16>
    %168 = vector.shape_cast %167 : vector<16x16x128xbf16> to vector<256x128xbf16>
    %c1_167 = arith.constant 1 : index
    %c3_168 = arith.constant 3 : index
    %c0_169 = arith.constant 0 : index
    %c0_170 = arith.constant 0 : index
    %169 = vector.load %arg4[%c1_167, %c3_168, %c0_169, %c0_170] : memref<3x9x128x128xbf16, #tpu.memory_space<vmem>>, vector<1x1x128x128xbf16>
    %170 = vector.shape_cast %169 : vector<1x1x128x128xbf16> to vector<128x128xbf16>
    %cst_171 = arith.constant dense<0.000000e+00> : vector<256x128xf32>
    %171 = tpu.matmul %168, %170, %cst_171 {dimension_numbers = #tpu.dot_dimension_numbers<[1], [0], [0], [1], [0, 0, 1, 1], [], []>} : vector<256x128xbf16>, vector<128x128xbf16>, vector<256x128xf32> -> vector<256x128xf32>
    %172 = arith.addf %166, %171 : vector<256x128xf32>
    %c2_172 = arith.constant 2 : index
    %c0_173 = arith.constant 0 : index
    %c0_174 = arith.constant 0 : index
    %173 = vector.load %arg9[%c2_172, %c0_173, %c0_174] : memref<4x256x128xf32, #tpu.memory_space<vmem>>, vector<1x256x128xf32>
    %174 = vector.shape_cast %173 : vector<1x256x128xf32> to vector<256x128xf32>
    %175 = vector.shape_cast %172 : vector<256x128xf32> to vector<1x256x128xf32>
    tpu.vector_store %arg9[%c2_172, %c0_173, %c0_174], %175 {strides = array<i32>} : memref<4x256x128xf32, #tpu.memory_space<vmem>>, vector<1x256x128xf32>,
    %c2_175 = arith.constant 2 : index
    %c0_176 = arith.constant 0 : index
    %c0_177 = arith.constant 0 : index
    %176 = vector.load %arg9[%c2_175, %c0_176, %c0_177] : memref<4x256x128xf32, #tpu.memory_space<vmem>>, vector<1x256x128xf32>
    %177 = vector.shape_cast %176 : vector<1x256x128xf32> to vector<256x128xf32>
    %178 = vector.extract_strided_slice %4 {offsets = [3, 0, 0], sizes = [16, 16, 128], strides = [1, 1, 1]} : vector<22x16x128xbf16> to vector<16x16x128xbf16>
    %179 = vector.shape_cast %178 : vector<16x16x128xbf16> to vector<256x128xbf16>
    %c1_178 = arith.constant 1 : index
    %c4_179 = arith.constant 4 : index
    %c0_180 = arith.constant 0 : index
    %c0_181 = arith.constant 0 : index
    %180 = vector.load %arg4[%c1_178, %c4_179, %c0_180, %c0_181] : memref<3x9x128x128xbf16, #tpu.memory_space<vmem>>, vector<1x1x128x128xbf16>
    %181 = vector.shape_cast %180 : vector<1x1x128x128xbf16> to vector<128x128xbf16>
    %cst_182 = arith.constant dense<0.000000e+00> : vector<256x128xf32>
    %182 = tpu.matmul %179, %181, %cst_182 {dimension_numbers = #tpu.dot_dimension_numbers<[1], [0], [0], [1], [0, 0, 1, 1], [], []>} : vector<256x128xbf16>, vector<128x128xbf16>, vector<256x128xf32> -> vector<256x128xf32>
    %183 = arith.addf %177, %182 : vector<256x128xf32>
    %c2_183 = arith.constant 2 : index
    %c0_184 = arith.constant 0 : index
    %c0_185 = arith.constant 0 : index
    %184 = vector.load %arg9[%c2_183, %c0_184, %c0_185] : memref<4x256x128xf32, #tpu.memory_space<vmem>>, vector<1x256x128xf32>
    %185 = vector.shape_cast %184 : vector<1x256x128xf32> to vector<256x128xf32>
    %186 = vector.shape_cast %183 : vector<256x128xf32> to vector<1x256x128xf32>
    tpu.vector_store %arg9[%c2_183, %c0_184, %c0_185], %186 {strides = array<i32>} : memref<4x256x128xf32, #tpu.memory_space<vmem>>, vector<1x256x128xf32>,
    %c2_186 = arith.constant 2 : index
    %c0_187 = arith.constant 0 : index
    %c0_188 = arith.constant 0 : index
    %187 = vector.load %arg9[%c2_186, %c0_187, %c0_188] : memref<4x256x128xf32, #tpu.memory_space<vmem>>, vector<1x256x128xf32>
    %188 = vector.shape_cast %187 : vector<1x256x128xf32> to vector<256x128xf32>
    %189 = vector.extract_strided_slice %12 {offsets = [2, 0, 0], sizes = [16, 16, 128], strides = [1, 1, 1]} : vector<20x16x128xbf16> to vector<16x16x128xbf16>
    %190 = vector.shape_cast %189 : vector<16x16x128xbf16> to vector<256x128xbf16>
    %c1_189 = arith.constant 1 : index
    %c5_190 = arith.constant 5 : index
    %c0_191 = arith.constant 0 : index
    %c0_192 = arith.constant 0 : index
    %191 = vector.load %arg4[%c1_189, %c5_190, %c0_191, %c0_192] : memref<3x9x128x128xbf16, #tpu.memory_space<vmem>>, vector<1x1x128x128xbf16>
    %192 = vector.shape_cast %191 : vector<1x1x128x128xbf16> to vector<128x128xbf16>
    %cst_193 = arith.constant dense<0.000000e+00> : vector<256x128xf32>
    %193 = tpu.matmul %190, %192, %cst_193 {dimension_numbers = #tpu.dot_dimension_numbers<[1], [0], [0], [1], [0, 0, 1, 1], [], []>} : vector<256x128xbf16>, vector<128x128xbf16>, vector<256x128xf32> -> vector<256x128xf32>
    %194 = arith.addf %188, %193 : vector<256x128xf32>
    %c2_194 = arith.constant 2 : index
    %c0_195 = arith.constant 0 : index
    %c0_196 = arith.constant 0 : index
    %195 = vector.load %arg9[%c2_194, %c0_195, %c0_196] : memref<4x256x128xf32, #tpu.memory_space<vmem>>, vector<1x256x128xf32>
    %196 = vector.shape_cast %195 : vector<1x256x128xf32> to vector<256x128xf32>
    %197 = vector.shape_cast %194 : vector<256x128xf32> to vector<1x256x128xf32>
    tpu.vector_store %arg9[%c2_194, %c0_195, %c0_196], %197 {strides = array<i32>} : memref<4x256x128xf32, #tpu.memory_space<vmem>>, vector<1x256x128xf32>,
    %c2_197 = arith.constant 2 : index
    %c0_198 = arith.constant 0 : index
    %c0_199 = arith.constant 0 : index
    %198 = vector.load %arg9[%c2_197, %c0_198, %c0_199] : memref<4x256x128xf32, #tpu.memory_space<vmem>>, vector<1x256x128xf32>
    %199 = vector.shape_cast %198 : vector<1x256x128xf32> to vector<256x128xf32>
    %200 = vector.extract_strided_slice %10 {offsets = [4, 0, 0], sizes = [16, 16, 128], strides = [1, 1, 1]} : vector<20x16x128xbf16> to vector<16x16x128xbf16>
    %201 = vector.shape_cast %200 : vector<16x16x128xbf16> to vector<256x128xbf16>
    %c1_200 = arith.constant 1 : index
    %c6_201 = arith.constant 6 : index
    %c0_202 = arith.constant 0 : index
    %c0_203 = arith.constant 0 : index
    %202 = vector.load %arg4[%c1_200, %c6_201, %c0_202, %c0_203] : memref<3x9x128x128xbf16, #tpu.memory_space<vmem>>, vector<1x1x128x128xbf16>
    %203 = vector.shape_cast %202 : vector<1x1x128x128xbf16> to vector<128x128xbf16>
    %cst_204 = arith.constant dense<0.000000e+00> : vector<256x128xf32>
    %204 = tpu.matmul %201, %203, %cst_204 {dimension_numbers = #tpu.dot_dimension_numbers<[1], [0], [0], [1], [0, 0, 1, 1], [], []>} : vector<256x128xbf16>, vector<128x128xbf16>, vector<256x128xf32> -> vector<256x128xf32>
    %205 = arith.addf %199, %204 : vector<256x128xf32>
    %c2_205 = arith.constant 2 : index
    %c0_206 = arith.constant 0 : index
    %c0_207 = arith.constant 0 : index
    %206 = vector.load %arg9[%c2_205, %c0_206, %c0_207] : memref<4x256x128xf32, #tpu.memory_space<vmem>>, vector<1x256x128xf32>
    %207 = vector.shape_cast %206 : vector<1x256x128xf32> to vector<256x128xf32>
    %208 = vector.shape_cast %205 : vector<256x128xf32> to vector<1x256x128xf32>
    tpu.vector_store %arg9[%c2_205, %c0_206, %c0_207], %208 {strides = array<i32>} : memref<4x256x128xf32, #tpu.memory_space<vmem>>, vector<1x256x128xf32>,
    %c2_208 = arith.constant 2 : index
    %c0_209 = arith.constant 0 : index
    %c0_210 = arith.constant 0 : index
    %209 = vector.load %arg9[%c2_208, %c0_209, %c0_210] : memref<4x256x128xf32, #tpu.memory_space<vmem>>, vector<1x256x128xf32>
    %210 = vector.shape_cast %209 : vector<1x256x128xf32> to vector<256x128xf32>
    %211 = vector.extract_strided_slice %4 {offsets = [5, 0, 0], sizes = [16, 16, 128], strides = [1, 1, 1]} : vector<22x16x128xbf16> to vector<16x16x128xbf16>
    %212 = vector.shape_cast %211 : vector<16x16x128xbf16> to vector<256x128xbf16>
    %c1_211 = arith.constant 1 : index
    %c7_212 = arith.constant 7 : index
    %c0_213 = arith.constant 0 : index
    %c0_214 = arith.constant 0 : index
    %213 = vector.load %arg4[%c1_211, %c7_212, %c0_213, %c0_214] : memref<3x9x128x128xbf16, #tpu.memory_space<vmem>>, vector<1x1x128x128xbf16>
    %214 = vector.shape_cast %213 : vector<1x1x128x128xbf16> to vector<128x128xbf16>
    %cst_215 = arith.constant dense<0.000000e+00> : vector<256x128xf32>
    %215 = tpu.matmul %212, %214, %cst_215 {dimension_numbers = #tpu.dot_dimension_numbers<[1], [0], [0], [1], [0, 0, 1, 1], [], []>} : vector<256x128xbf16>, vector<128x128xbf16>, vector<256x128xf32> -> vector<256x128xf32>
    %216 = arith.addf %210, %215 : vector<256x128xf32>
    %c2_216 = arith.constant 2 : index
    %c0_217 = arith.constant 0 : index
    %c0_218 = arith.constant 0 : index
    %217 = vector.load %arg9[%c2_216, %c0_217, %c0_218] : memref<4x256x128xf32, #tpu.memory_space<vmem>>, vector<1x256x128xf32>
    %218 = vector.shape_cast %217 : vector<1x256x128xf32> to vector<256x128xf32>
    %219 = vector.shape_cast %216 : vector<256x128xf32> to vector<1x256x128xf32>
    tpu.vector_store %arg9[%c2_216, %c0_217, %c0_218], %219 {strides = array<i32>} : memref<4x256x128xf32, #tpu.memory_space<vmem>>, vector<1x256x128xf32>,
    %c2_219 = arith.constant 2 : index
    %c0_220 = arith.constant 0 : index
    %c0_221 = arith.constant 0 : index
    %220 = vector.load %arg9[%c2_219, %c0_220, %c0_221] : memref<4x256x128xf32, #tpu.memory_space<vmem>>, vector<1x256x128xf32>
    %221 = vector.shape_cast %220 : vector<1x256x128xf32> to vector<256x128xf32>
    %222 = vector.extract_strided_slice %12 {offsets = [4, 0, 0], sizes = [16, 16, 128], strides = [1, 1, 1]} : vector<20x16x128xbf16> to vector<16x16x128xbf16>
    %223 = vector.shape_cast %222 : vector<16x16x128xbf16> to vector<256x128xbf16>
    %c1_222 = arith.constant 1 : index
    %c8_223 = arith.constant 8 : index
    %c0_224 = arith.constant 0 : index
    %c0_225 = arith.constant 0 : index
    %224 = vector.load %arg4[%c1_222, %c8_223, %c0_224, %c0_225] : memref<3x9x128x128xbf16, #tpu.memory_space<vmem>>, vector<1x1x128x128xbf16>
    %225 = vector.shape_cast %224 : vector<1x1x128x128xbf16> to vector<128x128xbf16>
    %cst_226 = arith.constant dense<0.000000e+00> : vector<256x128xf32>
    %226 = tpu.matmul %223, %225, %cst_226 {dimension_numbers = #tpu.dot_dimension_numbers<[1], [0], [0], [1], [0, 0, 1, 1], [], []>} : vector<256x128xbf16>, vector<128x128xbf16>, vector<256x128xf32> -> vector<256x128xf32>
    %227 = arith.addf %221, %226 : vector<256x128xf32>
    %c2_227 = arith.constant 2 : index
    %c0_228 = arith.constant 0 : index
    %c0_229 = arith.constant 0 : index
    %228 = vector.load %arg9[%c2_227, %c0_228, %c0_229] : memref<4x256x128xf32, #tpu.memory_space<vmem>>, vector<1x256x128xf32>
    %229 = vector.shape_cast %228 : vector<1x256x128xf32> to vector<256x128xf32>
    %230 = vector.shape_cast %227 : vector<256x128xf32> to vector<1x256x128xf32>
    tpu.vector_store %arg9[%c2_227, %c0_228, %c0_229], %230 {strides = array<i32>} : memref<4x256x128xf32, #tpu.memory_space<vmem>>, vector<1x256x128xf32>,
    %c3_230 = arith.constant 3 : index
    %c0_231 = arith.constant 0 : index
    %c0_232 = arith.constant 0 : index
    %231 = vector.load %arg9[%c3_230, %c0_231, %c0_232] : memref<4x256x128xf32, #tpu.memory_space<vmem>>, vector<1x256x128xf32>
    %232 = vector.shape_cast %231 : vector<1x256x128xf32> to vector<256x128xf32>
    %233 = vector.extract_strided_slice %14 {offsets = [0, 0, 0], sizes = [16, 16, 128], strides = [1, 1, 1]} : vector<22x16x128xbf16> to vector<16x16x128xbf16>
    %234 = vector.shape_cast %233 : vector<16x16x128xbf16> to vector<256x128xbf16>
    %c2_233 = arith.constant 2 : index
    %c0_234 = arith.constant 0 : index
    %c0_235 = arith.constant 0 : index
    %c0_236 = arith.constant 0 : index
    %235 = vector.load %arg4[%c2_233, %c0_234, %c0_235, %c0_236] : memref<3x9x128x128xbf16, #tpu.memory_space<vmem>>, vector<1x1x128x128xbf16>
    %236 = vector.shape_cast %235 : vector<1x1x128x128xbf16> to vector<128x128xbf16>
    %cst_237 = arith.constant dense<0.000000e+00> : vector<256x128xf32>
    %237 = tpu.matmul %234, %236, %cst_237 {dimension_numbers = #tpu.dot_dimension_numbers<[1], [0], [0], [1], [0, 0, 1, 1], [], []>} : vector<256x128xbf16>, vector<128x128xbf16>, vector<256x128xf32> -> vector<256x128xf32>
    %238 = arith.addf %232, %237 : vector<256x128xf32>
    %c3_238 = arith.constant 3 : index
    %c0_239 = arith.constant 0 : index
    %c0_240 = arith.constant 0 : index
    %239 = vector.load %arg9[%c3_238, %c0_239, %c0_240] : memref<4x256x128xf32, #tpu.memory_space<vmem>>, vector<1x256x128xf32>
    %240 = vector.shape_cast %239 : vector<1x256x128xf32> to vector<256x128xf32>
    %241 = vector.shape_cast %238 : vector<256x128xf32> to vector<1x256x128xf32>
    tpu.vector_store %arg9[%c3_238, %c0_239, %c0_240], %241 {strides = array<i32>} : memref<4x256x128xf32, #tpu.memory_space<vmem>>, vector<1x256x128xf32>,
    %c3_241 = arith.constant 3 : index
    %c0_242 = arith.constant 0 : index
    %c0_243 = arith.constant 0 : index
    %242 = vector.load %arg9[%c3_241, %c0_242, %c0_243] : memref<4x256x128xf32, #tpu.memory_space<vmem>>, vector<1x256x128xf32>
    %243 = vector.shape_cast %242 : vector<1x256x128xf32> to vector<256x128xf32>
    %244 = vector.extract_strided_slice %4 {offsets = [0, 0, 0], sizes = [16, 16, 128], strides = [1, 1, 1]} : vector<22x16x128xbf16> to vector<16x16x128xbf16>
    %245 = vector.shape_cast %244 : vector<16x16x128xbf16> to vector<256x128xbf16>
    %c2_244 = arith.constant 2 : index
    %c1_245 = arith.constant 1 : index
    %c0_246 = arith.constant 0 : index
    %c0_247 = arith.constant 0 : index
    %246 = vector.load %arg4[%c2_244, %c1_245, %c0_246, %c0_247] : memref<3x9x128x128xbf16, #tpu.memory_space<vmem>>, vector<1x1x128x128xbf16>
    %247 = vector.shape_cast %246 : vector<1x1x128x128xbf16> to vector<128x128xbf16>
    %cst_248 = arith.constant dense<0.000000e+00> : vector<256x128xf32>
    %248 = tpu.matmul %245, %247, %cst_248 {dimension_numbers = #tpu.dot_dimension_numbers<[1], [0], [0], [1], [0, 0, 1, 1], [], []>} : vector<256x128xbf16>, vector<128x128xbf16>, vector<256x128xf32> -> vector<256x128xf32>
    %249 = arith.addf %243, %248 : vector<256x128xf32>
    %c3_249 = arith.constant 3 : index
    %c0_250 = arith.constant 0 : index
    %c0_251 = arith.constant 0 : index
    %250 = vector.load %arg9[%c3_249, %c0_250, %c0_251] : memref<4x256x128xf32, #tpu.memory_space<vmem>>, vector<1x256x128xf32>
    %251 = vector.shape_cast %250 : vector<1x256x128xf32> to vector<256x128xf32>
    %252 = vector.shape_cast %249 : vector<256x128xf32> to vector<1x256x128xf32>
    tpu.vector_store %arg9[%c3_249, %c0_250, %c0_251], %252 {strides = array<i32>} : memref<4x256x128xf32, #tpu.memory_space<vmem>>, vector<1x256x128xf32>,
    %c3_252 = arith.constant 3 : index
    %c0_253 = arith.constant 0 : index
    %c0_254 = arith.constant 0 : index
    %253 = vector.load %arg9[%c3_252, %c0_253, %c0_254] : memref<4x256x128xf32, #tpu.memory_space<vmem>>, vector<1x256x128xf32>
    %254 = vector.shape_cast %253 : vector<1x256x128xf32> to vector<256x128xf32>
    %255 = vector.extract_strided_slice %16 {offsets = [0, 0, 0], sizes = [16, 16, 128], strides = [1, 1, 1]} : vector<22x16x128xbf16> to vector<16x16x128xbf16>
    %256 = vector.shape_cast %255 : vector<16x16x128xbf16> to vector<256x128xbf16>
    %c2_255 = arith.constant 2 : index
    %c2_256 = arith.constant 2 : index
    %c0_257 = arith.constant 0 : index
    %c0_258 = arith.constant 0 : index
    %257 = vector.load %arg4[%c2_255, %c2_256, %c0_257, %c0_258] : memref<3x9x128x128xbf16, #tpu.memory_space<vmem>>, vector<1x1x128x128xbf16>
    %258 = vector.shape_cast %257 : vector<1x1x128x128xbf16> to vector<128x128xbf16>
    %cst_259 = arith.constant dense<0.000000e+00> : vector<256x128xf32>
    %259 = tpu.matmul %256, %258, %cst_259 {dimension_numbers = #tpu.dot_dimension_numbers<[1], [0], [0], [1], [0, 0, 1, 1], [], []>} : vector<256x128xbf16>, vector<128x128xbf16>, vector<256x128xf32> -> vector<256x128xf32>
    %260 = arith.addf %254, %259 : vector<256x128xf32>
    %c3_260 = arith.constant 3 : index
    %c0_261 = arith.constant 0 : index
    %c0_262 = arith.constant 0 : index
    %261 = vector.load %arg9[%c3_260, %c0_261, %c0_262] : memref<4x256x128xf32, #tpu.memory_space<vmem>>, vector<1x256x128xf32>
    %262 = vector.shape_cast %261 : vector<1x256x128xf32> to vector<256x128xf32>
    %263 = vector.shape_cast %260 : vector<256x128xf32> to vector<1x256x128xf32>
    tpu.vector_store %arg9[%c3_260, %c0_261, %c0_262], %263 {strides = array<i32>} : memref<4x256x128xf32, #tpu.memory_space<vmem>>, vector<1x256x128xf32>,
    %c3_263 = arith.constant 3 : index
    %c0_264 = arith.constant 0 : index
    %c0_265 = arith.constant 0 : index
    %264 = vector.load %arg9[%c3_263, %c0_264, %c0_265] : memref<4x256x128xf32, #tpu.memory_space<vmem>>, vector<1x256x128xf32>
    %265 = vector.shape_cast %264 : vector<1x256x128xf32> to vector<256x128xf32>
    %266 = vector.extract_strided_slice %14 {offsets = [3, 0, 0], sizes = [16, 16, 128], strides = [1, 1, 1]} : vector<22x16x128xbf16> to vector<16x16x128xbf16>
    %267 = vector.shape_cast %266 : vector<16x16x128xbf16> to vector<256x128xbf16>
    %c2_266 = arith.constant 2 : index
    %c3_267 = arith.constant 3 : index
    %c0_268 = arith.constant 0 : index
    %c0_269 = arith.constant 0 : index
    %268 = vector.load %arg4[%c2_266, %c3_267, %c0_268, %c0_269] : memref<3x9x128x128xbf16, #tpu.memory_space<vmem>>, vector<1x1x128x128xbf16>
    %269 = vector.shape_cast %268 : vector<1x1x128x128xbf16> to vector<128x128xbf16>
    %cst_270 = arith.constant dense<0.000000e+00> : vector<256x128xf32>
    %270 = tpu.matmul %267, %269, %cst_270 {dimension_numbers = #tpu.dot_dimension_numbers<[1], [0], [0], [1], [0, 0, 1, 1], [], []>} : vector<256x128xbf16>, vector<128x128xbf16>, vector<256x128xf32> -> vector<256x128xf32>
    %271 = arith.addf %265, %270 : vector<256x128xf32>
    %c3_271 = arith.constant 3 : index
    %c0_272 = arith.constant 0 : index
    %c0_273 = arith.constant 0 : index
    %272 = vector.load %arg9[%c3_271, %c0_272, %c0_273] : memref<4x256x128xf32, #tpu.memory_space<vmem>>, vector<1x256x128xf32>
    %273 = vector.shape_cast %272 : vector<1x256x128xf32> to vector<256x128xf32>
    %274 = vector.shape_cast %271 : vector<256x128xf32> to vector<1x256x128xf32>
    tpu.vector_store %arg9[%c3_271, %c0_272, %c0_273], %274 {strides = array<i32>} : memref<4x256x128xf32, #tpu.memory_space<vmem>>, vector<1x256x128xf32>,
    %c3_274 = arith.constant 3 : index
    %c0_275 = arith.constant 0 : index
    %c0_276 = arith.constant 0 : index
    %275 = vector.load %arg9[%c3_274, %c0_275, %c0_276] : memref<4x256x128xf32, #tpu.memory_space<vmem>>, vector<1x256x128xf32>
    %276 = vector.shape_cast %275 : vector<1x256x128xf32> to vector<256x128xf32>
    %277 = vector.extract_strided_slice %4 {offsets = [3, 0, 0], sizes = [16, 16, 128], strides = [1, 1, 1]} : vector<22x16x128xbf16> to vector<16x16x128xbf16>
    %278 = vector.shape_cast %277 : vector<16x16x128xbf16> to vector<256x128xbf16>
    %c2_277 = arith.constant 2 : index
    %c4_278 = arith.constant 4 : index
    %c0_279 = arith.constant 0 : index
    %c0_280 = arith.constant 0 : index
    %279 = vector.load %arg4[%c2_277, %c4_278, %c0_279, %c0_280] : memref<3x9x128x128xbf16, #tpu.memory_space<vmem>>, vector<1x1x128x128xbf16>
    %280 = vector.shape_cast %279 : vector<1x1x128x128xbf16> to vector<128x128xbf16>
    %cst_281 = arith.constant dense<0.000000e+00> : vector<256x128xf32>
    %281 = tpu.matmul %278, %280, %cst_281 {dimension_numbers = #tpu.dot_dimension_numbers<[1], [0], [0], [1], [0, 0, 1, 1], [], []>} : vector<256x128xbf16>, vector<128x128xbf16>, vector<256x128xf32> -> vector<256x128xf32>
    %282 = arith.addf %276, %281 : vector<256x128xf32>
    %c3_282 = arith.constant 3 : index
    %c0_283 = arith.constant 0 : index
    %c0_284 = arith.constant 0 : index
    %283 = vector.load %arg9[%c3_282, %c0_283, %c0_284] : memref<4x256x128xf32, #tpu.memory_space<vmem>>, vector<1x256x128xf32>
    %284 = vector.shape_cast %283 : vector<1x256x128xf32> to vector<256x128xf32>
    %285 = vector.shape_cast %282 : vector<256x128xf32> to vector<1x256x128xf32>
    tpu.vector_store %arg9[%c3_282, %c0_283, %c0_284], %285 {strides = array<i32>} : memref<4x256x128xf32, #tpu.memory_space<vmem>>, vector<1x256x128xf32>,
    %c3_285 = arith.constant 3 : index
    %c0_286 = arith.constant 0 : index
    %c0_287 = arith.constant 0 : index
    %286 = vector.load %arg9[%c3_285, %c0_286, %c0_287] : memref<4x256x128xf32, #tpu.memory_space<vmem>>, vector<1x256x128xf32>
    %287 = vector.shape_cast %286 : vector<1x256x128xf32> to vector<256x128xf32>
    %288 = vector.extract_strided_slice %16 {offsets = [3, 0, 0], sizes = [16, 16, 128], strides = [1, 1, 1]} : vector<22x16x128xbf16> to vector<16x16x128xbf16>
    %289 = vector.shape_cast %288 : vector<16x16x128xbf16> to vector<256x128xbf16>
    %c2_288 = arith.constant 2 : index
    %c5_289 = arith.constant 5 : index
    %c0_290 = arith.constant 0 : index
    %c0_291 = arith.constant 0 : index
    %290 = vector.load %arg4[%c2_288, %c5_289, %c0_290, %c0_291] : memref<3x9x128x128xbf16, #tpu.memory_space<vmem>>, vector<1x1x128x128xbf16>
    %291 = vector.shape_cast %290 : vector<1x1x128x128xbf16> to vector<128x128xbf16>
    %cst_292 = arith.constant dense<0.000000e+00> : vector<256x128xf32>
    %292 = tpu.matmul %289, %291, %cst_292 {dimension_numbers = #tpu.dot_dimension_numbers<[1], [0], [0], [1], [0, 0, 1, 1], [], []>} : vector<256x128xbf16>, vector<128x128xbf16>, vector<256x128xf32> -> vector<256x128xf32>
    %293 = arith.addf %287, %292 : vector<256x128xf32>
    %c3_293 = arith.constant 3 : index
    %c0_294 = arith.constant 0 : index
    %c0_295 = arith.constant 0 : index
    %294 = vector.load %arg9[%c3_293, %c0_294, %c0_295] : memref<4x256x128xf32, #tpu.memory_space<vmem>>, vector<1x256x128xf32>
    %295 = vector.shape_cast %294 : vector<1x256x128xf32> to vector<256x128xf32>
    %296 = vector.shape_cast %293 : vector<256x128xf32> to vector<1x256x128xf32>
    tpu.vector_store %arg9[%c3_293, %c0_294, %c0_295], %296 {strides = array<i32>} : memref<4x256x128xf32, #tpu.memory_space<vmem>>, vector<1x256x128xf32>,
    %c3_296 = arith.constant 3 : index
    %c0_297 = arith.constant 0 : index
    %c0_298 = arith.constant 0 : index
    %297 = vector.load %arg9[%c3_296, %c0_297, %c0_298] : memref<4x256x128xf32, #tpu.memory_space<vmem>>, vector<1x256x128xf32>
    %298 = vector.shape_cast %297 : vector<1x256x128xf32> to vector<256x128xf32>
    %299 = vector.extract_strided_slice %14 {offsets = [6, 0, 0], sizes = [16, 16, 128], strides = [1, 1, 1]} : vector<22x16x128xbf16> to vector<16x16x128xbf16>
    %300 = vector.shape_cast %299 : vector<16x16x128xbf16> to vector<256x128xbf16>
    %c2_299 = arith.constant 2 : index
    %c6_300 = arith.constant 6 : index
    %c0_301 = arith.constant 0 : index
    %c0_302 = arith.constant 0 : index
    %301 = vector.load %arg4[%c2_299, %c6_300, %c0_301, %c0_302] : memref<3x9x128x128xbf16, #tpu.memory_space<vmem>>, vector<1x1x128x128xbf16>
    %302 = vector.shape_cast %301 : vector<1x1x128x128xbf16> to vector<128x128xbf16>
    %cst_303 = arith.constant dense<0.000000e+00> : vector<256x128xf32>
    %303 = tpu.matmul %300, %302, %cst_303 {dimension_numbers = #tpu.dot_dimension_numbers<[1], [0], [0], [1], [0, 0, 1, 1], [], []>} : vector<256x128xbf16>, vector<128x128xbf16>, vector<256x128xf32> -> vector<256x128xf32>
    %304 = arith.addf %298, %303 : vector<256x128xf32>
    %c3_304 = arith.constant 3 : index
    %c0_305 = arith.constant 0 : index
    %c0_306 = arith.constant 0 : index
    %305 = vector.load %arg9[%c3_304, %c0_305, %c0_306] : memref<4x256x128xf32, #tpu.memory_space<vmem>>, vector<1x256x128xf32>
    %306 = vector.shape_cast %305 : vector<1x256x128xf32> to vector<256x128xf32>
    %307 = vector.shape_cast %304 : vector<256x128xf32> to vector<1x256x128xf32>
    tpu.vector_store %arg9[%c3_304, %c0_305, %c0_306], %307 {strides = array<i32>} : memref<4x256x128xf32, #tpu.memory_space<vmem>>, vector<1x256x128xf32>,
    %c3_307 = arith.constant 3 : index
    %c0_308 = arith.constant 0 : index
    %c0_309 = arith.constant 0 : index
    %308 = vector.load %arg9[%c3_307, %c0_308, %c0_309] : memref<4x256x128xf32, #tpu.memory_space<vmem>>, vector<1x256x128xf32>
    %309 = vector.shape_cast %308 : vector<1x256x128xf32> to vector<256x128xf32>
    %310 = vector.extract_strided_slice %4 {offsets = [6, 0, 0], sizes = [16, 16, 128], strides = [1, 1, 1]} : vector<22x16x128xbf16> to vector<16x16x128xbf16>
    %311 = vector.shape_cast %310 : vector<16x16x128xbf16> to vector<256x128xbf16>
    %c2_310 = arith.constant 2 : index
    %c7_311 = arith.constant 7 : index
    %c0_312 = arith.constant 0 : index
    %c0_313 = arith.constant 0 : index
    %312 = vector.load %arg4[%c2_310, %c7_311, %c0_312, %c0_313] : memref<3x9x128x128xbf16, #tpu.memory_space<vmem>>, vector<1x1x128x128xbf16>
    %313 = vector.shape_cast %312 : vector<1x1x128x128xbf16> to vector<128x128xbf16>
    %cst_314 = arith.constant dense<0.000000e+00> : vector<256x128xf32>
    %314 = tpu.matmul %311, %313, %cst_314 {dimension_numbers = #tpu.dot_dimension_numbers<[1], [0], [0], [1], [0, 0, 1, 1], [], []>} : vector<256x128xbf16>, vector<128x128xbf16>, vector<256x128xf32> -> vector<256x128xf32>
    %315 = arith.addf %309, %314 : vector<256x128xf32>
    %c3_315 = arith.constant 3 : index
    %c0_316 = arith.constant 0 : index
    %c0_317 = arith.constant 0 : index
    %316 = vector.load %arg9[%c3_315, %c0_316, %c0_317] : memref<4x256x128xf32, #tpu.memory_space<vmem>>, vector<1x256x128xf32>
    %317 = vector.shape_cast %316 : vector<1x256x128xf32> to vector<256x128xf32>
    %318 = vector.shape_cast %315 : vector<256x128xf32> to vector<1x256x128xf32>
    tpu.vector_store %arg9[%c3_315, %c0_316, %c0_317], %318 {strides = array<i32>} : memref<4x256x128xf32, #tpu.memory_space<vmem>>, vector<1x256x128xf32>,
    %c3_318 = arith.constant 3 : index
    %c0_319 = arith.constant 0 : index
    %c0_320 = arith.constant 0 : index
    %319 = vector.load %arg9[%c3_318, %c0_319, %c0_320] : memref<4x256x128xf32, #tpu.memory_space<vmem>>, vector<1x256x128xf32>
    %320 = vector.shape_cast %319 : vector<1x256x128xf32> to vector<256x128xf32>
    %321 = vector.extract_strided_slice %16 {offsets = [6, 0, 0], sizes = [16, 16, 128], strides = [1, 1, 1]} : vector<22x16x128xbf16> to vector<16x16x128xbf16>
    %322 = vector.shape_cast %321 : vector<16x16x128xbf16> to vector<256x128xbf16>
    %c2_321 = arith.constant 2 : index
    %c8_322 = arith.constant 8 : index
    %c0_323 = arith.constant 0 : index
    %c0_324 = arith.constant 0 : index
    %323 = vector.load %arg4[%c2_321, %c8_322, %c0_323, %c0_324] : memref<3x9x128x128xbf16, #tpu.memory_space<vmem>>, vector<1x1x128x128xbf16>
    %324 = vector.shape_cast %323 : vector<1x1x128x128xbf16> to vector<128x128xbf16>
    %cst_325 = arith.constant dense<0.000000e+00> : vector<256x128xf32>
    %325 = tpu.matmul %322, %324, %cst_325 {dimension_numbers = #tpu.dot_dimension_numbers<[1], [0], [0], [1], [0, 0, 1, 1], [], []>} : vector<256x128xbf16>, vector<128x128xbf16>, vector<256x128xf32> -> vector<256x128xf32>
    %326 = arith.addf %320, %325 : vector<256x128xf32>
    %c3_326 = arith.constant 3 : index
    %c0_327 = arith.constant 0 : index
    %c0_328 = arith.constant 0 : index
    %327 = vector.load %arg9[%c3_326, %c0_327, %c0_328] : memref<4x256x128xf32, #tpu.memory_space<vmem>>, vector<1x256x128xf32>
    %328 = vector.shape_cast %327 : vector<1x256x128xf32> to vector<256x128xf32>
    %329 = vector.shape_cast %326 : vector<256x128xf32> to vector<1x256x128xf32>
    tpu.vector_store %arg9[%c3_326, %c0_327, %c0_328], %329 {strides = array<i32>} : memref<4x256x128xf32, #tpu.memory_space<vmem>>, vector<1x256x128xf32>,
    %c0_i32_329 = arith.constant 0 : i32
    %330 = arith.cmpi eq, %arg1, %c0_i32_329 : i32
    %331 = arith.extui %330 : i1 to i32
    %c0_i32_330 = arith.constant 0 : i32
    %332 = arith.cmpi ne, %331, %c0_i32_330 : i32
    scf.if %332 {
      %c0_331 = arith.constant 0 : index
      %c0_332 = arith.constant 0 : index
      %c0_333 = arith.constant 0 : index
      %333 = vector.load %arg9[%c0_331, %c0_332, %c0_333] : memref<4x256x128xf32, #tpu.memory_space<vmem>>, vector<1x256x128xf32>
      %334 = vector.shape_cast %333 : vector<1x256x128xf32> to vector<256x128xf32>
      %c0_334 = arith.constant 0 : index
      %c0_335 = arith.constant 0 : index
      %335 = vector.load %arg5[%c0_334, %c0_335] : memref<4x128xf32, #tpu.memory_space<vmem>>, vector<1x128xf32>
      %336 = vector.broadcast %335 : vector<1x128xf32> to vector<256x128xf32>
      %337 = arith.mulf %334, %336 : vector<256x128xf32>
      %c0_336 = arith.constant 0 : index
      %c0_337 = arith.constant 0 : index
      %338 = vector.load %arg6[%c0_336, %c0_337] : memref<4x128xf32, #tpu.memory_space<vmem>>, vector<1x128xf32>
      %339 = vector.broadcast %338 : vector<1x128xf32> to vector<256x128xf32>
      %340 = arith.addf %337, %339 : vector<256x128xf32>
      %cst_338 = arith.constant 0.000000e+00 : f32
      %341 = vector.broadcast %cst_338 : f32 to vector<256x128xf32>
      %342 = arith.maximumf %340, %341 : vector<256x128xf32>
      %343 = arith.truncf %342 : vector<256x128xf32> to vector<256x128xbf16>
      %c0_339 = arith.constant 0 : index
      %c0_340 = arith.constant 0 : index
      %c0_341 = arith.constant 0 : index
      %344 = vector.load %arg7[%c0_339, %c0_340, %c0_341] : memref<1x256x512xbf16, #tpu.memory_space<vmem>>, vector<1x256x128xbf16>
      %345 = vector.shape_cast %344 : vector<1x256x128xbf16> to vector<256x128xbf16>
      %346 = vector.shape_cast %343 : vector<256x128xbf16> to vector<1x256x128xbf16>
      tpu.vector_store %arg7[%c0_339, %c0_340, %c0_341], %346 {strides = array<i32>} : memref<1x256x512xbf16, #tpu.memory_space<vmem>>, vector<1x256x128xbf16>,
      %c1_342 = arith.constant 1 : index
      %c0_343 = arith.constant 0 : index
      %c0_344 = arith.constant 0 : index
      %347 = vector.load %arg9[%c1_342, %c0_343, %c0_344] : memref<4x256x128xf32, #tpu.memory_space<vmem>>, vector<1x256x128xf32>
      %348 = vector.shape_cast %347 : vector<1x256x128xf32> to vector<256x128xf32>
      %c1_345 = arith.constant 1 : index
      %c0_346 = arith.constant 0 : index
      %349 = vector.load %arg5[%c1_345, %c0_346] : memref<4x128xf32, #tpu.memory_space<vmem>>, vector<1x128xf32>
      %350 = vector.broadcast %349 : vector<1x128xf32> to vector<256x128xf32>
      %351 = arith.mulf %348, %350 : vector<256x128xf32>
      %c1_347 = arith.constant 1 : index
      %c0_348 = arith.constant 0 : index
      %352 = vector.load %arg6[%c1_347, %c0_348] : memref<4x128xf32, #tpu.memory_space<vmem>>, vector<1x128xf32>
      %353 = vector.broadcast %352 : vector<1x128xf32> to vector<256x128xf32>
      %354 = arith.addf %351, %353 : vector<256x128xf32>
      %cst_349 = arith.constant 0.000000e+00 : f32
      %355 = vector.broadcast %cst_349 : f32 to vector<256x128xf32>
      %356 = arith.maximumf %354, %355 : vector<256x128xf32>
      %357 = arith.truncf %356 : vector<256x128xf32> to vector<256x128xbf16>
      %c0_350 = arith.constant 0 : index
      %c0_351 = arith.constant 0 : index
      %c128 = arith.constant 128 : index
      %358 = vector.load %arg7[%c0_350, %c0_351, %c128] : memref<1x256x512xbf16, #tpu.memory_space<vmem>>, vector<1x256x128xbf16>
      %359 = vector.shape_cast %358 : vector<1x256x128xbf16> to vector<256x128xbf16>
      %360 = vector.shape_cast %357 : vector<256x128xbf16> to vector<1x256x128xbf16>
      tpu.vector_store %arg7[%c0_350, %c0_351, %c128], %360 {strides = array<i32>} : memref<1x256x512xbf16, #tpu.memory_space<vmem>>, vector<1x256x128xbf16>,
      %c2_352 = arith.constant 2 : index
      %c0_353 = arith.constant 0 : index
      %c0_354 = arith.constant 0 : index
      %361 = vector.load %arg9[%c2_352, %c0_353, %c0_354] : memref<4x256x128xf32, #tpu.memory_space<vmem>>, vector<1x256x128xf32>
      %362 = vector.shape_cast %361 : vector<1x256x128xf32> to vector<256x128xf32>
      %c2_355 = arith.constant 2 : index
      %c0_356 = arith.constant 0 : index
      %363 = vector.load %arg5[%c2_355, %c0_356] : memref<4x128xf32, #tpu.memory_space<vmem>>, vector<1x128xf32>
      %364 = vector.broadcast %363 : vector<1x128xf32> to vector<256x128xf32>
      %365 = arith.mulf %362, %364 : vector<256x128xf32>
      %c2_357 = arith.constant 2 : index
      %c0_358 = arith.constant 0 : index
      %366 = vector.load %arg6[%c2_357, %c0_358] : memref<4x128xf32, #tpu.memory_space<vmem>>, vector<1x128xf32>
      %367 = vector.broadcast %366 : vector<1x128xf32> to vector<256x128xf32>
      %368 = arith.addf %365, %367 : vector<256x128xf32>
      %cst_359 = arith.constant 0.000000e+00 : f32
      %369 = vector.broadcast %cst_359 : f32 to vector<256x128xf32>
      %370 = arith.maximumf %368, %369 : vector<256x128xf32>
      %371 = arith.truncf %370 : vector<256x128xf32> to vector<256x128xbf16>
      %c0_360 = arith.constant 0 : index
      %c0_361 = arith.constant 0 : index
      %c256 = arith.constant 256 : index
      %372 = vector.load %arg7[%c0_360, %c0_361, %c256] : memref<1x256x512xbf16, #tpu.memory_space<vmem>>, vector<1x256x128xbf16>
      %373 = vector.shape_cast %372 : vector<1x256x128xbf16> to vector<256x128xbf16>
      %374 = vector.shape_cast %371 : vector<256x128xbf16> to vector<1x256x128xbf16>
      tpu.vector_store %arg7[%c0_360, %c0_361, %c256], %374 {strides = array<i32>} : memref<1x256x512xbf16, #tpu.memory_space<vmem>>, vector<1x256x128xbf16>,
      %c3_362 = arith.constant 3 : index
      %c0_363 = arith.constant 0 : index
      %c0_364 = arith.constant 0 : index
      %375 = vector.load %arg9[%c3_362, %c0_363, %c0_364] : memref<4x256x128xf32, #tpu.memory_space<vmem>>, vector<1x256x128xf32>
      %376 = vector.shape_cast %375 : vector<1x256x128xf32> to vector<256x128xf32>
      %c3_365 = arith.constant 3 : index
      %c0_366 = arith.constant 0 : index
      %377 = vector.load %arg5[%c3_365, %c0_366] : memref<4x128xf32, #tpu.memory_space<vmem>>, vector<1x128xf32>
      %378 = vector.broadcast %377 : vector<1x128xf32> to vector<256x128xf32>
      %379 = arith.mulf %376, %378 : vector<256x128xf32>
      %c3_367 = arith.constant 3 : index
      %c0_368 = arith.constant 0 : index
      %380 = vector.load %arg6[%c3_367, %c0_368] : memref<4x128xf32, #tpu.memory_space<vmem>>, vector<1x128xf32>
      %381 = vector.broadcast %380 : vector<1x128xf32> to vector<256x128xf32>
      %382 = arith.addf %379, %381 : vector<256x128xf32>
      %cst_369 = arith.constant 0.000000e+00 : f32
      %383 = vector.broadcast %cst_369 : f32 to vector<256x128xf32>
      %384 = arith.maximumf %382, %383 : vector<256x128xf32>
      %385 = arith.truncf %384 : vector<256x128xf32> to vector<256x128xbf16>
      %c0_370 = arith.constant 0 : index
      %c0_371 = arith.constant 0 : index
      %c384 = arith.constant 384 : index
      %386 = vector.load %arg7[%c0_370, %c0_371, %c384] : memref<1x256x512xbf16, #tpu.memory_space<vmem>>, vector<1x256x128xbf16>
      %387 = vector.shape_cast %386 : vector<1x256x128xbf16> to vector<256x128xbf16>
      %388 = vector.shape_cast %385 : vector<256x128xbf16> to vector<1x256x128xbf16>
      tpu.vector_store %arg7[%c0_370, %c0_371, %c384], %388 {strides = array<i32>} : memref<1x256x512xbf16, #tpu.memory_space<vmem>>, vector<1x256x128xbf16>,
    } else {
    }
    return
  }
  func.func @transform_0(%arg0: i32, %arg1: i32) -> (i32, i32, i32, i32) {
    %c0_i32 = arith.constant 0 : i32
    %c0_i32_0 = arith.constant 0 : i32
    %c0_i32_1 = arith.constant 0 : i32
    return %arg0, %c0_i32, %c0_i32_0, %arg1 : i32, i32, i32, i32
  }
  func.func @transform_1(%arg0: i32, %arg1: i32) -> (i32, i32) {
    %c0_i32 = arith.constant 0 : i32
    %c0_i32_0 = arith.constant 0 : i32
    return %arg1, %c0_i32 : i32, i32
  }
  func.func @transform_2(%arg0: i32, %arg1: i32) -> (i32, i32, i32, i32) {
    %c0_i32 = arith.constant 0 : i32
    %c0_i32_0 = arith.constant 0 : i32
    %c0_i32_1 = arith.constant 0 : i32
    %c0_i32_2 = arith.constant 0 : i32
    return %c0_i32, %c0_i32_0, %arg1, %c0_i32_1 : i32, i32, i32, i32
  }
  func.func @transform_3(%arg0: i32, %arg1: i32) -> (i32, i32) {
    %c0_i32 = arith.constant 0 : i32
    %c0_i32_0 = arith.constant 0 : i32
    %c0_i32_1 = arith.constant 0 : i32
    return %c0_i32, %c0_i32_0 : i32, i32
  }
  func.func @transform_4(%arg0: i32, %arg1: i32) -> (i32, i32) {
    %c0_i32 = arith.constant 0 : i32
    %c0_i32_0 = arith.constant 0 : i32
    %c0_i32_1 = arith.constant 0 : i32
    return %c0_i32, %c0_i32_0 : i32, i32
  }
  func.func @transform_5(%arg0: i32, %arg1: i32) -> (i32, i32, i32) {
    %c0_i32 = arith.constant 0 : i32
    %c0_i32_0 = arith.constant 0 : i32
    %c0_i32_1 = arith.constant 0 : i32
    return %arg0, %c0_i32, %c0_i32_0 : i32, i32, i32
  }
  func.func @transform_6(%arg0: i32, %arg1: i32) -> (i32, i32, i32) {
    %c0_i32 = arith.constant 0 : i32
    %c0_i32_0 = arith.constant 0 : i32
    return %arg0, %c0_i32, %arg1 : i32, i32, i32
  }
}

module attributes {stable_mosaic.version = 11 : i64} {
  func.func @_project_kernel(%arg0: i32, %arg1: i32, %arg2: memref<1x128x512xbf16, #tpu.memory_space<vmem>>, %arg3: memref<1x1x128xf32, #tpu.memory_space<vmem>>, %arg4: memref<512x128xbf16, #tpu.memory_space<vmem>>, %arg5: memref<1x128xf32, #tpu.memory_space<vmem>>, %arg6: memref<1x128xf32, #tpu.memory_space<vmem>>, %arg7: memref<1x128x128xf32, #tpu.memory_space<vmem>>) attributes {dimension_semantics = [#tpu.dimension_semantics<parallel>, #tpu.dimension_semantics<parallel>], iteration_bounds = array<i64: 2, 2>, scalar_prefetch = 0 : i64, scratch_operands = 0 : i64, tpu.core_type = #tpu.core_type<tc>, window_params = [{transform_indices = @transform_0, window_bounds = array<i64: 1, 128, 512>}, {transform_indices = @transform_1, window_bounds = array<i64: 1, 1, 128>}, {pipeline_mode = #tpu.pipeline_mode<synchronous>, transform_indices = @transform_2, window_bounds = array<i64: 512, 128>}, {pipeline_mode = #tpu.pipeline_mode<synchronous>, transform_indices = @transform_3, window_bounds = array<i64: 1, 128>}, {pipeline_mode = #tpu.pipeline_mode<synchronous>, transform_indices = @transform_4, window_bounds = array<i64: 1, 128>}, {transform_indices = @transform_5, window_bounds = array<i64: 1, 128, 128>}]} {
    %c0 = arith.constant 0 : index
    %c0_0 = arith.constant 0 : index
    %c0_1 = arith.constant 0 : index
    %0 = vector.load %arg2[%c0, %c0_0, %c0_1] : memref<1x128x512xbf16, #tpu.memory_space<vmem>>, vector<1x128x512xbf16>
    %1 = vector.shape_cast %0 : vector<1x128x512xbf16> to vector<128x512xbf16>
    %c0_2 = arith.constant 0 : index
    %c0_3 = arith.constant 0 : index
    %2 = vector.load %arg4[%c0_2, %c0_3] : memref<512x128xbf16, #tpu.memory_space<vmem>>, vector<512x128xbf16>
    %cst = arith.constant dense<0.000000e+00> : vector<128x128xf32>
    %3 = tpu.matmul %1, %2, %cst {dimension_numbers = #tpu.dot_dimension_numbers<[1], [0], [0], [1], [0, 0, 1, 1], [], []>} : vector<128x512xbf16>, vector<512x128xbf16>, vector<128x128xf32> -> vector<128x128xf32>
    %c0_4 = arith.constant 0 : index
    %c0_5 = arith.constant 0 : index
    %c0_6 = arith.constant 0 : index
    %4 = vector.load %arg3[%c0_4, %c0_5, %c0_6] : memref<1x1x128xf32, #tpu.memory_space<vmem>>, vector<1x1x128xf32>
    %5 = vector.shape_cast %4 : vector<1x1x128xf32> to vector<1x128xf32>
    %6 = vector.broadcast %5 : vector<1x128xf32> to vector<128x128xf32>
    %7 = arith.addf %3, %6 : vector<128x128xf32>
    %c0_7 = arith.constant 0 : index
    %c0_8 = arith.constant 0 : index
    %8 = vector.load %arg5[%c0_7, %c0_8] : memref<1x128xf32, #tpu.memory_space<vmem>>, vector<1x128xf32>
    %9 = vector.broadcast %8 : vector<1x128xf32> to vector<128x128xf32>
    %10 = arith.mulf %7, %9 : vector<128x128xf32>
    %c0_9 = arith.constant 0 : index
    %c0_10 = arith.constant 0 : index
    %11 = vector.load %arg6[%c0_9, %c0_10] : memref<1x128xf32, #tpu.memory_space<vmem>>, vector<1x128xf32>
    %12 = vector.broadcast %11 : vector<1x128xf32> to vector<128x128xf32>
    %13 = arith.addf %10, %12 : vector<128x128xf32>
    %cst_11 = arith.constant 0.000000e+00 : f32
    %14 = vector.broadcast %cst_11 : f32 to vector<128x128xf32>
    %15 = arith.maximumf %13, %14 : vector<128x128xf32>
    %c0_12 = arith.constant 0 : index
    %c0_13 = arith.constant 0 : index
    %c0_14 = arith.constant 0 : index
    %16 = vector.load %arg7[%c0_12, %c0_13, %c0_14] : memref<1x128x128xf32, #tpu.memory_space<vmem>>, vector<1x128x128xf32>
    %17 = vector.shape_cast %16 : vector<1x128x128xf32> to vector<128x128xf32>
    %18 = vector.shape_cast %15 : vector<128x128xf32> to vector<1x128x128xf32>
    tpu.vector_store %arg7[%c0_12, %c0_13, %c0_14], %18 {strides = array<i32>} : memref<1x128x128xf32, #tpu.memory_space<vmem>>, vector<1x128x128xf32>,
    return
  }
  func.func @transform_0(%arg0: i32, %arg1: i32) -> (i32, i32, i32) {
    %c0_i32 = arith.constant 0 : i32
    %c0_i32_0 = arith.constant 0 : i32
    return %arg0, %arg1, %c0_i32 : i32, i32, i32
  }
  func.func @transform_1(%arg0: i32, %arg1: i32) -> (i32, i32, i32) {
    %c0_i32 = arith.constant 0 : i32
    %c0_i32_0 = arith.constant 0 : i32
    %c0_i32_1 = arith.constant 0 : i32
    return %arg0, %c0_i32, %c0_i32_0 : i32, i32, i32
  }
  func.func @transform_2(%arg0: i32, %arg1: i32) -> (i32, i32) {
    %c0_i32 = arith.constant 0 : i32
    %c0_i32_0 = arith.constant 0 : i32
    %c0_i32_1 = arith.constant 0 : i32
    return %c0_i32, %c0_i32_0 : i32, i32
  }
  func.func @transform_3(%arg0: i32, %arg1: i32) -> (i32, i32) {
    %c0_i32 = arith.constant 0 : i32
    %c0_i32_0 = arith.constant 0 : i32
    %c0_i32_1 = arith.constant 0 : i32
    return %c0_i32, %c0_i32_0 : i32, i32
  }
  func.func @transform_4(%arg0: i32, %arg1: i32) -> (i32, i32) {
    %c0_i32 = arith.constant 0 : i32
    %c0_i32_0 = arith.constant 0 : i32
    %c0_i32_1 = arith.constant 0 : i32
    return %c0_i32, %c0_i32_0 : i32, i32
  }
  func.func @transform_5(%arg0: i32, %arg1: i32) -> (i32, i32, i32) {
    %c0_i32 = arith.constant 0 : i32
    %c0_i32_0 = arith.constant 0 : i32
    return %arg0, %arg1, %c0_i32 : i32, i32, i32
  }
}

</mosaic_0001>

<bundles_post_ra>
// kernel: aspp_forward.3
= control target key start
LH: loop header
LB: loop body
LE: loop exit
PB: predicated region body
PF: predicated region fallthrough
CT: control target
= control target key end

     0   :  { %10 = vsyncpa [#allocation3], 0  ;;  %s1965_s0 = inlined_call_operand.vmem [shape: bf16[2,256,512], index: 0, kind: input, shape index: {}]   ;;  %s1966_s1 = inlined_call_operand.vmem [shape: f32[2,1,128], index: 1, kind: input, shape index: {}]   ;;  %s1967_s2 = inlined_call_operand.vmem [shape: bf16[512,128], index: 2, kind: input, shape index: {}]   ;;  %s1968_s3 = inlined_call_operand.vmem [shape: f32[1,128], index: 3, kind: input, shape index: {}]   ;;  %s1969_s4 = inlined_call_operand.vmem [shape: f32[1,128], index: 4, kind: input, shape index: {}]   ;;  %s1970_s5 = inlined_call_operand.hbm [shape: f32[2,256,128], index: 5, kind: output, shape index: {}]  }
   0x1   :  { %12 = vsyncpa [#allocation3 + $0x1], 0  ;;  %s1602_s18 = smov 0   ;;  %s1604_s19 = smov 0  }
   0x2   :  { %s1606_s20 = smov 0   ;;  %s1608_s21 = smov 0  }
   0x3   :  { %s1610_s22 = smov 0   ;;  %s1612_s23 = smov 0  }
   0x4   :  { %s1614_s24 = smov 0   ;;  %s1616_s25 = smov 0  }
   0x5 LB: > { %s1109_s26 = sadd.s32 4294967295, %s1567_s25   ;;  %s1110_s27 = sadd.s32 4294967294, %s1567_s25   ;;  %s1567_s25 = sphi %s1616_s25, %s18_s25   ;;  %s1563_s24 = sphi %s1614_s24, %s1982_s24   ;;  %s1559_s23 = sphi %s1612_s23, %s1981_s23   ;;  %s1555_s22 = sphi %s1610_s22, %s1980_s22   ;;  %s1551_s21 = sphi %s1608_s21, %s1979_s21   ;;  %s1547_s20 = sphi %s1606_s20, %s1978_s20   ;;  %s1543_s19 = sphi %s1604_s19, %s1977_s19   ;;  %s1539_s18 = sphi %s1602_s18, %s1976_s18  }
   0x6   : > { %s27_s28 = sadd.s32 1, %s1559_s23  ;;  %s30_s29 = sadd.s32 1, %s1563_s24 }
   0x7   : > { %p28_p0 = scmp.ge.s32.totalorder %s27_s28, 2  ;;  %p166_p1 = scmp.ne.s32.totalorder %s1547_s20, %s1543_s19 }
   0x8   : > { %p167_p2 = scmp.eq.s32.totalorder %s1109_s26, 3  ;;  %p172_p5 = scmp.ne.s32.totalorder %s1543_s19, %s1539_s18 }
   0x9   : > { %s1984_s28 = smov (%p28_p0, %s27_s28), 0  ;;  %s1986_s29 = smov (!%p28_p0, %s30_s29), %s1563_s24 }
   0xa   : > { %s152_s30 = ssub.s32 %s1559_s23, %s1984_s28  ;;  %p1653_p3 = por %p167_p2, %p166_p1 }
   0xb   : > { %p32_p4 = scmp.ge.s32.totalorder %s1986_s29, 2  ;;  %p173_p6 = scmp.eq.s32.totalorder %s1110_s27, 3 }
   0xc   : > { %p1113_p7 = scmp.ge.s32.totalorder %s1567_s25, 1  ;;  %p220_p9 = scmp.lt.s32.totalorder %s1567_s25, 5 }
   0xd   : > { %s1988_s29 = smov (%p32_p4, %s1986_s29), 0  ;;  %p1662_p8 = por %p173_p6, %p172_p5 }
   0xe   : > { %1973 = sst [smem:[#allocation5_spill]] %s1988_s29  ;;  %s151_s8 = ssub.s32 %s1563_s24, %s1988_s29 }
   0xf   : > { %s156_s9 = sadd.s32 1, %s1547_s20  ;;  %s153_s10 = sor.u32 %s152_s30, %s151_s8 }
  0x10   : > { %p221_p10 = pnand %p1113_p7, %p220_p9  ;;  %p154_p11 = scmp.eq.s32.totalorder %s153_s10, 0 }
  0x11   : > { %v1393_v0 = vld [vmem:[%s1967_s2 + $0x40] sm:$0xff] (!%p221_p10)   ;;  %v1397_v4 = vld [vmem:[%s1967_s2 + $0x48] sm:$0xff] (!%p221_p10)   ;;  %v1401_v8 = vld [vmem:[%s1967_s2 + $0x50] sm:$0xff] (!%p221_p10)   ;;  %s1704_s30 = sshll.u32 (!%p221_p10), %s1551_s21, 4  ;;  %p257_p12 = scmp.lt.s32.totalorder (!%p221_p10), %s1555_s22, 1 }
  0x12   : > { %s1671_s11 = scalar_select %p154_p11, %s1547_s20, %s156_s9  }
  0x13   : > { %224 = sbr.rel (%p221_p10) target bundleno = 350 (0x15e), region = 40  ;;  %v1394_v1 = vld [vmem:[%s1967_s2 + $0xc0] sm:$0xff] (!%p221_p10)   ;;  %1192 = vmatprep.subr.bf16.mxu0 (!%p221_p10), %v1393_v0  ;;  %v1398_v5 = vld [vmem:[%s1967_s2 + $0xc8] sm:$0xff] (!%p221_p10)   ;;  %v1402_v9 = vld [vmem:[%s1967_s2 + $0xd0] sm:$0xff] (!%p221_p10)   ;;  %p259_p13 = scmp.lt.s32.totalorder (!%p221_p10), %s1704_s30, 31 }
  0x14   : > { %v1395_v2 = vld [vmem:[%s1967_s2] sm:$0xff] (!%p221_p10)   ;;  %1256 = vmatprep.subr.bf16.mxu1 (!%p221_p10), %v1394_v1  ;;  %v1399_v6 = vld [vmem:[%s1967_s2 + $0x8] sm:$0xff] (!%p221_p10)   ;;  %v1403_v10 = vld [vmem:[%s1967_s2 + $0x10] sm:$0xff] (!%p221_p10)   ;;  %s253_s27 = sand.u32 (!%p221_p10), 1, %s1543_s19   ;;  %s1188_s21 = sshll.u32 (!%p221_p10), %s1555_s22, 5 }
  0x15   : > { %v1396_v3 = vld [vmem:[%s1967_s2 + $0x80] sm:$0xff] (!%p221_p10)   ;;  %1193 = vmatpush3.bf16.msra.mxu0 (!%p221_p10), %v1395_v2  ;;  %v1400_v7 = vld [vmem:[%s1967_s2 + $0x88] sm:$0xff] (!%p221_p10)   ;;  %v1404_v11 = vld [vmem:[%s1967_s2 + $0x90] sm:$0xff] (!%p221_p10)   ;;  %s1012_s16 = sadd.s32 (!%p221_p10), %s1188_s21, %s1704_s30 }
  0x16   : > { %1257 = vmatpush3.bf16.msra.mxu1 (!%p221_p10), %v1396_v3  ;;  %1194 = vmatprep.subr.bf16.mxu0 (!%p221_p10), %v1397_v4  ;;  %v1405_v12 = vld [vmem:[%s1967_s2 + $0x58] sm:$0xff] (!%p221_p10)   ;;  %v1409_v16 = vld [vmem:[%s1967_s2 + $0x60] sm:$0xff] (!%p221_p10)   ;;  %v1413_v20 = vld [vmem:[%s1967_s2 + $0x68] sm:$0xff] (!%p221_p10)  }
  0x17   : > { %1258 = vmatprep.subr.bf16.mxu1 (!%p221_p10), %v1398_v5  ;;  %v1406_v13 = vld [vmem:[%s1967_s2 + $0xd8] sm:$0xff] (!%p221_p10)   ;;  %v1410_v17 = vld [vmem:[%s1967_s2 + $0xe0] sm:$0xff] (!%p221_p10)   ;;  %v1414_v21 = vld [vmem:[%s1967_s2 + $0xe8] sm:$0xff] (!%p221_p10)  }
  0x18   : > { %v1407_v14 = vld [vmem:[%s1967_s2 + $0x18] sm:$0xff] (!%p221_p10)   ;;  %v1411_v18 = vld [vmem:[%s1967_s2 + $0x20] sm:$0xff] (!%p221_p10)   ;;  %v1415_v22 = vld [vmem:[%s1967_s2 + $0x28] sm:$0xff] (!%p221_p10)  }
  0x19   : > { %1195 = vmatpush3.bf16.msra.mxu0 (!%p221_p10), %v1399_v6  ;;  %v1408_v15 = vld [vmem:[%s1967_s2 + $0x98] sm:$0xff] (!%p221_p10)   ;;  %v1412_v19 = vld [vmem:[%s1967_s2 + $0xa0] sm:$0xff] (!%p221_p10)   ;;  %v1416_v23 = vld [vmem:[%s1967_s2 + $0xa8] sm:$0xff] (!%p221_p10)  }
  0x1a   : > { %1259 = vmatpush3.bf16.msra.mxu1 %v1400_v7  ;;  %1196 = vmatprep.subr.bf16.mxu0 %v1401_v8  ;;  %s1727_s8 = scalar_select %p257_p12, %s1555_s22, 1  ;;  %v1417_v24 = vld [vmem:[%s1967_s2 + $0x70] sm:$0xff]   ;;  %v1421_v28 = vld [vmem:[%s1967_s2 + $0x78] sm:$0xff]  }
  0x1b   : > { %1260 = vmatprep.subr.bf16.mxu1 %v1402_v9  ;;  %s260_s12 = scalar_select %p259_p13, %s1704_s30, 31  ;;  %v1418_v25 = vld [vmem:[%s1967_s2 + $0xf0] sm:$0xff]   ;;  %v1422_v29 = vld [vmem:[%s1967_s2 + $0xf8] sm:$0xff]  }
  0x1c   : > { %s1117_s26 = sshll.u32 %s1727_s8, 7  ;;  %v1419_v26 = vld [vmem:[%s1967_s2 + $0x30] sm:$0xff]   ;;  %v1423_v30 = vld [vmem:[%s1967_s2 + $0x38] sm:$0xff]   ;;  %s1189_s22 = sshll.u32 %s1012_s16, 7 }
  0x1d   : > { %1197 = vmatpush3.bf16.msra.mxu0 %v1403_v10  ;;  %s1116_s10 = sshll.u32 %s260_s12, 2  ;;  %v1420_v27 = vld [vmem:[%s1967_s2 + $0xb0] sm:$0xff]   ;;  %v1424_v31 = vld [vmem:[%s1967_s2 + $0xb8] sm:$0xff]   ;;  %s1913_s30 = scalar_lea.sflag [#allocation3], %s253_s27 }
  0x1e   : > { %1261 = vmatpush3.bf16.msra.mxu1 %v1404_v11  ;;  %1198 = vmatprep.subr.bf16.mxu0 %v1405_v12  ;;  %s263_s29 = sadd.s32 %s1117_s26, %s1116_s10  ;;  %s269_s10 = scalar_lea.vmem %s1966_s1, %s1727_s8 }
  0x1f   : > { %1262 = vmatprep.subr.bf16.mxu1 %v1406_v13  ;;  %s1118_s15 = sshll.u32 %s263_s29, 2  ;;  %v1820_v2 = vld [vmem:[%s269_s10] ss:$0 sm:$0xff]  ;;  %s1905_s10 = scalar_lea.hbm %s1970_s5, %s1189_s22 }
  0x20   : > { %s1776_s14 = scalar_lea.vmem %s1965_s0, %s1118_s15  ;;  %v1827_v13 = vld [vmem:[%s1968_s3] ss:$0 sm:$0xff]  ;;  %s1569_s12 = smov [#allocation2]  }
  0x21   : > { %1199 = vmatpush3.bf16.msra.mxu0 %v1407_v14  ;;  %v1425_v32 = vld [vmem:[%s1776_s14] ss:$16 sps:$4 sm:$0xff]   ;;  %v1427_v33 = vld [vmem:[%s1776_s14 + $0x4] ss:$16 sps:$4 sm:$0xff]   ;;  %v1428_v34 = vld [vmem:[%s1776_s14 + $0x8] ss:$16 sps:$4 sm:$0xff]  }
  0x22   : > { %1263 = vmatpush3.bf16.msra.mxu1 %v1408_v15  ;;  %1200 = vmatprep.subr.bf16.mxu0 %v1409_v16  ;;  %v1430_v35 = vld [vmem:[%s1776_s14 + $0xc] ss:$16 sps:$4 sm:$0xff]   ;;  %v1431_v36 = vld [vmem:[%s1776_s14 + $0x24] ss:$16 sps:$4 sm:$0xff]   ;;  %v1435_v38 = vld [vmem:[%s1776_s14 + $0x20] ss:$16 sps:$4 sm:$0xff]  }
  0x23   : > { %1264 = vmatprep.subr.bf16.mxu1 %v1410_v17  ;;  %759 = vmatprep.mubr.bf16.mxu0 %v1427_v33  ;;  %v1433_v37 = vld [vmem:[%s1776_s14 + $0x2c] ss:$16 sps:$4 sm:$0xff]   ;;  %v1436_v39 = vld [vmem:[%s1776_s14 + $0x28] ss:$16 sps:$4 sm:$0xff]   ;;  %v1437_v40 = vld [vmem:[%s1776_s14 + $0x44] ss:$16 sps:$4 sm:$0xff]  }
  0x24   : > { %856 = vmatprep.mubr.bf16.mxu1 %v1430_v35  ;;  %v1439_v41 = vld [vmem:[%s1776_s14 + $0x4c] ss:$16 sps:$4 sm:$0xff]   ;;  %v1441_v42 = vld [vmem:[%s1776_s14 + $0x40] ss:$16 sps:$4 sm:$0xff]   ;;  %v1442_v43 = vld [vmem:[%s1776_s14 + $0x48] ss:$16 sps:$4 sm:$0xff]  }
  0x25   : > { %1201 = vmatpush3.bf16.msra.mxu0 %v1411_v18  ;;  %v1443_v44 = vld [vmem:[%s1776_s14 + $0x64] ss:$16 sps:$4 sm:$0xff]   ;;  %v1445_v45 = vld [vmem:[%s1776_s14 + $0x6c] ss:$16 sps:$4 sm:$0xff]   ;;  %v1447_v46 = vld [vmem:[%s1776_s14 + $0x60] ss:$16 sps:$4 sm:$0xff]  }
  0x26   : > { %1265 = vmatpush3.bf16.msra.mxu1 %v1412_v19  ;;  %1202 = vmatprep.subr.bf16.mxu0 %v1413_v20  ;;  %v1448_v47 = vld [vmem:[%s1776_s14 + $0x68] ss:$16 sps:$4 sm:$0xff]   ;;  %v1449_v48 = vld [vmem:[%s1776_s14 + $0x84] ss:$16 sps:$4 sm:$0xff]   ;;  %v1451_v49 = vld [vmem:[%s1776_s14 + $0x8c] ss:$16 sps:$4 sm:$0xff]  }
  0x27   : > { %1266 = vmatprep.subr.bf16.mxu1 %v1414_v21  ;;  %v1453_v50 = vld [vmem:[%s1776_s14 + $0x80] ss:$16 sps:$4 sm:$0xff]   ;;  %v1454_v51 = vld [vmem:[%s1776_s14 + $0x88] ss:$16 sps:$4 sm:$0xff]   ;;  %v1455_v52 = vld [vmem:[%s1776_s14 + $0xa4] ss:$16 sps:$4 sm:$0xff]  }
  0x28   : > { %v1457_v53 = vld [vmem:[%s1776_s14 + $0xac] ss:$16 sps:$4 sm:$0xff]   ;;  %v1459_v54 = vld [vmem:[%s1776_s14 + $0xa0] ss:$16 sps:$4 sm:$0xff]   ;;  %v1460_v55 = vld [vmem:[%s1776_s14 + $0xa8] ss:$16 sps:$4 sm:$0xff]  }
  0x29   : > { %1203 = vmatpush3.bf16.msra.mxu0 %v1415_v22  ;;  %v1461_v56 = vld [vmem:[%s1776_s14 + $0xc4] ss:$16 sps:$4 sm:$0xff]   ;;  %v1463_v57 = vld [vmem:[%s1776_s14 + $0xcc] ss:$16 sps:$4 sm:$0xff]   ;;  %v1465_v58 = vld [vmem:[%s1776_s14 + $0xc0] ss:$16 sps:$4 sm:$0xff]  }
  0x2a   : > { %1267 = vmatpush3.bf16.msra.mxu1 %v1416_v23  ;;  %1204 = vmatprep.subr.bf16.mxu0 %v1417_v24  ;;  %v1466_v59 = vld [vmem:[%s1776_s14 + $0xc8] ss:$16 sps:$4 sm:$0xff]   ;;  %v1467_v60 = vld [vmem:[%s1776_s14 + $0xe4] ss:$16 sps:$4 sm:$0xff]   ;;  %v1469_v61 = vld [vmem:[%s1776_s14 + $0xec] ss:$16 sps:$4 sm:$0xff]  }
  0x2b   : > { %1268 = vmatprep.subr.bf16.mxu1 %v1418_v25  ;;  %v1471_v62 = vld [vmem:[%s1776_s14 + $0xe0] ss:$16 sps:$4 sm:$0xff]   ;;  %v1472_v63 = vld [vmem:[%s1776_s14 + $0xe8] ss:$16 sps:$4 sm:$0xff]   ;;  %s1114_s14 = sshll.u32 %s253_s27, 7  ;;  %s1477_s8 = sshll.u32 %s1569_s12, 4  ;;  %s1478_s8 = int_to_ptr.vmem [resolvable:$false] %s1477_s8 }
  0x2c   : > { %v1833_v17 = vld [vmem:[%s1969_s4] ss:$0 sm:$0xff]  ;;  %s1842_s29 = scalar_lea.vmem [#allocation2], %s1114_s14  ;;  %s1479_s13 = scalar_lea.vmem %s1478_s8, 4096 }
  0x2d   : > { %1205 = vmatpush3.bf16.msra.mxu0 %v1419_v26  ;;  %s1015_s17 = sshll.u32 %s1842_s29, 4  ;;  %s1907_s17 = int_to_ptr.vmem [resolvable:$true] %s1015_s17 }
  0x2e   : > { %1269 = vmatpush3.bf16.msra.mxu1 %v1420_v27  ;;  %1206 = vmatprep.subr.bf16.mxu0 %v1421_v28  ;;  %s1473_s9 = scalar_lea.vmem %s1907_s17, 2048  ;;  %p1480_p4 = scmp.lt.s32.totalorder %s1907_s17, %s1478_s8 }
  0x2f   : > { %1270 = vmatprep.subr.bf16.mxu1 %v1422_v29  ;;  %p1474_p0 = scmp.ne.s32.totalorder %s1907_s17, %s1473_s9  ;;  %p1481_p5 = scmp.lt.s32.totalorder %s1479_s13, %s1473_s9 }
  0x31   : > { %1207 = vmatpush3.bf16.msra.mxu0 %v1423_v30  ;;  %p1475_p1 = pnand %p1474_p0, %p1653_p3  ;;  %p1482_p6 = por %p1481_p5, %p1480_p4 }
  0x32   : > { %1271 = vmatpush3.bf16.msra.mxu1 %v1424_v31 }
  0x33   : > { %p1476_p2 = pneg %p1475_p1 }
  0x34   : > { %760 = vmatmul.mubr.bf16.vlgmr.msra.gmra.mrb[0].mxu0 %v1425_v32 }
  0x35   : > { %857 = vmatmul.mubr.bf16.vlgmr.msra.gmra.mrb[0].mxu1 %v1428_v34  ;;  %767 = vmatprep.mubr.bf16.mxu0 %v1431_v36  ;;  %p1483_p7 = pnand %p1482_p6, %p1476_p2 }
  0x36   : > { %864 = vmatprep.mubr.bf16.mxu1 %v1433_v37 }
  0x3c   : > { %768 = vmatmul.mubr.bf16.gmra.mrb[4].mxu0 %v1435_v38 }
  0x3d   : > { %865 = vmatmul.mubr.bf16.gmra.mrb[4].mxu1 %v1436_v39  ;;  %775 = vmatprep.mubr.bf16.mxu0 %v1437_v40 }
  0x3e   : > { %872 = vmatprep.mubr.bf16.mxu1 %v1439_v41 }
  0x44   : > { %776 = vmatmul.mubr.bf16.gmra.mrb[8].mxu0 %v1441_v42 }
  0x45   : > { %873 = vmatmul.mubr.bf16.gmra.mrb[8].mxu1 %v1442_v43  ;;  %783 = vmatprep.mubr.bf16.mxu0 %v1443_v44 }
  0x46   : > { %880 = vmatprep.mubr.bf16.mxu1 %v1445_v45 }
  0x4c   : > { %784 = vmatmul.mubr.bf16.gmra.mrb[12].mxu0 %v1447_v46 }
  0x4d   : > { %881 = vmatmul.mubr.bf16.gmra.mrb[12].mxu1 %v1448_v47  ;;  %791 = vmatprep.mubr.bf16.mxu0 %v1449_v48 }
  0x4e   : > { %888 = vmatprep.mubr.bf16.mxu1 %v1451_v49 }
  0x54   : > { %792 = vmatmul.mubr.bf16.gmra.mrb[16].mxu0 %v1453_v50 }
  0x55   : > { %889 = vmatmul.mubr.bf16.gmra.mrb[16].mxu1 %v1454_v51  ;;  %799 = vmatprep.mubr.bf16.mxu0 %v1455_v52 }
  0x56   : > { %896 = vmatprep.mubr.bf16.mxu1 %v1457_v53 }
  0x5c   : > { %800 = vmatmul.mubr.bf16.gmra.mrb[20].mxu0 %v1459_v54 }
  0x5d   : > { %897 = vmatmul.mubr.bf16.gmra.mrb[20].mxu1 %v1460_v55  ;;  %807 = vmatprep.mubr.bf16.mxu0 %v1461_v56 }
  0x5e   : > { %904 = vmatprep.mubr.bf16.mxu1 %v1463_v57 }
  0x64   : > { %808 = vmatmul.mubr.bf16.gmra.mrb[24].mxu0 %v1465_v58 }
  0x65   : > { %905 = vmatmul.mubr.bf16.gmra.mrb[24].mxu1 %v1466_v59  ;;  %815 = vmatprep.mubr.bf16.mxu0 %v1467_v60 }
  0x66   : > { %912 = vmatprep.mubr.bf16.mxu1 %v1469_v61 }
  0x6c   : > { %816 = vmatmul.mubr.bf16.gmra.mrb[28].mxu0 %v1471_v62 }
  0x6d   : > { %913 = vmatmul.mubr.bf16.gmra.mrb[28].mxu1 %v1472_v63 }
 0x107   : > { %v1208_v0 = vpop.f32.mrb[0].mxu0 }
 0x108   : > { %v1272_v1 = vpop.f32.mrb[0].mxu1  ;;  %v1209_v3 = vpop.f32.mrb[1].mxu0 }
 0x109   : > { %v1210_v4 = vadd.f32 %v1209_v3, %v1208_v0  ;;  %v1273_v5 = vpop.f32.mrb[1].mxu1  ;;  %v1211_v6 = vpop.f32.mrb[2].mxu0 }
 0x10a   : > { %v1274_v7 = vadd.f32 %v1273_v5, %v1272_v1  ;;  %v1275_v8 = vpop.f32.mrb[2].mxu1  ;;  %v1212_v9 = vpop.f32.mrb[3].mxu0 }
 0x10b   : > { %v762_v10 = vadd.f32 %v1210_v4, %v1820_v2  ;;  %v1213_v11 = vadd.f32 %v1212_v9, %v1211_v6  ;;  %v1276_v12 = vpop.f32.mrb[3].mxu1 }
 0x10c   : > { %v1277_v14 = vadd.f32 %v1276_v12, %v1275_v8 }
 0x10d   : > { %v859_v15 = vadd.f32 %v1274_v7, %v762_v10  ;;  %v765_v16 = vadd.f32 %v1213_v11, %v1820_v2 }
 0x10f   : > { %v928_v18 = vmul.f32 %v1827_v13, %v859_v15  ;;  %v862_v19 = vadd.f32 %v1277_v14, %v765_v16  ;;  %v1214_v20 = vpop.f32.mrb[4].mxu0 }
 0x110   : > { %v1278_v21 = vpop.f32.mrb[4].mxu1  ;;  %v1215_v22 = vpop.f32.mrb[5].mxu0 }
 0x111   : > { %v951_v23 = vadd.f32 %v1833_v17, %v928_v18  ;;  %v929_v24 = vmul.f32 %v1827_v13, %v862_v19  ;;  %v1216_v25 = vadd.f32 %v1215_v22, %v1214_v20  ;;  %v1279_v26 = vpop.f32.mrb[5].mxu1  ;;  %v1217_v27 = vpop.f32.mrb[6].mxu0 }
 0x112   : > { %v1280_v28 = vadd.f32 %v1279_v26, %v1278_v21  ;;  %v1281_v29 = vpop.f32.mrb[6].mxu1  ;;  %v1218_v30 = vpop.f32.mrb[7].mxu0 }
 0x113   : > { %v967_v31 = vmax.f32 %v951_v23, 0.0  ;;  %v952_v32 = vadd.f32 %v1833_v17, %v929_v24  ;;  %v770_v33 = vadd.f32 %v1216_v25, %v1820_v2  ;;  %v1219_v34 = vadd.f32 %v1218_v30, %v1217_v27  ;;  %v1282_v35 = vpop.f32.mrb[7].mxu1 }
 0x114   : > { %v1283_v36 = vadd.f32 %v1282_v35, %v1281_v29 }
 0x115   : > { %983 = vst [vmem:[%s1842_s29] sm:$0xff] %v967_v31  ;;  %v968_v37 = vmax.f32 %v952_v32, 0.0  ;;  %v867_v38 = vadd.f32 %v1280_v28, %v770_v33  ;;  %v773_v39 = vadd.f32 %v1219_v34, %v1820_v2 }
 0x117   : > { %984 = vst [vmem:[%s1842_s29 + $0x8] sm:$0xff] %v968_v37  ;;  %v930_v40 = vmul.f32 %v1827_v13, %v867_v38  ;;  %v870_v41 = vadd.f32 %v1283_v36, %v773_v39  ;;  %v1220_v42 = vpop.f32.mrb[8].mxu0 }
 0x118   : > { %v1284_v43 = vpop.f32.mrb[8].mxu1  ;;  %v1221_v44 = vpop.f32.mrb[9].mxu0 }
 0x119   : > { %v953_v45 = vadd.f32 %v1833_v17, %v930_v40  ;;  %v931_v46 = vmul.f32 %v1827_v13, %v870_v41  ;;  %v1222_v47 = vadd.f32 %v1221_v44, %v1220_v42  ;;  %v1285_v48 = vpop.f32.mrb[9].mxu1  ;;  %v1223_v49 = vpop.f32.mrb[10].mxu0 }
 0x11a   : > { %v1286_v50 = vadd.f32 %v1285_v48, %v1284_v43  ;;  %v1287_v51 = vpop.f32.mrb[10].mxu1  ;;  %v1224_v52 = vpop.f32.mrb[11].mxu0 }
 0x11b   : > { %v969_v53 = vmax.f32 %v953_v45, 0.0  ;;  %v954_v54 = vadd.f32 %v1833_v17, %v931_v46  ;;  %v778_v55 = vadd.f32 %v1222_v47, %v1820_v2  ;;  %v1225_v56 = vadd.f32 %v1224_v52, %v1223_v49  ;;  %v1288_v57 = vpop.f32.mrb[11].mxu1 }
 0x11c   : > { %v1289_v58 = vadd.f32 %v1288_v57, %v1287_v51 }
 0x11d   : > { %985 = vst [vmem:[%s1842_s29 + $0x10] sm:$0xff] %v969_v53  ;;  %v970_v59 = vmax.f32 %v954_v54, 0.0  ;;  %v875_v60 = vadd.f32 %v1286_v50, %v778_v55  ;;  %v781_v61 = vadd.f32 %v1225_v56, %v1820_v2 }
 0x11f   : > { %986 = vst [vmem:[%s1842_s29 + $0x18] sm:$0xff] %v970_v59  ;;  %v932_v62 = vmul.f32 %v1827_v13, %v875_v60  ;;  %v878_v63 = vadd.f32 %v1289_v58, %v781_v61  ;;  %v1226_v0 = vpop.f32.mrb[12].mxu0 }
 0x120   : > { %v1290_v1 = vpop.f32.mrb[12].mxu1  ;;  %v1227_v3 = vpop.f32.mrb[13].mxu0 }
 0x121   : > { %v955_v4 = vadd.f32 %v1833_v17, %v932_v62  ;;  %v933_v5 = vmul.f32 %v1827_v13, %v878_v63  ;;  %v1228_v6 = vadd.f32 %v1227_v3, %v1226_v0  ;;  %v1291_v7 = vpop.f32.mrb[13].mxu1  ;;  %v1229_v8 = vpop.f32.mrb[14].mxu0 }
 0x122   : > { %v1292_v9 = vadd.f32 %v1291_v7, %v1290_v1  ;;  %v1293_v10 = vpop.f32.mrb[14].mxu1  ;;  %v1230_v11 = vpop.f32.mrb[15].mxu0 }
 0x123   : > { %v971_v12 = vmax.f32 %v955_v4, 0.0  ;;  %v956_v14 = vadd.f32 %v1833_v17, %v933_v5  ;;  %v786_v15 = vadd.f32 %v1228_v6, %v1820_v2  ;;  %v1231_v16 = vadd.f32 %v1230_v11, %v1229_v8  ;;  %v1294_v18 = vpop.f32.mrb[15].mxu1 }
 0x124   : > { %v1295_v19 = vadd.f32 %v1294_v18, %v1293_v10 }
 0x125   : > { %987 = vst [vmem:[%s1842_s29 + $0x20] sm:$0xff] %v971_v12  ;;  %v972_v20 = vmax.f32 %v956_v14, 0.0  ;;  %v883_v21 = vadd.f32 %v1292_v9, %v786_v15  ;;  %v789_v22 = vadd.f32 %v1231_v16, %v1820_v2 }
 0x127   : > { %988 = vst [vmem:[%s1842_s29 + $0x28] sm:$0xff] %v972_v20  ;;  %v934_v23 = vmul.f32 %v1827_v13, %v883_v21  ;;  %v886_v24 = vadd.f32 %v1295_v19, %v789_v22  ;;  %v1232_v25 = vpop.f32.mrb[16].mxu0 }
 0x128   : > { %v1296_v26 = vpop.f32.mrb[16].mxu1  ;;  %v1233_v27 = vpop.f32.mrb[17].mxu0 }
 0x129   : > { %v957_v28 = vadd.f32 %v1833_v17, %v934_v23  ;;  %v935_v29 = vmul.f32 %v1827_v13, %v886_v24  ;;  %v1234_v30 = vadd.f32 %v1233_v27, %v1232_v25  ;;  %v1297_v31 = vpop.f32.mrb[17].mxu1  ;;  %v1235_v32 = vpop.f32.mrb[18].mxu0 }
 0x12a   : > { %v1298_v33 = vadd.f32 %v1297_v31, %v1296_v26  ;;  %v1299_v34 = vpop.f32.mrb[18].mxu1  ;;  %v1236_v35 = vpop.f32.mrb[19].mxu0 }
 0x12b   : > { %v973_v36 = vmax.f32 %v957_v28, 0.0  ;;  %v958_v37 = vadd.f32 %v1833_v17, %v935_v29  ;;  %v794_v38 = vadd.f32 %v1234_v30, %v1820_v2  ;;  %v1237_v39 = vadd.f32 %v1236_v35, %v1235_v32  ;;  %v1300_v40 = vpop.f32.mrb[19].mxu1 }
 0x12c   : > { %v1301_v41 = vadd.f32 %v1300_v40, %v1299_v34 }
 0x12d   : > { %989 = vst [vmem:[%s1842_s29 + $0x30] sm:$0xff] %v973_v36  ;;  %v974_v42 = vmax.f32 %v958_v37, 0.0  ;;  %v891_v43 = vadd.f32 %v1298_v33, %v794_v38  ;;  %v797_v44 = vadd.f32 %v1237_v39, %v1820_v2 }
 0x12f   : > { %990 = vst [vmem:[%s1842_s29 + $0x38] sm:$0xff] %v974_v42  ;;  %v936_v45 = vmul.f32 %v1827_v13, %v891_v43  ;;  %v894_v46 = vadd.f32 %v1301_v41, %v797_v44  ;;  %v1238_v47 = vpop.f32.mrb[20].mxu0 }
 0x130   : > { %v1302_v48 = vpop.f32.mrb[20].mxu1  ;;  %v1239_v49 = vpop.f32.mrb[21].mxu0 }
 0x131   : > { %v959_v50 = vadd.f32 %v1833_v17, %v936_v45  ;;  %v937_v51 = vmul.f32 %v1827_v13, %v894_v46  ;;  %v1240_v52 = vadd.f32 %v1239_v49, %v1238_v47  ;;  %v1303_v53 = vpop.f32.mrb[21].mxu1  ;;  %v1241_v54 = vpop.f32.mrb[22].mxu0 }
 0x132   : > { %v1304_v55 = vadd.f32 %v1303_v53, %v1302_v48  ;;  %v1305_v56 = vpop.f32.mrb[22].mxu1  ;;  %v1242_v57 = vpop.f32.mrb[23].mxu0 }
 0x133   : > { %v975_v58 = vmax.f32 %v959_v50, 0.0  ;;  %v960_v59 = vadd.f32 %v1833_v17, %v937_v51  ;;  %v802_v60 = vadd.f32 %v1240_v52, %v1820_v2  ;;  %v1243_v61 = vadd.f32 %v1242_v57, %v1241_v54  ;;  %v1306_v62 = vpop.f32.mrb[23].mxu1 }
 0x134   : > { %v1307_v63 = vadd.f32 %v1306_v62, %v1305_v56 }
 0x135   : > { %991 = vst [vmem:[%s1842_s29 + $0x40] sm:$0xff] %v975_v58  ;;  %v976_v0 = vmax.f32 %v960_v59, 0.0  ;;  %v899_v1 = vadd.f32 %v1304_v55, %v802_v60  ;;  %v805_v3 = vadd.f32 %v1243_v61, %v1820_v2 }
 0x137   : > { %992 = vst [vmem:[%s1842_s29 + $0x48] sm:$0xff] %v976_v0  ;;  %v938_v4 = vmul.f32 %v1827_v13, %v899_v1  ;;  %v902_v5 = vadd.f32 %v1307_v63, %v805_v3  ;;  %v1244_v6 = vpop.f32.mrb[24].mxu0 }
 0x138   : > { %v1308_v7 = vpop.f32.mrb[24].mxu1  ;;  %v1245_v8 = vpop.f32.mrb[25].mxu0 }
 0x139   : > { %v961_v9 = vadd.f32 %v1833_v17, %v938_v4  ;;  %v939_v10 = vmul.f32 %v1827_v13, %v902_v5  ;;  %v1246_v11 = vadd.f32 %v1245_v8, %v1244_v6  ;;  %v1309_v12 = vpop.f32.mrb[25].mxu1  ;;  %v1247_v14 = vpop.f32.mrb[26].mxu0 }
 0x13a   : > { %v1310_v15 = vadd.f32 %v1309_v12, %v1308_v7  ;;  %v1311_v16 = vpop.f32.mrb[26].mxu1  ;;  %v1248_v18 = vpop.f32.mrb[27].mxu0 }
 0x13b   : > { %v977_v19 = vmax.f32 %v961_v9, 0.0  ;;  %v962_v20 = vadd.f32 %v1833_v17, %v939_v10  ;;  %v810_v21 = vadd.f32 %v1246_v11, %v1820_v2  ;;  %v1249_v22 = vadd.f32 %v1248_v18, %v1247_v14  ;;  %v1312_v23 = vpop.f32.mrb[27].mxu1 }
 0x13c   : > { %v1313_v24 = vadd.f32 %v1312_v23, %v1311_v16 }
 0x13d   : > { %993 = vst [vmem:[%s1842_s29 + $0x50] sm:$0xff] %v977_v19  ;;  %v978_v25 = vmax.f32 %v962_v20, 0.0  ;;  %v907_v26 = vadd.f32 %v1310_v15, %v810_v21  ;;  %v813_v27 = vadd.f32 %v1249_v22, %v1820_v2 }
 0x13f   : > { %994 = vst [vmem:[%s1842_s29 + $0x58] sm:$0xff] %v978_v25  ;;  %v940_v28 = vmul.f32 %v1827_v13, %v907_v26  ;;  %v910_v29 = vadd.f32 %v1313_v24, %v813_v27  ;;  %v1250_v30 = vpop.f32.mrb[28].mxu0 }
 0x140   : > { %v1314_v31 = vpop.f32.mrb[28].mxu1  ;;  %v1251_v32 = vpop.f32.mrb[29].mxu0 }
 0x141   : > { %v963_v33 = vadd.f32 %v1833_v17, %v940_v28  ;;  %v941_v34 = vmul.f32 %v1827_v13, %v910_v29  ;;  %v1252_v35 = vadd.f32 %v1251_v32, %v1250_v30  ;;  %v1315_v36 = vpop.f32.mrb[29].mxu1  ;;  %v1253_v37 = vpop.f32.mrb[30].mxu0 }
 0x142   : > { %v1316_v38 = vadd.f32 %v1315_v36, %v1314_v31  ;;  %v1317_v39 = vpop.f32.mrb[30].mxu1  ;;  %v1254_v40 = vpop.f32.mrb[31].mxu0 }
 0x143   : > { %v979_v41 = vmax.f32 %v963_v33, 0.0  ;;  %v964_v42 = vadd.f32 %v1833_v17, %v941_v34  ;;  %v818_v43 = vadd.f32 %v1252_v35, %v1820_v2  ;;  %v1255_v44 = vadd.f32 %v1254_v40, %v1253_v37  ;;  %v1318_v45 = vpop.f32.mrb[31].mxu1 }
 0x144   : > { %v1319_v46 = vadd.f32 %v1318_v45, %v1317_v39 }
 0x145   : > { %995 = vst [vmem:[%s1842_s29 + $0x60] sm:$0xff] %v979_v41  ;;  %v980_v47 = vmax.f32 %v964_v42, 0.0  ;;  %v915_v48 = vadd.f32 %v1316_v38, %v818_v43  ;;  %v821_v49 = vadd.f32 %v1255_v44, %v1820_v2 }
 0x147   : > { %996 = vst [vmem:[%s1842_s29 + $0x68] sm:$0xff] %v980_v47  ;;  %v942_v50 = vmul.f32 %v1827_v13, %v915_v48  ;;  %v918_v51 = vadd.f32 %v1319_v46, %v821_v49 }
 0x149   : > { %v965_v52 = vadd.f32 %v1833_v17, %v942_v50  ;;  %v943_v53 = vmul.f32 %v1827_v13, %v918_v51 }
 0x14b   : > { %v981_v54 = vmax.f32 %v965_v52, 0.0  ;;  %v966_v55 = vadd.f32 %v1833_v17, %v943_v53 }
 0x14d   : > { %997 = vst [vmem:[%s1842_s29 + $0x70] sm:$0xff] %v981_v54  ;;  %v982_v2 = vmax.f32 %v966_v55, 0.0 }
 0x14f   : > { %998 = vst [vmem:[%s1842_s29 + $0x78] sm:$0xff] %v982_v2 }
 0x150   : > { %1486 = shalt.err (!%p1483_p7)
}
 0x151   : > { %s1487_s27 = scalar_lea.hbm %s1905_s10, 2048  ;;  %s1491_s21 = scalar_lea.hbm %s1970_s5, 8192 }
 0x152   : > { %p1488_p9 = scmp.ne.s32.totalorder %s1905_s10, %s1487_s27  ;;  %p1492_p12 = scmp.lt.u32.totalorder %s1905_s10, %s1970_s5 }
 0x153   : > { %p1493_p13 = scmp.lt.u32.totalorder %s1491_s21, %s1487_s27  ;;  %p1495_p1 = scmp.lt.u32.totalorder %s1487_s27, %s1905_s10 }
 0x154   : > { %p1489_p10 = pnand %p1488_p9, %p1653_p3 }
 0x155   : > { %p1494_p0 = por %p1493_p13, %p1492_p12 }
 0x156   : > { %p1490_p11 = pneg %p1489_p10 }
 0x157   : > { %p1496_p2 = por %p1495_p1, %p1494_p0 }
 0x159   : > { %p1497_p4 = pnand %p1496_p2, %p1490_p11 }
 0x15b   : > { %1500 = shalt.err (!%p1497_p4)
}
 0x15c   : > { %s1570_s15 = smov 128   ;;  %s1571_s26 = smov 8  }
 0x15d   : > { %1320 = dma.vmem_to_hbm [thread:$0]  (%p1653_p3), %s1907_s17, 2048, %s1905_s10, %s1913_s30, %s1570_s15, %s1570_s15, %s1571_s26  }
 0x15e PF: > { %p1326_p5 = scmp.ge.s32.totalorder %s1567_s25, 2  ;;  %s1030_s9 = sand.u32 1, %s1539_s18  }
 0x15f   : > { %s1031_s12 = scalar_lea.sflag [#allocation3], %s1030_s9 }
 0x160   : > { %p1323_p6 = pnand %p1326_p5, %p1662_p8 }
 0x162   : > { %1534 = dma.done.wait (!%p1323_p6), %s1031_s12, 2048  }
 0x163   : > { %1536 = vsyncadd (!%p1323_p6), %s1031_s12, 4294965248  ;;  %s18_s25 = sadd.s32 1, %s1567_s25   ;;  %s1975_s6 = sld [smem:[#allocation5_spill]] }
 0x164   : > { %p15_p7 = scmp.ge.s32.totalorder %s18_s25, 6   ;;  %s1976_s18 = smov %s1543_s19 }
 0x165   : > { %s1977_s19 = smov %s1547_s20  ;;  %s1978_s20 = smov %s1671_s11 }
 0x166   : > { %s1979_s21 = smov %s1559_s23  ;;  %s1980_s22 = smov %s1563_s24 }
 0x167   : > { %s1981_s23 = smov %s1984_s28  ;;  %17 = sbr.rel (!%p15_p7) target bundleno = 5 (0x5), region = 78 }
 0x169   : > { %s1982_s24 = smov %s1975_s6 }
 0x16e   :  { %1036 = vsyncpa [#allocation3], 1 }
 0x16f   :  { %1038 = vsyncpa [#allocation3 + $0x1], 1 }

// kernel: aspp_forward.2
= control target key start
LH: loop header
LB: loop body
LE: loop exit
PB: predicated region body
PF: predicated region fallthrough
CT: control target
= control target key end

     0   :  { %s18417_s21 = smov 0   ;;  %s18419_s22 = smov 0   ;;  %s22096_s0 = inlined_call_operand.vmem [shape: bf16[2,22,22,128], index: 0, kind: input, shape index: {}]   ;;  %s22097_s1 = inlined_call_operand.vmem [shape: bf16[128,128], index: 1, kind: input, shape index: {}]   ;;  %s22098_s2 = inlined_call_operand.vmem [shape: bf16[3,9,128,128], index: 2, kind: input, shape index: {}]   ;;  %s22099_s3 = inlined_call_operand.vmem [shape: f32[4,128], index: 3, kind: input, shape index: {}]   ;;  %s22100_s4 = inlined_call_operand.vmem [shape: f32[4,128], index: 4, kind: input, shape index: {}]   ;;  %s22101_s5 = inlined_call_operand.vmem [shape: bf16[2,256,512], index: 5, kind: output, shape index: {0}]   ;;  %s22102_s6 = inlined_call_operand.vmem [shape: f32[2,1,128], index: 6, kind: output, shape index: {1}]  }
   0x1   :  { %s18421_s23 = smov 0  }
   0x2 LB: > { %s29_s24 = sadd.s32 1, %s18376_s22  ;;  %p13974_p0 = scmp.ge.s32.totalorder %s18380_s23, 1  ;;  %s18380_s23 = sphi %s18421_s23, %s17_s23   ;;  %s18376_s22 = sphi %s18419_s22, %s22559_s22   ;;  %s18372_s21 = sphi %s18417_s21, %s22558_s21  }
   0x3   : > { %p31_p1 = scmp.ge.s32.totalorder %s29_s24, 2  ;;  %p256_p2 = scmp.lt.s32.totalorder %s18380_s23, 3 }
   0x5   : > { %s22561_s24 = smov (%p31_p1, %s29_s24), 0  ;;  %p257_p3 = pnand %p13974_p0, %p256_p2 }
   0x7   : > { %260 = sbr.rel (%p257_p3) target bundleno = 1178 (0x49a), region = 40 }
   0xe   : > { %v18084_v0 = vld [vmem:[%s22097_s1] sm:$0xff]   ;;  %v18086_v2 = vld [vmem:[%s22097_s1 + $0x8] sm:$0xff]   ;;  %v18088_v4 = vld [vmem:[%s22097_s1 + $0x10] sm:$0xff]   ;;  %p305_p4 = scmp.lt.s32.totalorder %s18372_s21, 1  ;;  %vm793_vm0 = vsmask.f32 2304 }
   0xf   : > { %v18085_v1 = vld [vmem:[%s22098_s2 + $0x100] sm:$0xff]   ;;  %15947 = vmatprep.subr.bf16.mxu0 %v18084_v0  ;;  %v18087_v3 = vld [vmem:[%s22098_s2 + $0x108] sm:$0xff]   ;;  %v18089_v5 = vld [vmem:[%s22098_s2 + $0x110] sm:$0xff]   ;;  %vm794_vm1 = vsmask.f32 6416  ;;  %v22290_v44 = vmov 0 }
  0x10   : > { %16187 = vmatprep.subr.bf16.mxu1 %v18085_v1  ;;  %15948 = vmatpush3.bf16.msra.mxu0 %v18084_v0  ;;  %v18090_v6 = vld [vmem:[%s22097_s1 + $0x18] sm:$0xff]   ;;  %s22563_s21 = smov (!%p305_p4, %s18372_s21), 1  ;;  %v18092_v8 = vld [vmem:[%s22097_s1 + $0x20] sm:$0xff]   ;;  %v18094_v10 = vld [vmem:[%s22097_s1 + $0x28] sm:$0xff]   ;;  %vm1812_vm3 = vcmask 1042432   ;;  %vm1813_vm4 = vcmask 1046532  }
  0x11   : > { %16188 = vmatpush3.bf16.msra.mxu1 %v18085_v1  ;;  %15949 = vmatprep.subr.bf16.mxu0 %v18086_v2  ;;  %v18091_v7 = vld [vmem:[%s22098_s2 + $0x118] sm:$0xff]   ;;  %v18093_v9 = vld [vmem:[%s22098_s2 + $0x120] sm:$0xff]   ;;  %s18059_s25 = smul.u32 264, %s22563_s21  ;;  %v18095_v11 = vld [vmem:[%s22098_s2 + $0x128] sm:$0xff]   ;;  %vm2698_vm5 = vcmask 1041408   ;;  %vm2699_vm6 = vcmask 1045508   ;;  %s335_s30 = scalar_lea.vmem %s22102_s6, %s22563_s21 }
  0x12   : > { %16189 = vmatprep.subr.bf16.mxu1 %v18087_v3  ;;  %v18096_v12 = vld [vmem:[%s22097_s1 + $0x30] sm:$0xff]   ;;  %v18098_v18 = vld [vmem:[%s22097_s1 + $0x38] sm:$0xff]   ;;  %v18502_v43 = vld [vmem:[%s22098_s2] sm:$0xff]   ;;  %s15146_s15 = sshll.u32 %s22563_s21, 9  ;;  %vm5218_vm9 = vsmask.f32 3328 }
  0x13   : > { %s18477_s8 = scalar_lea.vmem %s22096_s0, %s18059_s25  ;;  %v18097_v15 = vld [vmem:[%s22098_s2 + $0x130] sm:$0xff]   ;;  %v18099_v20 = vld [vmem:[%s22098_s2 + $0x138] sm:$0xff]   ;;  %vm18506_vm2 = vmor %vm793_vm0, %vm794_vm1  ;;  %s19532_s19 = scalar_lea.vmem %s22101_s5, %s15146_s15  ;;  %vm5219_vm10 = vsmask.f32 7440  ;;  %vm6345_vm12 = vsmask.f32 1280 }
  0x14   : > { %15950 = vmatpush3.bf16.msra.mxu0 %v18086_v2  ;;  %v478_v13 = vld [vmem:[%s18477_s8 + $0x24] sm:$0xe]  ;;  %v479_v14 = vld [vmem:[%s18477_s8 + $0x28] sm:$0xf]  ;;  %v480_v16 = vld [vmem:[%s18477_s8 + $0x2c] sm:$0x3] }
  0x15   : > { %16190 = vmatpush3.bf16.msra.mxu1 %v18087_v3  ;;  %15951 = vmatprep.subr.bf16.mxu0 %v18088_v4  ;;  %v481_v17 = vld [vmem:[%s18477_s8 + $0x30] sm:$0xe]  ;;  %v482_v19 = vld [vmem:[%s18477_s8 + $0x34] sm:$0xf]  ;;  %v483_v21 = vld [vmem:[%s18477_s8 + $0x38] sm:$0x3] }
  0x16   : > { %16191 = vmatprep.subr.bf16.mxu1 %v18089_v5  ;;  %v797_v22 = vshrl.u32 %v478_v13, 16  ;;  %v800_v23 = vshll.u32 %v478_v13, 16  ;;  %v806_v24 = vshrl.u32 %v479_v14, 16  ;;  %v809_v25 = vshll.u32 %v479_v14, 16  ;;  %v484_v29 = vld [vmem:[%s18477_s8 + $0x3c] sm:$0xe]  ;;  %vm18892_vm7 = vmor %vm1812_vm3, %vm1813_vm4 }
  0x17   : > { %v816_v26 = vshrl.u32 %v480_v16, 16  ;;  %v819_v27 = vshll.u32 %v480_v16, 16  ;;  %v825_v28 = vshrl.u32 %v481_v17, 16  ;;  %v828_v33 = vshll.u32 %v481_v17, 16  ;;  %v485_v38 = vld [vmem:[%s18477_s8 + $0x40] sm:$0xf]  ;;  %vm18918_vm8 = vmor %vm2698_vm5, %vm2699_vm6 }
  0x18   : > { %15952 = vmatpush3.bf16.msra.mxu0 %v18088_v4  ;;  %v799_v30 = vrot.slane %v797_v22, 5  ;;  %v802_v31 = vrot.slane %v800_v23, 6  ;;  %v808_v32 = vrot.slane %v806_v24, 5  ;;  %v811_v34 = vrot.slane %v809_v25, 6  ;;  %v486_v49 = vld [vmem:[%s18477_s8 + $0x44] sm:$0x3]  ;;  %vm19907_vm11 = vmor %vm5218_vm9, %vm5219_vm10 }
  0x19   : > { %16192 = vmatpush3.bf16.msra.mxu1 %v18089_v5  ;;  %15953 = vmatprep.subr.bf16.mxu0 %v18090_v6  ;;  %v818_v35 = vrot.slane %v816_v26, 5  ;;  %v821_v36 = vrot.slane %v819_v27, 6  ;;  %v827_v37 = vrot.slane %v825_v28, 5  ;;  %v830_v40 = vrot.slane %v828_v33, 6  ;;  %v487_v50 = vld [vmem:[%s18477_s8 + $0x48] sm:$0xe] }
  0x1a   : > { %16193 = vmatprep.subr.bf16.mxu1 %v18091_v7  ;;  %v803_v39 = vor.u32 %v802_v31, %v799_v30  ;;  %v834_v41 = vshrl.u32 %v482_v19, 16  ;;  %v837_v42 = vshll.u32 %v482_v19, 16  ;;  %v22291_v44 = vsel %vm18506_vm2, 4294967295, %v22290_v44  ;;  %v18515_v55 = vld [vmem:[%s22098_s2 + $0x140] sm:$0xff]   ;;  %v488_v60 = vld [vmem:[%s18477_s8 + $0x4c] sm:$0xf] }
  0x1b   : > { %22292 = vst [vmem:[#allocation3_spill] sm:$0xff] %v22291_v44  ;;  %v812_v45 = vor.u32 %v811_v34, %v808_v32  ;;  %v822_v46 = vor.u32 %v821_v36, %v818_v35  ;;  %v844_v47 = vshrl.u32 %v483_v21, 16  ;;  %v847_v48 = vshll.u32 %v483_v21, 16  ;;  %v489_v13 = vld [vmem:[%s18477_s8 + $0x50] sm:$0x3] }
  0x1c   : > { %15954 = vmatpush3.bf16.msra.mxu0 %v18090_v6  ;;  %v804_v51 = vrot.slane %v803_v39, 4  ;;  %v831_v52 = vor.u32 %v830_v40, %v827_v37  ;;  %v836_v53 = vrot.slane %v834_v41, 5  ;;  %v839_v54 = vrot.slane %v837_v42, 6  ;;  %v490_v14 = vld [vmem:[%s18477_s8 + $0x54] sm:$0xe] }
  0x1d   : > { %16194 = vmatpush3.bf16.msra.mxu1 %v18091_v7  ;;  %15955 = vmatprep.subr.bf16.mxu0 %v18092_v8  ;;  %v814_v56 = vrot.slane %v812_v45, 4  ;;  %v846_v57 = vrot.slane %v844_v47, 5  ;;  %v849_v58 = vrot.slane %v847_v48, 6  ;;  %v853_v59 = vshrl.u32 %v484_v29, 16  ;;  %v491_v19 = vld [vmem:[%s18477_s8 + $0x58] sm:$0xf] }
  0x1e   : > { %16195 = vmatprep.subr.bf16.mxu1 %v18093_v9  ;;  %v18520_v61 = vsel %vm18506_vm2, %v804_v51, %v812_v45  ;;  %v832_v62 = vrot.slane %v831_v52, 4  ;;  %v840_v63 = vor.u32 %v839_v54, %v836_v53  ;;  %v856_v0 = vshll.u32 %v484_v29, 16  ;;  %v492_v36 = vld [vmem:[%s18477_s8 + $0x5c] sm:$0x3]  ;;  %v493_v41 = vld [vmem:[%s18477_s8 + $0x60] sm:$0xe] }
  0x1f   : > { %v18524_v1 = vsel %vm18506_vm2, %v814_v56, %v822_v46  ;;  %v850_v2 = vor.u32 %v849_v58, %v846_v57  ;;  %v855_v3 = vrot.slane %v853_v59, 5  ;;  %v862_v4 = vshrl.u32 %v485_v38, 16  ;;  %v494_v48 = vld [vmem:[%s18477_s8 + $0x64] sm:$0xf]  ;;  %v495_v53 = vld [vmem:[%s18477_s8 + $0x68] sm:$0x3] }
  0x20   : > { %15956 = vmatpush3.bf16.msra.mxu0 %v18092_v8  ;;  %v18529_v5 = vsel %vm18506_vm2, %v832_v62, %v840_v63  ;;  %v842_v6 = vrot.slane %v840_v63, 4  ;;  %v858_v7 = vrot.slane %v856_v0, 6  ;;  %v865_v8 = vshll.u32 %v485_v38, 16  ;;  %v496_v59 = vld [vmem:[%s18477_s8 + $0x6c] sm:$0xe] }
  0x21   : > { %16196 = vmatpush3.bf16.msra.mxu1 %v18093_v9  ;;  %15957 = vmatprep.subr.bf16.mxu0 %v18094_v10  ;;  %v864_v9 = vrot.slane %v862_v4, 5  ;;  %v890_v23 = vshrl.u32 %v488_v60, 16  ;;  %v893_v27 = vshll.u32 %v488_v60, 16  ;;  %v900_v30 = vshrl.u32 %v489_v13, 16 }
  0x22   : > { %16197 = vmatprep.subr.bf16.mxu1 %v18095_v11  ;;  %v859_v16 = vor.u32 %v858_v7, %v855_v3  ;;  %v867_v17 = vrot.slane %v865_v8, 6  ;;  %v903_v31 = vshll.u32 %v489_v13, 16  ;;  %v909_v39 = vshrl.u32 %v490_v14, 16 }
  0x23   : > { %v892_v29 = vrot.slane %v890_v23, 5  ;;  %v895_v35 = vrot.slane %v893_v27, 6  ;;  %v902_v37 = vrot.slane %v900_v30, 5  ;;  %v912_v40 = vshll.u32 %v490_v14, 16 }
  0x24   : > { %15958 = vmatpush3.bf16.msra.mxu0 %v18094_v10  ;;  %v872_v10 = vshrl.u32 %v486_v49, 16  ;;  %v860_v24 = vrot.slane %v859_v16, 4  ;;  %v868_v25 = vor.u32 %v867_v17, %v864_v9  ;;  %v905_v38 = vrot.slane %v903_v31, 6 }
  0x25   : > { %16198 = vmatpush3.bf16.msra.mxu1 %v18095_v11  ;;  %15959 = vmatprep.subr.bf16.mxu0 %v18096_v12  ;;  %v875_v11 = vshll.u32 %v486_v49, 16  ;;  %v896_v46 = vor.u32 %v895_v35, %v892_v29  ;;  %v918_v47 = vshrl.u32 %v491_v19, 16  ;;  %v914_v51 = vrot.slane %v912_v40, 6 }
  0x26   : > { %16199 = vmatprep.subr.bf16.mxu1 %v18097_v15  ;;  %v18541_v32 = vsel %vm18506_vm2, %v860_v24, %v868_v25  ;;  %v870_v33 = vrot.slane %v868_v25, 4  ;;  %v906_v49 = vor.u32 %v905_v38, %v902_v37  ;;  %v921_v52 = vshll.u32 %v491_v19, 16 }
  0x27   : > { %v877_v21 = vrot.slane %v875_v11, 6  ;;  %v898_v56 = vrot.slane %v896_v46, 4  ;;  %v920_v57 = vrot.slane %v918_v47, 5  ;;  %v928_v58 = vshrl.u32 %v492_v36, 16 }
  0x28   : > { %15960 = vmatpush3.bf16.msra.mxu0 %v18096_v12  ;;  %v881_v12 = vshrl.u32 %v487_v50, 16  ;;  %v923_v62 = vrot.slane %v921_v52, 6  ;;  %v931_v63 = vshll.u32 %v492_v36, 16  ;;  %v937_v0 = vshrl.u32 %v493_v41, 16 }
  0x29   : > { %16200 = vmatpush3.bf16.msra.mxu1 %v18097_v15  ;;  %15961 = vmatprep.subr.bf16.mxu0 %v18098_v18  ;;  %v18536_v15 = vsel %vm18506_vm2, %v842_v6, %v850_v2  ;;  %v497_v2 = vld [vmem:[%s18477_s8 + $0x70] sm:$0xf]  ;;  %v18559_v3 = vsel %vm18506_vm2, %v898_v56, %v906_v49  ;;  %v930_v4 = vrot.slane %v928_v58, 5  ;;  %v940_v6 = vshll.u32 %v493_v41, 16  ;;  %v498_v58 = vld [vmem:[%s18477_s8 + $0x74] sm:$0x3] }
  0x2a   : > { %16201 = vmatprep.subr.bf16.mxu1 %v18099_v20  ;;  %v883_v22 = vrot.slane %v881_v12, 5  ;;  %v946_v7 = vshrl.u32 %v494_v48, 16  ;;  %v924_v9 = vor.u32 %v923_v62, %v920_v57  ;;  %v939_v11 = vrot.slane %v937_v0, 5 }
  0x2b   : > { %v942_v12 = vrot.slane %v940_v6, 6  ;;  %v949_v14 = vshll.u32 %v494_v48, 16  ;;  %v956_v16 = vshrl.u32 %v495_v53, 16  ;;  %v965_v24 = vshrl.u32 %v496_v59, 16  ;;  %v501_v6 = vld [vmem:[%s18477_s8 + $0x80] sm:$0x3] }
  0x2c   : > { %15962 = vmatpush3.bf16.msra.mxu0 %v18098_v18  ;;  %v884_v18 = vshll.u32 %v487_v50, 16  ;;  %v911_v50 = vrot.slane %v909_v39, 5  ;;  %v948_v13 = vrot.slane %v946_v7, 5  ;;  %v968_v27 = vshll.u32 %v496_v59, 16  ;;  %v499_v59 = vld [vmem:[%s18477_s8 + $0x78] sm:$0xe] }
  0x2d   : > { %16202 = vmatpush3.bf16.msra.mxu1 %v18099_v20  ;;  %15995 = vmatprep.subr.bf16.mxu0 %v18502_v43  ;;  %v874_v20 = vrot.slane %v872_v10, 5  ;;  %v933_v10 = vrot.slane %v931_v63, 6  ;;  %v958_v23 = vrot.slane %v956_v16, 5  ;;  %v967_v31 = vrot.slane %v965_v24, 5 }
  0x2e   : > { %16235 = vmatprep.subr.bf16.mxu1 %v18515_v55  ;;  %v886_v26 = vrot.slane %v884_v18, 6  ;;  %v915_v60 = vor.u32 %v914_v51, %v911_v50  ;;  %v926_v18 = vrot.slane %v924_v9, 4  ;;  %v970_v35 = vrot.slane %v968_v27, 6 }
  0x2f   : > { %v878_v28 = vor.u32 %v877_v21, %v874_v20  ;;  %v934_v19 = vor.u32 %v933_v10, %v930_v4  ;;  %v959_v20 = vshll.u32 %v495_v53, 16  ;;  %v943_v21 = vor.u32 %v942_v12, %v939_v11  ;;  %v500_v4 = vld [vmem:[%s18477_s8 + $0x7c] sm:$0xf] }
  0x30   : > { %v887_v34 = vor.u32 %v886_v26, %v883_v22  ;;  %v916_v8 = vrot.slane %v915_v60, 4  ;;  %v951_v22 = vrot.slane %v949_v14, 6  ;;  %v18571_v37 = vcombine.low %v18520_v61, %v18524_v1 }
  0x31   : > { %v18547_v42 = vsel %vm18506_vm2, %v870_v33, %v878_v28  ;;  %v18567_v25 = vsel %vm18506_vm2, %v926_v18, %v934_v19  ;;  %v961_v26 = vrot.slane %v959_v20, 6  ;;  %v974_v28 = vshrl.u32 %v497_v2, 16  ;;  %v18104_v18 = vld [vmem:[%s22098_s2 + $0x10] sm:$0xff]  }
  0x32   : > { %v888_v45 = vrot.slane %v887_v34, 4  ;;  %v18563_v17 = vsel %vm18506_vm2, %v916_v8, %v924_v9  ;;  %v944_v29 = vrot.slane %v943_v21, 4  ;;  %v952_v30 = vor.u32 %v951_v22, %v948_v13  ;;  %22293 = vst [vmem:[#allocation4_spill] sm:$0xff] %v18571_v37  ;;  %15963 = vmatprep.mubr.bf16.mxu0 %v18571_v37  ;;  %16203 = vmatprep.mubr.bf16.mxu1 %v18571_v37  ;;  %v18102_v9 = vld [vmem:[%s22098_s2 + $0x8] sm:$0xff]  }
  0x33   : > { %v977_v33 = vshll.u32 %v497_v2, 16  ;;  %v962_v34 = vor.u32 %v961_v26, %v958_v23  ;;  %v976_v36 = vrot.slane %v974_v28, 5  ;;  %v18579_v41 = vcombine.low %v18541_v32, %v18547_v42  ;;  %v18103_v13 = vld [vmem:[%s22098_s2 + $0x148] sm:$0xff]   ;;  %v18105_v26 = vld [vmem:[%s22098_s2 + $0x150] sm:$0xff]  }
  0x34   : > { %v18553_v54 = vsel %vm18506_vm2, %v888_v45, %v896_v46  ;;  %v18575_v38 = vsel %vm18506_vm2, %v944_v29, %v952_v30  ;;  %v954_v39 = vrot.slane %v952_v30, 4  ;;  %v971_v45 = vor.u32 %v970_v35, %v967_v31  ;;  %v503_v23 = vld [vmem:[%s18477_s8 + $0x88] sm:$0xf] }
  0x35   : > { %v979_v40 = vrot.slane %v977_v33, 6  ;;  %22294 = vst [vmem:[#allocation5_spill] sm:$0xff] %v18579_v41  ;;  %v18583_v46 = vcombine.low %v18553_v54, %v18559_v3  ;;  %v18587_v47 = vcombine.low %v18563_v17, %v18567_v25  ;;  %v1661_v48 = vunpack.c.l.bf16 %v18520_v61 }
  0x36   : > { %v18594_v49 = vsel %vm18506_vm2, %v954_v39, %v962_v34  ;;  %v1662_v51 = vunpack.c.l.bf16 %v18524_v1  ;;  %v1663_v52 = vunpack.c.l.bf16 %v18529_v5  ;;  %v972_v53 = vrot.slane %v971_v45, 4 }
  0x37   : > { %22295 = vst [vmem:[#allocation6_spill] sm:$0xff] %v18583_v46  ;;  %22296 = vst [vmem:[#allocation7_spill] sm:$0xff] %v18587_v47  ;;  %v18596_v50 = vor.u32 %v979_v40, %v976_v36  ;;  %v1664_v56 = vunpack.c.l.bf16 %v18536_v15  ;;  %v1665_v57 = vunpack.c.l.bf16 %v18541_v32  ;;  %v1666_v61 = vunpack.c.l.bf16 %v18547_v42 }
  0x38   : > { %v1667_v60 = vunpack.c.l.bf16 %v18553_v54  ;;  %v1668_v62 = vunpack.c.l.bf16 %v18559_v3  ;;  %v1669_v63 = vunpack.c.l.bf16 %v18563_v17  ;;  %v1670_v1 = vunpack.c.l.bf16 %v18567_v25 }
  0x39   : > { %v18612_v0 = vsel %vm18506_vm2, %v972_v53, %v18596_v50  ;;  %v1671_v32 = vunpack.c.l.bf16 %v18575_v38  ;;  %v1672_v42 = vunpack.c.l.bf16 %v18594_v49  ;;  %v1693_v2 = vadd.f32 %v1662_v51, %v1661_v48  ;;  %v504_v53 = vld [vmem:[%s18477_s8 + $0x8c] sm:$0x3] }
  0x3a   : > { %v1673_v7 = vunpack.c.l.bf16 %v18612_v0  ;;  %v18621_v8 = vcombine.low %v18529_v5, %v18536_v15  ;;  %v18628_v10 = vcombine.low %v18575_v38, %v18594_v49  ;;  %v982_v11 = vrot.slane %v18596_v50, 4  ;;  %v502_v15 = vld [vmem:[%s18477_s8 + $0x84] sm:$0xe]  ;;  %v18112_v49 = vld [vmem:[%s22098_s2 + $0x30] sm:$0xff]  }
  0x3b   : > { %v1694_v12 = vadd.f32 %v1693_v2, %v1663_v52  ;;  %v984_v14 = vshrl.u32 %v498_v58, 16  ;;  %v987_v16 = vshll.u32 %v498_v58, 16  ;;  %v993_v5 = vshrl.u32 %v499_v59, 16 }
  0x3c   : > { %22297 = vst [vmem:[#allocation8_spill] sm:$0xff] %v18621_v8  ;;  %22298 = vst [vmem:[#allocation9_spill] sm:$0xff] %v18628_v10  ;;  %15964 = vmatmul.mubr.bf16.vlgmr.msra.gmra.mrb[0].mxu0 %v18621_v8  ;;  %16204 = vmatmul.mubr.bf16.vlgmr.msra.gmra.mrb[0].mxu1 %v18621_v8  ;;  %v996_v19 = vshll.u32 %v499_v59, 16  ;;  %v1002_v20 = vshrl.u32 %v500_v4, 16  ;;  %v1005_v21 = vshll.u32 %v500_v4, 16  ;;  %v1012_v22 = vshrl.u32 %v501_v6, 16 }
  0x3d   : > { %v1695_v24 = vadd.f32 %v1694_v12, %v1664_v56  ;;  %15996 = vmatpush3.bf16.msra.mxu0 %v18502_v43  ;;  %16236 = vmatpush3.bf16.msra.mxu1 %v18515_v55  ;;  %v986_v27 = vrot.slane %v984_v14, 5  ;;  %v989_v28 = vrot.slane %v987_v16, 6  ;;  %v995_v29 = vrot.slane %v993_v5, 5 }
  0x3e   : > { %15967 = vmatprep.mubr.bf16.mxu0 %v18579_v41  ;;  %16207 = vmatprep.mubr.bf16.mxu1 %v18579_v41  ;;  %v998_v30 = vrot.slane %v996_v19, 6  ;;  %v1004_v31 = vrot.slane %v1002_v20, 5  ;;  %v1007_v33 = vrot.slane %v1005_v21, 6  ;;  %v1014_v34 = vrot.slane %v1012_v22, 5  ;;  %v506_v21 = vld [vmem:[%s18477_s8 + $0x94] sm:$0xf] }
  0x3f   : > { %v1696_v35 = vadd.f32 %v1695_v24, %v1665_v57  ;;  %15997 = vmatprep.subr.bf16.mxu0 %v18102_v9  ;;  %16237 = vmatprep.subr.bf16.mxu1 %v18103_v13  ;;  %v990_v43 = vor.u32 %v989_v28, %v986_v27  ;;  %v1015_v55 = vshll.u32 %v501_v6, 16  ;;  %v1021_v36 = vshrl.u32 %v502_v15, 16  ;;  %v18106_v6 = vld [vmem:[%s22098_s2 + $0x18] sm:$0xff]   ;;  %v18108_v22 = vld [vmem:[%s22098_s2 + $0x20] sm:$0xff]  }
  0x40   : > { %v999_v39 = vor.u32 %v998_v30, %v995_v29  ;;  %v1008_v40 = vor.u32 %v1007_v33, %v1004_v31  ;;  %v1024_v45 = vshll.u32 %v502_v15, 16  ;;  %v1030_v48 = vshrl.u32 %v503_v23, 16  ;;  %v507_v27 = vld [vmem:[%s18477_s8 + $0x98] sm:$0x3] }
  0x41   : > { %v1697_v50 = vadd.f32 %v1696_v35, %v1666_v61  ;;  %15998 = vmatpush3.bf16.msra.mxu0 %v18102_v9  ;;  %16238 = vmatpush3.bf16.msra.mxu1 %v18103_v13  ;;  %v18650_v51 = vsel %vm18506_vm2, %v982_v11, %v990_v43  ;;  %v1017_v52 = vrot.slane %v1015_v55, 6  ;;  %v1023_v56 = vrot.slane %v1021_v36, 5  ;;  %v18107_v9 = vld [vmem:[%s22098_s2 + $0x158] sm:$0xff]   ;;  %v505_v13 = vld [vmem:[%s18477_s8 + $0x90] sm:$0xe] }
  0x42   : > { %15999 = vmatprep.subr.bf16.mxu0 %v18104_v18  ;;  %16239 = vmatprep.subr.bf16.mxu1 %v18105_v26  ;;  %v18655_v57 = vcombine.low %v18612_v0, %v18650_v51  ;;  %v1674_v58 = vunpack.c.l.bf16 %v18650_v51  ;;  %v1000_v59 = vrot.slane %v999_v39, 4  ;;  %v1010_v61 = vrot.slane %v1008_v40, 4  ;;  %v18114_v51 = vld [vmem:[%s22098_s2 + $0x38] sm:$0xff]  }
  0x43   : > { %v1698_v2 = vadd.f32 %v1697_v50, %v1667_v60  ;;  %v1018_v4 = vor.u32 %v1017_v52, %v1014_v34  ;;  %v1026_v11 = vrot.slane %v1024_v45, 6  ;;  %v1032_v12 = vrot.slane %v1030_v48, 5 }
  0x44   : > { %22299 = vst [vmem:[#allocation10_spill] sm:$0xff] %v18655_v57  ;;  %15968 = vmatmul.mubr.bf16.gmra.mrb[4].mxu0 %v18583_v46  ;;  %16208 = vmatmul.mubr.bf16.gmra.mrb[4].mxu1 %v18583_v46  ;;  %v18671_v54 = vsel %vm18506_vm2, %v1000_v59, %v1008_v40  ;;  %v1033_v60 = vshll.u32 %v503_v23, 16  ;;  %v1040_v14 = vshrl.u32 %v504_v53, 16  ;;  %v1043_v16 = vshll.u32 %v504_v53, 16  ;;  %v18110_v53 = vld [vmem:[%s22098_s2 + $0x28] sm:$0xff]  }
  0x45   : > { %v1699_v5 = vadd.f32 %v1698_v2, %v1668_v62  ;;  %15971 = vmatprep.mubr.bf16.mxu0 %v18587_v47  ;;  %16211 = vmatprep.mubr.bf16.mxu1 %v18587_v47  ;;  %v18679_v15 = vsel %vm18506_vm2, %v1010_v61, %v1018_v4  ;;  %v1675_v19 = vunpack.c.l.bf16 %v18671_v54  ;;  %v1027_v20 = vor.u32 %v1026_v11, %v1023_v56  ;;  %v18111_v56 = vld [vmem:[%s22098_s2 + $0x168] sm:$0xff]   ;;  %v509_v61 = vld [vmem:[%s18477_s8 + $0xa0] sm:$0xf] }
  0x46   : > { %16000 = vmatpush3.bf16.msra.mxu0 %v18104_v18  ;;  %16240 = vmatpush3.bf16.msra.mxu1 %v18105_v26  ;;  %v18688_v3 = vcombine.low %v18671_v54, %v18679_v15  ;;  %v1676_v62 = vunpack.c.l.bf16 %v18679_v15  ;;  %v1035_v23 = vrot.slane %v1033_v60, 6  ;;  %v1042_v24 = vrot.slane %v1040_v14, 5  ;;  %v18109_v18 = vld [vmem:[%s22098_s2 + $0x160] sm:$0xff]  }
  0x47   : > { %v1700_v28 = vadd.f32 %v1699_v5, %v1669_v63  ;;  %16001 = vmatprep.subr.bf16.mxu0 %v18106_v6  ;;  %16241 = vmatprep.subr.bf16.mxu1 %v18107_v9  ;;  %v1028_v29 = vrot.slane %v1027_v20, 4  ;;  %v1045_v30 = vrot.slane %v1043_v16, 6  ;;  %v1049_v31 = vshrl.u32 %v505_v13, 16  ;;  %v508_v63 = vld [vmem:[%s18477_s8 + $0x9c] sm:$0xe]  ;;  %v18780_v15 = vld [vmem:[%s22098_s2 + $0x40] sm:$0xff]  }
  0x48   : > { %22300 = vst [vmem:[#allocation11_spill] sm:$0xff] %v18688_v3  ;;  %v1036_v26 = vor.u32 %v1035_v23, %v1032_v12  ;;  %v1052_v33 = vshll.u32 %v505_v13, 16  ;;  %v1058_v34 = vshrl.u32 %v506_v21, 16  ;;  %v1061_v35 = vshll.u32 %v506_v21, 16  ;;  %v510_v12 = vld [vmem:[%s18477_s8 + $0xa4] sm:$0x3] }
  0x49   : > { %v1701_v43 = vadd.f32 %v1700_v28, %v1670_v1  ;;  %v1046_v55 = vor.u32 %v1045_v30, %v1042_v24  ;;  %v1051_v17 = vrot.slane %v1049_v31, 5  ;;  %v1068_v36 = vshrl.u32 %v507_v27, 16  ;;  %v511_v31 = vld [vmem:[%s18477_s8 + $0xa8] sm:$0xe] }
  0x4a   : > { %16002 = vmatpush3.bf16.msra.mxu0 %v18106_v6  ;;  %16242 = vmatpush3.bf16.msra.mxu1 %v18107_v9  ;;  %v18702_v39 = vsel %vm18506_vm2, %v1028_v29, %v1036_v26  ;;  %v1038_v40 = vrot.slane %v1036_v26, 4  ;;  %v1054_v45 = vrot.slane %v1052_v33, 6  ;;  %v1060_v48 = vrot.slane %v1058_v34, 5 }
  0x4b   : > { %v1702_v50 = vadd.f32 %v1701_v43, %v1671_v32  ;;  %v1677_v25 = vunpack.c.l.bf16 %v18702_v39  ;;  %v1063_v1 = vrot.slane %v1061_v35, 6  ;;  %v1070_v52 = vrot.slane %v1068_v36, 5  ;;  %16003 = vmatprep.subr.bf16.mxu0 %v18108_v22  ;;  %16243 = vmatprep.subr.bf16.mxu1 %v18109_v18  ;;  %v512_v35 = vld [vmem:[%s18477_s8 + $0xac] sm:$0xf]  ;;  %v513_v36 = vld [vmem:[%s18477_s8 + $0xb0] sm:$0x3] }
  0x4c   : > { %15972 = vmatmul.mubr.bf16.gmra.mrb[8].mxu0 %v18628_v10  ;;  %16212 = vmatmul.mubr.bf16.gmra.mrb[8].mxu1 %v18628_v10  ;;  %v18717_v38 = vsel %vm18506_vm2, %v1038_v40, %v1046_v55  ;;  %v1055_v32 = vor.u32 %v1054_v45, %v1051_v17  ;;  %v1071_v59 = vshll.u32 %v507_v27, 16  ;;  %v1077_v2 = vshrl.u32 %v508_v63, 16 }
  0x4d   : > { %v1703_v4 = vadd.f32 %v1702_v50, %v1672_v42  ;;  %15975 = vmatprep.mubr.bf16.mxu0 %v18655_v57  ;;  %16215 = vmatprep.mubr.bf16.mxu1 %v18655_v57  ;;  %v18726_v6 = vcombine.low %v18702_v39, %v18717_v38  ;;  %v1678_v9 = vunpack.c.l.bf16 %v18717_v38  ;;  %v1064_v11 = vor.u32 %v1063_v1, %v1060_v48 }
  0x4e   : > { %v1056_v13 = vrot.slane %v1055_v32, 4  ;;  %v1073_v60 = vrot.slane %v1071_v59, 6  ;;  %16004 = vmatpush3.bf16.msra.mxu0 %v18108_v22  ;;  %16244 = vmatpush3.bf16.msra.mxu1 %v18109_v18  ;;  %v1079_v14 = vrot.slane %v1077_v2, 5  ;;  %v1080_v16 = vshll.u32 %v508_v63, 16  ;;  %v18113_v22 = vld [vmem:[%s22098_s2 + $0x170] sm:$0xff]   ;;  %v18115_v63 = vld [vmem:[%s22098_s2 + $0x178] sm:$0xff]  }
  0x4f   : > { %22301 = vst [vmem:[#allocation12_spill] sm:$0xff] %v18726_v6  ;;  %v1704_v42 = vadd.f32 %v1703_v4, %v1673_v7  ;;  %v1066_v5 = vrot.slane %v1064_v11, 4  ;;  %v1086_v20 = vshrl.u32 %v509_v61, 16  ;;  %v1089_v21 = vshll.u32 %v509_v61, 16  ;;  %16005 = vmatprep.subr.bf16.mxu0 %v18110_v53  ;;  %16245 = vmatprep.subr.bf16.mxu1 %v18111_v56  ;;  %v515_v2 = vld [vmem:[%s18477_s8 + $0xb8] sm:$0xf] }
  0x50   : > { %v18740_v23 = vsel %vm18506_vm2, %v1056_v13, %v1064_v11  ;;  %v1074_v24 = vor.u32 %v1073_v60, %v1070_v52  ;;  %v1082_v27 = vrot.slane %v1080_v16, 6  ;;  %v1096_v28 = vshrl.u32 %v510_v12, 16  ;;  %v18787_v13 = vld [vmem:[%s22098_s2 + $0x180] sm:$0xff]  }
  0x51   : > { %v1705_v0 = vadd.f32 %v1704_v42, %v1674_v58  ;;  %v1679_v7 = vunpack.c.l.bf16 %v18740_v23  ;;  %v1088_v29 = vrot.slane %v1086_v20, 5  ;;  %v1091_v30 = vrot.slane %v1089_v21, 6 }
  0x52   : > { %v18748_v18 = vsel %vm18506_vm2, %v1066_v5, %v1074_v24  ;;  %v1083_v26 = vor.u32 %v1082_v27, %v1079_v14  ;;  %v1098_v33 = vrot.slane %v1096_v28, 5  ;;  %v1099_v34 = vshll.u32 %v510_v12, 16  ;;  %16006 = vmatpush3.bf16.msra.mxu0 %v18110_v53  ;;  %16246 = vmatpush3.bf16.msra.mxu1 %v18111_v56  ;;  %v514_v53 = vld [vmem:[%s18477_s8 + $0xb4] sm:$0xe]  ;;  %v517_v28 = vld [vmem:[%s18477_s8 + $0xc0] sm:$0xe] }
  0x53   : > { %v1706_v58 = vadd.f32 %v1705_v0, %v1675_v19  ;;  %v18758_v43 = vcombine.low %v18740_v23, %v18748_v18  ;;  %v1680_v55 = vunpack.c.l.bf16 %v18748_v18  ;;  %v1092_v17 = vor.u32 %v1091_v30, %v1088_v29  ;;  %16007 = vmatprep.subr.bf16.mxu0 %v18112_v49  ;;  %16247 = vmatprep.subr.bf16.mxu1 %v18113_v22 }
  0x54   : > { %15976 = vmatmul.mubr.bf16.gmra.mrb[12].mxu0 %v18688_v3  ;;  %16216 = vmatmul.mubr.bf16.gmra.mrb[12].mxu1 %v18688_v3  ;;  %v1084_v54 = vrot.slane %v1083_v26, 4  ;;  %v1101_v19 = vrot.slane %v1099_v34, 6  ;;  %v1105_v40 = vshrl.u32 %v511_v31, 16  ;;  %v1108_v45 = vshll.u32 %v511_v31, 16  ;;  %v518_v34 = vld [vmem:[%s18477_s8 + $0xc4] sm:$0xf] }
  0x55   : > { %22302 = vst [vmem:[#allocation13_spill] sm:$0xff] %v18758_v43  ;;  %v1707_v48 = vadd.f32 %v1706_v58, %v1676_v62  ;;  %15979 = vmatprep.mubr.bf16.mxu0 %v18726_v6  ;;  %16219 = vmatprep.mubr.bf16.mxu1 %v18726_v6  ;;  %v1094_v50 = vrot.slane %v1092_v17, 4  ;;  %v1114_v1 = vshrl.u32 %v512_v35, 16  ;;  %v1117_v52 = vshll.u32 %v512_v35, 16 }
  0x56   : > { %v18774_v56 = vsel %vm18506_vm2, %v1084_v54, %v1092_v17  ;;  %v1102_v32 = vor.u32 %v1101_v19, %v1098_v33  ;;  %v1107_v59 = vrot.slane %v1105_v40, 5  ;;  %v1110_v61 = vrot.slane %v1108_v45, 6  ;;  %16008 = vmatpush3.bf16.msra.mxu0 %v18112_v49  ;;  %16248 = vmatpush3.bf16.msra.mxu1 %v18113_v22  ;;  %v516_v49 = vld [vmem:[%s18477_s8 + $0xbc] sm:$0x3]  ;;  %v519_v19 = vld [vmem:[%s18477_s8 + $0xc8] sm:$0x3] }
  0x57   : > { %v1708_v62 = vadd.f32 %v1707_v48, %v1677_v25  ;;  %v1116_v4 = vrot.slane %v1114_v1, 5  ;;  %v1119_v11 = vrot.slane %v1117_v52, 6  ;;  %v1124_v12 = vshrl.u32 %v513_v36, 16  ;;  %16009 = vmatprep.subr.bf16.mxu0 %v18114_v51  ;;  %16249 = vmatprep.subr.bf16.mxu1 %v18115_v63  ;;  %v520_v52 = vld [vmem:[%s18477_s8 + $0xcc] sm:$0xe] }
  0x58   : > { %v18791_v60 = vsel %vm18506_vm2, %v1094_v50, %v1102_v32  ;;  %v1111_v14 = vor.u32 %v1110_v61, %v1107_v59  ;;  %v1127_v16 = vshll.u32 %v513_v36, 16  ;;  %v1133_v39 = vshrl.u32 %v514_v53, 16 }
  0x59   : > { %v18796_v25 = vadd.f32 %v1708_v62, %v1678_v9  ;;  %v18800_v42 = vcombine.low %v18774_v56, %v18791_v60  ;;  %v1120_v5 = vor.u32 %v1119_v11, %v1116_v4  ;;  %v1126_v20 = vrot.slane %v1124_v12, 5 }
  0x5a   : > { %v1112_v21 = vrot.slane %v1111_v14, 4  ;;  %v1129_v22 = vrot.slane %v1127_v16, 6  ;;  %v1135_v24 = vrot.slane %v1133_v39, 5  ;;  %v1136_v27 = vshll.u32 %v514_v53, 16  ;;  %16010 = vmatpush3.bf16.msra.mxu0 %v18114_v51  ;;  %16250 = vmatpush3.bf16.msra.mxu1 %v18115_v63 }
  0x5b   : > { %22303 = vst [vmem:[#allocation14_spill] sm:$0xff] %v18800_v42  ;;  %v1122_v0 = vrot.slane %v1120_v5, 4  ;;  %v1142_v29 = vshrl.u32 %v515_v2, 16  ;;  %v1145_v30 = vshll.u32 %v515_v2, 16  ;;  %v1152_v38 = vshrl.u32 %v516_v49, 16  ;;  %16043 = vmatprep.subr.bf16.mxu0 %v18780_v15  ;;  %16283 = vmatprep.subr.bf16.mxu1 %v18787_v13 }
  0x5c   : > { %15980 = vmatmul.mubr.bf16.gmra.mrb[16].mxu0 %v18758_v43  ;;  %16220 = vmatmul.mubr.bf16.gmra.mrb[16].mxu1 %v18758_v43  ;;  %v18809_v9 = vsel %vm18506_vm2, %v1112_v21, %v1120_v5  ;;  %v1130_v31 = vor.u32 %v1129_v22, %v1126_v20  ;;  %v1138_v26 = vrot.slane %v1136_v27, 6  ;;  %v1155_v33 = vshll.u32 %v516_v49, 16  ;;  %v521_v49 = vld [vmem:[%s18477_s8 + $0xd0] sm:$0xf]  ;;  %v522_v22 = vld [vmem:[%s18477_s8 + $0xd4] sm:$0x3] }
  0x5d   : > { %15983 = vmatprep.mubr.bf16.mxu0 %v18800_v42  ;;  %16223 = vmatprep.mubr.bf16.mxu1 %v18800_v42  ;;  %v1144_v35 = vrot.slane %v1142_v29, 5  ;;  %v1147_v51 = vrot.slane %v1145_v30, 6  ;;  %v1154_v58 = vrot.slane %v1152_v38, 5  ;;  %v1161_v17 = vshrl.u32 %v517_v28, 16  ;;  %v523_v30 = vld [vmem:[%s18477_s8 + $0xd8] sm:$0xe] }
  0x5e   : > { %v18816_v36 = vsel %vm18506_vm2, %v1122_v0, %v1130_v31  ;;  %v1139_v63 = vor.u32 %v1138_v26, %v1135_v24  ;;  %v1157_v54 = vrot.slane %v1155_v33, 6  ;;  %v1164_v40 = vshll.u32 %v517_v28, 16 }
  0x5f   : > { %v18821_v45 = vcombine.low %v18809_v9, %v18816_v36  ;;  %v1148_v48 = vor.u32 %v1147_v51, %v1144_v35  ;;  %v1163_v50 = vrot.slane %v1161_v17, 5  ;;  %v1170_v1 = vshrl.u32 %v518_v34, 16 }
  0x60   : > { %v1140_v53 = vrot.slane %v1139_v63, 4  ;;  %v1158_v32 = vor.u32 %v1157_v54, %v1154_v58  ;;  %v1166_v59 = vrot.slane %v1164_v40, 6  ;;  %v1173_v61 = vshll.u32 %v518_v34, 16  ;;  %v524_v34 = vld [vmem:[%s18477_s8 + $0xdc] sm:$0xf] }
  0x61   : > { %22304 = vst [vmem:[#allocation15_spill] sm:$0xff] %v18821_v45  ;;  %v1150_v2 = vrot.slane %v1148_v48, 4  ;;  %v1172_v62 = vrot.slane %v1170_v1, 5  ;;  %v1180_v4 = vshrl.u32 %v519_v19, 16  ;;  %v1183_v11 = vshll.u32 %v519_v19, 16 }
  0x62   : > { %v18826_v12 = vsel %vm18506_vm2, %v1140_v53, %v1148_v48  ;;  %v1167_v14 = vor.u32 %v1166_v59, %v1163_v50  ;;  %v1175_v16 = vrot.slane %v1173_v61, 6  ;;  %v1189_v39 = vshrl.u32 %v520_v52, 16  ;;  %v525_v63 = vld [vmem:[%s18477_s8 + $0xe0] sm:$0x3] }
  0x63   : > { %v18831_v5 = vsel %vm18506_vm2, %v1150_v2, %v1158_v32  ;;  %v1182_v20 = vrot.slane %v1180_v4, 5  ;;  %v1185_v21 = vrot.slane %v1183_v11, 6  ;;  %v1192_v24 = vshll.u32 %v520_v52, 16 }
  0x64   : > { %15984 = vmatmul.mubr.bf16.gmra.mrb[20].mxu0 %v18821_v45  ;;  %16224 = vmatmul.mubr.bf16.gmra.mrb[20].mxu1 %v18821_v45  ;;  %v18838_v27 = vcombine.low %v18826_v12, %v18831_v5  ;;  %v1168_v28 = vrot.slane %v1167_v14, 4  ;;  %v1176_v0 = vor.u32 %v1175_v16, %v1172_v62  ;;  %v1191_v29 = vrot.slane %v1189_v39, 5 }
  0x65   : > { %v1186_v38 = vor.u32 %v1185_v21, %v1182_v20  ;;  %v1194_v31 = vrot.slane %v1192_v24, 6  ;;  %v1198_v26 = vshrl.u32 %v521_v49, 16  ;;  %v1201_v33 = vshll.u32 %v521_v49, 16  ;;  %v14039_v21 = vld [vmem:[%s18477_s8 + $0x44] sm:$0x3] }
  0x66   : > { %22305 = vst [vmem:[#allocation16_spill] sm:$0xff] %v18838_v27  ;;  %15987 = vmatprep.mubr.bf16.mxu0 %v18838_v27  ;;  %16227 = vmatprep.mubr.bf16.mxu1 %v18838_v27  ;;  %v18846_v35 = vsel %vm18506_vm2, %v1168_v28, %v1176_v0  ;;  %v1178_v51 = vrot.slane %v1176_v0, 4  ;;  %v1208_v58 = vshrl.u32 %v522_v22, 16  ;;  %v1211_v17 = vshll.u32 %v522_v22, 16 }
  0x67   : > { %v1195_v54 = vor.u32 %v1194_v31, %v1191_v29  ;;  %v1200_v19 = vrot.slane %v1198_v26, 5  ;;  %v1203_v40 = vrot.slane %v1201_v33, 6  ;;  %v1217_v48 = vshrl.u32 %v523_v30, 16  ;;  %v13978_v31 = vld [vmem:[%s18477_s8 + $0x18] sm:$0xe] }
  0x68   : > { %v18851_v50 = vsel %vm18506_vm2, %v1178_v51, %v1186_v38  ;;  %v1210_v1 = vrot.slane %v1208_v58, 5  ;;  %v1213_v52 = vrot.slane %v1211_v17, 6  ;;  %v1220_v53 = vshll.u32 %v523_v30, 16  ;;  %v13979_v58 = vld [vmem:[%s18477_s8 + $0x1c] sm:$0xf] }
  0x69   : > { %v18855_v32 = vcombine.low %v18846_v35, %v18851_v50  ;;  %v1196_v59 = vrot.slane %v1195_v54, 4  ;;  %v1204_v61 = vor.u32 %v1203_v40, %v1200_v19  ;;  %v1219_v2 = vrot.slane %v1217_v48, 5  ;;  %v13980_v17 = vld [vmem:[%s18477_s8 + $0x20] sm:$0x1]  ;;  %v13982_v40 = vld [vmem:[%s18477_s8 + $0x28] sm:$0xf] }
  0x6a   : > { %v1214_v62 = vor.u32 %v1213_v52, %v1210_v1  ;;  %v1222_v4 = vrot.slane %v1220_v53, 6  ;;  %v1226_v11 = vshrl.u32 %v524_v34, 16  ;;  %v1229_v14 = vshll.u32 %v524_v34, 16  ;;  %v14034_v48 = vld [vmem:[%s18477_s8 + $0x24] sm:$0xc]  ;;  %v18152_v53 = vld [vmem:[%s22098_s2 + $0xd0] sm:$0xff]  }
  0x6b   : > { %22306 = vst [vmem:[#allocation17_spill] sm:$0xff] %v18855_v32  ;;  %v18859_v16 = vsel %vm18506_vm2, %v1196_v59, %v1204_v61  ;;  %v1206_v49 = vrot.slane %v1204_v61, 4  ;;  %v1236_v39 = vshrl.u32 %v525_v63, 16  ;;  %v1239_v20 = vshll.u32 %v525_v63, 16  ;;  %v14035_v59 = vld [vmem:[%s18477_s8 + $0x2c] sm:$0x3] }
  0x6c   : > { %15988 = vmatmul.mubr.bf16.gmra.mrb[24].mxu0 %v18855_v32  ;;  %16228 = vmatmul.mubr.bf16.gmra.mrb[24].mxu1 %v18855_v32  ;;  %v1223_v22 = vor.u32 %v1222_v4, %v1219_v2  ;;  %v1228_v24 = vrot.slane %v1226_v11, 5  ;;  %v1231_v28 = vrot.slane %v1229_v14, 6  ;;  %v1681_v38 = vunpack.c.l.bf16 %v18774_v56  ;;  %v13981_v11 = vld [vmem:[%s18477_s8 + $0x24] sm:$0xe]  ;;  %v13983_v14 = vld [vmem:[%s18477_s8 + $0x2c] sm:$0x1] }
  0x6d   : > { %v18866_v0 = vsel %vm18506_vm2, %v1206_v49, %v1214_v62  ;;  %v1238_v29 = vrot.slane %v1236_v39, 5  ;;  %v1241_v30 = vrot.slane %v1239_v20, 6  ;;  %v1682_v51 = vunpack.c.l.bf16 %v18791_v60  ;;  %v18936_v62 = vld [vmem:[%s18477_s8 + $0x40] sm:$0xf]  ;;  %v14038_v2 = vld [vmem:[%s18477_s8 + $0x3c] sm:$0xc] }
  0x6e   : > { %v18872_v26 = vcombine.low %v18859_v16, %v18866_v0  ;;  %v1224_v33 = vrot.slane %v1223_v22, 4  ;;  %v1232_v34 = vor.u32 %v1231_v28, %v1228_v24  ;;  %v1683_v54 = vunpack.c.l.bf16 %v18809_v9  ;;  %v13986_v28 = vld [vmem:[%s18477_s8 + $0x38] sm:$0x1] }
  0x6f   : > { %v1242_v63 = vor.u32 %v1241_v30, %v1238_v29  ;;  %v1684_v19 = vunpack.c.l.bf16 %v18816_v36  ;;  %v1685_v56 = vunpack.c.l.bf16 %v18826_v12  ;;  %v1686_v52 = vunpack.c.l.bf16 %v18831_v5  ;;  %v13985_v29 = vld [vmem:[%s18477_s8 + $0x34] sm:$0xf]  ;;  %v14036_v30 = vld [vmem:[%s18477_s8 + $0x30] sm:$0xc] }
  0x70   : > { %22307 = vst [vmem:[#allocation18_spill] sm:$0xff] %v18872_v26  ;;  %15991 = vmatprep.mubr.bf16.mxu0 %v18872_v26  ;;  %16231 = vmatprep.mubr.bf16.mxu1 %v18872_v26  ;;  %v18886_v60 = vsel %vm18506_vm2, %v1224_v33, %v1232_v34  ;;  %v1234_v1 = vrot.slane %v1232_v34, 4  ;;  %v1710_v4 = vadd.f32 %v18796_v25, %v1679_v7  ;;  %v14192_v39 = vrot.slane %v13978_v31, 9  ;;  %v14037_v31 = vld [vmem:[%s18477_s8 + $0x38] sm:$0x3] }
  0x71   : > { %v1817_v20 = vrot.slane %v13979_v58, 5  ;;  %v1820_v22 = vrot.slane %v13980_v17, 5  ;;  %v1824_v7 = vrot.slane %v13982_v40, 5  ;;  %v14258_v58 = vrot.slane %v14034_v48, 10 }
  0x72   : > { %v18907_v49 = vsel %vm18506_vm2, %v1234_v1, %v1242_v63  ;;  %v1711_v23 = vadd.f32 %v1710_v4, %v1680_v55  ;;  %v2710_v18 = vrot.slane %v13982_v40, 6  ;;  %v13984_v55 = vld [vmem:[%s18477_s8 + $0x30] sm:$0xe]  ;;  %v2713_v1 = vrot.slane %v14035_v59, 6 }
  0x73   : > { %v18911_v24 = vcombine.low %v18886_v60, %v18907_v49  ;;  %v1818_v33 = vsel %vm18892_vm7, %v14192_v39, %v1817_v20  ;;  %v1819_v34 = vrot.slane %v1817_v20, 4  ;;  %v1826_v63 = vrot.slane %v1824_v7, 4 }
  0x74   : > { %v1712_v17 = vadd.f32 %v1711_v23, %v1681_v38  ;;  %v14193_v4 = vrot.slane %v13981_v11, 9  ;;  %v2711_v20 = vsel %vm18918_vm8, %v14258_v58, %v2710_v18  ;;  %v2712_v48 = vrot.slane %v2710_v18, 4  ;;  %v13987_v18 = vld [vmem:[%s18477_s8 + $0x3c] sm:$0xe] }
  0x75   : > { %22310 = vst [vmem:[#allocation19_spill] sm:$0xff] %v18911_v24  ;;  %15992 = vmatmul.mubr.bf16.gmra.mrb[28].mxu0 %v18911_v24  ;;  %16232 = vmatmul.mubr.bf16.gmra.mrb[28].mxu1 %v18911_v24  ;;  %v1821_v39 = vsel %vm18892_vm7, %v1819_v34, %v1820_v22  ;;  %v1827_v40 = vrot.slane %v13983_v14, 5  ;;  %v14259_v11 = vrot.slane %v14036_v30, 10  ;;  %v2717_v58 = vrot.slane %v13985_v29, 6  ;;  %v14021_v24 = vld [vmem:[%s18477_s8 + $0xc4] sm:$0xf] }
  0x76   : > { %v1713_v38 = vadd.f32 %v1712_v17, %v1682_v51  ;;  %v14208_v23 = vcombine.low %v1818_v33, %v1821_v39  ;;  %v1825_v59 = vsel %vm18892_vm7, %v14193_v4, %v1824_v7  ;;  %v2714_v22 = vsel %vm18918_vm8, %v2712_v48, %v2713_v1  ;;  %v13989_v17 = vld [vmem:[%s18477_s8 + $0x44] sm:$0x1]  ;;  %v14040_v7 = vld [vmem:[%s18477_s8 + $0x48] sm:$0xc] }
  0x77   : > { %v1828_v34 = vsel %vm18892_vm7, %v1826_v63, %v1827_v40  ;;  %v2720_v14 = vrot.slane %v14037_v31, 6  ;;  %v18947_v9 = vcombine.low %v2711_v20, %v2714_v22  ;;  %v14194_v33 = vrot.slane %v13984_v55, 9  ;;  %v18118_v20 = vld [vmem:[%s22098_s2 + $0x48] sm:$0xff]  }
  0x78   : > { %v1714_v61 = vadd.f32 %v1713_v38, %v1683_v54  ;;  %16011 = vmatprep.mubr.bf16.mxu0 %v14208_v23  ;;  %v18949_v51 = vcombine.low %v1825_v59, %v1828_v34  ;;  %v2718_v30 = vsel %vm18918_vm8, %v14259_v11, %v2717_v58  ;;  %v2719_v1 = vrot.slane %v2717_v58, 4  ;;  %v18119_v23 = vld [vmem:[%s22098_s2 + $0x188] sm:$0xff]   ;;  %v13992_v11 = vld [vmem:[%s18477_s8 + $0x50] sm:$0x1]  ;;  %v18985_v58 = vld [vmem:[%s18477_s8 + $0x58] sm:$0xf] }
  0x79   : > { %v1831_v4 = vrot.slane %v13985_v29, 5  ;;  %v1834_v63 = vrot.slane %v13986_v28, 5  ;;  %16251 = vmatprep.mubr.bf16.mxu1 %v18947_v9  ;;  %v14260_v54 = vrot.slane %v14038_v2, 10  ;;  %v2724_v39 = vrot.slane %v18936_v62, 6  ;;  %v14041_v2 = vld [vmem:[%s18477_s8 + $0x50] sm:$0x3] }
  0x7a   : > { %22313 = vst [vmem:[#allocation20_spill] sm:$0xff] %v18949_v51  ;;  %v1715_v31 = vadd.f32 %v1714_v61, %v1684_v19  ;;  %v2727_v55 = vrot.slane %v14039_v21, 6  ;;  %v2721_v48 = vsel %vm18918_vm8, %v2719_v1, %v2720_v14  ;;  %v14195_v19 = vrot.slane %v13987_v18, 9  ;;  %v13991_v61 = vld [vmem:[%s18477_s8 + $0x4c] sm:$0xf]  ;;  %v18120_v14 = vld [vmem:[%s22098_s2 + $0x50] sm:$0xff]  }
  0x7b   : > { %v1832_v28 = vsel %vm18892_vm7, %v14194_v33, %v1831_v4  ;;  %v1833_v36 = vrot.slane %v1831_v4, 4  ;;  %v18971_v21 = vcombine.low %v2718_v30, %v2721_v48  ;;  %v2725_v40 = vsel %vm18918_vm8, %v14260_v54, %v2724_v39  ;;  %v13990_v59 = vld [vmem:[%s18477_s8 + $0x48] sm:$0xe]  ;;  %v18121_v30 = vld [vmem:[%s22098_s2 + $0x190] sm:$0xff]   ;;  %v19014_v48 = vld [vmem:[%s18477_s8 + $0x5c] sm:$0x1] }
  0x7c   : > { %v1716_v29 = vadd.f32 %v1715_v31, %v1685_v56  ;;  %v2726_v38 = vrot.slane %v2724_v39, 4  ;;  %v1838_v56 = vrot.slane %v18936_v62, 5  ;;  %v1841_v22 = vrot.slane %v13989_v17, 5  ;;  %v14042_v17 = vld [vmem:[%s18477_s8 + $0x54] sm:$0xc] }
  0x7d   : > { %16012 = vmatmul.mubr.bf16.vlgmr.msra.gmra.mrb[32].mxu0 %v18949_v51  ;;  %v1835_v12 = vsel %vm18892_vm7, %v1833_v36, %v1834_v63  ;;  %v14261_v34 = vrot.slane %v14040_v7, 10  ;;  %16252 = vmatmul.mubr.bf16.vlgmr.msra.gmra.mrb[0].mxu1 %v18971_v21  ;;  %v2731_v62 = vrot.slane %v13991_v61, 6  ;;  %v14043_v7 = vld [vmem:[%s18477_s8 + $0x5c] sm:$0x3]  ;;  %v2734_v4 = vrot.slane %v14041_v2, 6 }
  0x7e   : > { %16044 = vmatpush3.bf16.msra.mxu0 %v18780_v15  ;;  %v1717_v18 = vadd.f32 %v1716_v29, %v1686_v52  ;;  %v18993_v33 = vcombine.low %v1832_v28, %v1835_v12  ;;  %v2728_v15 = vsel %vm18918_vm8, %v2726_v38, %v2727_v55  ;;  %16284 = vmatpush3.bf16.msra.mxu1 %v18787_v13  ;;  %v1840_v1 = vrot.slane %v1838_v56, 4  ;;  %v13993_v55 = vld [vmem:[%s18477_s8 + $0x54] sm:$0xe]  ;;  %v19020_v2 = vld [vmem:[%s18477_s8 + $0x64] sm:$0xf] }
  0x7f   : > { %16045 = vmatprep.subr.bf16.mxu0 %v18118_v20  ;;  %v19003_v5 = vcombine.low %v2725_v40, %v2728_v15  ;;  %v1839_v52 = vsel %vm18892_vm7, %v14195_v19, %v1838_v56  ;;  %v22314_v63 = vunpack.c.l.bf16 %v18846_v35  ;;  %v2732_v54 = vsel %vm18918_vm8, %v14261_v34, %v2731_v62  ;;  %16285 = vmatprep.subr.bf16.mxu1 %v18119_v23  ;;  %v14044_v29 = vld [vmem:[%s18477_s8 + $0x60] sm:$0xc]  ;;  %v18122_v40 = vld [vmem:[%s22098_s2 + $0x58] sm:$0xff]   ;;  %v14055_v51 = vld [vmem:[%s18477_s8 + $0xa4] sm:$0x3] }
  0x80   : > { %16015 = vmatprep.mubr.bf16.mxu0 %v18993_v33  ;;  %v2733_v39 = vrot.slane %v2731_v62, 4  ;;  %v14196_v13 = vrot.slane %v13990_v59, 9  ;;  %v1842_v28 = vsel %vm18892_vm7, %v1840_v1, %v1841_v22  ;;  %v1845_v35 = vrot.slane %v13991_v61, 5  ;;  %v13996_v15 = vld [vmem:[%s18477_s8 + $0x60] sm:$0xe] }
  0x81   : > { %v1718_v31 = vadd.f32 %v1717_v18, %v22314_v63  ;;  %16255 = vmatprep.mubr.bf16.mxu1 %v19003_v5  ;;  %v1848_v36 = vrot.slane %v13992_v11, 5  ;;  %v14262_v19 = vrot.slane %v14042_v17, 10  ;;  %v22315_v38 = vunpack.c.l.bf16 %v18851_v50  ;;  %v18123_v11 = vld [vmem:[%s22098_s2 + $0x198] sm:$0xff]   ;;  %v14045_v18 = vld [vmem:[%s18477_s8 + $0x68] sm:$0x3] }
  0x82   : > { %16046 = vmatpush3.bf16.msra.mxu0 %v18118_v20  ;;  %v19028_v12 = vcombine.low %v1839_v52, %v1842_v28  ;;  %v2735_v20 = vsel %vm18918_vm8, %v2733_v39, %v2734_v4  ;;  %v2738_v61 = vrot.slane %v18985_v58, 6  ;;  %16286 = vmatpush3.bf16.msra.mxu1 %v18119_v23  ;;  %v1846_v50 = vsel %vm18892_vm7, %v14196_v13, %v1845_v35  ;;  %v13998_v23 = vld [vmem:[%s18477_s8 + $0x68] sm:$0x1]  ;;  %v14046_v63 = vld [vmem:[%s18477_s8 + $0x6c] sm:$0xc]  ;;  %v18124_v13 = vld [vmem:[%s22098_s2 + $0x60] sm:$0xff]  }
  0x83   : > { %v1719_v59 = vadd.f32 %v1718_v31, %v22315_v38  ;;  %16047 = vmatprep.subr.bf16.mxu0 %v18120_v14  ;;  %v19036_v56 = vcombine.low %v2732_v54, %v2735_v20  ;;  %v1847_v22 = vrot.slane %v1845_v35, 4  ;;  %v2741_v34 = vrot.slane %v14043_v7, 6  ;;  %16287 = vmatprep.subr.bf16.mxu1 %v18121_v30  ;;  %v19054_v39 = vld [vmem:[%s18477_s8 + $0x70] sm:$0xf] }
  0x84   : > { %v22316_v62 = vunpack.c.l.bf16 %v18859_v16  ;;  %v2739_v52 = vsel %vm18918_vm8, %v14262_v19, %v2738_v61  ;;  %v2740_v1 = vrot.slane %v2738_v61, 4  ;;  %v14197_v4 = vrot.slane %v13993_v55, 9 }
  0x85   : > { %16016 = vmatmul.mubr.bf16.gmra.mrb[36].mxu0 %v19028_v12  ;;  %v1849_v7 = vsel %vm18892_vm7, %v1847_v22, %v1848_v36  ;;  %v1852_v31 = vrot.slane %v18985_v58, 5  ;;  %v1855_v54 = vrot.slane %v19014_v48, 5  ;;  %v14263_v16 = vrot.slane %v14044_v29, 10  ;;  %16256 = vmatmul.mubr.bf16.gmra.mrb[4].mxu1 %v19036_v56  ;;  %v14047_v48 = vld [vmem:[%s18477_s8 + $0x74] sm:$0x3]  ;;  %v18125_v36 = vld [vmem:[%s22098_s2 + $0x1a0] sm:$0xff]  }
  0x86   : > { %v1720_v17 = vadd.f32 %v1719_v59, %v22316_v62  ;;  %16048 = vmatpush3.bf16.msra.mxu0 %v18120_v14  ;;  %v22317_v55 = vunpack.c.l.bf16 %v18866_v0  ;;  %v19062_v35 = vcombine.low %v1846_v50, %v1849_v7  ;;  %v2742_v58 = vsel %vm18918_vm8, %v2740_v1, %v2741_v34  ;;  %16288 = vmatpush3.bf16.msra.mxu1 %v18121_v30  ;;  %v13999_v59 = vld [vmem:[%s18477_s8 + $0x6c] sm:$0xe]  ;;  %v19082_v62 = vld [vmem:[%s18477_s8 + $0x74] sm:$0x1]  ;;  %v19090_v1 = vld [vmem:[%s18477_s8 + $0x7c] sm:$0xf] }
  0x87   : > { %v2745_v14 = vrot.slane %v19020_v2, 6  ;;  %16049 = vmatprep.subr.bf16.mxu0 %v18122_v40  ;;  %v19071_v19 = vcombine.low %v2739_v52, %v2742_v58  ;;  %v1853_v0 = vsel %vm18892_vm7, %v14197_v4, %v1852_v31  ;;  %v1854_v29 = vrot.slane %v1852_v31, 4  ;;  %16289 = vmatprep.subr.bf16.mxu1 %v18123_v11 }
  0x88   : > { %v1721_v28 = vadd.f32 %v1720_v17, %v22317_v55  ;;  %v2748_v38 = vrot.slane %v14045_v18, 6  ;;  %v22319_v20 = vunpack.c.l.bf16 %v18886_v60  ;;  %16019 = vmatprep.mubr.bf16.mxu0 %v19062_v35  ;;  %v14198_v34 = vrot.slane %v13996_v15, 9  ;;  %v14048_v17 = vld [vmem:[%s18477_s8 + $0x78] sm:$0xc] }
  0x89   : > { %22318 = vst [vmem:[#allocation21_spill] sm:$0xff] %v19071_v19  ;;  %v2746_v50 = vsel %vm18918_vm8, %v14263_v16, %v2745_v14  ;;  %v2747_v22 = vrot.slane %v2745_v14, 4  ;;  %16259 = vmatprep.mubr.bf16.mxu1 %v19071_v19  ;;  %v1856_v30 = vsel %vm18892_vm7, %v1854_v29, %v1855_v54  ;;  %v1859_v60 = vrot.slane %v19020_v2, 5  ;;  %v14049_v54 = vld [vmem:[%s18477_s8 + $0x80] sm:$0x3]  ;;  %v18126_v2 = vld [vmem:[%s22098_s2 + $0x68] sm:$0xff]  }
  0x8a   : > { %v1722_v61 = vadd.f32 %v1721_v28, %v22319_v20  ;;  %v1862_v18 = vrot.slane %v13998_v23, 5  ;;  %v14264_v52 = vrot.slane %v14046_v63, 10  ;;  %16050 = vmatpush3.bf16.msra.mxu0 %v18122_v40  ;;  %v22320_v4 = vunpack.c.l.bf16 %v18907_v49  ;;  %16290 = vmatpush3.bf16.msra.mxu1 %v18123_v11  ;;  %v14002_v55 = vld [vmem:[%s18477_s8 + $0x78] sm:$0xe]  ;;  %v19112_v29 = vld [vmem:[%s18477_s8 + $0x80] sm:$0x1] }
  0x8b   : > { %v19094_v7 = vcombine.low %v1853_v0, %v1856_v30  ;;  %v2749_v31 = vsel %vm18918_vm8, %v2747_v22, %v2748_v38  ;;  %v2752_v16 = vrot.slane %v19054_v39, 6  ;;  %16051 = vmatprep.subr.bf16.mxu0 %v18124_v13  ;;  %v1860_v49 = vsel %vm18892_vm7, %v14198_v34, %v1859_v60  ;;  %v14050_v38 = vld [vmem:[%s18477_s8 + $0x84] sm:$0xc]  ;;  %16291 = vmatprep.subr.bf16.mxu1 %v18125_v36  ;;  %v19123_v22 = vld [vmem:[%s18477_s8 + $0x88] sm:$0xf] }
  0x8c   : > { %v1723_v15 = vadd.f32 %v1722_v61, %v22320_v4  ;;  %v19103_v23 = vcombine.low %v2746_v50, %v2749_v31  ;;  %v1861_v40 = vrot.slane %v1859_v60, 4  ;;  %v2755_v63 = vrot.slane %v14047_v48, 6  ;;  %v18127_v48 = vld [vmem:[%s22098_s2 + $0x1a8] sm:$0xff]   ;;  %v14005_v4 = vld [vmem:[%s18477_s8 + $0x84] sm:$0xe] }
  0x8d   : > { %16020 = vmatmul.mubr.bf16.gmra.mrb[40].mxu0 %v19094_v7  ;;  %v2753_v58 = vsel %vm18918_vm8, %v14264_v52, %v2752_v16  ;;  %v2754_v14 = vrot.slane %v2752_v16, 4  ;;  %v14199_v0 = vrot.slane %v13999_v59, 9  ;;  %v1866_v20 = vrot.slane %v19054_v39, 5  ;;  %v14051_v39 = vld [vmem:[%s18477_s8 + $0x8c] sm:$0x3] }
  0x8e   : > { %22321 = vst [vmem:[#allocation22_spill] sm:$0xff] %v19103_v23  ;;  %v1724_v28 = vrot.slane %v1723_v15, 4  ;;  %v1863_v11 = vsel %vm18892_vm7, %v1861_v40, %v1862_v18  ;;  %v1869_v61 = vrot.slane %v19082_v62, 5  ;;  %v14265_v50 = vrot.slane %v14048_v17, 10  ;;  %16052 = vmatpush3.bf16.msra.mxu0 %v18124_v13  ;;  %16260 = vmatmul.mubr.bf16.gmra.mrb[8].mxu1 %v19103_v23  ;;  %v18128_v62 = vld [vmem:[%s22098_s2 + $0x70] sm:$0xff]  }
  0x8f   : > { %v19126_v34 = vcombine.low %v1860_v49, %v1863_v11  ;;  %v2756_v30 = vsel %vm18918_vm8, %v2754_v14, %v2755_v63  ;;  %v2759_v60 = vrot.slane %v19090_v1, 6  ;;  %16053 = vmatprep.subr.bf16.mxu0 %v18126_v2  ;;  %v1867_v13 = vsel %vm18892_vm7, %v14199_v0, %v1866_v20  ;;  %16292 = vmatpush3.bf16.msra.mxu1 %v18125_v36  ;;  %v19144_v40 = vld [vmem:[%s18477_s8 + $0x8c] sm:$0x1]  ;;  %v14052_v63 = vld [vmem:[%s18477_s8 + $0x90] sm:$0xc] }
  0x90   : > { %v1725_v59 = vadd.f32 %v1724_v28, %v1723_v15  ;;  %v19135_v17 = vcombine.low %v2753_v58, %v2756_v30  ;;  %v1868_v18 = vrot.slane %v1866_v20, 4  ;;  %v2762_v52 = vrot.slane %v14049_v54, 6  ;;  %16293 = vmatprep.subr.bf16.mxu1 %v18127_v48  ;;  %v18129_v54 = vld [vmem:[%s22098_s2 + $0x1b0] sm:$0xff]  }
  0x91   : > { %16023 = vmatprep.mubr.bf16.mxu0 %v19126_v34  ;;  %v2760_v31 = vsel %vm18918_vm8, %v14265_v50, %v2759_v60  ;;  %v2761_v16 = vrot.slane %v2759_v60, 4  ;;  %v14200_v49 = vrot.slane %v14002_v55, 9  ;;  %v1873_v28 = vrot.slane %v19090_v1, 5  ;;  %v19156_v14 = vld [vmem:[%s18477_s8 + $0x94] sm:$0xf]  ;;  %v18130_v1 = vld [vmem:[%s22098_s2 + $0x78] sm:$0xff]  }
  0x92   : > { %22322 = vst [vmem:[#allocation23_spill] sm:$0xff] %v19135_v17  ;;  %v1726_v15 = vrot.slane %v1725_v59, 2  ;;  %16263 = vmatprep.mubr.bf16.mxu1 %v19135_v17  ;;  %v1870_v36 = vsel %vm18892_vm7, %v1868_v18, %v1869_v61  ;;  %v1876_v58 = vrot.slane %v19112_v29, 5  ;;  %v14266_v55 = vrot.slane %v14050_v38, 10  ;;  %16054 = vmatpush3.bf16.msra.mxu0 %v18126_v2  ;;  %v14053_v61 = vld [vmem:[%s18477_s8 + $0x98] sm:$0x3] }
  0x93   : > { %v19158_v11 = vcombine.low %v1867_v13, %v1870_v36  ;;  %v2763_v20 = vsel %vm18918_vm8, %v2761_v16, %v2762_v52  ;;  %v2766_v50 = vrot.slane %v19123_v22, 6  ;;  %16055 = vmatprep.subr.bf16.mxu0 %v18128_v62  ;;  %v1874_v2 = vsel %vm18892_vm7, %v14200_v49, %v1873_v28  ;;  %v14008_v30 = vld [vmem:[%s18477_s8 + $0x90] sm:$0xe]  ;;  %16294 = vmatpush3.bf16.msra.mxu1 %v18127_v48  ;;  %v14054_v16 = vld [vmem:[%s18477_s8 + $0x9c] sm:$0xc] }
  0x94   : > { %v1727_v0 = vadd.f32 %v1726_v15, %v1725_v59  ;;  %v19167_v29 = vcombine.low %v2760_v31, %v2763_v20  ;;  %v1875_v38 = vrot.slane %v1873_v28, 4  ;;  %v2769_v59 = vrot.slane %v14051_v39, 6  ;;  %v14010_v15 = vld [vmem:[%s18477_s8 + $0x98] sm:$0x1]  ;;  %v19177_v31 = vld [vmem:[%s18477_s8 + $0xa0] sm:$0xf]  ;;  %16295 = vmatprep.subr.bf16.mxu1 %v18129_v54 }
  0x95   : > { %16024 = vmatmul.mubr.bf16.gmra.mrb[44].mxu0 %v19158_v11  ;;  %v2767_v13 = vsel %vm18918_vm8, %v14266_v55, %v2766_v50  ;;  %v2768_v18 = vrot.slane %v2766_v50, 4  ;;  %v14201_v52 = vrot.slane %v14005_v4, 9  ;;  %v18131_v39 = vld [vmem:[%s22098_s2 + $0x1b8] sm:$0xff]   ;;  %v1880_v49 = vrot.slane %v19123_v22, 5  ;;  %v19201_v22 = vld [vmem:[%s22098_s2 + $0x80] sm:$0xff]  }
  0x96   : > { %22323 = vst [vmem:[#allocation24_spill] sm:$0xff] %v19167_v29  ;;  %v1728_v60 = vrot.slane %v1727_v0, 1  ;;  %v1877_v48 = vsel %vm18892_vm7, %v1875_v38, %v1876_v58  ;;  %v1883_v4 = vrot.slane %v19144_v40, 5  ;;  %v14267_v36 = vrot.slane %v14052_v63, 10  ;;  %16056 = vmatpush3.bf16.msra.mxu0 %v18128_v62  ;;  %16264 = vmatmul.mubr.bf16.gmra.mrb[12].mxu1 %v19167_v29  ;;  %v14024_v29 = vld [vmem:[%s18477_s8 + $0xd0] sm:$0xf] }
  0x97   : > { %v19192_v55 = vcombine.low %v1874_v2, %v1877_v48  ;;  %v2770_v20 = vsel %vm18918_vm8, %v2768_v18, %v2769_v59  ;;  %v2773_v50 = vrot.slane %v19156_v14, 6  ;;  %16057 = vmatprep.subr.bf16.mxu0 %v18130_v1  ;;  %v1881_v62 = vsel %vm18892_vm7, %v14201_v52, %v1880_v49  ;;  %v14013_v2 = vld [vmem:[%s18477_s8 + $0xa4] sm:$0x1]  ;;  %16296 = vmatpush3.bf16.msra.mxu1 %v18129_v54  ;;  %v14015_v18 = vld [vmem:[%s18477_s8 + $0xac] sm:$0xf] }
  0x98   : > { %v1729_v28 = vadd.f32 %v1728_v60, %v1727_v0  ;;  %v19203_v40 = vcombine.low %v2767_v13, %v2770_v20  ;;  %v1882_v63 = vrot.slane %v1880_v49, 4  ;;  %v2776_v58 = vrot.slane %v14053_v61, 6  ;;  %v14011_v0 = vld [vmem:[%s18477_s8 + $0x9c] sm:$0xe]  ;;  %16297 = vmatprep.subr.bf16.mxu1 %v18131_v39  ;;  %v19217_v61 = vld [vmem:[%s22098_s2 + $0x1c0] sm:$0xff]  }
  0x99   : > { %16027 = vmatprep.mubr.bf16.mxu0 %v19192_v55  ;;  %v2774_v38 = vsel %vm18918_vm8, %v14267_v36, %v2773_v50  ;;  %v2775_v59 = vrot.slane %v2773_v50, 4  ;;  %v14202_v60 = vrot.slane %v14008_v30, 9  ;;  %v1887_v13 = vrot.slane %v19156_v14, 5  ;;  %v14056_v14 = vld [vmem:[%s18477_s8 + $0xa8] sm:$0xc] }
  0x9a   : > { %22324 = vst [vmem:[#allocation25_spill] sm:$0xff] %v19203_v40  ;;  %1730 = vst [vmem:[%s335_s30] sm:$0x1] %v1729_v28  ;;  %16267 = vmatprep.mubr.bf16.mxu1 %v19203_v40  ;;  %v1884_v54 = vsel %vm18892_vm7, %v1882_v63, %v1883_v4  ;;  %v1890_v52 = vrot.slane %v14010_v15, 5  ;;  %v14268_v48 = vrot.slane %v14054_v16, 10  ;;  %v2780_v30 = vrot.slane %v19177_v31, 6  ;;  %16058 = vmatpush3.bf16.msra.mxu0 %v18130_v1 }
  0x9b   : > { %v19224_v49 = vcombine.low %v1881_v62, %v1884_v54  ;;  %v2777_v36 = vsel %vm18918_vm8, %v2775_v59, %v2776_v58  ;;  %v1888_v28 = vsel %vm18892_vm7, %v14202_v60, %v1887_v13  ;;  %v1889_v20 = vrot.slane %v1887_v13, 4  ;;  %v14057_v50 = vld [vmem:[%s18477_s8 + $0xb0] sm:$0x3]  ;;  %v14014_v4 = vld [vmem:[%s18477_s8 + $0xa8] sm:$0xe]  ;;  %16091 = vmatprep.subr.bf16.mxu0 %v19201_v22  ;;  %16298 = vmatpush3.bf16.msra.mxu1 %v18131_v39 }
  0x9c   : > { %v19233_v15 = vcombine.low %v2774_v38, %v2777_v36  ;;  %v2781_v16 = vsel %vm18918_vm8, %v14268_v48, %v2780_v30  ;;  %v2782_v1 = vrot.slane %v2780_v30, 4  ;;  %v2783_v62 = vrot.slane %v14055_v51, 6  ;;  %v14016_v63 = vld [vmem:[%s18477_s8 + $0xb0] sm:$0x1]  ;;  %v14018_v54 = vld [vmem:[%s18477_s8 + $0xb8] sm:$0xf]  ;;  %16331 = vmatprep.subr.bf16.mxu1 %v19217_v61 }
  0x9d   : > { %16028 = vmatmul.mubr.bf16.gmra.mrb[48].mxu0 %v19224_v49  ;;  %v1891_v58 = vsel %vm18892_vm7, %v1889_v20, %v1890_v52  ;;  %v14203_v59 = vrot.slane %v14011_v0, 9  ;;  %v1894_v38 = vrot.slane %v19177_v31, 5  ;;  %v1897_v60 = vrot.slane %v14013_v2, 5  ;;  %v14058_v13 = vld [vmem:[%s18477_s8 + $0xb4] sm:$0xc] }
  0x9e   : > { %22325 = vst [vmem:[#allocation26_spill] sm:$0xff] %v19233_v15  ;;  %v19245_v48 = vcombine.low %v1888_v28, %v1891_v58  ;;  %v2784_v51 = vsel %vm18918_vm8, %v2782_v1, %v2783_v62  ;;  %v14269_v39 = vrot.slane %v14056_v14, 10  ;;  %v2787_v30 = vrot.slane %v14015_v18, 6  ;;  %v14059_v36 = vld [vmem:[%s18477_s8 + $0xbc] sm:$0x3]  ;;  %16268 = vmatmul.mubr.bf16.gmra.mrb[16].mxu1 %v19233_v15 }
  0x9f   : > { %v19251_v0 = vcombine.low %v2781_v16, %v2784_v51  ;;  %v1895_v31 = vsel %vm18892_vm7, %v14203_v59, %v1894_v38  ;;  %v1896_v2 = vrot.slane %v1894_v38, 4  ;;  %v2790_v52 = vrot.slane %v14057_v50, 6  ;;  %v14017_v28 = vld [vmem:[%s18477_s8 + $0xb4] sm:$0xe]  ;;  %v14019_v20 = vld [vmem:[%s18477_s8 + $0xbc] sm:$0x1] }
  0xa0   : > { %16031 = vmatprep.mubr.bf16.mxu0 %v19245_v48  ;;  %v2788_v14 = vsel %vm18918_vm8, %v14269_v39, %v2787_v30  ;;  %v2789_v1 = vrot.slane %v2787_v30, 4  ;;  %v14204_v62 = vrot.slane %v14014_v4, 9  ;;  %v1901_v58 = vrot.slane %v14015_v18, 5  ;;  %v14060_v16 = vld [vmem:[%s18477_s8 + $0xc0] sm:$0xc] }
  0xa1   : > { %22326 = vst [vmem:[#allocation27_spill] sm:$0xff] %v19251_v0  ;;  %16271 = vmatprep.mubr.bf16.mxu1 %v19251_v0  ;;  %v1898_v50 = vsel %vm18892_vm7, %v1896_v2, %v1897_v60  ;;  %v1904_v59 = vrot.slane %v14016_v63, 5  ;;  %v14270_v38 = vrot.slane %v14058_v13, 10  ;;  %v2794_v51 = vrot.slane %v14018_v54, 6  ;;  %v14061_v15 = vld [vmem:[%s18477_s8 + $0xc8] sm:$0x3] }
  0xa2   : > { %v19266_v40 = vcombine.low %v1895_v31, %v1898_v50  ;;  %v2791_v4 = vsel %vm18918_vm8, %v2789_v1, %v2790_v52  ;;  %v1902_v18 = vsel %vm18892_vm7, %v14204_v62, %v1901_v58  ;;  %v1903_v39 = vrot.slane %v1901_v58, 4  ;;  %v14020_v30 = vld [vmem:[%s18477_s8 + $0xc0] sm:$0xe]  ;;  %v14022_v2 = vld [vmem:[%s18477_s8 + $0xc8] sm:$0x1] }
  0xa3   : > { %v19273_v0 = vcombine.low %v2788_v14, %v2791_v4  ;;  %v2795_v60 = vsel %vm18918_vm8, %v14270_v38, %v2794_v51  ;;  %v2796_v63 = vrot.slane %v2794_v51, 4  ;;  %v2797_v13 = vrot.slane %v14059_v36, 6  ;;  %v14062_v31 = vld [vmem:[%s18477_s8 + $0xcc] sm:$0xc]  ;;  %v14063_v51 = vld [vmem:[%s18477_s8 + $0xd4] sm:$0x3] }
  0xa4   : > { %v1905_v52 = vsel %vm18892_vm7, %v1903_v39, %v1904_v59  ;;  %v14205_v1 = vrot.slane %v14017_v28, 9  ;;  %v1908_v62 = vrot.slane %v14018_v54, 5  ;;  %v1911_v58 = vrot.slane %v14019_v20, 5  ;;  %v14023_v20 = vld [vmem:[%s18477_s8 + $0xcc] sm:$0xe] }
  0xa5   : > { %22327 = vst [vmem:[#allocation28_spill] sm:$0xff] %v19273_v0  ;;  %16032 = vmatmul.mubr.bf16.gmra.mrb[52].mxu0 %v19266_v40  ;;  %v19283_v14 = vcombine.low %v1902_v18, %v1905_v52  ;;  %v2798_v50 = vsel %vm18918_vm8, %v2796_v63, %v2797_v13  ;;  %v14271_v36 = vrot.slane %v14060_v16, 10  ;;  %v2801_v38 = vrot.slane %v14021_v24, 6  ;;  %v14025_v39 = vld [vmem:[%s18477_s8 + $0xd4] sm:$0x1] }
  0xa6   : > { %v19288_v4 = vcombine.low %v2795_v60, %v2798_v50  ;;  %v1909_v59 = vsel %vm18892_vm7, %v14205_v1, %v1908_v62  ;;  %v1910_v28 = vrot.slane %v1908_v62, 4  ;;  %v2804_v54 = vrot.slane %v14061_v15, 6  ;;  %16272 = vmatmul.mubr.bf16.gmra.mrb[20].mxu1 %v19273_v0  ;;  %v19299_v13 = vld [vmem:[%s18477_s8 + $0xdc] sm:$0xf]  ;;  %v14064_v52 = vld [vmem:[%s18477_s8 + $0xd8] sm:$0xc] }
  0xa7   : > { %16035 = vmatprep.mubr.bf16.mxu0 %v19283_v14  ;;  %v2802_v16 = vsel %vm18918_vm8, %v14271_v36, %v2801_v38  ;;  %v2803_v18 = vrot.slane %v2801_v38, 4  ;;  %v14206_v63 = vrot.slane %v14020_v30, 9  ;;  %v1915_v60 = vrot.slane %v14021_v24, 5  ;;  %v14065_v0 = vld [vmem:[%s18477_s8 + $0xe0] sm:$0x3] }
  0xa8   : > { %22328 = vst [vmem:[#allocation29_spill] sm:$0xff] %v19288_v4  ;;  %16275 = vmatprep.mubr.bf16.mxu1 %v19288_v4  ;;  %v1912_v15 = vsel %vm18892_vm7, %v1910_v28, %v1911_v58  ;;  %v1918_v1 = vrot.slane %v14022_v2, 5  ;;  %v14272_v62 = vrot.slane %v14062_v31, 10  ;;  %v2808_v50 = vrot.slane %v14024_v29, 6  ;;  %v475_v38 = vld [vmem:[%s18477_s8 + $0x18] sm:$0xe] }
  0xa9   : > { %v19306_v17 = vcombine.low %v1909_v59, %v1912_v15  ;;  %v2805_v30 = vsel %vm18918_vm8, %v2803_v18, %v2804_v54  ;;  %v1916_v24 = vsel %vm18892_vm7, %v14206_v63, %v1915_v60  ;;  %v1917_v36 = vrot.slane %v1915_v60, 4  ;;  %v476_v31 = vld [vmem:[%s18477_s8 + $0x1c] sm:$0xf]  ;;  %v477_v28 = vld [vmem:[%s18477_s8 + $0x20] sm:$0x3] }
  0xaa   : > { %v19313_v23 = vcombine.low %v2802_v16, %v2805_v30  ;;  %v2809_v4 = vsel %vm18918_vm8, %v14272_v62, %v2808_v50  ;;  %v2810_v58 = vrot.slane %v2808_v50, 4  ;;  %v2811_v2 = vrot.slane %v14063_v51, 6 }
  0xab   : > { %v1919_v59 = vsel %vm18892_vm7, %v1917_v36, %v1918_v1  ;;  %v14207_v15 = vrot.slane %v14023_v20, 9  ;;  %v1922_v19 = vrot.slane %v14024_v29, 5  ;;  %v1925_v54 = vrot.slane %v14025_v39, 5 }
  0xac   : > { %22329 = vst [vmem:[#allocation30_spill] sm:$0xff] %v19313_v23  ;;  %v19321_v18 = vcombine.low %v1916_v24, %v1919_v59  ;;  %v2812_v63 = vsel %vm18918_vm8, %v2810_v58, %v2811_v2  ;;  %v14363_v16 = vrot.slane %v14064_v52, 10  ;;  %v3861_v60 = vrot.slane %v19299_v13, 6 }
  0xad   : > { %16036 = vmatmul.mubr.bf16.gmra.mrb[56].mxu0 %v19306_v17  ;;  %v19327_v62 = vcombine.low %v2809_v4, %v2812_v63  ;;  %v1924_v51 = vrot.slane %v1922_v19, 4  ;;  %v3864_v50 = vrot.slane %v14065_v0, 6  ;;  %v1923_v29 = vsel %vm18892_vm7, %v14207_v15, %v1922_v19 }
  0xae   : > { %16039 = vmatprep.mubr.bf16.mxu0 %v19321_v18  ;;  %v3863_v20 = vrot.slane %v3861_v60, 4  ;;  %v2313_v39 = vshrl.u32 %v475_v38, 16  ;;  %v2316_v1 = vshll.u32 %v475_v38, 16  ;;  %16276 = vmatmul.mubr.bf16.gmra.mrb[24].mxu1 %v19313_v23  ;;  %v2322_v30 = vshrl.u32 %v476_v31, 16 }
  0xaf   : > { %22330 = vst [vmem:[#allocation31_spill] sm:$0xff] %v19327_v62  ;;  %v1926_v52 = vsel %vm18892_vm7, %v1924_v51, %v1925_v54  ;;  %v2325_v24 = vshll.u32 %v476_v31, 16  ;;  %v2332_v36 = vshrl.u32 %v477_v28, 16  ;;  %16279 = vmatprep.mubr.bf16.mxu1 %v19327_v62  ;;  %v3862_v0 = vsel %vm18918_vm8, %v14363_v16, %v3861_v60 }
  0xb0   : > { %v3865_v4 = vsel %vm18918_vm8, %v3863_v20, %v3864_v50  ;;  %v2315_v19 = vrot.slane %v2313_v39, 5  ;;  %v2318_v58 = vrot.slane %v2316_v1, 6  ;;  %v19340_v2 = vcombine.low %v1923_v29, %v1926_v52  ;;  %v18134_v20 = vld [vmem:[%s22098_s2 + $0x88] sm:$0xff]   ;;  %v18137_v39 = vld [vmem:[%s22098_s2 + $0x1d0] sm:$0xff]   ;;  %v18139_v1 = vld [vmem:[%s22098_s2 + $0x1d8] sm:$0xff]  }
  0xb1   : > { %v2324_v38 = vrot.slane %v2322_v30, 5  ;;  %v2327_v59 = vrot.slane %v2325_v24, 6  ;;  %v2334_v63 = vrot.slane %v2332_v36, 5  ;;  %v2335_v54 = vshll.u32 %v477_v28, 16  ;;  %v18141_v52 = vld [vmem:[%s22098_s2 + $0x1e0] sm:$0xff]   ;;  %v18142_v30 = vld [vmem:[%s22098_s2 + $0xa8] sm:$0xff]  }
  0xb2   : > { %v2319_v15 = vor.u32 %v2318_v58, %v2315_v19  ;;  %v19342_v51 = vcombine.low %v3862_v0, %v3865_v4  ;;  %v18143_v24 = vld [vmem:[%s22098_s2 + $0x1e8] sm:$0xff]   ;;  %v18144_v36 = vld [vmem:[%s22098_s2 + $0xb0] sm:$0xff]   ;;  %v18146_v4 = vld [vmem:[%s22098_s2 + $0xb8] sm:$0xff]   ;;  %vm6346_vm13 = vsmask.f32 5392  ;;  %vm10091_vm14 = vcmask 1040384  }
  0xb3   : > { %v2328_v31 = vor.u32 %v2327_v59, %v2324_v38  ;;  %v2337_v62 = vrot.slane %v2335_v54, 6  ;;  %v18145_v0 = vld [vmem:[%s22098_s2 + $0x1f0] sm:$0xff]   ;;  %v14026_v19 = vld [vmem:[%s18477_s8 + $0xd8] sm:$0xe]  ;;  %v14028_v38 = vld [vmem:[%s18477_s8 + $0xe0] sm:$0x1] }
  0xb4   : > { %v2320_v23 = vrot.slane %v2319_v15, 4  ;;  %v18147_v58 = vld [vmem:[%s22098_s2 + $0x1f8] sm:$0xff]   ;;  %v19413_v59 = vld [vmem:[%s18477_s8 + $0xe8] sm:$0xf]  ;;  %v18148_v15 = vld [vmem:[%s22098_s2 + $0xc0] sm:$0xff]   ;;  %v3204_v54 = vrot.slane %v19299_v13, 5 }
  0xb5   : > { %16040 = vmatmul.mubr.bf16.gmra.mrb[60].mxu0 %v19340_v2  ;;  %v2330_v16 = vrot.slane %v2328_v31, 4  ;;  %v2338_v50 = vor.u32 %v2337_v62, %v2334_v63  ;;  %v18136_v62 = vld [vmem:[%s22098_s2 + $0x90] sm:$0xff]   ;;  %v14313_v63 = vrot.slane %v14026_v19, 9  ;;  %vm10092_vm15 = vcmask 1044484   ;;  %vm20462_vm0 = vmor %vm6345_vm12, %vm6346_vm13 }
  0xb6   : > { %v2329_v60 = vsel %vm18506_vm2, %v2320_v23, %v2328_v31  ;;  %16280 = vmatmul.mubr.bf16.gmra.mrb[28].mxu1 %v19342_v51  ;;  %v18135_v23 = vld [vmem:[%s22098_s2 + $0x1c8] sm:$0xff]   ;;  %v3207_v31 = vrot.slane %v14028_v38, 5  ;;  %v3206_v13 = vrot.slane %v3204_v54, 4  ;;  %vm20492_vm1 = vmor %vm10091_vm14, %vm10092_vm15 }
  0xb7   : > { %v2339_v29 = vsel %vm18506_vm2, %v2330_v16, %v2338_v50  ;;  %16299 = vmatprep.mubr.bf16.mxu1 %v18993_v33  ;;  %v4197_v16 = vrot.slane %v19413_v59, 5  ;;  %v14029_v50 = vld [vmem:[%s18477_s8 + $0xe4] sm:$0xe] }
  0xb8   : > { %v19351_v28 = vcombine.low %v2329_v60, %v2339_v29  ;;  %v18149_v60 = vld [vmem:[%s22098_s2 + $0x200] sm:$0xff]   ;;  %v14389_v29 = vrot.slane %v14029_v50, 9  ;;  %v18150_v50 = vld [vmem:[%s22098_s2 + $0xc8] sm:$0xff]  }
  0xba   : > { %16059 = vmatprep.mubr.bf16.mxu0 %v19351_v28  ;;  %v4198_v38 = vsel %vm18892_vm7, %v14389_v29, %v4197_v16  ;;  %v18157_v29 = vld [vmem:[%s22098_s2 + $0x220] sm:$0xff]  }
  0xbd   : > { %16060 = vmatmul.mubr.bf16.vlgmr.msra.gmra.mrb[32].mxu0 %v18571_v37 }
  0xbe   : > { %16092 = vmatpush3.bf16.msra.mxu0 %v19201_v22  ;;  %16063 = vmatprep.mubr.bf16.mxu0 %v18621_v8  ;;  %v18138_v22 = vld [vmem:[%s22098_s2 + $0x98] sm:$0xff]  }
  0xbf   : > { %16300 = vmatmul.mubr.bf16.vlgmr.msra.gmra.mrb[0].mxu1 %v19028_v12  ;;  %16093 = vmatprep.subr.bf16.mxu0 %v18134_v20 }
  0xc0   : > { %16332 = vmatpush3.bf16.msra.mxu1 %v19217_v61  ;;  %16303 = vmatprep.mubr.bf16.mxu1 %v19062_v35  ;;  %v18140_v61 = vld [vmem:[%s22098_s2 + $0xa0] sm:$0xff]  }
  0xc1   : > { %16333 = vmatprep.subr.bf16.mxu1 %v18135_v23 }
  0xc2   : > { %16094 = vmatpush3.bf16.msra.mxu0 %v18134_v20  ;;  %v4199_v20 = vrot.slane %v4197_v16, 4  ;;  %v18151_v16 = vld [vmem:[%s22098_s2 + $0x208] sm:$0xff]  }
  0xc3   : > { %16095 = vmatprep.subr.bf16.mxu0 %v18136_v62 }
  0xc4   : > { %16334 = vmatpush3.bf16.msra.mxu1 %v18135_v23  ;;  %v18330_v23 = vld [vmem:[%s18477_s8 + $0x1c] sm:$0xf] }
  0xc5   : > { %16064 = vmatmul.mubr.bf16.gmra.mrb[36].mxu0 %v18579_v41  ;;  %16335 = vmatprep.subr.bf16.mxu1 %v18137_v39 }
  0xc6   : > { %16067 = vmatprep.mubr.bf16.mxu0 %v18583_v46  ;;  %16096 = vmatpush3.bf16.msra.mxu0 %v18136_v62  ;;  %v2703_v62 = vrot.slane %v18330_v23, 6  ;;  %v22331_v23 = vld [vmem:[#allocation21_spill] sm:$0xff] }
  0xc7   : > { %16304 = vmatmul.mubr.bf16.gmra.mrb[4].mxu1 %v19094_v7  ;;  %16097 = vmatprep.subr.bf16.mxu0 %v18138_v22 }
  0xc8   : > { %16307 = vmatprep.mubr.bf16.mxu1 %v19126_v34  ;;  %16336 = vmatpush3.bf16.msra.mxu1 %v18137_v39  ;;  %v14031_v39 = vld [vmem:[%s18477_s8 + $0xec] sm:$0x1] }
  0xc9   : > { %16337 = vmatprep.subr.bf16.mxu1 %v18139_v1 }
  0xca   : > { %16098 = vmatpush3.bf16.msra.mxu0 %v18138_v22  ;;  %v14032_v22 = vld [vmem:[%s18477_s8 + $0x18] sm:$0xc] }
  0xcb   : > { %16099 = vmatprep.subr.bf16.mxu0 %v18140_v61 }
  0xcc   : > { %16338 = vmatpush3.bf16.msra.mxu1 %v18139_v1  ;;  %v14033_v1 = vld [vmem:[%s18477_s8 + $0x20] sm:$0x3] }
  0xcd   : > { %16068 = vmatmul.mubr.bf16.gmra.mrb[40].mxu0 %v18587_v47  ;;  %16339 = vmatprep.subr.bf16.mxu1 %v18141_v52 }
  0xce   : > { %16071 = vmatprep.mubr.bf16.mxu0 %v18628_v10  ;;  %16100 = vmatpush3.bf16.msra.mxu0 %v18140_v61  ;;  %v4200_v61 = vrot.slane %v14031_v39, 5  ;;  %v18159_v39 = vld [vmem:[%s22098_s2 + $0x228] sm:$0xff]  }
  0xcf   : > { %16308 = vmatmul.mubr.bf16.gmra.mrb[8].mxu1 %v19158_v11  ;;  %16101 = vmatprep.subr.bf16.mxu0 %v18142_v30 }
  0xd0   : > { %16311 = vmatprep.mubr.bf16.mxu1 %v19192_v55  ;;  %16340 = vmatpush3.bf16.msra.mxu1 %v18141_v52  ;;  %v14257_v52 = vrot.slane %v14032_v22, 10  ;;  %v22332_v22 = vld [vmem:[#allocation22_spill] sm:$0xff] }
  0xd1   : > { %16341 = vmatprep.subr.bf16.mxu1 %v18143_v24 }
  0xd2   : > { %16102 = vmatpush3.bf16.msra.mxu0 %v18142_v30  ;;  %v2705_v30 = vrot.slane %v2703_v62, 4  ;;  %v2704_v19 = vsel %vm18918_vm8, %v14257_v52, %v2703_v62  ;;  %v19499_v62 = vld [vmem:[%s22099_s3] ss:$0 sm:$0xff]  ;;  %v18160_v52 = vld [vmem:[%s22098_s2 + $0xf0] sm:$0xff]  }
  0xd3   : > { %16103 = vmatprep.subr.bf16.mxu0 %v18144_v36 }
  0xd4   : > { %16342 = vmatpush3.bf16.msra.mxu1 %v18143_v24  ;;  %v2706_v24 = vrot.slane %v14033_v1, 6 }
  0xd5   : > { %16072 = vmatmul.mubr.bf16.gmra.mrb[44].mxu0 %v18655_v57  ;;  %16343 = vmatprep.subr.bf16.mxu1 %v18145_v0 }
  0xd6   : > { %16075 = vmatprep.mubr.bf16.mxu0 %v18688_v3  ;;  %16104 = vmatpush3.bf16.msra.mxu0 %v18144_v36  ;;  %v3205_v36 = vsel %vm18892_vm7, %v14313_v63, %v3204_v54  ;;  %v4201_v63 = vsel %vm18892_vm7, %v4199_v20, %v4200_v61  ;;  %v18158_v20 = vld [vmem:[%s22098_s2 + $0xe8] sm:$0xff]   ;;  %v19509_v61 = vld [vmem:[%s22100_s4] ss:$0 sm:$0xff] }
  0xd7   : > { %16312 = vmatmul.mubr.bf16.gmra.mrb[12].mxu1 %v19224_v49  ;;  %16105 = vmatprep.subr.bf16.mxu0 %v18146_v4 }
  0xd8   : > { %16315 = vmatprep.mubr.bf16.mxu1 %v19245_v48  ;;  %16344 = vmatpush3.bf16.msra.mxu1 %v18145_v0  ;;  %v3208_v0 = vsel %vm18892_vm7, %v3206_v13, %v3207_v31  ;;  %v14406_v31 = vcombine.low %v4198_v38, %v4201_v63  ;;  %v18156_v13 = vld [vmem:[%s22098_s2 + $0xe0] sm:$0xff]  }
  0xd9   : > { %16345 = vmatprep.subr.bf16.mxu1 %v18147_v58 }
  0xda   : > { %16106 = vmatpush3.bf16.msra.mxu0 %v18146_v4  ;;  %v19444_v4 = vcombine.low %v3205_v36, %v3208_v0 }
  0xdb   : > { %16139 = vmatprep.subr.bf16.mxu0 %v18148_v15 }
  0xdc   : > { %16346 = vmatpush3.bf16.msra.mxu1 %v18147_v58  ;;  %v2707_v58 = vsel %vm18918_vm8, %v2705_v30, %v2706_v24 }
  0xdd   : > { %16076 = vmatmul.mubr.bf16.gmra.mrb[48].mxu0 %v18726_v6  ;;  %16379 = vmatprep.subr.bf16.mxu1 %v18149_v60  ;;  %v14289_v54 = vcombine.low %v2704_v19, %v2707_v58  ;;  %v18161_v19 = vld [vmem:[%s22098_s2 + $0x230] sm:$0xff]  }
  0xde   : > { %16079 = vmatprep.mubr.bf16.mxu0 %v18758_v43 }
  0xdf   : > { %16316 = vmatmul.mubr.bf16.gmra.mrb[16].mxu1 %v19266_v40 }
  0xe0   : > { %16319 = vmatprep.mubr.bf16.mxu1 %v19283_v14 }
  0xe5   : > { %16080 = vmatmul.mubr.bf16.gmra.mrb[52].mxu0 %v18800_v42 }
  0xe6   : > { %16083 = vmatprep.mubr.bf16.mxu0 %v18821_v45 }
  0xe7   : > { %16320 = vmatmul.mubr.bf16.gmra.mrb[20].mxu1 %v19306_v17 }
  0xe8   : > { %16323 = vmatprep.mubr.bf16.mxu1 %v19321_v18 }
  0xed   : > { %16084 = vmatmul.mubr.bf16.gmra.mrb[56].mxu0 %v18838_v27 }
  0xee   : > { %16087 = vmatprep.mubr.bf16.mxu0 %v18855_v32 }
  0xef   : > { %16324 = vmatmul.mubr.bf16.gmra.mrb[24].mxu1 %v19340_v2 }
  0xf0   : > { %16327 = vmatprep.mubr.bf16.mxu1 %v19444_v4 }
  0xf5   : > { %16088 = vmatmul.mubr.bf16.gmra.mrb[60].mxu0 %v18872_v26 }
  0xf6   : > { %16107 = vmatprep.mubr.bf16.mxu0 %v14289_v54 }
  0xf7   : > { %16328 = vmatmul.mubr.bf16.gmra.mrb[28].mxu1 %v14406_v31 }
  0xf8   : > { %16347 = vmatprep.mubr.bf16.mxu1 %v18621_v8 }
  0xfd   : > { %16108 = vmatmul.mubr.bf16.vlgmr.msra.gmra.mrb[32].mxu0 %v18947_v9  ;;  %v18153_v9 = vld [vmem:[%s22098_s2 + $0x210] sm:$0xff]  }
  0xfe   : > { %16140 = vmatpush3.bf16.msra.mxu0 %v18148_v15  ;;  %16111 = vmatprep.mubr.bf16.mxu0 %v18971_v21  ;;  %v18154_v15 = vld [vmem:[%s22098_s2 + $0xd8] sm:$0xff]  }
  0xff   : > { %16348 = vmatmul.mubr.bf16.vlgmr.msra.gmra.mrb[0].mxu1 %v18579_v41  ;;  %16141 = vmatprep.subr.bf16.mxu0 %v18150_v50 }
 0x100   : > { %16380 = vmatpush3.bf16.msra.mxu1 %v18149_v60  ;;  %16351 = vmatprep.mubr.bf16.mxu1 %v18583_v46  ;;  %v18155_v60 = vld [vmem:[%s22098_s2 + $0x218] sm:$0xff]  }
 0x101   : > { %16381 = vmatprep.subr.bf16.mxu1 %v18151_v16 }
 0x102   : > { %16142 = vmatpush3.bf16.msra.mxu0 %v18150_v50  ;;  %v18162_v50 = vld [vmem:[%s22098_s2 + $0xf8] sm:$0xff]  }
 0x103   : > { %16143 = vmatprep.subr.bf16.mxu0 %v18152_v53 }
 0x104   : > { %16382 = vmatpush3.bf16.msra.mxu1 %v18151_v16 }
 0x105   : > { %16112 = vmatmul.mubr.bf16.gmra.mrb[36].mxu0 %v19003_v5  ;;  %16383 = vmatprep.subr.bf16.mxu1 %v18153_v9 }
 0x106   : > { %16115 = vmatprep.mubr.bf16.mxu0 %v19036_v56  ;;  %16144 = vmatpush3.bf16.msra.mxu0 %v18152_v53 }
 0x107   : > { %16352 = vmatmul.mubr.bf16.gmra.mrb[4].mxu1 %v18587_v47  ;;  %16145 = vmatprep.subr.bf16.mxu0 %v18154_v15 }
 0x108   : > { %16355 = vmatprep.mubr.bf16.mxu1 %v18628_v10  ;;  %16384 = vmatpush3.bf16.msra.mxu1 %v18153_v9 }
 0x109   : > { %16385 = vmatprep.subr.bf16.mxu1 %v18155_v60 }
 0x10a   : > { %16146 = vmatpush3.bf16.msra.mxu0 %v18154_v15 }
 0x10b   : > { %16147 = vmatprep.subr.bf16.mxu0 %v18156_v13 }
 0x10c   : > { %16386 = vmatpush3.bf16.msra.mxu1 %v18155_v60  ;;  %v22333_v60 = vld [vmem:[#allocation23_spill] sm:$0xff] }
 0x10d   : > { %16116 = vmatmul.mubr.bf16.gmra.mrb[40].mxu0 %v22331_v23  ;;  %16387 = vmatprep.subr.bf16.mxu1 %v18157_v29 }
 0x10e   : > { %16119 = vmatprep.mubr.bf16.mxu0 %v22332_v22  ;;  %16148 = vmatpush3.bf16.msra.mxu0 %v18156_v13  ;;  %v18163_v13 = vld [vmem:[%s22098_s2 + $0x238] sm:$0xff]  }
 0x10f   : > { %16356 = vmatmul.mubr.bf16.gmra.mrb[8].mxu1 %v18655_v57  ;;  %v15965_v1 = vpop.f32.mrb[0].mxu0  ;;  %16149 = vmatprep.subr.bf16.mxu0 %v18158_v20 }
 0x110   : > { %v12680_v30 = vmul.f32 %v15965_v1, %v19499_v62  ;;  %v1470_v24 = vpop.f32.mrb[1].mxu0  ;;  %16359 = vmatprep.mubr.bf16.mxu1 %v18688_v3  ;;  %16388 = vmatpush3.bf16.msra.mxu1 %v18157_v29 }
 0x111   : > { %v12678_v36 = vmul.f32 %v19499_v62, %v1470_v24  ;;  %v15966_v0 = vpop.f32.mrb[2].mxu0  ;;  %16389 = vmatprep.subr.bf16.mxu1 %v18159_v39 }
 0x112   : > { %v12717_v58 = vadd.f32 %v19509_v61, %v12680_v30  ;;  %v12681_v38 = vmul.f32 %v15966_v0, %v19499_v62  ;;  %v1473_v63 = vpop.f32.mrb[3].mxu0  ;;  %16150 = vmatpush3.bf16.msra.mxu0 %v18158_v20 }
 0x113   : > { %v12715_v54 = vadd.f32 %v19509_v61, %v12678_v36  ;;  %v12679_v31 = vmul.f32 %v19499_v62, %v1473_v63  ;;  %16151 = vmatprep.subr.bf16.mxu0 %v18160_v52  ;;  %v19544_v36 = vld [vmem:[%s22098_s2 + $0x240] sm:$0xff]  }
 0x114   : > { %v12749_v16 = vmax.f32 %v12717_v58, 0.0  ;;  %v12718_v53 = vadd.f32 %v19509_v61, %v12681_v38  ;;  %16390 = vmatpush3.bf16.msra.mxu1 %v18159_v39  ;;  %v22334_v39 = vld [vmem:[#allocation24_spill] sm:$0xff] }
 0x115   : > { %v12747_v9 = vmax.f32 %v12715_v54, 0.0  ;;  %v12716_v15 = vadd.f32 %v19509_v61, %v12679_v31  ;;  %16120 = vmatmul.mubr.bf16.gmra.mrb[44].mxu0 %v22333_v60  ;;  %16391 = vmatprep.subr.bf16.mxu1 %v18161_v19  ;;  %v19554_v31 = vld [vmem:[%s22098_s2 + $0x480] sm:$0xff]  }
 0x116   : > { %v15149_v29 = vpack.c.bf16 %v12749_v16, %v12749_v16  ;;  %v12750_v20 = vmax.f32 %v12718_v53, 0.0  ;;  %16123 = vmatprep.mubr.bf16.mxu0 %v22334_v39  ;;  %16152 = vmatpush3.bf16.msra.mxu0 %v18160_v52 }
 0x117   : > { %v15147_v1 = vpack.c.bf16 %v12747_v9, %v12747_v9  ;;  %v12748_v30 = vmax.f32 %v12716_v15, 0.0  ;;  %16360 = vmatmul.mubr.bf16.gmra.mrb[12].mxu1 %v18726_v6  ;;  %v15969_v24 = vpop.f32.mrb[4].mxu0  ;;  %16153 = vmatprep.subr.bf16.mxu0 %v18162_v50 }
 0x118   : > { %12909 = vst [vmem:[%s19532_s19 + $0x20] sm:$0xf] %v15149_v29  ;;  %v15150_v0 = vpack.c.bf16 %v12750_v20, %v12750_v20  ;;  %v12684_v58 = vmul.f32 %v15969_v24, %v19499_v62  ;;  %v1486_v38 = vpop.f32.mrb[5].mxu0  ;;  %16363 = vmatprep.mubr.bf16.mxu1 %v18758_v43  ;;  %16392 = vmatpush3.bf16.msra.mxu1 %v18161_v19  ;;  %v526_v29 = vld [vmem:[%s18477_s8 + $0xe4] sm:$0xe] }
 0x119   : > { %12907 = vst [vmem:[%s19532_s19] sm:$0xf] %v15147_v1  ;;  %v15148_v52 = vpack.c.bf16 %v12748_v30, %v12748_v30  ;;  %v12682_v63 = vmul.f32 %v19499_v62, %v1486_v38  ;;  %v15970_v54 = vpop.f32.mrb[6].mxu0  ;;  %16393 = vmatprep.subr.bf16.mxu1 %v18163_v13  ;;  %v527_v30 = vld [vmem:[%s18477_s8 + $0xe8] sm:$0xf] }
 0x11a   : > { %12910 = vst [vmem:[%s19532_s19 + $0x30] sm:$0xf] %v15150_v0  ;;  %v12721_v16 = vadd.f32 %v19509_v61, %v12684_v58  ;;  %v12685_v53 = vmul.f32 %v15970_v54, %v19499_v62  ;;  %v1489_v9 = vpop.f32.mrb[7].mxu0  ;;  %16154 = vmatpush3.bf16.msra.mxu0 %v18162_v50  ;;  %v22335_v58 = vld [vmem:[#allocation25_spill] sm:$0xff]  ;;  %v4532_v54 = vshll.u32 %v526_v29, 16 }
 0x11b   : > { %12908 = vst [vmem:[%s19532_s19 + $0x10] sm:$0xf] %v15148_v52  ;;  %v12719_v19 = vadd.f32 %v19509_v61, %v12682_v63  ;;  %v12683_v15 = vmul.f32 %v19499_v62, %v1489_v9  ;;  %16427 = vmatprep.subr.bf16.mxu0 %v19544_v36  ;;  %v22336_v52 = vld [vmem:[#allocation26_spill] sm:$0xff]  ;;  %v4529_v63 = vshrl.u32 %v526_v29, 16  ;;  %v4538_v9 = vshrl.u32 %v527_v30, 16 }
 0x11c   : > { %v12753_v20 = vmax.f32 %v12721_v16, 0.0  ;;  %v12722_v1 = vadd.f32 %v19509_v61, %v12685_v53  ;;  %16394 = vmatpush3.bf16.msra.mxu1 %v18163_v13  ;;  %v4534_v3 = vrot.slane %v4532_v54, 6  ;;  %v22338_v54 = vld [vmem:[#allocation28_spill] sm:$0xff] }
 0x11d   : > { %v12751_v24 = vmax.f32 %v12719_v19, 0.0  ;;  %v12720_v0 = vadd.f32 %v19509_v61, %v12683_v15  ;;  %16124 = vmatmul.mubr.bf16.gmra.mrb[48].mxu0 %v22335_v58  ;;  %16859 = vmatprep.subr.bf16.mxu1 %v19554_v31  ;;  %v4540_v57 = vrot.slane %v4538_v9, 5 }
 0x11e   : > { %v15153_v50 = vpack.c.bf16 %v12753_v20, %v12753_v20  ;;  %v12754_v38 = vmax.f32 %v12722_v1, 0.0  ;;  %16127 = vmatprep.mubr.bf16.mxu0 %v22336_v52  ;;  %v528_v20 = vld [vmem:[%s18477_s8 + $0xec] sm:$0x3]  ;;  %v4541_v1 = vshll.u32 %v527_v30, 16 }
 0x11f   : > { %v15151_v16 = vpack.c.bf16 %v12751_v24, %v12751_v24  ;;  %v12752_v53 = vmax.f32 %v12720_v0, 0.0  ;;  %16364 = vmatmul.mubr.bf16.gmra.mrb[16].mxu1 %v18800_v42  ;;  %v15973_v13 = vpop.f32.mrb[8].mxu0  ;;  %v4548_v30 = vshrl.u32 %v528_v20, 16 }
 0x120   : > { %12913 = vst [vmem:[%s19532_s19 + $0x60] sm:$0xf] %v15153_v50  ;;  %v15154_v19 = vpack.c.bf16 %v12754_v38, %v12754_v38  ;;  %v12688_v15 = vmul.f32 %v15973_v13, %v19499_v62  ;;  %v1502_v43 = vpop.f32.mrb[9].mxu0  ;;  %16367 = vmatprep.mubr.bf16.mxu1 %v18821_v45  ;;  %v4531_v38 = vrot.slane %v4529_v63, 5 }
 0x121   : > { %12911 = vst [vmem:[%s19532_s19 + $0x40] sm:$0xf] %v15151_v16  ;;  %v15152_v6 = vpack.c.bf16 %v12752_v53, %v12752_v53  ;;  %v12686_v29 = vmul.f32 %v19499_v62, %v1502_v43  ;;  %v15974_v24 = vpop.f32.mrb[10].mxu0  ;;  %v4543_v53 = vrot.slane %v4541_v1, 6 }
 0x122   : > { %12914 = vst [vmem:[%s19532_s19 + $0x70] sm:$0xf] %v15154_v19  ;;  %v12725_v0 = vadd.f32 %v19509_v61, %v12688_v15  ;;  %v12689_v42 = vmul.f32 %v15974_v24, %v19499_v62  ;;  %v1505_v50 = vpop.f32.mrb[11].mxu0  ;;  %v4551_v19 = vshll.u32 %v528_v20, 16  ;;  %v22337_v24 = vld [vmem:[#allocation27_spill] sm:$0xff] }
 0x123   : > { %12912 = vst [vmem:[%s19532_s19 + $0x50] sm:$0xf] %v15152_v6  ;;  %v12723_v13 = vadd.f32 %v19509_v61, %v12686_v29  ;;  %v12687_v45 = vmul.f32 %v19499_v62, %v1505_v50 }
 0x124   : > { %v12757_v16 = vmax.f32 %v12725_v0, 0.0  ;;  %v12726_v43 = vadd.f32 %v19509_v61, %v12689_v42  ;;  %v4535_v0 = vor.u32 %v4534_v3, %v4531_v38  ;;  %v4550_v42 = vrot.slane %v4548_v30, 5 }
 0x125   : > { %v12755_v10 = vmax.f32 %v12723_v13, 0.0  ;;  %v12724_v15 = vadd.f32 %v19509_v61, %v12687_v45  ;;  %16128 = vmatmul.mubr.bf16.gmra.mrb[52].mxu0 %v22337_v24  ;;  %v4544_v13 = vor.u32 %v4543_v53, %v4540_v57 }
 0x126   : > { %v15157_v63 = vpack.c.bf16 %v12757_v16, %v12757_v16  ;;  %v12758_v6 = vmax.f32 %v12726_v43, 0.0  ;;  %16131 = vmatprep.mubr.bf16.mxu0 %v22338_v54  ;;  %v4553_v16 = vrot.slane %v4551_v19, 6 }
 0x127   : > { %v15155_v29 = vpack.c.bf16 %v12755_v10, %v12755_v10  ;;  %v12756_v50 = vmax.f32 %v12724_v15, 0.0  ;;  %16368 = vmatmul.mubr.bf16.gmra.mrb[20].mxu1 %v18838_v27  ;;  %v15977_v9 = vpop.f32.mrb[12].mxu0  ;;  %v4546_v19 = vrot.slane %v4544_v13, 4 }
 0x128   : > { %12917 = vst [vmem:[%s19532_s19 + $0xa0] sm:$0xf] %v15157_v63  ;;  %v15158_v20 = vpack.c.bf16 %v12758_v6, %v12758_v6  ;;  %v12692_v45 = vmul.f32 %v15977_v9, %v19499_v62  ;;  %v1518_v1 = vpop.f32.mrb[13].mxu0  ;;  %16371 = vmatprep.mubr.bf16.mxu1 %v18855_v32  ;;  %v4536_v6 = vrot.slane %v4535_v0, 4 }
 0x129   : > { %12915 = vst [vmem:[%s19532_s19 + $0x80] sm:$0xf] %v15155_v29  ;;  %v15156_v43 = vpack.c.bf16 %v12756_v50, %v12756_v50  ;;  %v12690_v10 = vmul.f32 %v19499_v62, %v1518_v1  ;;  %v15978_v15 = vpop.f32.mrb[14].mxu0  ;;  %v4554_v29 = vor.u32 %v4553_v16, %v4550_v42 }
 0x12a   : > { %12918 = vst [vmem:[%s19532_s19 + $0xb0] sm:$0xf] %v15158_v20  ;;  %v12729_v27 = vadd.f32 %v19509_v61, %v12692_v45  ;;  %v12693_v3 = vmul.f32 %v15978_v15, %v19499_v62  ;;  %v1521_v38 = vpop.f32.mrb[15].mxu0  ;;  %v22339_v20 = vld [vmem:[#allocation29_spill] sm:$0xff] }
 0x12b   : > { %12916 = vst [vmem:[%s19532_s19 + $0x90] sm:$0xf] %v15156_v43  ;;  %v12727_v30 = vadd.f32 %v19509_v61, %v12690_v10  ;;  %v12691_v63 = vmul.f32 %v19499_v62, %v1521_v38  ;;  %v22340_v43 = vld [vmem:[#allocation30_spill] sm:$0xff]  ;;  %v4545_v38 = vsel %vm18506_vm2, %v4536_v6, %v4544_v13 }
 0x12c   : > { %v12761_v57 = vmax.f32 %v12729_v27, 0.0  ;;  %v12730_v53 = vadd.f32 %v19509_v61, %v12693_v3  ;;  %v22341_v3 = vld [vmem:[#allocation19_spill] sm:$0xff] }
 0x12d   : > { %v12759_v50 = vmax.f32 %v12727_v30, 0.0  ;;  %v12728_v9 = vadd.f32 %v19509_v61, %v12691_v63  ;;  %16132 = vmatmul.mubr.bf16.gmra.mrb[56].mxu0 %v22339_v20  ;;  %v4555_v30 = vsel %vm18506_vm2, %v4546_v19, %v4554_v29 }
 0x12e   : > { %v15161_v45 = vpack.c.bf16 %v12761_v57, %v12761_v57  ;;  %v12762_v1 = vmax.f32 %v12730_v53, 0.0  ;;  %16135 = vmatprep.mubr.bf16.mxu0 %v22340_v43  ;;  %v19619_v6 = vcombine.low %v4545_v38, %v4555_v30 }
 0x12f   : > { %v15159_v10 = vpack.c.bf16 %v12759_v50, %v12759_v50  ;;  %v12760_v15 = vmax.f32 %v12728_v9, 0.0  ;;  %16372 = vmatmul.mubr.bf16.gmra.mrb[24].mxu1 %v18872_v26  ;;  %v15981_v27 = vpop.f32.mrb[16].mxu0 }
 0x130   : > { %12921 = vst [vmem:[%s19532_s19 + $0xe0] sm:$0xf] %v15161_v45  ;;  %v15162_v0 = vpack.c.bf16 %v12762_v1, %v12762_v1  ;;  %v12696_v42 = vmul.f32 %v15981_v27, %v19499_v62  ;;  %v1534_v16 = vpop.f32.mrb[17].mxu0  ;;  %16375 = vmatprep.mubr.bf16.mxu1 %v22341_v3  ;;  %22342 = vst [vmem:[#allocation21_spill] sm:$0xff] %v19619_v6  ;;  %v22343_v27 = vld [vmem:[#allocation31_spill] sm:$0xff] }
 0x131   : > { %12919 = vst [vmem:[%s19532_s19 + $0xc0] sm:$0xf] %v15159_v10  ;;  %v15160_v63 = vpack.c.bf16 %v12760_v15, %v12760_v15  ;;  %v12694_v57 = vmul.f32 %v19499_v62, %v1534_v16  ;;  %v15982_v53 = vpop.f32.mrb[18].mxu0  ;;  %v22344_v16 = vld [vmem:[#allocation20_spill] sm:$0xff]  ;;  %v19918_v3 = vld [vmem:[%s18477_s8 + $0x4] sm:$0xf] }
 0x132   : > { %12922 = vst [vmem:[%s19532_s19 + $0xf0] sm:$0xf] %v15162_v0  ;;  %v12733_v50 = vadd.f32 %v19509_v61, %v12696_v42  ;;  %v12697_v9 = vmul.f32 %v15982_v53, %v19499_v62  ;;  %v1537_v45 = vpop.f32.mrb[19].mxu0 }
 0x133   : > { %12920 = vst [vmem:[%s19532_s19 + $0xd0] sm:$0xf] %v15160_v63  ;;  %v12731_v1 = vadd.f32 %v19509_v61, %v12694_v57  ;;  %v12695_v13 = vmul.f32 %v19499_v62, %v1537_v45 }
 0x134   : > { %v12765_v19 = vmax.f32 %v12733_v50, 0.0  ;;  %v12734_v29 = vadd.f32 %v19509_v61, %v12697_v9 }
 0x135   : > { %v12763_v10 = vmax.f32 %v12731_v1, 0.0  ;;  %v12732_v15 = vadd.f32 %v19509_v61, %v12695_v13  ;;  %16136 = vmatmul.mubr.bf16.gmra.mrb[60].mxu0 %v22343_v27 }
 0x136   : > { %v15165_v0 = vpack.c.bf16 %v12765_v19, %v12765_v19  ;;  %v12766_v42 = vmax.f32 %v12734_v29, 0.0  ;;  %16155 = vmatprep.mubr.bf16.mxu0 %v22344_v16 }
 0x137   : > { %v15163_v63 = vpack.c.bf16 %v12763_v10, %v12763_v10  ;;  %v12764_v57 = vmax.f32 %v12732_v15, 0.0  ;;  %16376 = vmatmul.mubr.bf16.gmra.mrb[28].mxu1 %v19619_v6  ;;  %v15985_v38 = vpop.f32.mrb[20].mxu0  ;;  %v14074_v6 = vld [vmem:[%s18477_s8 + $0x24] sm:$0xf] }
 0x138   : > { %12925 = vst [vmem:[%s19532_s19 + $0x120] sm:$0xf] %v15165_v0  ;;  %v15166_v30 = vpack.c.bf16 %v12766_v42, %v12766_v42  ;;  %v12700_v53 = vmul.f32 %v15985_v38, %v19499_v62  ;;  %v1550_v50 = vpop.f32.mrb[21].mxu0  ;;  %16395 = vmatprep.mubr.bf16.mxu1 %v18971_v21  ;;  %v18166_v21 = vld [vmem:[%s22098_s2 + $0x248] sm:$0xff]   ;;  %v19647_v38 = vld [vmem:[%s18477_s8 + $0xe4] sm:$0xc] }
 0x139   : > { %12923 = vst [vmem:[%s19532_s19 + $0x100] sm:$0xf] %v15163_v63  ;;  %v15164_v9 = vpack.c.bf16 %v12764_v57, %v12764_v57  ;;  %v12698_v45 = vmul.f32 %v19499_v62, %v1550_v50  ;;  %v15986_v1 = vpop.f32.mrb[22].mxu0  ;;  %v18167_v57 = vld [vmem:[%s22098_s2 + $0x488] sm:$0xff]   ;;  %v18168_v50 = vld [vmem:[%s22098_s2 + $0x250] sm:$0xff]  }
 0x13a   : > { %12926 = vst [vmem:[%s19532_s19 + $0x130] sm:$0xf] %v15166_v30  ;;  %v12737_v13 = vadd.f32 %v19509_v61, %v12700_v53  ;;  %v12701_v19 = vmul.f32 %v15986_v1, %v19499_v62  ;;  %v1553_v29 = vpop.f32.mrb[23].mxu0  ;;  %v18169_v1 = vld [vmem:[%s22098_s2 + $0x490] sm:$0xff]  }
 0x13b   : > { %12924 = vst [vmem:[%s19532_s19 + $0x110] sm:$0xf] %v15164_v9  ;;  %v12735_v10 = vadd.f32 %v19509_v61, %v12698_v45  ;;  %v12699_v15 = vmul.f32 %v19499_v62, %v1553_v29 }
 0x13c   : > { %v12769_v0 = vmax.f32 %v12737_v13, 0.0  ;;  %v12738_v42 = vadd.f32 %v19509_v61, %v12701_v19  ;;  %v19659_v13 = vld [vmem:[%s18477_s8 + $0xc] sm:$0xf] }
 0x13d   : > { %v12767_v16 = vmax.f32 %v12735_v10, 0.0  ;;  %v12736_v63 = vadd.f32 %v19509_v61, %v12699_v15  ;;  %16156 = vmatmul.mubr.bf16.vlgmr.msra.gmra.mrb[32].mxu0 %v18993_v33 }
 0x13e   : > { %v15169_v30 = vpack.c.bf16 %v12769_v0, %v12769_v0  ;;  %v12770_v53 = vmax.f32 %v12738_v42, 0.0  ;;  %16428 = vmatpush3.bf16.msra.mxu0 %v19544_v36  ;;  %16159 = vmatprep.mubr.bf16.mxu0 %v19028_v12  ;;  %v19712_v0 = vld [vmem:[%s18477_s8 + $0x14] sm:$0x1] }
 0x13f   : > { %v15167_v9 = vpack.c.bf16 %v12767_v16, %v12767_v16  ;;  %v12768_v45 = vmax.f32 %v12736_v63, 0.0  ;;  %16396 = vmatmul.mubr.bf16.vlgmr.msra.gmra.mrb[0].mxu1 %v19003_v5  ;;  %v15989_v33 = vpop.f32.mrb[24].mxu0  ;;  %16429 = vmatprep.subr.bf16.mxu0 %v18166_v21  ;;  %v22144_v5 = vrot.slane %v19413_v59, 6  ;;  %v19676_v63 = vld [vmem:[%s18477_s8 + $0x10] sm:$0xf] }
 0x140   : > { %12929 = vst [vmem:[%s19532_s19 + $0x160] sm:$0xf] %v15169_v30  ;;  %v15170_v12 = vpack.c.bf16 %v12770_v53, %v12770_v53  ;;  %16860 = vmatpush3.bf16.msra.mxu1 %v19554_v31  ;;  %v12704_v36 = vmul.f32 %v15989_v33, %v19499_v62  ;;  %v1566_v19 = vpop.f32.mrb[25].mxu0  ;;  %16399 = vmatprep.mubr.bf16.mxu1 %v19036_v56  ;;  %v18170_v31 = vld [vmem:[%s22098_s2 + $0x258] sm:$0xff]   ;;  %v5222_v30 = vshrl.u32 %v19659_v13, 16 }
 0x141   : > { %12927 = vst [vmem:[%s19532_s19 + $0x140] sm:$0xf] %v15167_v9  ;;  %v15168_v29 = vpack.c.bf16 %v12768_v45, %v12768_v45  ;;  %v12702_v10 = vmul.f32 %v19499_v62, %v1566_v19  ;;  %v15990_v15 = vpop.f32.mrb[26].mxu0  ;;  %16861 = vmatprep.subr.bf16.mxu1 %v18167_v57  ;;  %v18171_v45 = vld [vmem:[%s22098_s2 + $0x498] sm:$0xff]  }
 0x142   : > { %12930 = vst [vmem:[%s19532_s19 + $0x170] sm:$0xf] %v15170_v12  ;;  %v12741_v42 = vadd.f32 %v19509_v61, %v12704_v36  ;;  %v12705_v56 = vmul.f32 %v15990_v15, %v19499_v62  ;;  %v1569_v16 = vpop.f32.mrb[27].mxu0  ;;  %16430 = vmatpush3.bf16.msra.mxu0 %v18166_v21  ;;  %v14071_v33 = vld [vmem:[%s18477_s8 + $0x18] sm:$0xf]  ;;  %v19689_v21 = vrot.slane %v22144_v5, 4 }
 0x143   : > { %12928 = vst [vmem:[%s19532_s19 + $0x150] sm:$0xf] %v15168_v29  ;;  %v12739_v53 = vadd.f32 %v19509_v61, %v12702_v10  ;;  %v12703_v9 = vmul.f32 %v19499_v62, %v1569_v16  ;;  %16431 = vmatprep.subr.bf16.mxu0 %v18168_v50  ;;  %v18172_v10 = vld [vmem:[%s22098_s2 + $0x260] sm:$0xff]   ;;  %v5225_v15 = vshll.u32 %v19659_v13, 16  ;;  %v22146_v16 = vshrl.u32 %v19676_v63, 16 }
 0x144   : > { %v12773_v12 = vmax.f32 %v12741_v42, 0.0  ;;  %v12742_v36 = vadd.f32 %v19509_v61, %v12705_v56  ;;  %16862 = vmatpush3.bf16.msra.mxu1 %v18167_v57  ;;  %v22145_v42 = vshll.u32 %v19676_v63, 16  ;;  %v18173_v13 = vld [vmem:[%s22098_s2 + $0x4a0] sm:$0xff]  }
 0x145   : > { %v12771_v19 = vmax.f32 %v12739_v53, 0.0  ;;  %v12740_v29 = vadd.f32 %v19509_v61, %v12703_v9  ;;  %16160 = vmatmul.mubr.bf16.gmra.mrb[36].mxu0 %v19062_v35  ;;  %16863 = vmatprep.subr.bf16.mxu1 %v18169_v1  ;;  %v19701_v35 = vld [vmem:[%s18477_s8 + $0x1c] sm:$0xf] }
 0x146   : > { %v15173_v57 = vpack.c.bf16 %v12773_v12, %v12773_v12  ;;  %v12774_v56 = vmax.f32 %v12742_v36, 0.0  ;;  %16163 = vmatprep.mubr.bf16.mxu0 %v19094_v7  ;;  %16432 = vmatpush3.bf16.msra.mxu0 %v18168_v50  ;;  %v19707_v12 = vrot.slane %v5222_v30, 4  ;;  %v5246_v7 = vshrl.u32 %v14071_v33, 16  ;;  %v18174_v30 = vld [vmem:[%s22098_s2 + $0x268] sm:$0xff]  }
 0x147   : > { %v15171_v53 = vpack.c.bf16 %v12771_v19, %v12771_v19  ;;  %v12772_v9 = vmax.f32 %v12740_v29, 0.0  ;;  %16400 = vmatmul.mubr.bf16.gmra.mrb[4].mxu1 %v22331_v23  ;;  %16433 = vmatprep.subr.bf16.mxu0 %v18170_v31  ;;  %v5249_v19 = vshll.u32 %v14071_v33, 16  ;;  %v19725_v33 = vrot.slane %v22145_v42, 5 }
 0x148   : > { %12933 = vst [vmem:[%s19532_s19 + $0x1a0] sm:$0xf] %v15173_v57  ;;  %v15174_v50 = vpack.c.bf16 %v12774_v56, %v12774_v56  ;;  %v15993_v36 = vpop.f32.mrb[28].mxu0  ;;  %16403 = vmatprep.mubr.bf16.mxu1 %v22332_v22  ;;  %16864 = vmatpush3.bf16.msra.mxu1 %v18169_v1  ;;  %v19719_v57 = vrot.slane %v5225_v15, 5  ;;  %v5237_v56 = vrot.slane %v22146_v16, 4 }
 0x149   : > { %12931 = vst [vmem:[%s19532_s19 + $0x180] sm:$0xf] %v15171_v53  ;;  %v15172_v23 = vpack.c.bf16 %v12772_v9, %v12772_v9  ;;  %v12708_v29 = vmul.f32 %v15993_v36, %v19499_v62  ;;  %v1582_v5 = vpop.f32.mrb[29].mxu0  ;;  %16865 = vmatprep.subr.bf16.mxu1 %v18171_v45 }
 0x14a   : > { %12934 = vst [vmem:[%s19532_s19 + $0x1b0] sm:$0xf] %v15174_v50  ;;  %v12706_v22 = vmul.f32 %v19499_v62, %v1582_v5  ;;  %v15994_v1 = vpop.f32.mrb[30].mxu0  ;;  %16434 = vmatpush3.bf16.msra.mxu0 %v18170_v31  ;;  %v18175_v5 = vld [vmem:[%s22098_s2 + $0x4a8] sm:$0xff]   ;;  %v5241_v31 = vshll.u32 %v19712_v0, 16  ;;  %v18176_v0 = vld [vmem:[%s22098_s2 + $0x270] sm:$0xff]  }
 0x14b   : > { %12932 = vst [vmem:[%s19532_s19 + $0x190] sm:$0xf] %v15172_v23  ;;  %v12745_v9 = vadd.f32 %v19509_v61, %v12708_v29  ;;  %v12709_v15 = vmul.f32 %v15994_v1, %v19499_v62  ;;  %v1585_v36 = vpop.f32.mrb[31].mxu0  ;;  %16435 = vmatprep.subr.bf16.mxu0 %v18172_v10  ;;  %v19738_v50 = vld [vmem:[%s18477_s8 + $0x20] sm:$0x1]  ;;  %v19742_v29 = vrot.slane %v5246_v7, 4 }
 0x14c   : > { %v12743_v42 = vadd.f32 %v19509_v61, %v12706_v22  ;;  %v12707_v23 = vmul.f32 %v19499_v62, %v1585_v36  ;;  %16866 = vmatpush3.bf16.msra.mxu1 %v18171_v45  ;;  %v19744_v1 = vrot.slane %v5249_v19, 5  ;;  %v19756_v7 = vld [vmem:[%s18477_s8 + $0xec] sm:$0x3]  ;;  %v22345_v19 = vshll.u32 %v19701_v35, 16 }
 0x14d   : > { %v12777_v16 = vmax.f32 %v12745_v9, 0.0  ;;  %v12746_v53 = vadd.f32 %v19509_v61, %v12709_v15  ;;  %16164 = vmatmul.mubr.bf16.gmra.mrb[40].mxu0 %v19126_v34  ;;  %16867 = vmatprep.subr.bf16.mxu1 %v18173_v13  ;;  %v5228_v34 = vor.u32 %v19719_v57, %v19707_v12  ;;  %v19765_v15 = vld [vmem:[%s18477_s8 + $0x28] sm:$0xf]  ;;  %v22354_v32 = vrot.slane %v19756_v7, 6 }
 0x14e   : > { %v12775_v62 = vmax.f32 %v12743_v42, 0.0  ;;  %v12744_v45 = vadd.f32 %v19509_v61, %v12707_v23  ;;  %16167 = vmatprep.mubr.bf16.mxu0 %v19158_v11  ;;  %16436 = vmatpush3.bf16.msra.mxu0 %v18172_v10  ;;  %v19762_v9 = vrot.slane %v22345_v19, 5  ;;  %v18177_v11 = vld [vmem:[%s22098_s2 + $0x4b0] sm:$0xff]   ;;  %v5238_v61 = vor.u32 %v5237_v56, %v19725_v33 }
 0x14f   : > { %v15177_v36 = vpack.c.bf16 %v12777_v16, %v12777_v16  ;;  %v12778_v22 = vmax.f32 %v12746_v53, 0.0  ;;  %16404 = vmatmul.mubr.bf16.gmra.mrb[8].mxu1 %v22333_v60  ;;  %16437 = vmatprep.subr.bf16.mxu0 %v18174_v30  ;;  %v5265_v10 = vshll.u32 %v19738_v50, 16  ;;  %v14077_v42 = vld [vmem:[%s18477_s8 + $0x30] sm:$0xf]  ;;  %v5270_v16 = vshrl.u32 %v14074_v6, 16 }
 0x150   : > { %v15175_v12 = vpack.c.bf16 %v12775_v62, %v12775_v62  ;;  %v12776_v57 = vmax.f32 %v12744_v45, 0.0  ;;  %16407 = vmatprep.mubr.bf16.mxu1 %v22334_v39  ;;  %16868 = vmatpush3.bf16.msra.mxu1 %v18173_v13  ;;  %v22346_v53 = vshrl.u32 %v19701_v35, 16  ;;  %v5273_v19 = vshll.u32 %v14074_v6, 16  ;;  %v18178_v13 = vld [vmem:[%s22098_s2 + $0x278] sm:$0xff]   ;;  %v14076_v6 = vld [vmem:[%s18477_s8 + $0x2c] sm:$0x1] }
 0x151   : > { %12937 = vst [vmem:[%s19532_s19 + $0x1e0] sm:$0xf] %v15177_v36  ;;  %v15178_v60 = vpack.c.bf16 %v12778_v22, %v12778_v22  ;;  %16869 = vmatprep.subr.bf16.mxu1 %v18175_v5  ;;  %v22150_v50 = vshll.u32 %v19765_v15, 16  ;;  %v22151_v62 = vshrl.u32 %v19765_v15, 16  ;;  %v19786_v22 = vrot.slane %v5228_v34, 4 }
 0x152   : > { %v5261_v23 = vrot.slane %v22346_v53, 4  ;;  %12935 = vst [vmem:[%s19532_s19 + $0x1c0] sm:$0xf] %v15175_v12  ;;  %v15176_v56 = vpack.c.bf16 %v12776_v57, %v12776_v57  ;;  %16438 = vmatpush3.bf16.msra.mxu0 %v18174_v30  ;;  %v19788_v45 = vrot.slane %v5238_v61, 4  ;;  %v5294_v30 = vshrl.u32 %v14077_v42, 16  ;;  %v18179_v12 = vld [vmem:[%s22098_s2 + $0x4b8] sm:$0xff]  }
 0x153   : > { %12938 = vst [vmem:[%s19532_s19 + $0x1f0] sm:$0xf] %v15178_v60  ;;  %16439 = vmatprep.subr.bf16.mxu0 %v18176_v0  ;;  %v5297_v36 = vshll.u32 %v14077_v42, 16  ;;  %v19796_v57 = vrot.slane %v5241_v31, 5  ;;  %v5252_v34 = vor.u32 %v19744_v1, %v19742_v29  ;;  %v5272_v61 = vrot.slane %v5270_v16, 4 }
 0x154   : > { %12936 = vst [vmem:[%s19532_s19 + $0x1d0] sm:$0xf] %v15176_v56  ;;  %16870 = vmatpush3.bf16.msra.mxu1 %v18175_v5  ;;  %v5275_v60 = vrot.slane %v5273_v19, 5  ;;  %v5262_v5 = vor.u32 %v5261_v23, %v19762_v9  ;;  %v19802_v42 = vrot.slane %v5265_v10, 5  ;;  %v5285_v31 = vrot.slane %v22151_v62, 4 }
 0x155   : > { %16168 = vmatmul.mubr.bf16.gmra.mrb[44].mxu0 %v19192_v55  ;;  %16871 = vmatprep.subr.bf16.mxu1 %v18177_v11  ;;  %v19806_v55 = vrot.slane %v22150_v50, 5  ;;  %v5289_v29 = vshll.u32 %v14076_v6, 16  ;;  %v19817_v1 = vld [vmem:[%s18477_s8 + $0x34] sm:$0xf]  ;;  %v5299_v10 = vrot.slane %v5297_v36, 5  ;;  %v19820_v16 = vrot.slane %v5252_v34, 4 }
 0x156   : > { %16171 = vmatprep.mubr.bf16.mxu0 %v19224_v49  ;;  %16440 = vmatpush3.bf16.msra.mxu0 %v18176_v0  ;;  %v19814_v49 = vld [vmem:[%s22098_s2 + $0x280] sm:$0xff]   ;;  %v5296_v0 = vrot.slane %v5294_v30, 4  ;;  %v5276_v53 = vor.u32 %v5275_v60, %v5272_v61  ;;  %v14079_v23 = vld [vmem:[%s18477_s8 + $0x38] sm:$0x1]  ;;  %v19828_v19 = vrot.slane %v5262_v5, 4  ;;  %v22152_v34 = vshrl.u32 %v19817_v1, 16 }
 0x157   : > { %16408 = vmatmul.mubr.bf16.gmra.mrb[12].mxu1 %v22335_v58  ;;  %16441 = vmatprep.subr.bf16.mxu0 %v18178_v13  ;;  %v19825_v58 = vld [vmem:[%s22098_s2 + $0x4c0] sm:$0xff]   ;;  %v5286_v56 = vor.u32 %v5285_v31, %v19806_v55  ;;  %v19837_v30 = vrot.slane %v5289_v29, 5  ;;  %v5313_v61 = vshll.u32 %v14079_v23, 16  ;;  %v14083_v60 = vld [vmem:[%s18477_s8 + $0x48] sm:$0xf]  ;;  %v5258_v25 = vsel %vm19907_vm11, %v19820_v16, %v19762_v9 }
 0x158   : > { %16411 = vmatprep.mubr.bf16.mxu1 %v22336_v52  ;;  %16872 = vmatpush3.bf16.msra.mxu1 %v18177_v11  ;;  %v22149_v52 = vshll.u32 %v19817_v1, 16  ;;  %v14080_v11 = vld [vmem:[%s18477_s8 + $0x3c] sm:$0xf]  ;;  %v19835_v6 = vld [vmem:[%s18477_s8 + $0x40] sm:$0xf]  ;;  %v5300_v36 = vor.u32 %v5299_v10, %v5296_v0  ;;  %v5342_v23 = vshrl.u32 %v14083_v60, 16 }
 0x159   : > { %16873 = vmatprep.subr.bf16.mxu1 %v18179_v12  ;;  %22347 = vst [vmem:[#allocation22_spill] sm:$0xff] %v19835_v6  ;;  %v19846_v5 = vrot.slane %v5286_v56, 4  ;;  %v19849_v31 = vld [vmem:[%s18477_s8 + $0x4c] sm:$0xf]  ;;  %v5321_v29 = vshll.u32 %v14080_v11, 16  ;;  %v22153_v0 = vshll.u32 %v19835_v6, 16 }
 0x15a   : > { %16442 = vmatpush3.bf16.msra.mxu0 %v18178_v13  ;;  %v19842_v13 = vrot.slane %v5276_v53, 4  ;;  %22348 = vst [vmem:[#allocation23_spill] sm:$0xff] %v19849_v31  ;;  %v22154_v10 = vshrl.u32 %v19835_v6, 16  ;;  %v19863_v53 = vrot.slane %v22152_v34, 4  ;;  %v5345_v56 = vshll.u32 %v14083_v60, 16 }
 0x15b   : > { %16475 = vmatprep.subr.bf16.mxu0 %v19814_v49  ;;  %v22155_v50 = vshll.u32 %v19849_v31, 16  ;;  %v22156_v62 = vshrl.u32 %v19849_v31, 16  ;;  %v19892_v39 = vld [vmem:[%s18477_s8 + $0x58] sm:$0xf]  ;;  %v19915_v60 = vld [vmem:[%s18477_s8 + $0x64] sm:$0xf] }
 0x15c   : > { %16874 = vmatpush3.bf16.msra.mxu1 %v18179_v12  ;;  %v5318_v12 = vshrl.u32 %v14080_v11, 16  ;;  %v19882_v34 = vrot.slane %v22154_v10, 4  ;;  %v19937_v31 = vld [vmem:[%s18477_s8 + $0xc] sm:$0xf]  ;;  %v19940_v6 = vld [vmem:[%s18477_s8 + $0x18] sm:$0xf] }
 0x15d   : > { %16172 = vmatmul.mubr.bf16.gmra.mrb[48].mxu0 %v19245_v48  ;;  %16907 = vmatprep.subr.bf16.mxu1 %v19825_v58  ;;  %v19854_v48 = vrot.slane %v22149_v52, 5  ;;  %v19868_v52 = vrot.slane %v5313_v61, 5  ;;  %v14086_v61 = vld [vmem:[%s18477_s8 + $0x54] sm:$0xf]  ;;  %v19901_v10 = vrot.slane %v22156_v62, 4  ;;  %v22172_v7 = vshrl.u32 %v19915_v60, 16 }
 0x15e   : > { %16175 = vmatprep.mubr.bf16.mxu0 %v19266_v40  ;;  %v19859_v40 = vrot.slane %v5300_v36, 4  ;;  %v19870_v11 = vrot.slane %v5318_v12, 4  ;;  %v19878_v36 = vrot.slane %v22153_v0, 5  ;;  %v19887_v12 = vrot.slane %v5342_v23, 4  ;;  %v14089_v62 = vld [vmem:[%s18477_s8 + $0x60] sm:$0xf] }
 0x15f   : > { %16412 = vmatmul.mubr.bf16.gmra.mrb[16].mxu1 %v22337_v24  ;;  %v19866_v24 = vld [vmem:[%s18477_s8 + $0x44] sm:$0x1]  ;;  %v19897_v0 = vrot.slane %v22155_v50, 5  ;;  %v5369_v23 = vshll.u32 %v14086_v61, 16  ;;  %v4890_v50 = vsel %vm18918_vm8, %v19689_v21, %v22354_v32  ;;  %v5393_v47 = vshll.u32 %v14089_v62, 16 }
 0x160   : > { %16415 = vmatprep.mubr.bf16.mxu1 %v22338_v54  ;;  %v19874_v54 = vrot.slane %v5321_v29, 5  ;;  %v19889_v29 = vrot.slane %v5345_v56, 5  ;;  %v19934_v56 = vld [vmem:[%s18477_s8 + $0x10] sm:$0xf]  ;;  %v5244_v32 = vsel %vm19907_vm11, %v19788_v45, %v19796_v57  ;;  %v5292_v21 = vsel %vm19907_vm11, %v19846_v5, %v19837_v30 }
 0x161   : > { %v14741_v57 = vcombine.low %v19937_v31, %v19934_v56  ;;  %v5371_v30 = vrot.slane %v5369_v23, 5  ;;  %v731_v31 = vld [vmem:[%s18477_s8 + $0x30] sm:$0xf] }
 0x165   : > { %16176 = vmatmul.mubr.bf16.gmra.mrb[52].mxu0 %v19283_v14  ;;  %v5366_v14 = vshrl.u32 %v14086_v61, 16  ;;  %v22353_v61 = vrot.slane %v19647_v38, 10  ;;  %v5282_v38 = vsel %vm19907_vm11, %v19842_v13, %v19806_v55  ;;  %v19979_v55 = vld [vmem:[%s18477_s8 + $0x1c] sm:$0xf]  ;;  %v22356_v13 = vshll.u32 %v19892_v39, 16 }
 0x166   : > { %16179 = vmatprep.mubr.bf16.mxu0 %v19306_v17  ;;  %v22349_v17 = vmov 0  ;;  %v14742_v16 = vcombine.low %v19940_v6, %v19979_v55  ;;  %v734_v6 = vld [vmem:[%s18477_s8 + $0x54] sm:$0xf] }
 0x167   : > { %16416 = vmatmul.mubr.bf16.gmra.mrb[20].mxu1 %v22339_v20  ;;  %v22350_v17 = vsel %vm19907_vm11, 4294967295, %v22349_v17  ;;  %v727_v20 = vld [vmem:[%s18477_s8] sm:$0xf]  ;;  %v19988_v5 = vrot.slane %v22356_v13, 5 }
 0x168   : > { %16419 = vmatprep.mubr.bf16.mxu1 %v22340_v43  ;;  %22351 = vst [vmem:[#allocation24_spill] sm:$0xff] %v22350_v17  ;;  %v22352_v43 = vrot.slane %v19413_v59, 6  ;;  %v5234_v59 = vsel %vm19907_vm11, %v19786_v22, %v19725_v33  ;;  %v22171_v33 = vshll.u32 %v19915_v60, 16  ;;  %v5310_v22 = vor.u32 %v19863_v53, %v19854_v48  ;;  %v761_v17 = vld [vmem:[%s18477_s8 + $0x48] sm:$0x8] }
 0x169   : > { %v22357_v53 = vshrl.u32 %v19892_v39, 16 }
 0x16a   : > { %v4887_v26 = vsel %vm18918_vm8, %v22353_v61, %v22352_v43  ;;  %v5395_v61 = vrot.slane %v5393_v47, 5  ;;  %v5311_v23 = vrot.slane %v5310_v22, 4  ;;  %v5324_v47 = vor.u32 %v19874_v54, %v19870_v11 }
 0x16b   : > { %v14457_v9 = vcombine.low %v4887_v26, %v4890_v50  ;;  %v14088_v26 = vld [vmem:[%s18477_s8 + $0x5c] sm:$0x1]  ;;  %v14092_v50 = vld [vmem:[%s18477_s8 + $0x6c] sm:$0xf] }
 0x16c   : > { %v5385_v22 = vshll.u32 %v14088_v26, 16 }
 0x16d   : > { %16180 = vmatmul.mubr.bf16.gmra.mrb[56].mxu0 %v19321_v18  ;;  %v5390_v18 = vshrl.u32 %v14089_v62, 16  ;;  %v14740_v62 = vcombine.low %v727_v20, %v19918_v3  ;;  %v5381_v20 = vrot.slane %v22357_v53, 4  ;;  %v20015_v53 = vld [vmem:[%s18477_s8 + $0x70] sm:$0xf] }
 0x16e   : > { %16183 = vmatprep.mubr.bf16.mxu0 %v19340_v2  ;;  %v5268_v2 = vsel %vm19907_vm11, %v19828_v19, %v19802_v42  ;;  %v19976_v42 = vcombine.low %v5282_v38, %v5292_v21  ;;  %v5368_v19 = vrot.slane %v5366_v14, 4  ;;  %v5306_v14 = vsel %vm19907_vm11, %v19859_v40, %v19854_v48  ;;  %22359 = vst [vmem:[#allocation26_spill] sm:$0xff] %v20015_v53 }
 0x16f   : > { %16420 = vmatmul.mubr.bf16.gmra.mrb[24].mxu1 %v22343_v27  ;;  %v14482_v27 = vcombine.low %v5234_v59, %v5244_v32  ;;  %v14483_v45 = vcombine.low %v5258_v25, %v5268_v2  ;;  %v5392_v43 = vrot.slane %v5390_v18, 4  ;;  %v19994_v59 = vrot.slane %v22171_v33, 5  ;;  %v14091_v25 = vld [vmem:[%s18477_s8 + $0x68] sm:$0x1] }
 0x170   : > { %16423 = vmatprep.mubr.bf16.mxu1 %v19342_v51  ;;  %22355 = vst [vmem:[#allocation25_spill] sm:$0xff] %v19976_v42  ;;  %v14085_v51 = vld [vmem:[%s18477_s8 + $0x50] sm:$0x1]  ;;  %v5405_v32 = vrot.slane %v22172_v7, 4  ;;  %v5414_v2 = vshrl.u32 %v14092_v50, 16  ;;  %v5417_v38 = vshll.u32 %v14092_v50, 16  ;;  %v5334_v18 = vor.u32 %v19882_v34, %v19878_v36 }
 0x171   : > { %v22358_v21 = vshll.u32 %v19866_v24, 16  ;;  %v5358_v48 = vor.u32 %v19901_v10, %v19897_v0  ;;  %v5361_v40 = vshll.u32 %v14085_v51, 16  ;;  %v5382_v11 = vor.u32 %v5381_v20, %v19988_v5 }
 0x172   : > { %v5396_v34 = vor.u32 %v5395_v61, %v5392_v43  ;;  %v5406_v24 = vor.u32 %v5405_v32, %v19994_v59  ;;  %v5409_v54 = vshll.u32 %v14091_v25, 16  ;;  %v5416_v50 = vrot.slane %v5414_v2, 4  ;;  %v14095_v61 = vld [vmem:[%s18477_s8 + $0x78] sm:$0xf] }
 0x173   : > { %v20010_v13 = vrot.slane %v22358_v21, 5  ;;  %v5419_v21 = vrot.slane %v5417_v38, 5  ;;  %v5316_v10 = vsel %vm19907_vm11, %v5311_v23, %v19868_v52  ;;  %v5335_v51 = vrot.slane %v5334_v18, 4  ;;  %v18187_v23 = vld [vmem:[%s22098_s2 + $0x4c8] sm:$0xff]  }
 0x174   : > { %v5387_v43 = vrot.slane %v5385_v22, 5  ;;  %v5383_v32 = vrot.slane %v5382_v11, 4  ;;  %v5397_v25 = vrot.slane %v5396_v34, 4  ;;  %v5407_v2 = vrot.slane %v5406_v24, 4  ;;  %v733_v24 = vld [vmem:[%s18477_s8 + $0x48] sm:$0xf] }
 0x175   : > { %16184 = vmatmul.mubr.bf16.gmra.mrb[60].mxu0 %v19444_v4  ;;  %v5348_v4 = vor.u32 %v19889_v29, %v19887_v12  ;;  %v22169_v12 = vshll.u32 %v20015_v53, 16  ;;  %v22170_v29 = vshrl.u32 %v20015_v53, 16  ;;  %v5411_v38 = vrot.slane %v5409_v54, 5 }
 0x176   : > { %16443 = vmatprep.mubr.bf16.mxu0 %v14482_v27  ;;  %v5372_v27 = vor.u32 %v5371_v30, %v5368_v19  ;;  %v5359_v19 = vrot.slane %v5358_v48, 4  ;;  %v5363_v30 = vrot.slane %v5361_v40, 5  ;;  %v20030_v52 = vcombine.low %v5306_v14, %v5316_v10  ;;  %v20042_v48 = vld [vmem:[%s18477_s8 + $0x7c] sm:$0xf]  ;;  %v14094_v40 = vld [vmem:[%s18477_s8 + $0x74] sm:$0x1] }
 0x177   : > { %16424 = vmatmul.mubr.bf16.gmra.mrb[28].mxu1 %v14457_v9  ;;  %v18185_v9 = vld [vmem:[%s22098_s2 + $0x288] sm:$0xff]   ;;  %v5349_v26 = vrot.slane %v5348_v4, 4  ;;  %v20037_v18 = vrot.slane %v22169_v12, 5  ;;  %v5429_v4 = vrot.slane %v22170_v29, 4  ;;  %22361 = vst [vmem:[#allocation28_spill] sm:$0xff] %v20042_v48  ;;  %v5340_v14 = vsel %vm19907_vm11, %v5335_v51, %v20010_v13  ;;  %v18189_v13 = vld [vmem:[%s22098_s2 + $0x290] sm:$0xff]  }
 0x178   : > { %16875 = vmatprep.mubr.bf16.mxu1 %v14740_v62  ;;  %v5325_v62 = vrot.slane %v5324_v47, 4  ;;  %v5373_v20 = vrot.slane %v5372_v27, 4  ;;  %22360 = vst [vmem:[#allocation27_spill] sm:$0xff] %v20030_v52  ;;  %v5420_v47 = vor.u32 %v5419_v21, %v5416_v50  ;;  %v5438_v27 = vshrl.u32 %v14095_v61, 16 }
 0x179   : > { %v5441_v22 = vshll.u32 %v14095_v61, 16  ;;  %v5354_v11 = vsel %vm19907_vm11, %v5349_v26, %v19897_v0  ;;  %v5388_v0 = vsel %vm19907_vm11, %v5383_v32, %v5387_v43  ;;  %v5402_v54 = vsel %vm19907_vm11, %v5397_v25, %v19994_v59  ;;  %v20108_v61 = vld [vmem:[%s18477_s8 + $0x40] sm:$0xf]  ;;  %v18193_v25 = vld [vmem:[%s22098_s2 + $0x298] sm:$0xff]  }
 0x17a   : > { %v5378_v34 = vsel %vm19907_vm11, %v5373_v20, %v19988_v5  ;;  %v5412_v5 = vsel %vm19907_vm11, %v5407_v2, %v5411_v38  ;;  %v5430_v50 = vor.u32 %v5429_v4, %v20037_v18  ;;  %v5433_v21 = vshll.u32 %v14094_v40, 16  ;;  %v20100_v20 = vld [vmem:[%s18477_s8 + $0x34] sm:$0xf]  ;;  %v14098_v2 = vld [vmem:[%s18477_s8 + $0x84] sm:$0xf] }
 0x17b   : > { %v22167_v10 = vshll.u32 %v20042_v48, 16  ;;  %v5443_v51 = vrot.slane %v5441_v22, 5  ;;  %v22168_v26 = vshrl.u32 %v20042_v48, 16  ;;  %v20103_v43 = vcombine.low %v731_v31, %v20100_v20  ;;  %v20131_v22 = vld [vmem:[%s18477_s8 + $0x88] sm:$0xf] }
 0x17c   : > { %v20117_v38 = vcombine.low %v5378_v34, %v5388_v0  ;;  %22371 = vst [vmem:[#allocation37_spill] sm:$0xff] %v20131_v22  ;;  %v20145_v34 = vrot.slane %v5430_v50, 4  ;;  %v20147_v31 = vrot.slane %v5433_v21, 5  ;;  %v14104_v0 = vld [vmem:[%s18477_s8 + $0x9c] sm:$0xf]  ;;  %v18197_v50 = vld [vmem:[%s22098_s2 + $0x2a0] sm:$0xff]  }
 0x17d   : > { %16444 = vmatmul.mubr.bf16.vlgmr.msra.gmra.mrb[64].mxu0 %v14483_v45  ;;  %v5330_v45 = vsel %vm19907_vm11, %v5325_v62, %v19878_v36  ;;  %v5364_v36 = vsel %vm19907_vm11, %v5359_v19, %v5363_v30  ;;  %v5440_v62 = vrot.slane %v5438_v27, 4  ;;  %v20094_v19 = vld [vmem:[%s18477_s8 + $0x28] sm:$0xf]  ;;  %22364 = vst [vmem:[#allocation31_spill] sm:$0xff] %v20103_v43  ;;  %v20128_v27 = vld [vmem:[%s18477_s8 + $0x80] sm:$0x1] }
 0x17e   : > { %16476 = vmatpush3.bf16.msra.mxu0 %v19814_v49  ;;  %16447 = vmatprep.mubr.bf16.mxu0 %v19976_v42  ;;  %v730_v49 = vld [vmem:[%s18477_s8 + $0x24] sm:$0xf]  ;;  %v20090_v59 = vcombine.low %v5330_v45, %v5340_v14  ;;  %22367 = vst [vmem:[#allocation33_spill] sm:$0xff] %v20117_v38  ;;  %v20122_v45 = vcombine.low %v5402_v54, %v5412_v5  ;;  %v18336_v14 = vld [vmem:[%s18477_s8 + $0x58] sm:$0xf]  ;;  %v5453_v54 = vrot.slane %v22168_v26, 4 }
 0x17f   : > { %16876 = vmatmul.mubr.bf16.vlgmr.msra.gmra.mrb[32].mxu1 %v14741_v57  ;;  %16477 = vmatprep.subr.bf16.mxu0 %v18185_v9  ;;  %v732_v57 = vld [vmem:[%s18477_s8 + $0x3c] sm:$0xf]  ;;  %v20097_v30 = vcombine.low %v730_v49, %v20094_v19  ;;  %v20125_v40 = vcombine.low %v734_v6, %v18336_v14  ;;  %v14101_v49 = vld [vmem:[%s18477_s8 + $0x90] sm:$0xf]  ;;  %v5462_v5 = vshrl.u32 %v14098_v2, 16  ;;  %v5465_v6 = vshll.u32 %v14098_v2, 16 }
 0x180   : > { %16908 = vmatpush3.bf16.msra.mxu1 %v19825_v58  ;;  %16879 = vmatprep.mubr.bf16.mxu1 %v14742_v16  ;;  %v18191_v58 = vld [vmem:[%s22098_s2 + $0x4d0] sm:$0xff]   ;;  %v20086_v16 = vrot.slane %v5420_v47, 4  ;;  %22362 = vst [vmem:[#allocation29_spill] sm:$0xff] %v20090_v59  ;;  %v20111_v32 = vcombine.low %v732_v57, %v20108_v61  ;;  %v18335_v47 = vld [vmem:[%s18477_s8 + $0x4c] sm:$0xf]  ;;  %22369 = vst [vmem:[#allocation35_spill] sm:$0xff] %v20122_v45  ;;  %v5436_v12 = vsel %vm19907_vm11, %v20145_v34, %v20147_v31 }
 0x181   : > { %16909 = vmatprep.subr.bf16.mxu1 %v18187_v23  ;;  %22363 = vst [vmem:[#allocation30_spill] sm:$0xff] %v20097_v30  ;;  %v20120_v4 = vcombine.low %v733_v24, %v18335_v47  ;;  %22370 = vst [vmem:[#allocation36_spill] sm:$0xff] %v20125_v40  ;;  %v20151_v57 = vrot.slane %v22167_v10, 5  ;;  %v5444_v24 = vor.u32 %v5443_v51, %v5440_v62  ;;  %v20158_v47 = vld [vmem:[%s18477_s8 + $0xa0] sm:$0xf]  ;;  %v22176_v21 = vshll.u32 %v20131_v22, 16 }
 0x182   : > { %16478 = vmatpush3.bf16.msra.mxu0 %v18185_v9  ;;  %v20105_v9 = vcombine.low %v5354_v11, %v5364_v36  ;;  %22366 = vst [vmem:[#allocation32_spill] sm:$0xff] %v20111_v32  ;;  %v20135_v11 = vld [vmem:[%s18477_s8 + $0x94] sm:$0xf]  ;;  %v5486_v62 = vshrl.u32 %v14101_v49, 16  ;;  %v5489_v51 = vshll.u32 %v14101_v49, 16  ;;  %v5510_v10 = vshrl.u32 %v14104_v0, 16 }
 0x183   : > { %16479 = vmatprep.subr.bf16.mxu0 %v18189_v13  ;;  %22368 = vst [vmem:[#allocation34_spill] sm:$0xff] %v20120_v4  ;;  %22372 = vst [vmem:[#allocation38_spill] sm:$0xff] %v20135_v11  ;;  %v5513_v26 = vshll.u32 %v14104_v0, 16  ;;  %v5457_v29 = vshll.u32 %v20128_v27, 16  ;;  %v18199_v49 = vld [vmem:[%s22098_s2 + $0x4e0] sm:$0xff]   ;;  %v20182_v14 = vrot.slane %v5444_v24, 4  ;;  %v5454_v34 = vor.u32 %v5453_v54, %v20151_v57 }
 0x184   : > { %22365 = vst [vmem:[#allocation20_spill] sm:$0xff] %v20105_v9  ;;  %16910 = vmatpush3.bf16.msra.mxu1 %v18187_v23  ;;  %v18195_v23 = vld [vmem:[%s22098_s2 + $0x4d8] sm:$0xff]   ;;  %v14107_v36 = vld [vmem:[%s18477_s8 + $0xa8] sm:$0xf]  ;;  %v735_v0 = vld [vmem:[%s18477_s8 + $0x60] sm:$0xf] }
 0x185   : > { %16448 = vmatmul.mubr.bf16.gmra.mrb[68].mxu0 %v20030_v52  ;;  %16911 = vmatprep.subr.bf16.mxu1 %v18191_v58  ;;  %v5464_v31 = vrot.slane %v5462_v5, 4  ;;  %v5467_v2 = vrot.slane %v5465_v6, 5  ;;  %v20187_v27 = vrot.slane %v22176_v21, 5  ;;  %v5488_v7 = vrot.slane %v5486_v62, 4  ;;  %v14106_v21 = vld [vmem:[%s18477_s8 + $0xa4] sm:$0x1] }
 0x186   : > { %16451 = vmatprep.mubr.bf16.mxu0 %v20090_v59  ;;  %16480 = vmatpush3.bf16.msra.mxu0 %v18189_v13  ;;  %v22179_v13 = vshrl.u32 %v20131_v22, 16  ;;  %v5491_v59 = vrot.slane %v5489_v51, 5  ;;  %v22373_v24 = vshll.u32 %v20135_v11, 16  ;;  %v22374_v5 = vshrl.u32 %v20135_v11, 16  ;;  %v18203_v62 = vld [vmem:[%s22098_s2 + $0x4e8] sm:$0xff]  }
 0x187   : > { %16880 = vmatmul.mubr.bf16.gmra.mrb[36].mxu1 %v20097_v30  ;;  %16481 = vmatprep.subr.bf16.mxu0 %v18193_v25  ;;  %v5512_v52 = vrot.slane %v5510_v10, 4  ;;  %v5515_v30 = vrot.slane %v5513_v26, 5  ;;  %v5534_v42 = vshrl.u32 %v14107_v36, 16  ;;  %v5455_v10 = vrot.slane %v5454_v34, 4  ;;  %v18337_v22 = vld [vmem:[%s18477_s8 + $0x64] sm:$0xf] }
 0x188   : > { %16883 = vmatprep.mubr.bf16.mxu1 %v20103_v43  ;;  %16912 = vmatpush3.bf16.msra.mxu1 %v18191_v58  ;;  %v14100_v58 = vld [vmem:[%s18477_s8 + $0x8c] sm:$0x1]  ;;  %v5477_v33 = vrot.slane %v22179_v13, 4  ;;  %v14103_v43 = vld [vmem:[%s18477_s8 + $0x98] sm:$0x1]  ;;  %v20197_v54 = vrot.slane %v22373_v24, 5  ;;  %v20215_v48 = vcombine.low %v735_v0, %v18337_v22  ;;  %v5492_v53 = vor.u32 %v5491_v59, %v5488_v7 }
 0x189   : > { %16913 = vmatprep.subr.bf16.mxu1 %v18195_v23  ;;  %v5501_v6 = vrot.slane %v22374_v5, 4  ;;  %v22376_v24 = vshrl.u32 %v20158_v47, 16  ;;  %v5537_v5 = vshll.u32 %v14107_v36, 16  ;;  %v5459_v26 = vrot.slane %v5457_v29, 5  ;;  %v18205_v36 = vld [vmem:[%s22098_s2 + $0x2b0] sm:$0xff]  }
 0x18a   : > { %16482 = vmatpush3.bf16.msra.mxu0 %v18193_v25  ;;  %v18201_v25 = vld [vmem:[%s22098_s2 + $0x2a8] sm:$0xff]   ;;  %v5481_v11 = vshll.u32 %v14100_v58, 16  ;;  %22377 = vst [vmem:[#allocation39_spill] sm:$0xff] %v20215_v48  ;;  %v22378_v29 = vsel %vm19907_vm11, %v20086_v16, %v20037_v18  ;;  %v5505_v7 = vshll.u32 %v14103_v43, 16  ;;  %v5529_v59 = vshll.u32 %v14106_v21, 16  ;;  %v18207_v18 = vld [vmem:[%s22098_s2 + $0x4f0] sm:$0xff]  }
 0x18b   : > { %16483 = vmatprep.subr.bf16.mxu0 %v18197_v50  ;;  %v5525_v13 = vrot.slane %v22376_v24, 4  ;;  %v20231_v22 = vld [vmem:[%s18477_s8 + $0xac] sm:$0xf]  ;;  %v5536_v0 = vrot.slane %v5534_v42, 4  ;;  %v5539_v34 = vrot.slane %v5537_v5, 5  ;;  %v5450_v16 = vsel %vm19907_vm11, %v20182_v14, %v20151_v57  ;;  %v18209_v57 = vld [vmem:[%s22098_s2 + $0x2b8] sm:$0xff]  }
 0x18c   : > { %16914 = vmatpush3.bf16.msra.mxu1 %v18195_v23  ;;  %v22375_v23 = vshll.u32 %v20158_v47, 16  ;;  %v5460_v43 = vsel %vm19907_vm11, %v5455_v10, %v5459_v26  ;;  %v736_v21 = vld [vmem:[%s18477_s8 + $0x6c] sm:$0xf]  ;;  %v20246_v42 = vld [vmem:[%s18477_s8 + $0xb8] sm:$0xf]  ;;  %v5507_v24 = vrot.slane %v5505_v7, 5 }
 0x18d   : > { %16452 = vmatmul.mubr.bf16.gmra.mrb[72].mxu0 %v20105_v9  ;;  %16915 = vmatprep.subr.bf16.mxu1 %v18199_v49  ;;  %v5468_v9 = vor.u32 %v5467_v2, %v5464_v31  ;;  %v5516_v2 = vor.u32 %v5515_v30, %v5512_v52  ;;  %v5483_v52 = vrot.slane %v5481_v11, 5  ;;  %22380 = vst [vmem:[#allocation41_spill] sm:$0xff] %v20246_v42  ;;  %v22191_v31 = vshll.u32 %v20231_v22, 16  ;;  %v738_v7 = vld [vmem:[%s18477_s8 + $0x84] sm:$0xf] }
 0x18e   : > { %v20208_v51 = vrot.slane %v22375_v23, 5  ;;  %16455 = vmatprep.mubr.bf16.mxu0 %v20117_v38  ;;  %16484 = vmatpush3.bf16.msra.mxu0 %v18197_v50  ;;  %v5478_v23 = vor.u32 %v5477_v33, %v20187_v27  ;;  %v20227_v50 = vcombine.low %v22378_v29, %v5436_v12  ;;  %v5502_v33 = vor.u32 %v5501_v6, %v20197_v54  ;;  %v14110_v12 = vld [vmem:[%s18477_s8 + $0xb4] sm:$0xf] }
 0x18f   : > { %16884 = vmatmul.mubr.bf16.gmra.mrb[40].mxu1 %v20111_v32  ;;  %16485 = vmatprep.subr.bf16.mxu0 %v18201_v25  ;;  %v22192_v6 = vshrl.u32 %v20231_v22, 16  ;;  %v5561_v11 = vshll.u32 %v14110_v12, 16  ;;  %v5531_v10 = vrot.slane %v5529_v59, 5  ;;  %v5540_v26 = vor.u32 %v5539_v34, %v5536_v0 }
 0x190   : > { %16887 = vmatprep.mubr.bf16.mxu1 %v20120_v4  ;;  %22379 = vst [vmem:[#allocation40_spill] sm:$0xff] %v20227_v50  ;;  %16916 = vmatpush3.bf16.msra.mxu1 %v18199_v49  ;;  %v5526_v58 = vor.u32 %v5525_v13, %v20208_v51  ;;  %v5469_v49 = vrot.slane %v5468_v9, 4  ;;  %v5479_v30 = vrot.slane %v5478_v23, 4  ;;  %v5493_v13 = vrot.slane %v5492_v53, 4  ;;  %v737_v53 = vld [vmem:[%s18477_s8 + $0x78] sm:$0xf] }
 0x191   : > { %16917 = vmatprep.subr.bf16.mxu1 %v18203_v62  ;;  %v5503_v14 = vrot.slane %v5502_v33, 4  ;;  %v5558_v9 = vshrl.u32 %v14110_v12, 16  ;;  %v18211_v23 = vld [vmem:[%s22098_s2 + $0x4f8] sm:$0xff]   ;;  %v20259_v29 = vcombine.low %v5450_v16, %v5460_v43  ;;  %v22193_v59 = vshll.u32 %v20246_v42, 16  ;;  %v20286_v16 = vld [vmem:[%s22098_s2 + $0x2c0] sm:$0xff]  }
 0x192   : > { %16486 = vmatpush3.bf16.msra.mxu0 %v18201_v25  ;;  %v5517_v25 = vrot.slane %v5516_v2, 4  ;;  %v5527_v5 = vrot.slane %v5526_v58, 4  ;;  %v14109_v2 = vld [vmem:[%s18477_s8 + $0xb0] sm:$0x1]  ;;  %v5474_v0 = vsel %vm19907_vm11, %v5469_v49, %v20187_v27  ;;  %v5484_v34 = vsel %vm19907_vm11, %v5479_v30, %v5483_v52  ;;  %v14112_v49 = vld [vmem:[%s18477_s8 + $0xbc] sm:$0x1] }
 0x193   : > { %16487 = vmatprep.subr.bf16.mxu0 %v18205_v36  ;;  %22381 = vst [vmem:[#allocation42_spill] sm:$0xff] %v20259_v29  ;;  %v20279_v12 = vrot.slane %v22191_v31, 5  ;;  %v5498_v27 = vsel %vm19907_vm11, %v5493_v13, %v20197_v54  ;;  %v5508_v43 = vsel %vm19907_vm11, %v5503_v14, %v5507_v24  ;;  %v5560_v52 = vrot.slane %v5558_v9, 4  ;;  %v14113_v13 = vld [vmem:[%s18477_s8 + $0xc0] sm:$0xf] }
 0x194   : > { %16918 = vmatpush3.bf16.msra.mxu1 %v18203_v62  ;;  %v20262_v62 = vld [vmem:[%s18477_s8 + $0x70] sm:$0xf]  ;;  %v5563_v30 = vrot.slane %v5561_v11, 5  ;;  %v5522_v31 = vsel %vm19907_vm11, %v5517_v25, %v20208_v51  ;;  %v20301_v58 = vrot.slane %v5540_v26, 4  ;;  %v5553_v54 = vshll.u32 %v14109_v2, 16 }
 0x195   : > { %16456 = vmatmul.mubr.bf16.gmra.mrb[76].mxu0 %v20122_v45  ;;  %16919 = vmatprep.subr.bf16.mxu1 %v18207_v18  ;;  %v20265_v33 = vcombine.low %v736_v21, %v20262_v62  ;;  %v739_v21 = vld [vmem:[%s18477_s8 + $0x90] sm:$0xf]  ;;  %v20309_v14 = vcombine.low %v5474_v0, %v5484_v34  ;;  %v18339_v24 = vld [vmem:[%s18477_s8 + $0x7c] sm:$0xf]  ;;  %v20316_v51 = vrot.slane %v22193_v59, 5  ;;  %v22385_v11 = vshrl.u32 %v20246_v42, 16 }
 0x196   : > { %16459 = vmatprep.mubr.bf16.mxu0 %v20227_v50  ;;  %16488 = vmatpush3.bf16.msra.mxu0 %v18205_v36  ;;  %v5549_v36 = vrot.slane %v22192_v6, 4  ;;  %v5532_v6 = vsel %vm19907_vm11, %v5527_v5, %v5531_v10  ;;  %v20312_v9 = vcombine.low %v737_v53, %v18339_v24  ;;  %v20321_v5 = vld [vmem:[%s18477_s8 + $0xc4] sm:$0xf]  ;;  %v20323_v10 = vcombine.low %v5498_v27, %v5508_v43  ;;  %v18340_v26 = vld [vmem:[%s18477_s8 + $0x88] sm:$0xf] }
 0x197   : > { %22382 = vst [vmem:[#allocation43_spill] sm:$0xff] %v20265_v33  ;;  %16888 = vmatmul.mubr.bf16.gmra.mrb[44].mxu1 %v20125_v40  ;;  %16489 = vmatprep.subr.bf16.mxu0 %v18209_v57  ;;  %22383 = vst [vmem:[#allocation44_spill] sm:$0xff] %v20309_v14  ;;  %v5573_v25 = vrot.slane %v22385_v11, 4  ;;  %v20326_v2 = vcombine.low %v738_v7, %v18340_v26  ;;  %v5577_v53 = vshll.u32 %v14112_v49, 16  ;;  %v472_v34 = vld [vmem:[%s18477_s8 + $0xc] sm:$0xe] }
 0x198   : > { %16891 = vmatprep.mubr.bf16.mxu1 %v20215_v48  ;;  %16920 = vmatpush3.bf16.msra.mxu1 %v18207_v18  ;;  %v20307_v18 = vld [vmem:[%s22098_s2 + $0x500] sm:$0xff]   ;;  %22384 = vst [vmem:[#allocation45_spill] sm:$0xff] %v20312_v9  ;;  %22386 = vst [vmem:[#allocation46_spill] sm:$0xff] %v20321_v5  ;;  %v5550_v0 = vor.u32 %v5549_v36, %v20279_v12  ;;  %v20331_v24 = vcombine.low %v5522_v31, %v5532_v6  ;;  %v18341_v59 = vld [vmem:[%s18477_s8 + $0x94] sm:$0xf]  ;;  %v5582_v50 = vshrl.u32 %v14113_v13, 16 }
 0x199   : > { %16921 = vmatprep.subr.bf16.mxu1 %v18211_v23  ;;  %22387 = vst [vmem:[#allocation47_spill] sm:$0xff] %v20323_v10  ;;  %22388 = vst [vmem:[#allocation48_spill] sm:$0xff] %v20326_v2  ;;  %v20334_v48 = vcombine.low %v739_v21, %v18341_v59  ;;  %v5564_v11 = vor.u32 %v5563_v30, %v5560_v52  ;;  %v5555_v7 = vrot.slane %v5553_v54, 5  ;;  %v5585_v36 = vshll.u32 %v14113_v13, 16  ;;  %v469_v31 = vld [vmem:[%s18477_s8] sm:$0xe] }
 0x19a   : > { %16490 = vmatpush3.bf16.msra.mxu0 %v18209_v57  ;;  %22389 = vst [vmem:[#allocation49_spill] sm:$0xff] %v20331_v24  ;;  %v5546_v57 = vsel %vm19907_vm11, %v20301_v58, %v20279_v12  ;;  %v22212_v27 = vshll.u32 %v20321_v5, 16  ;;  %v5574_v6 = vor.u32 %v5573_v25, %v20316_v51  ;;  %v5992_v59 = vshrl.u32 %v472_v34, 16  ;;  %v474_v54 = vld [vmem:[%s18477_s8 + $0x14] sm:$0x3] }
 0x19b   : > { %16523 = vmatprep.subr.bf16.mxu0 %v20286_v16  ;;  %22390 = vst [vmem:[#allocation50_spill] sm:$0xff] %v20334_v48  ;;  %v5995_v43 = vshll.u32 %v472_v34, 16  ;;  %v5551_v58 = vrot.slane %v5550_v0, 4  ;;  %v5579_v12 = vrot.slane %v5577_v53, 5  ;;  %v6001_v21 = vshrl.u32 %v19934_v56, 16 }
 0x19c   : > { %16922 = vmatpush3.bf16.msra.mxu1 %v18211_v23  ;;  %v6004_v49 = vshll.u32 %v19934_v56, 16  ;;  %v5565_v52 = vrot.slane %v5564_v11, 4  ;;  %v5584_v30 = vrot.slane %v5582_v50, 4  ;;  %v9706_v13 = vshrl.u32 %v469_v31, 16  ;;  %v14115_v26 = vld [vmem:[%s18477_s8 + $0xc8] sm:$0x1] }
 0x19d   : > { %16460 = vmatmul.mubr.bf16.gmra.mrb[80].mxu0 %v20259_v29  ;;  %16955 = vmatprep.subr.bf16.mxu1 %v20307_v18  ;;  %v9709_v25 = vshll.u32 %v469_v31, 16  ;;  %v5587_v23 = vrot.slane %v5585_v36, 5  ;;  %v20355_v34 = vrot.slane %v22212_v27, 5  ;;  %v9715_v0 = vshrl.u32 %v19918_v3, 16  ;;  %v471_v50 = vld [vmem:[%s18477_s8 + $0x8] sm:$0x3] }
 0x19e   : > { %16463 = vmatprep.mubr.bf16.mxu0 %v20309_v14  ;;  %v9718_v53 = vshll.u32 %v19918_v3, 16  ;;  %v5575_v14 = vrot.slane %v5574_v6, 4  ;;  %v22391_v29 = vshrl.u32 %v20321_v5, 16  ;;  %v5997_v11 = vrot.slane %v5995_v43, 6 }
 0x19f   : > { %16892 = vmatmul.mubr.bf16.gmra.mrb[48].mxu1 %v20265_v33  ;;  %v6003_v45 = vrot.slane %v6001_v21, 5  ;;  %v6006_v40 = vrot.slane %v6004_v49, 6  ;;  %v6011_v31 = vshrl.u32 %v474_v54, 16  ;;  %v6014_v4 = vshll.u32 %v474_v54, 16 }
 0x1a0   : > { %16895 = vmatprep.mubr.bf16.mxu1 %v20312_v9  ;;  %v5597_v33 = vrot.slane %v22391_v29, 4  ;;  %v5994_v9 = vrot.slane %v5992_v59, 5  ;;  %v5556_v36 = vsel %vm19907_vm11, %v5551_v58, %v5555_v7  ;;  %v5601_v27 = vshll.u32 %v14115_v26, 16 }
 0x1a1   : > { %v9708_v38 = vrot.slane %v9706_v13, 5  ;;  %v9711_v32 = vrot.slane %v9709_v25, 6  ;;  %v9717_v42 = vrot.slane %v9715_v0, 5  ;;  %v9720_v6 = vrot.slane %v9718_v53, 6  ;;  %v740_v0 = vld [vmem:[%s18477_s8 + $0x9c] sm:$0xf] }
 0x1a2   : > { %v9725_v29 = vshrl.u32 %v471_v50, 16  ;;  %v9728_v59 = vshll.u32 %v471_v50, 16  ;;  %v5570_v43 = vsel %vm19907_vm11, %v5565_v52, %v20316_v51  ;;  %v5580_v7 = vsel %vm19907_vm11, %v5575_v14, %v5579_v12  ;;  %v741_v51 = vld [vmem:[%s18477_s8 + $0xa8] sm:$0xf]  ;;  %v18343_v50 = vld [vmem:[%s18477_s8 + $0xac] sm:$0xf] }
 0x1a3   : > { %v5588_v58 = vor.u32 %v5587_v23, %v5584_v30  ;;  %v5598_v21 = vor.u32 %v5597_v33, %v20355_v34  ;;  %v5998_v49 = vor.u32 %v5997_v11, %v5994_v9  ;;  %v6007_v54 = vor.u32 %v6006_v40, %v6003_v45  ;;  %v18342_v11 = vld [vmem:[%s18477_s8 + $0xa0] sm:$0xf] }
 0x1a4   : > { %v6013_v13 = vrot.slane %v6011_v31, 5  ;;  %v6016_v25 = vrot.slane %v6014_v4, 6  ;;  %v20374_v26 = vcombine.low %v5546_v57, %v5556_v36  ;;  %v9712_v52 = vor.u32 %v9711_v32, %v9708_v38 }
 0x1a5   : > { %16464 = vmatmul.mubr.bf16.gmra.mrb[84].mxu0 %v20323_v10  ;;  %v9721_v53 = vor.u32 %v9720_v6, %v9717_v42  ;;  %v9727_v14 = vrot.slane %v9725_v29, 5  ;;  %v9730_v23 = vrot.slane %v9728_v59, 6  ;;  %v20378_v12 = vcombine.low %v5570_v43, %v5580_v7  ;;  %v14128_v59 = vld [vmem:[%s18477_s8 + $0xc] sm:$0xc]  ;;  %v742_v43 = vld [vmem:[%s18477_s8 + $0xb4] sm:$0xf] }
 0x1a6   : > { %16467 = vmatprep.mubr.bf16.mxu0 %v20331_v24  ;;  %22392 = vst [vmem:[#allocation51_spill] sm:$0xff] %v20374_v26  ;;  %v5589_v33 = vrot.slane %v5588_v58, 4  ;;  %v5599_v30 = vrot.slane %v5598_v21, 4  ;;  %v5603_v9 = vrot.slane %v5601_v27, 5  ;;  %v20381_v45 = vcombine.low %v740_v0, %v18342_v11  ;;  %v14130_v0 = vld [vmem:[%s18477_s8 + $0x18] sm:$0xc] }
 0x1a7   : > { %16896 = vmatmul.mubr.bf16.gmra.mrb[52].mxu1 %v20326_v2  ;;  %22393 = vst [vmem:[#allocation52_spill] sm:$0xff] %v20378_v12  ;;  %v5999_v4 = vrot.slane %v5998_v49, 4  ;;  %v6009_v40 = vrot.slane %v6007_v54, 4  ;;  %v6017_v57 = vor.u32 %v6016_v25, %v6013_v13  ;;  %v20384_v31 = vcombine.low %v741_v51, %v18343_v50 }
 0x1a8   : > { %16899 = vmatprep.mubr.bf16.mxu1 %v20334_v48  ;;  %22394 = vst [vmem:[#allocation53_spill] sm:$0xff] %v20381_v45  ;;  %v9713_v32 = vrot.slane %v9712_v52, 4  ;;  %v9723_v38 = vrot.slane %v9721_v53, 4  ;;  %v9731_v42 = vor.u32 %v9730_v23, %v9727_v14  ;;  %v5594_v27 = vsel %vm19907_vm11, %v5589_v33, %v20355_v34  ;;  %v14129_v52 = vld [vmem:[%s18477_s8 + $0x14] sm:$0x7] }
 0x1a9   : > { %22395 = vst [vmem:[#allocation54_spill] sm:$0xff] %v20384_v31  ;;  %v5604_v36 = vsel %vm19907_vm11, %v5599_v30, %v5603_v9  ;;  %v6008_v6 = vsel %vm18506_vm2, %v5999_v4, %v6007_v54  ;;  %v6018_v29 = vsel %vm18506_vm2, %v6009_v40, %v6017_v57  ;;  %v6349_v49 = vshrl.u32 %v14128_v59, 16  ;;  %v18344_v54 = vld [vmem:[%s18477_s8 + $0xb8] sm:$0xf] }
 0x1aa   : > { %v20401_v7 = vcombine.low %v5594_v27, %v5604_v36  ;;  %v9722_v34 = vsel %vm18506_vm2, %v9713_v32, %v9721_v53  ;;  %v9732_v58 = vsel %vm18506_vm2, %v9723_v38, %v9731_v42  ;;  %v14522_v21 = vcombine.low %v6008_v6, %v6018_v29  ;;  %v18214_v42 = vld [vmem:[%s22098_s2 + $0x2c8] sm:$0xff]   ;;  %v14132_v36 = vld [vmem:[%s18477_s8 + $0x24] sm:$0xc] }
 0x1ab   : > { %v6352_v13 = vshll.u32 %v14128_v59, 16  ;;  %v20408_v25 = vcombine.low %v742_v43, %v18344_v54  ;;  %v14780_v51 = vcombine.low %v9722_v34, %v9732_v58  ;;  %v6351_v14 = vrot.slane %v6349_v49, 6  ;;  %v18216_v59 = vld [vmem:[%s22098_s2 + $0x2d0] sm:$0xff]   ;;  %v20436_v43 = vld [vmem:[%s18477_s8] sm:$0x8] }
 0x1ac   : > { %22396 = vst [vmem:[#allocation55_spill] sm:$0xff] %v20401_v7  ;;  %v6372_v33 = vshrl.u32 %v14130_v0, 16  ;;  %v6375_v53 = vshll.u32 %v14130_v0, 16  ;;  %v22398_v30 = vshrl.u32 %v19676_v63, 16  ;;  %v22399_v11 = vshll.u32 %v19676_v63, 16  ;;  %v18215_v63 = vld [vmem:[%s22098_s2 + $0x508] sm:$0xff]  }
 0x1ad   : > { %16468 = vmatmul.mubr.bf16.gmra.mrb[88].mxu0 %v20374_v26  ;;  %22397 = vst [vmem:[#allocation56_spill] sm:$0xff] %v20408_v25  ;;  %v6354_v23 = vrot.slane %v6352_v13, 7  ;;  %v6363_v40 = vshrl.u32 %v14129_v52, 16  ;;  %v6366_v57 = vshll.u32 %v14129_v52, 16  ;;  %v14131_v58 = vld [vmem:[%s18477_s8 + $0x20] sm:$0x7] }
 0x1ae   : > { %16471 = vmatprep.mubr.bf16.mxu0 %v20378_v12  ;;  %v6357_v9 = vrot.slane %v22398_v30, 6  ;;  %v6358_v4 = vrot.slane %v22399_v11, 7  ;;  %v6374_v32 = vrot.slane %v6372_v33, 6  ;;  %v6377_v38 = vrot.slane %v6375_v53, 7  ;;  %v14133_v0 = vld [vmem:[%s18477_s8 + $0x2c] sm:$0x7] }
 0x1af   : > { %16900 = vmatmul.mubr.bf16.gmra.mrb[56].mxu1 %v20381_v45  ;;  %v6355_v50 = vor.u32 %v6354_v23, %v6351_v14  ;;  %v20424_v6 = vrot.slane %v6363_v40, 6  ;;  %v20426_v29 = vrot.slane %v6366_v57, 7  ;;  %v6395_v13 = vshrl.u32 %v14132_v36, 16  ;;  %v14134_v53 = vld [vmem:[%s18477_s8 + $0x30] sm:$0xc]  ;;  %v22423_v12 = vld [vmem:[#allocation12_spill] sm:$0xff] }
 0x1b0   : > { %16903 = vmatprep.mubr.bf16.mxu1 %v20384_v31  ;;  %v20421_v27 = vor.u32 %v6358_v4, %v6357_v9  ;;  %v6378_v49 = vor.u32 %v6377_v38, %v6374_v32  ;;  %v14789_v52 = vrot.slane %v20436_v43, 11  ;;  %v10096_v14 = vrot.slane %v19918_v3, 7  ;;  %v750_v30 = vld [vmem:[%s18477_s8 + $0x8] sm:$0x7]  ;;  %v751_v57 = vld [vmem:[%s18477_s8 + $0xc] sm:$0x8] }
 0x1b1   : > { %v20440_v34 = vrot.slane %v6355_v50, 4  ;;  %v22400_v23 = vshrl.u32 %v19701_v35, 16  ;;  %v22403_v9 = vshll.u32 %v19701_v35, 16  ;;  %v6386_v11 = vshrl.u32 %v14131_v58, 16  ;;  %v752_v43 = vld [vmem:[%s18477_s8 + $0x14] sm:$0x7] }
 0x1b2   : > { %v6389_v4 = vshll.u32 %v14131_v58, 16  ;;  %v10103_v40 = vrot.slane %v19934_v56, 7  ;;  %v6397_v50 = vrot.slane %v6395_v13, 6  ;;  %v22404_v32 = vshrl.u32 %v19765_v15, 16  ;;  %v18345_v31 = vld [vmem:[%s18477_s8 + $0x4c] sm:$0xf] }
 0x1b3   : > { %v6380_v33 = vrot.slane %v22400_v23, 6  ;;  %v6381_v3 = vrot.slane %v22403_v9, 7  ;;  %v6412_v35 = vshll.u32 %v14133_v0, 16  ;;  %v6418_v9 = vshrl.u32 %v14134_v53, 16 }
 0x1b4   : > { %v6403_v38 = vrot.slane %v22404_v32, 6  ;;  %v6421_v54 = vshll.u32 %v14134_v53, 16  ;;  %v6360_v56 = vsel %vm20462_vm0, %v20440_v34, %v20421_v27  ;;  %v10099_v58 = vrot.slane %v750_v30, 7  ;;  %v14135_v32 = vld [vmem:[%s18477_s8 + $0x38] sm:$0x7] }
 0x1b5   : > { %16472 = vmatmul.mubr.bf16.gmra.mrb[92].mxu0 %v20401_v7  ;;  %v20480_v13 = vrot.slane %v6378_v49, 4  ;;  %v14790_v53 = vrot.slane %v751_v57, 11  ;;  %v10105_v49 = vrot.slane %v10103_v40, 4  ;;  %v10106_v30 = vrot.slane %v752_v43, 7  ;;  %v22422_v7 = vld [vmem:[#allocation11_spill] sm:$0xff] }
 0x1b6   : > { %16491 = vmatprep.mubr.bf16.mxu0 %v14522_v21  ;;  %v22408_v57 = vshrl.u32 %v19817_v1, 16  ;;  %v21888_v34 = vld [vmem:[%s22099_s3 + $0x3] ss:$0 sm:$0xff] }
 0x1b7   : > { %16904 = vmatmul.mubr.bf16.gmra.mrb[60].mxu1 %v20408_v25 }
 0x1b8   : > { %16923 = vmatprep.mubr.bf16.mxu1 %v14780_v51  ;;  %v6398_v51 = vshll.u32 %v14132_v36, 16  ;;  %v22405_v36 = vshll.u32 %v19765_v15, 16  ;;  %v18219_v15 = vld [vmem:[%s22098_s2 + $0x518] sm:$0xff]   ;;  %v6426_v43 = vrot.slane %v22408_v57, 6  ;;  %v754_v57 = vld [vmem:[%s18477_s8 + $0x20] sm:$0x7] }
 0x1ba   : > { %v6400_v23 = vrot.slane %v6398_v51, 7  ;;  %v6388_v51 = vrot.slane %v6386_v11, 6  ;;  %v6420_v11 = vrot.slane %v6418_v9, 6  ;;  %v18222_v9 = vld [vmem:[%s22098_s2 + $0x2e8] sm:$0xff]  }
 0x1bd   : > { %16492 = vmatmul.mubr.bf16.vlgmr.msra.gmra.mrb[64].mxu0 %v19351_v28 }
 0x1be   : > { %16524 = vmatpush3.bf16.msra.mxu0 %v20286_v16  ;;  %16495 = vmatprep.mubr.bf16.mxu0 %v18571_v37  ;;  %v18217_v16 = vld [vmem:[%s22098_s2 + $0x510] sm:$0xff]  }
 0x1bf   : > { %16924 = vmatmul.mubr.bf16.vlgmr.msra.gmra.mrb[32].mxu1 %v14522_v21  ;;  %16525 = vmatprep.subr.bf16.mxu0 %v18214_v42  ;;  %v6369_v21 = vor.u32 %v20426_v29, %v20424_v6  ;;  %v6404_v6 = vrot.slane %v22405_v36, 7  ;;  %v6409_v29 = vshrl.u32 %v14133_v0, 16  ;;  %v20486_v0 = vor.u32 %v6381_v3, %v6380_v33  ;;  %v18220_v33 = vld [vmem:[%s22098_s2 + $0x2e0] sm:$0xff]  }
 0x1c0   : > { %16956 = vmatpush3.bf16.msra.mxu1 %v20307_v18  ;;  %16927 = vmatprep.mubr.bf16.mxu1 %v19351_v28  ;;  %v18218_v28 = vld [vmem:[%s22098_s2 + $0x2d8] sm:$0xff]   ;;  %v6401_v3 = vor.u32 %v6400_v23, %v6397_v50  ;;  %v18221_v50 = vld [vmem:[%s22098_s2 + $0x520] sm:$0xff]   ;;  %v22410_v23 = vrot.slane %v20421_v27, 4  ;;  %v20528_v27 = vsel %vm20492_vm1, %v14790_v53, %v10103_v40 }
 0x1c1   : > { %16957 = vmatprep.subr.bf16.mxu1 %v18215_v63  ;;  %v20496_v36 = vor.u32 %v6404_v6, %v6403_v38  ;;  %v6411_v44 = vrot.slane %v6409_v29, 6  ;;  %v22409_v38 = vshll.u32 %v19817_v1, 16  ;;  %v6432_v29 = vshrl.u32 %v14135_v32, 16  ;;  %v21883_v18 = vld [vmem:[%s22100_s4 + $0x2] ss:$0 sm:$0xff] }
 0x1c2   : > { %16526 = vmatpush3.bf16.msra.mxu0 %v18214_v42  ;;  %v10098_v42 = vrot.slane %v10096_v14, 4  ;;  %v6384_v1 = vrot.slane %v20486_v0, 4 }
 0x1c3   : > { %16527 = vmatprep.subr.bf16.mxu0 %v18216_v59  ;;  %v6427_v6 = vrot.slane %v22409_v38, 7  ;;  %v6434_v53 = vrot.slane %v6432_v29, 6  ;;  %v10117_v29 = vrot.slane %v20094_v19, 7 }
 0x1c4   : > { %16958 = vmatpush3.bf16.msra.mxu1 %v18215_v63  ;;  %v6391_v63 = vrot.slane %v6389_v4, 7  ;;  %v6423_v4 = vrot.slane %v6421_v54, 7  ;;  %v6370_v54 = vsel %vm20462_vm0, %v22410_v23, %v6369_v21  ;;  %v20532_v21 = vsel %vm20492_vm1, %v10105_v49, %v10106_v30  ;;  %v22411_v30 = vld [vmem:[#allocation7_spill] sm:$0xff]  ;;  %v18225_v23 = vld [vmem:[%s22098_s2 + $0x530] sm:$0xff]  }
 0x1c5   : > { %16496 = vmatmul.mubr.bf16.gmra.mrb[68].mxu0 %v18621_v8  ;;  %16959 = vmatprep.subr.bf16.mxu1 %v18217_v16  ;;  %v20540_v40 = vor.u32 %v6427_v6, %v6426_v43  ;;  %v14138_v43 = vld [vmem:[%s18477_s8 + $0x48] sm:$0xc]  ;;  %v755_v6 = vld [vmem:[%s18477_s8 + $0x24] sm:$0x8] }
 0x1c6   : > { %16499 = vmatprep.mubr.bf16.mxu0 %v18579_v41  ;;  %16528 = vmatpush3.bf16.msra.mxu0 %v18216_v59  ;;  %v6414_v59 = vrot.slane %v6412_v35, 7  ;;  %v6392_v35 = vor.u32 %v6391_v63, %v6388_v51  ;;  %v753_v63 = vld [vmem:[%s18477_s8 + $0x18] sm:$0x8] }
 0x1c7   : > { %16928 = vmatmul.mubr.bf16.gmra.mrb[36].mxu1 %v18571_v37  ;;  %16529 = vmatprep.subr.bf16.mxu0 %v18218_v28  ;;  %v6435_v37 = vshll.u32 %v14135_v32, 16  ;;  %v20524_v32 = vsel %vm20492_vm1, %v10098_v42, %v10099_v58  ;;  %v6424_v42 = vor.u32 %v6423_v4, %v6420_v11  ;;  %v20538_v58 = vcombine.low %v6360_v56, %v6370_v54 }
 0x1c8   : > { %16931 = vmatprep.mubr.bf16.mxu1 %v18621_v8  ;;  %16960 = vmatpush3.bf16.msra.mxu1 %v18217_v16  ;;  %v20516_v16 = vsel %vm20492_vm1, %v14789_v52, %v10096_v14  ;;  %v10110_v52 = vrot.slane %v19979_v55, 7  ;;  %v6402_v14 = vrot.slane %v6401_v3, 4  ;;  %v6415_v51 = vor.u32 %v6414_v59, %v6411_v44  ;;  %v18223_v55 = vld [vmem:[%s22098_s2 + $0x528] sm:$0xff]  }
 0x1c9   : > { %16961 = vmatprep.subr.bf16.mxu1 %v18219_v15  ;;  %v6437_v49 = vrot.slane %v6435_v37, 7  ;;  %v6383_v56 = vsel %vm20462_vm0, %v20480_v13, %v20486_v0  ;;  %v14136_v37 = vld [vmem:[%s18477_s8 + $0x3c] sm:$0xc]  ;;  %v14791_v59 = vrot.slane %v753_v63, 11  ;;  %v10113_v4 = vrot.slane %v754_v57, 7  ;;  %v18224_v13 = vld [vmem:[%s22098_s2 + $0x2f0] sm:$0xff]  }
 0x1ca   : > { %16530 = vmatpush3.bf16.msra.mxu0 %v18218_v28  ;;  %v6407_v28 = vrot.slane %v20496_v36, 4  ;;  %v10112_v11 = vrot.slane %v10110_v52, 4  ;;  %v6406_v0 = vsel %vm20462_vm0, %v6402_v14, %v20496_v36  ;;  %v6425_v38 = vrot.slane %v6424_v42, 4  ;;  %v14137_v14 = vld [vmem:[%s18477_s8 + $0x44] sm:$0x7] }
 0x1cb   : > { %16531 = vmatprep.subr.bf16.mxu0 %v18220_v33  ;;  %v6430_v54 = vrot.slane %v20540_v40, 4  ;;  %v6441_v63 = vshrl.u32 %v14136_v37, 16  ;;  %v6444_v36 = vshll.u32 %v14136_v37, 16  ;;  %v6467_v3 = vshll.u32 %v14138_v43, 16  ;;  %v18226_v37 = vld [vmem:[%s22098_s2 + $0x2f8] sm:$0xff]  }
 0x1cc   : > { %16962 = vmatpush3.bf16.msra.mxu1 %v18219_v15  ;;  %v6393_v15 = vsel %vm20462_vm0, %v6384_v1, %v6392_v35  ;;  %v6438_v1 = vor.u32 %v6437_v49, %v6434_v53  ;;  %v756_v35 = vld [vmem:[%s18477_s8 + $0x2c] sm:$0x7]  ;;  %v20587_v53 = vsel %vm20492_vm1, %v14791_v59, %v10110_v52  ;;  %v20591_v49 = vsel %vm20492_vm1, %v10112_v11, %v10113_v4 }
 0x1cd   : > { %16500 = vmatmul.mubr.bf16.gmra.mrb[72].mxu0 %v18583_v46  ;;  %16963 = vmatprep.subr.bf16.mxu1 %v18221_v50  ;;  %v20581_v44 = vcombine.low %v6383_v56, %v6393_v15  ;;  %v14792_v56 = vrot.slane %v755_v6, 11  ;;  %v10119_v15 = vrot.slane %v10117_v29, 4  ;;  %v6443_v59 = vrot.slane %v6441_v63, 6 }
 0x1ce   : > { %16503 = vmatprep.mubr.bf16.mxu0 %v22411_v30  ;;  %16532 = vmatpush3.bf16.msra.mxu0 %v18220_v33  ;;  %v6416_v33 = vsel %vm20462_vm0, %v6407_v28, %v6415_v51  ;;  %v22412_v28 = vld [vmem:[#allocation22_spill] sm:$0xff]  ;;  %v6439_v52 = vsel %vm20462_vm0, %v6430_v54, %v6438_v1  ;;  %v6446_v11 = vrot.slane %v6444_v36, 7  ;;  %v6455_v4 = vshrl.u32 %v14137_v14, 16  ;;  %v22417_v54 = vld [vmem:[#allocation23_spill] sm:$0xff] }
 0x1cf   : > { %16932 = vmatmul.mubr.bf16.gmra.mrb[40].mxu1 %v18579_v41  ;;  %16533 = vmatprep.subr.bf16.mxu0 %v18222_v9  ;;  %v22413_v51 = vshrl.u32 %v22412_v28, 16  ;;  %v22414_v19 = vshll.u32 %v22412_v28, 16  ;;  %v22415_v28 = vld [vmem:[#allocation9_spill] sm:$0xff]  ;;  %v22418_v1 = vshrl.u32 %v22417_v54, 16  ;;  %v22419_v36 = vshll.u32 %v22417_v54, 16 }
 0x1d0   : > { %16935 = vmatprep.mubr.bf16.mxu1 %v18583_v46  ;;  %16964 = vmatpush3.bf16.msra.mxu1 %v18221_v50  ;;  %v6464_v50 = vshrl.u32 %v14138_v43, 16  ;;  %v20583_v46 = vcombine.low %v6406_v0, %v6416_v33  ;;  %v10120_v43 = vrot.slane %v756_v35, 7  ;;  %v14139_v0 = vld [vmem:[%s18477_s8 + $0x50] sm:$0x7]  ;;  %v14140_v33 = vld [vmem:[%s18477_s8 + $0x54] sm:$0xc]  ;;  %v6447_v54 = vor.u32 %v6446_v11, %v6443_v59 }
 0x1d1   : > { %16965 = vmatprep.subr.bf16.mxu1 %v18223_v55  ;;  %v6449_v57 = vrot.slane %v22413_v51, 6  ;;  %v6450_v42 = vrot.slane %v22414_v19, 7  ;;  %v18227_v51 = vld [vmem:[%s22098_s2 + $0x538] sm:$0xff]   ;;  %v6469_v35 = vrot.slane %v6467_v3, 7  ;;  %v6472_v63 = vrot.slane %v22418_v1, 6  ;;  %v20618_v3 = vld [vmem:[%s22098_s2 + $0x300] sm:$0xff]  }
 0x1d2   : > { %16534 = vmatpush3.bf16.msra.mxu0 %v18222_v9  ;;  %v6429_v9 = vsel %vm20462_vm0, %v6425_v38, %v20540_v40  ;;  %v6458_v38 = vshll.u32 %v14137_v14, 16  ;;  %v6466_v6 = vrot.slane %v6464_v50, 6  ;;  %v6473_v19 = vrot.slane %v22419_v36, 7  ;;  %v757_v36 = vld [vmem:[%s18477_s8 + $0x30] sm:$0x8] }
 0x1d3   : > { %16535 = vmatprep.subr.bf16.mxu0 %v18224_v13  ;;  %v20607_v40 = vor.u32 %v6450_v42, %v6449_v57  ;;  %v6478_v41 = vshrl.u32 %v14139_v0, 16  ;;  %v6481_v8 = vshll.u32 %v14139_v0, 16  ;;  %v20624_v14 = vsel %vm20492_vm1, %v14792_v56, %v10117_v29  ;;  %v20638_v29 = vld [vmem:[%s22098_s2 + $0x540] sm:$0xff]  }
 0x1d4   : > { %16966 = vmatpush3.bf16.msra.mxu1 %v18223_v55  ;;  %v22416_v55 = vld [vmem:[#allocation10_spill] sm:$0xff]  ;;  %v6487_v57 = vshrl.u32 %v14140_v33, 16  ;;  %v6490_v42 = vshll.u32 %v14140_v33, 16  ;;  %v20627_v50 = vcombine.low %v6429_v9, %v6439_v52  ;;  %v20631_v0 = vsel %vm20492_vm1, %v10119_v15, %v10120_v43 }
 0x1d5   : > { %16504 = vmatmul.mubr.bf16.gmra.mrb[76].mxu0 %v22415_v28  ;;  %16967 = vmatprep.subr.bf16.mxu1 %v18225_v23  ;;  %v6457_v1 = vrot.slane %v6455_v4, 6  ;;  %v6460_v9 = vrot.slane %v6458_v38, 7  ;;  %v10124_v56 = vrot.slane %v20100_v20, 7  ;;  %v6470_v52 = vor.u32 %v6469_v35, %v6466_v6  ;;  %v14141_v15 = vld [vmem:[%s18477_s8 + $0x5c] sm:$0x7] }
 0x1d6   : > { %16507 = vmatprep.mubr.bf16.mxu0 %v22416_v55  ;;  %16536 = vmatpush3.bf16.msra.mxu0 %v18224_v13  ;;  %v758_v13 = vld [vmem:[%s18477_s8 + $0x38] sm:$0x7]  ;;  %v20643_v43 = vor.u32 %v6473_v19, %v6472_v63  ;;  %v6480_v59 = vrot.slane %v6478_v41, 6  ;;  %v6483_v11 = vrot.slane %v6481_v8, 7  ;;  %v759_v4 = vld [vmem:[%s18477_s8 + $0x3c] sm:$0x8] }
 0x1d7   : > { %16936 = vmatmul.mubr.bf16.gmra.mrb[44].mxu1 %v22411_v30  ;;  %16537 = vmatprep.subr.bf16.mxu0 %v18226_v37  ;;  %v10131_v33 = vrot.slane %v20108_v61, 7  ;;  %v6489_v30 = vrot.slane %v6487_v57, 6  ;;  %v6492_v38 = vrot.slane %v6490_v42, 7  ;;  %v22420_v20 = vshrl.u32 %v19892_v39, 16  ;;  %v14142_v61 = vld [vmem:[%s18477_s8 + $0x60] sm:$0xc] }
 0x1d8   : > { %16939 = vmatprep.mubr.bf16.mxu1 %v22415_v28  ;;  %16968 = vmatpush3.bf16.msra.mxu1 %v18225_v23  ;;  %v6453_v23 = vrot.slane %v20607_v40, 4  ;;  %v760_v28 = vld [vmem:[%s18477_s8 + $0x44] sm:$0x7]  ;;  %v6448_v63 = vrot.slane %v6447_v54, 4  ;;  %v14793_v41 = vrot.slane %v757_v36, 11  ;;  %v6501_v8 = vshrl.u32 %v14141_v15, 16 }
 0x1d9   : > { %16969 = vmatprep.subr.bf16.mxu1 %v18227_v51  ;;  %v6495_v6 = vrot.slane %v22420_v20, 6  ;;  %v6504_v19 = vshll.u32 %v14141_v15, 16  ;;  %v6461_v57 = vor.u32 %v6460_v9, %v6457_v1  ;;  %v10126_v25 = vrot.slane %v10124_v56, 4 }
 0x1da   : > { %16538 = vmatpush3.bf16.msra.mxu0 %v18226_v37  ;;  %v22421_v37 = vshll.u32 %v19892_v39, 16  ;;  %v10127_v42 = vrot.slane %v758_v13, 7  ;;  %v10138_v20 = vrot.slane %v18345_v31, 7  ;;  %v6471_v39 = vrot.slane %v6470_v52, 4 }
 0x1db   : > { %16571 = vmatprep.subr.bf16.mxu0 %v20618_v3  ;;  %v14794_v54 = vrot.slane %v759_v4, 11  ;;  %v10134_v36 = vrot.slane %v760_v28, 7  ;;  %v6484_v15 = vor.u32 %v6483_v11, %v6480_v59  ;;  %v10133_v26 = vrot.slane %v10131_v33, 4 }
 0x1dc   : > { %v6496_v35 = vrot.slane %v22421_v37, 7  ;;  %16970 = vmatpush3.bf16.msra.mxu1 %v18227_v51  ;;  %v6476_v51 = vrot.slane %v20643_v43, 4  ;;  %v762_v37 = vld [vmem:[%s18477_s8 + $0x50] sm:$0x7]  ;;  %v6493_v45 = vor.u32 %v6492_v38, %v6489_v30  ;;  %v6503_v13 = vrot.slane %v6501_v8, 6 }
 0x1dd   : > { %16508 = vmatmul.mubr.bf16.gmra.mrb[80].mxu0 %v22422_v7  ;;  %17003 = vmatprep.subr.bf16.mxu1 %v20638_v29  ;;  %v6506_v31 = vrot.slane %v6504_v19, 7  ;;  %v14795_v1 = vrot.slane %v761_v17, 11  ;;  %v6510_v9 = vshrl.u32 %v14142_v61, 16  ;;  %v10125_v52 = vsel %vm20492_vm1, %v14793_v41, %v10124_v56  ;;  %v22424_v8 = vld [vmem:[#allocation13_spill] sm:$0xff] }
 0x1de   : > { %16511 = vmatprep.mubr.bf16.mxu0 %v22423_v12  ;;  %v20662_v48 = vor.u32 %v6496_v35, %v6495_v6  ;;  %v10140_v28 = vrot.slane %v10138_v20, 4  ;;  %v10141_v4 = vrot.slane %v762_v37, 7  ;;  %v6513_v24 = vshll.u32 %v14142_v61, 16  ;;  %v14143_v35 = vld [vmem:[%s18477_s8 + $0x68] sm:$0x7] }
 0x1df   : > { %16940 = vmatmul.mubr.bf16.gmra.mrb[48].mxu1 %v22416_v55  ;;  %v6452_v30 = vsel %vm20462_vm0, %v6448_v63, %v20607_v40  ;;  %v6462_v59 = vsel %vm20462_vm0, %v6453_v23, %v6461_v57  ;;  %v10128_v11 = vsel %vm20492_vm1, %v10126_v25, %v10127_v42  ;;  %v10132_v17 = vsel %vm20492_vm1, %v14794_v54, %v10131_v33  ;;  %v14144_v23 = vld [vmem:[%s18477_s8 + $0x6c] sm:$0xc]  ;;  %v14146_v42 = vld [vmem:[%s18477_s8 + $0x78] sm:$0xc] }
 0x1e0   : > { %16943 = vmatprep.mubr.bf16.mxu1 %v22422_v7  ;;  %v6475_v56 = vsel %vm20462_vm0, %v6471_v39, %v20643_v43  ;;  %v6485_v38 = vsel %vm20462_vm0, %v6476_v51, %v6484_v15  ;;  %v10135_v40 = vsel %vm20492_vm1, %v10133_v26, %v10134_v36  ;;  %v6494_v6 = vrot.slane %v6493_v45, 4  ;;  %v22427_v39 = vld [vmem:[#allocation14_spill] sm:$0xff] }
 0x1e1   : > { %v6499_v63 = vrot.slane %v20662_v48, 4  ;;  %v6507_v25 = vor.u32 %v6506_v31, %v6503_v13  ;;  %v10139_v33 = vsel %vm20492_vm1, %v14795_v1, %v10138_v20  ;;  %v6512_v41 = vrot.slane %v6510_v9, 6  ;;  %v14145_v1 = vld [vmem:[%s18477_s8 + $0x74] sm:$0x7] }
 0x1e2   : > { %v10142_v43 = vsel %vm20492_vm1, %v10140_v28, %v10141_v4  ;;  %v6515_v19 = vrot.slane %v6513_v24, 7  ;;  %v22425_v61 = vshrl.u32 %v19915_v60, 16  ;;  %v22426_v26 = vshll.u32 %v19915_v60, 16 }
 0x1e3   : > { %v6524_v51 = vshrl.u32 %v14143_v35, 16  ;;  %v6527_v54 = vshll.u32 %v14143_v35, 16  ;;  %v6533_v20 = vshrl.u32 %v14144_v23, 16  ;;  %v6536_v36 = vshll.u32 %v14144_v23, 16 }
 0x1e4   : > { %v6518_v57 = vrot.slane %v22425_v61, 6  ;;  %v6519_v45 = vrot.slane %v22426_v26, 7  ;;  %v20700_v24 = vcombine.low %v20624_v14, %v20631_v0  ;;  %v20702_v37 = vcombine.low %v6452_v30, %v6462_v59  ;;  %v20722_v30 = vld [vmem:[%s18477_s8 + $0x54] sm:$0x8] }
 0x1e5   : > { %16512 = vmatmul.mubr.bf16.gmra.mrb[84].mxu0 %v22424_v8  ;;  %v20704_v15 = vcombine.low %v10125_v52, %v10128_v11  ;;  %v20706_v60 = vcombine.low %v6475_v56, %v6485_v38  ;;  %v20709_v13 = vcombine.low %v10132_v17, %v10135_v40  ;;  %v6498_v31 = vsel %vm20462_vm0, %v6494_v6, %v20662_v48  ;;  %v14147_v56 = vld [vmem:[%s18477_s8 + $0x80] sm:$0x7]  ;;  %v20730_v38 = vld [vmem:[%s18477_s8 + $0x5c] sm:$0x7] }
 0x1e6   : > { %16515 = vmatprep.mubr.bf16.mxu0 %v22427_v39  ;;  %22428 = vst [vmem:[#allocation22_spill] sm:$0xff] %v20702_v37  ;;  %v6556_v9 = vshrl.u32 %v14146_v42, 16  ;;  %v6559_v14 = vshll.u32 %v14146_v42, 16  ;;  %v6508_v0 = vsel %vm20462_vm0, %v6499_v63, %v6507_v25  ;;  %v20717_v52 = vcombine.low %v10139_v33, %v10142_v43  ;;  %v22431_v40 = vld [vmem:[#allocation26_spill] sm:$0xff]  ;;  %v22437_v42 = vld [vmem:[#allocation15_spill] sm:$0xff] }
 0x1e7   : > { %16944 = vmatmul.mubr.bf16.gmra.mrb[52].mxu1 %v22423_v12  ;;  %22429 = vst [vmem:[#allocation23_spill] sm:$0xff] %v20706_v60  ;;  %v6516_v28 = vor.u32 %v6515_v19, %v6512_v41  ;;  %v20719_v4 = vor.u32 %v6519_v45, %v6518_v57  ;;  %v20724_v59 = vrot.slane %v6524_v51, 6  ;;  %v20726_v11 = vrot.slane %v6527_v54, 7  ;;  %v22434_v19 = vld [vmem:[#allocation28_spill] sm:$0xff]  ;;  %v18346_v54 = vld [vmem:[%s18477_s8 + $0x58] sm:$0xf] }
 0x1e8   : > { %16947 = vmatprep.mubr.bf16.mxu1 %v22424_v8  ;;  %22430 = vst [vmem:[#allocation57_spill] sm:$0xff] %v20717_v52  ;;  %v6535_v17 = vrot.slane %v6533_v20, 6  ;;  %v6538_v48 = vrot.slane %v6536_v36, 7  ;;  %v22432_v6 = vshrl.u32 %v22431_v40, 16  ;;  %v22433_v23 = vshll.u32 %v22431_v40, 16  ;;  %v22438_v40 = vld [vmem:[#allocation16_spill] sm:$0xff] }
 0x1e9   : > { %v6547_v25 = vshrl.u32 %v14145_v1, 16  ;;  %v6550_v33 = vshll.u32 %v14145_v1, 16  ;;  %v6558_v41 = vrot.slane %v6556_v9, 6  ;;  %v6561_v43 = vrot.slane %v6559_v14, 7  ;;  %v14148_v12 = vld [vmem:[%s18477_s8 + $0x84] sm:$0xc] }
 0x1ea   : > { %v6541_v35 = vrot.slane %v22432_v6, 6  ;;  %v6542_v63 = vrot.slane %v22433_v23, 7  ;;  %v22435_v61 = vshrl.u32 %v22434_v19, 16  ;;  %v22436_v26 = vshll.u32 %v22434_v19, 16  ;;  %v765_v19 = vld [vmem:[%s18477_s8 + $0x60] sm:$0x8] }
 0x1eb   : > { %v14796_v51 = vrot.slane %v20722_v30, 11  ;;  %v10145_v20 = vrot.slane %v18346_v54, 7  ;;  %v6570_v36 = vshrl.u32 %v14147_v56, 16  ;;  %v6573_v1 = vshll.u32 %v14147_v56, 16  ;;  %v18347_v56 = vld [vmem:[%s18477_s8 + $0x64] sm:$0xf] }
 0x1ec   : > { %v6564_v57 = vrot.slane %v22435_v61, 6  ;;  %v6565_v45 = vrot.slane %v22436_v26, 7  ;;  %v20744_v9 = vcombine.low %v6498_v31, %v6508_v0  ;;  %v20746_v14 = vrot.slane %v6516_v28, 4  ;;  %v766_v61 = vld [vmem:[%s18477_s8 + $0x68] sm:$0x7] }
 0x1ed   : > { %16516 = vmatmul.mubr.bf16.gmra.mrb[88].mxu0 %v22437_v42  ;;  %v10148_v6 = vrot.slane %v20730_v38, 7  ;;  %v6539_v23 = vor.u32 %v6538_v48, %v6535_v17  ;;  %v20752_v30 = vor.u32 %v6542_v63, %v6541_v35  ;;  %v6549_v26 = vrot.slane %v6547_v25, 6  ;;  %v767_v48 = vld [vmem:[%s18477_s8 + $0x6c] sm:$0x8]  ;;  %v768_v35 = vld [vmem:[%s18477_s8 + $0x74] sm:$0x7] }
 0x1ee   : > { %16519 = vmatprep.mubr.bf16.mxu0 %v22438_v40  ;;  %22439 = vst [vmem:[#allocation26_spill] sm:$0xff] %v20744_v9  ;;  %v6552_v54 = vrot.slane %v6550_v33, 7  ;;  %v10152_v8 = vrot.slane %v18347_v56, 7  ;;  %v6522_v31 = vrot.slane %v20719_v4, 4  ;;  %v6530_v0 = vor.u32 %v20726_v11, %v20724_v59 }
 0x1ef   : > { %16948 = vmatmul.mubr.bf16.gmra.mrb[56].mxu1 %v22427_v39  ;;  %v6562_v28 = vor.u32 %v6561_v43, %v6558_v41  ;;  %v6566_v17 = vor.u32 %v6565_v45, %v6564_v57  ;;  %v10147_v38 = vrot.slane %v10145_v20, 4  ;;  %v6572_v39 = vrot.slane %v6570_v36, 6  ;;  %v22440_v57 = vld [vmem:[#allocation17_spill] sm:$0xff] }
 0x1f0   : > { %16951 = vmatprep.mubr.bf16.mxu1 %v22437_v42  ;;  %v6575_v7 = vrot.slane %v6573_v1, 7  ;;  %v10159_v63 = vrot.slane %v20262_v62, 7  ;;  %v14797_v25 = vrot.slane %v765_v19, 11  ;;  %v10155_v33 = vrot.slane %v766_v61, 7  ;;  %v22441_v62 = vld [vmem:[#allocation37_spill] sm:$0xff] }
 0x1f1   : > { %v6579_v56 = vshrl.u32 %v14148_v12, 16  ;;  %v6582_v55 = vshll.u32 %v14148_v12, 16  ;;  %v6540_v10 = vrot.slane %v6539_v23, 4  ;;  %v6545_v42 = vrot.slane %v20752_v30, 4 }
 0x1f2   : > { %v6553_v2 = vor.u32 %v6552_v54, %v6549_v26  ;;  %v10154_v5 = vrot.slane %v10152_v8, 4  ;;  %v6563_v59 = vrot.slane %v6562_v28, 4  ;;  %v6568_v11 = vrot.slane %v6566_v17, 4  ;;  %v14149_v54 = vld [vmem:[%s18477_s8 + $0x8c] sm:$0x7] }
 0x1f3   : > { %v14798_v41 = vrot.slane %v767_v48, 11  ;;  %v10162_v43 = vrot.slane %v768_v35, 7  ;;  %v6576_v45 = vor.u32 %v6575_v7, %v6572_v39  ;;  %v10161_v36 = vrot.slane %v10159_v63, 4  ;;  %v18231_v35 = vld [vmem:[%s22098_s2 + $0x548] sm:$0xff]  }
 0x1f4   : > { %v22442_v1 = vshrl.u32 %v22441_v62, 16  ;;  %v22443_v12 = vshll.u32 %v22441_v62, 16  ;;  %v6521_v61 = vsel %vm20462_vm0, %v20746_v14, %v20719_v4  ;;  %v10146_v26 = vsel %vm20492_vm1, %v14796_v51, %v10145_v20  ;;  %v14150_v51 = vld [vmem:[%s18477_s8 + $0x90] sm:$0xc] }
 0x1f5   : > { %16520 = vmatmul.mubr.bf16.gmra.mrb[92].mxu0 %v22440_v57  ;;  %v6581_v28 = vrot.slane %v6579_v56, 6  ;;  %v6584_v7 = vrot.slane %v6582_v55, 7  ;;  %v6531_v39 = vsel %vm20462_vm0, %v6522_v31, %v6530_v0  ;;  %v6544_v48 = vsel %vm20462_vm0, %v6540_v10, %v20752_v30  ;;  %v769_v0 = vld [vmem:[%s18477_s8 + $0x78] sm:$0x8] }
 0x1f6   : > { %v6587_v19 = vrot.slane %v22442_v1, 6  ;;  %v6588_v23 = vrot.slane %v22443_v12, 7  ;;  %16539 = vmatprep.mubr.bf16.mxu0 %v20538_v58  ;;  %v10149_v58 = vsel %vm20492_vm1, %v10147_v38, %v10148_v6  ;;  %v10153_v4 = vsel %vm20492_vm1, %v14797_v25, %v10152_v8  ;;  %v18230_v38 = vld [vmem:[%s22098_s2 + $0x308] sm:$0xff]   ;;  %v18348_v12 = vld [vmem:[%s18477_s8 + $0x7c] sm:$0xf] }
 0x1f7   : > { %16952 = vmatmul.mubr.bf16.gmra.mrb[60].mxu1 %v22438_v40  ;;  %v22444_v55 = vcombine.low %v20516_v16, %v20524_v32  ;;  %v6554_v20 = vsel %vm20462_vm0, %v6545_v42, %v6553_v2  ;;  %v10156_v14 = vsel %vm20492_vm1, %v10154_v5, %v10155_v33  ;;  %v6567_v6 = vsel %vm20462_vm0, %v6563_v59, %v6566_v17  ;;  %v14152_v2 = vld [vmem:[%s18477_s8 + $0x9c] sm:$0xc] }
 0x1f8   : > { %v10160_v10 = vsel %vm20492_vm1, %v14798_v41, %v10159_v63  ;;  %v6577_v8 = vsel %vm20462_vm0, %v6568_v11, %v6576_v45  ;;  %v10163_v30 = vsel %vm20492_vm1, %v10161_v36, %v10162_v43  ;;  %v20803_v16 = vor.u32 %v6588_v23, %v6587_v19  ;;  %v20826_v41 = vld [vmem:[%s18477_s8 + $0x80] sm:$0x7]  ;;  %v14151_v43 = vld [vmem:[%s18477_s8 + $0x98] sm:$0x7] }
 0x1f9   : > { %16971 = vmatprep.mubr.bf16.mxu1 %v22444_v55  ;;  %v6593_v32 = vshrl.u32 %v14149_v54, 16  ;;  %v20806_v42 = vcombine.low %v6521_v61, %v6531_v39  ;;  %v6585_v5 = vor.u32 %v6584_v7, %v6581_v28  ;;  %v6596_v31 = vshll.u32 %v14149_v54, 16  ;;  %v14154_v61 = vld [vmem:[%s18477_s8 + $0xa8] sm:$0xc]  ;;  %v22451_v7 = vld [vmem:[#allocation38_spill] sm:$0xff] }
 0x1fa   : > { %v6602_v17 = vshrl.u32 %v14150_v51, 16  ;;  %v20815_v63 = vcombine.low %v10146_v26, %v10149_v58  ;;  %v20817_v25 = vcombine.low %v6544_v48, %v6554_v20  ;;  %v20819_v33 = vcombine.low %v10153_v4, %v10156_v14  ;;  %v14153_v58 = vld [vmem:[%s18477_s8 + $0xa4] sm:$0x7] }
 0x1fb   : > { %22445 = vst [vmem:[#allocation28_spill] sm:$0xff] %v20806_v42  ;;  %v6605_v56 = vshll.u32 %v14150_v51, 16  ;;  %v20821_v59 = vcombine.low %v6567_v6, %v6577_v8  ;;  %v20823_v11 = vcombine.low %v10160_v10, %v10163_v30  ;;  %v6625_v45 = vshrl.u32 %v14152_v2, 16 }
 0x1fc   : > { %22446 = vst [vmem:[#allocation37_spill] sm:$0xff] %v20815_v63  ;;  %22447 = vst [vmem:[#allocation58_spill] sm:$0xff] %v20817_v25  ;;  %v6628_v36 = vshll.u32 %v14152_v2, 16  ;;  %v6591_v62 = vrot.slane %v20803_v16, 4  ;;  %v20831_v1 = vrot.slane %v6593_v32, 6  ;;  %v14799_v19 = vrot.slane %v769_v0, 11 }
 0x1fd   : > { %22448 = vst [vmem:[#allocation59_spill] sm:$0xff] %v20819_v33  ;;  %22449 = vst [vmem:[#allocation60_spill] sm:$0xff] %v20821_v59  ;;  %16540 = vmatmul.mubr.bf16.vlgmr.msra.gmra.mrb[64].mxu0 %v20581_v44  ;;  %v10166_v23 = vrot.slane %v18348_v12, 7  ;;  %v20837_v26 = vrot.slane %v6585_v5, 4  ;;  %v6598_v54 = vrot.slane %v6596_v31, 7  ;;  %v20839_v28 = vrot.slane %v6602_v17, 6 }
 0x1fe   : > { %22450 = vst [vmem:[#allocation61_spill] sm:$0xff] %v20823_v11  ;;  %16572 = vmatpush3.bf16.msra.mxu0 %v20618_v3  ;;  %16543 = vmatprep.mubr.bf16.mxu0 %v20583_v46  ;;  %v22452_v39 = vshrl.u32 %v22451_v7, 16  ;;  %v22453_v48 = vcombine.low %v20528_v27, %v20532_v21  ;;  %v18232_v3 = vld [vmem:[%s22098_s2 + $0x310] sm:$0xff]   ;;  %v6607_v4 = vrot.slane %v6605_v56, 7  ;;  %v22454_v51 = vshll.u32 %v22451_v7, 16  ;;  %v18234_v56 = vld [vmem:[%s22098_s2 + $0x318] sm:$0xff]  }
 0x1ff   : > { %16573 = vmatprep.subr.bf16.mxu0 %v18230_v38  ;;  %v6616_v20 = vshrl.u32 %v14151_v43, 16  ;;  %v6619_v14 = vshll.u32 %v14151_v43, 16  ;;  %v22455_v6 = vcombine.low %v20587_v53, %v20591_v49  ;;  %v6627_v10 = vrot.slane %v6625_v45, 6  ;;  %v18233_v2 = vld [vmem:[%s22098_s2 + $0x550] sm:$0xff]   ;;  %v771_v12 = vld [vmem:[%s18477_s8 + $0x84] sm:$0x8] }
 0x200   : > { %v6610_v44 = vrot.slane %v22452_v39, 6  ;;  %16972 = vmatmul.mubr.bf16.vlgmr.msra.gmra.mrb[32].mxu1 %v22453_v48  ;;  %v6611_v55 = vrot.slane %v22454_v51, 7  ;;  %v6630_v27 = vrot.slane %v6628_v36, 7  ;;  %v22456_v21 = vshrl.u32 %v20158_v47, 16  ;;  %v14155_v36 = vld [vmem:[%s18477_s8 + $0xb0] sm:$0x7] }
 0x201   : > { %17004 = vmatpush3.bf16.msra.mxu1 %v20638_v29  ;;  %16975 = vmatprep.mubr.bf16.mxu1 %v22455_v6  ;;  %v22457_v30 = vshll.u32 %v20158_v47, 16  ;;  %v10169_v29 = vrot.slane %v20826_v41, 7  ;;  %v6639_v5 = vshrl.u32 %v14153_v58, 16  ;;  %v6642_v31 = vshll.u32 %v14153_v58, 16  ;;  %v18236_v6 = vld [vmem:[%s22098_s2 + $0x320] sm:$0xff]  }
 0x202   : > { %v6633_v8 = vrot.slane %v22456_v21, 6  ;;  %17005 = vmatprep.subr.bf16.mxu1 %v18231_v35  ;;  %v6648_v53 = vshrl.u32 %v14154_v61, 16  ;;  %16574 = vmatpush3.bf16.msra.mxu0 %v18230_v38  ;;  %v6599_v49 = vor.u32 %v6598_v54, %v20831_v1  ;;  %v20867_v47 = vsel %vm20492_vm1, %v14799_v19, %v10166_v23  ;;  %v18235_v1 = vld [vmem:[%s22098_s2 + $0x558] sm:$0xff]   ;;  %v18350_v21 = vld [vmem:[%s18477_s8 + $0x94] sm:$0xf] }
 0x203   : > { %v6634_v32 = vrot.slane %v22457_v30, 7  ;;  %v10168_v0 = vrot.slane %v10166_v23, 4  ;;  %v6651_v17 = vshll.u32 %v14154_v61, 16  ;;  %16575 = vmatprep.subr.bf16.mxu0 %v18232_v3  ;;  %v6590_v38 = vsel %vm20462_vm0, %v20837_v26, %v20803_v16  ;;  %v18349_v23 = vld [vmem:[%s18477_s8 + $0x88] sm:$0xf] }
 0x204   : > { %v6608_v41 = vor.u32 %v6607_v4, %v20839_v28  ;;  %v20877_v43 = vor.u32 %v6611_v55, %v6610_v44  ;;  %v20879_v45 = vrot.slane %v6616_v20, 6  ;;  %v20885_v19 = vrot.slane %v6619_v14, 7  ;;  %v772_v28 = vld [vmem:[%s18477_s8 + $0x8c] sm:$0x7] }
 0x205   : > { %17006 = vmatpush3.bf16.msra.mxu1 %v18231_v35  ;;  %v10173_v61 = vrot.slane %v18349_v23, 7  ;;  %v6631_v54 = vor.u32 %v6630_v27, %v6627_v10  ;;  %v20889_v7 = vor.u32 %v6634_v32, %v6633_v8  ;;  %16544 = vmatmul.mubr.bf16.gmra.mrb[68].mxu0 %v20627_v50  ;;  %v6641_v39 = vrot.slane %v6639_v5, 6  ;;  %v773_v27 = vld [vmem:[%s18477_s8 + $0x90] sm:$0x8] }
 0x206   : > { %17007 = vmatprep.subr.bf16.mxu1 %v18233_v2  ;;  %v6644_v44 = vrot.slane %v6642_v31, 7  ;;  %v6650_v35 = vrot.slane %v6648_v53, 6  ;;  %v22458_v58 = vshrl.u32 %v20231_v22, 16  ;;  %16547 = vmatprep.mubr.bf16.mxu0 %v20702_v37  ;;  %v6653_v4 = vrot.slane %v6651_v17, 7 }
 0x207   : > { %16576 = vmatpush3.bf16.msra.mxu0 %v18232_v3  ;;  %v22459_v51 = vshll.u32 %v20231_v22, 16  ;;  %v6662_v20 = vshrl.u32 %v14155_v36, 16  ;;  %v6665_v14 = vshll.u32 %v14155_v36, 16  ;;  %v20906_v10 = vsel %vm20462_vm0, %v6591_v62, %v6599_v49  ;;  %v774_v62 = vld [vmem:[%s18477_s8 + $0x98] sm:$0x7] }
 0x208   : > { %v6656_v48 = vrot.slane %v22458_v58, 6  ;;  %16976 = vmatmul.mubr.bf16.gmra.mrb[36].mxu1 %v20700_v24  ;;  %16577 = vmatprep.subr.bf16.mxu0 %v18234_v56  ;;  %v10170_v22 = vsel %vm20492_vm1, %v10168_v0, %v10169_v29  ;;  %v14800_v3 = vrot.slane %v771_v12, 11  ;;  %v10180_v8 = vrot.slane %v18350_v21, 7  ;;  %v18237_v29 = vld [vmem:[%s22098_s2 + $0x560] sm:$0xff]   ;;  %v18238_v12 = vld [vmem:[%s22098_s2 + $0x328] sm:$0xff]  }
 0x209   : > { %v6657_v55 = vrot.slane %v22459_v51, 7  ;;  %16979 = vmatprep.mubr.bf16.mxu1 %v20704_v15  ;;  %17008 = vmatpush3.bf16.msra.mxu1 %v18233_v2  ;;  %v6609_v30 = vrot.slane %v6608_v41, 4  ;;  %v6614_v32 = vrot.slane %v20877_v43, 4  ;;  %v6622_v5 = vor.u32 %v20885_v19, %v20879_v45  ;;  %v14156_v2 = vld [vmem:[%s18477_s8 + $0xb4] sm:$0xc] }
 0x20a   : > { %v10176_v31 = vrot.slane %v772_v28, 7  ;;  %17009 = vmatprep.subr.bf16.mxu1 %v18235_v1  ;;  %v10175_v53 = vrot.slane %v10173_v61, 4  ;;  %v6632_v49 = vrot.slane %v6631_v54, 4  ;;  %v6637_v0 = vrot.slane %v20889_v7, 4 }
 0x20b   : > { %v6645_v17 = vor.u32 %v6644_v44, %v6641_v39  ;;  %16578 = vmatpush3.bf16.msra.mxu0 %v18234_v56  ;;  %v6654_v41 = vor.u32 %v6653_v4, %v6650_v35  ;;  %v20922_v36 = vor.u32 %v6657_v55, %v6656_v48  ;;  %v6664_v45 = vrot.slane %v6662_v20, 6  ;;  %v775_v44 = vld [vmem:[%s18477_s8 + $0x9c] sm:$0x8]  ;;  %v18351_v35 = vld [vmem:[%s18477_s8 + $0xa0] sm:$0xf] }
 0x20c   : > { %v6667_v19 = vrot.slane %v6665_v14, 7  ;;  %16579 = vmatprep.subr.bf16.mxu0 %v18236_v6  ;;  %v10174_v23 = vsel %vm20492_vm1, %v14800_v3, %v10173_v61  ;;  %v14801_v54 = vrot.slane %v773_v27, 11  ;;  %v10182_v28 = vrot.slane %v10180_v8, 4  ;;  %v776_v55 = vld [vmem:[%s18477_s8 + $0xa4] sm:$0x7] }
 0x20d   : > { %v10183_v39 = vrot.slane %v774_v62, 7  ;;  %17010 = vmatpush3.bf16.msra.mxu1 %v18235_v1  ;;  %v6613_v56 = vsel %vm20462_vm0, %v6609_v30, %v20877_v43  ;;  %v10187_v58 = vrot.slane %v18351_v35, 7  ;;  %v6671_v48 = vshrl.u32 %v14156_v2, 16  ;;  %16548 = vmatmul.mubr.bf16.gmra.mrb[72].mxu0 %v20706_v60  ;;  %v18239_v1 = vld [vmem:[%s22098_s2 + $0x568] sm:$0xff]  }
 0x20e   : > { %v6674_v4 = vshll.u32 %v14156_v2, 16  ;;  %17011 = vmatprep.subr.bf16.mxu1 %v18237_v29  ;;  %v6623_v61 = vsel %vm20462_vm0, %v6614_v32, %v6622_v5  ;;  %v10177_v51 = vsel %vm20492_vm1, %v10175_v53, %v10176_v31  ;;  %v6636_v43 = vsel %vm20462_vm0, %v6632_v49, %v20889_v7  ;;  %16551 = vmatprep.mubr.bf16.mxu0 %v20744_v9  ;;  %v20962_v5 = vld [vmem:[%s18477_s8 + $0xbc] sm:$0x7] }
 0x20f   : > { %16580 = vmatpush3.bf16.msra.mxu0 %v18236_v6  ;;  %v6646_v20 = vsel %vm20462_vm0, %v6637_v0, %v6645_v17  ;;  %v6655_v14 = vrot.slane %v6654_v41, 4  ;;  %v6660_v3 = vrot.slane %v20922_v36, 4  ;;  %v6668_v27 = vor.u32 %v6667_v19, %v6664_v45  ;;  %v18240_v6 = vld [vmem:[%s22098_s2 + $0x330] sm:$0xff]   ;;  %v20985_v45 = vld [vmem:[%s22099_s3 + $0x1] ss:$0 sm:$0xff] }
 0x210   : > { %16980 = vmatmul.mubr.bf16.gmra.mrb[40].mxu1 %v20709_v13  ;;  %v20952_v21 = vcombine.low %v20867_v47, %v10170_v22  ;;  %16581 = vmatprep.subr.bf16.mxu0 %v18238_v12  ;;  %v10181_v7 = vsel %vm20492_vm1, %v14801_v54, %v10180_v8  ;;  %v10184_v30 = vsel %vm20492_vm1, %v10182_v28, %v10183_v39  ;;  %v14802_v32 = vrot.slane %v775_v44, 11  ;;  %v16157_v31 = vpop.f32.mrb[32].mxu0 }
 0x211   : > { %16983 = vmatprep.mubr.bf16.mxu1 %v20717_v52  ;;  %17012 = vmatpush3.bf16.msra.mxu1 %v18237_v29  ;;  %v10189_v47 = vrot.slane %v10187_v58, 4  ;;  %v10190_v22 = vrot.slane %v776_v55, 7  ;;  %v6673_v62 = vrot.slane %v6671_v48, 6  ;;  %v6676_v53 = vrot.slane %v6674_v4, 7  ;;  %v3312_v49 = vpop.f32.mrb[33].mxu0  ;;  %v18241_v29 = vld [vmem:[%s22098_s2 + $0x570] sm:$0xff]  }
 0x212   : > { %22460 = vst [vmem:[#allocation38_spill] sm:$0xff] %v20952_v21  ;;  %v20971_v8 = vcombine.low %v6590_v38, %v20906_v10  ;;  %v20973_v0 = vcombine.low %v6613_v56, %v6623_v61  ;;  %v20975_v17 = vcombine.low %v10174_v23, %v10177_v51  ;;  %17013 = vmatprep.subr.bf16.mxu1 %v18239_v1  ;;  %v16397_v41 = vpop.f32.mrb[0].mxu1  ;;  %v16158_v16 = vpop.f32.mrb[34].mxu0  ;;  %v22465_v10 = vld [vmem:[#allocation41_spill] sm:$0xff]  ;;  %v777_v48 = vld [vmem:[%s18477_s8 + $0xa8] sm:$0x8] }
 0x213   : > { %v20977_v2 = vcombine.low %v6636_v43, %v6646_v20  ;;  %16582 = vmatpush3.bf16.msra.mxu0 %v18238_v12  ;;  %v6659_v26 = vsel %vm20462_vm0, %v6655_v14, %v20922_v36  ;;  %v6669_v38 = vsel %vm20462_vm0, %v6660_v3, %v6668_v27  ;;  %v22466_v19 = vshrl.u32 %v22465_v10, 16  ;;  %v4994_v56 = vpop.f32.mrb[1].mxu1  ;;  %v3315_v44 = vpop.f32.mrb[35].mxu0  ;;  %v18242_v4 = vld [vmem:[%s22098_s2 + $0x338] sm:$0xff]   ;;  %v21010_v61 = vld [vmem:[%s22100_s4 + $0x1] ss:$0 sm:$0xff] }
 0x214   : > { %22461 = vst [vmem:[#allocation62_spill] sm:$0xff] %v20971_v8  ;;  %22462 = vst [vmem:[#allocation63_spill] sm:$0xff] %v20973_v0  ;;  %v22467_v54 = vshll.u32 %v22465_v10, 16  ;;  %v17291_v39 = vadd.f32 %v16397_v41, %v16157_v31  ;;  %v20996_v35 = vcombine.low %v10181_v7, %v10184_v30  ;;  %16583 = vmatprep.subr.bf16.mxu0 %v18240_v6  ;;  %v6685_v36 = vshrl.u32 %v20962_v5, 16  ;;  %v16398_v43 = vpop.f32.mrb[2].mxu1 }
 0x215   : > { %22463 = vst [vmem:[#allocation64_spill] sm:$0xff] %v20975_v17  ;;  %22464 = vst [vmem:[#allocation65_spill] sm:$0xff] %v20977_v2  ;;  %v6679_v23 = vrot.slane %v22466_v19, 6  ;;  %v21000_v12 = vsel %vm20492_vm1, %v14802_v32, %v10187_v58  ;;  %v17292_v51 = vadd.f32 %v4994_v56, %v3312_v49  ;;  %17014 = vmatpush3.bf16.msra.mxu1 %v18239_v1  ;;  %v6688_v20 = vshll.u32 %v20962_v5, 16  ;;  %v4997_v27 = vpop.f32.mrb[3].mxu1  ;;  %v18243_v1 = vld [vmem:[%s22098_s2 + $0x578] sm:$0xff]  }
 0x216   : > { %v6680_v28 = vrot.slane %v22467_v54, 7  ;;  %22468 = vst [vmem:[#allocation41_spill] sm:$0xff] %v20996_v35  ;;  %v21014_v58 = vsel %vm20492_vm1, %v10189_v47, %v10190_v22  ;;  %v6677_v55 = vor.u32 %v6676_v53, %v6673_v62  ;;  %v12978_v14 = vmul.f32 %v17291_v39, %v20985_v45  ;;  %16552 = vmatmul.mubr.bf16.gmra.mrb[76].mxu0 %v20806_v42  ;;  %v21029_v31 = vld [vmem:[%s18477_s8 + $0xb0] sm:$0x7]  ;;  %v21032_v22 = vld [vmem:[%s18477_s8 + $0xc0] sm:$0xc] }
 0x217   : > { %v17293_v3 = vadd.f32 %v16398_v43, %v16158_v16  ;;  %v21019_v7 = vcombine.low %v6659_v26, %v6669_v38  ;;  %17015 = vmatprep.subr.bf16.mxu1 %v18241_v29  ;;  %v12976_v30 = vmul.f32 %v17292_v51, %v20985_v45  ;;  %v17294_v32 = vadd.f32 %v4997_v27, %v3315_v44  ;;  %v18352_v41 = vld [vmem:[%s18477_s8 + $0xac] sm:$0xf] }
 0x218   : > { %16555 = vmatprep.mubr.bf16.mxu0 %v20817_v25  ;;  %16584 = vmatpush3.bf16.msra.mxu0 %v18240_v6  ;;  %v21026_v5 = vor.u32 %v6680_v28, %v6679_v23  ;;  %v14803_v47 = vrot.slane %v777_v48, 11  ;;  %v13015_v62 = vadd.f32 %v21010_v61, %v12978_v14  ;;  %v21037_v49 = vrot.slane %v6685_v36, 6  ;;  %v21043_v6 = vld [vmem:[%s22098_s2 + $0x340] sm:$0xff]   ;;  %v16161_v10 = vpop.f32.mrb[36].mxu0 }
 0x219   : > { %v12979_v53 = vmul.f32 %v17293_v3, %v20985_v45  ;;  %16984 = vmatmul.mubr.bf16.gmra.mrb[44].mxu1 %v20815_v63  ;;  %v10194_v16 = vrot.slane %v18352_v41, 7  ;;  %16585 = vmatprep.subr.bf16.mxu0 %v18242_v4  ;;  %v13013_v26 = vadd.f32 %v21010_v61, %v12976_v30  ;;  %v12977_v38 = vmul.f32 %v17294_v32, %v20985_v45  ;;  %v3328_v39 = vpop.f32.mrb[37].mxu0  ;;  %v21058_v36 = vld [vmem:[%s22098_s2 + $0x580] sm:$0xff]  }
 0x21a   : > { %16987 = vmatprep.mubr.bf16.mxu1 %v20819_v33  ;;  %17016 = vmatpush3.bf16.msra.mxu1 %v18241_v29  ;;  %v21048_v19 = vrot.slane %v6677_v55, 4  ;;  %v21050_v23 = vrot.slane %v6688_v20, 7  ;;  %v13047_v54 = vmax.f32 %v13015_v62, 0.0  ;;  %v10197_v56 = vrot.slane %v21029_v31, 7  ;;  %v16401_v51 = vpop.f32.mrb[4].mxu1  ;;  %v16162_v43 = vpop.f32.mrb[38].mxu0 }
 0x21b   : > { %v13016_v28 = vadd.f32 %v21010_v61, %v12979_v53  ;;  %v6694_v44 = vshrl.u32 %v21032_v22, 16  ;;  %17017 = vmatprep.subr.bf16.mxu1 %v18243_v1  ;;  %v13045_v48 = vmax.f32 %v13013_v26, 0.0  ;;  %v13014_v29 = vadd.f32 %v21010_v61, %v12977_v38  ;;  %v5010_v30 = vpop.f32.mrb[5].mxu1  ;;  %v3331_v32 = vpop.f32.mrb[39].mxu0 }
 0x21c   : > { %v6683_v55 = vrot.slane %v21026_v5, 4  ;;  %v21064_v20 = vsel %vm20492_vm1, %v14803_v47, %v10194_v16  ;;  %16586 = vmatpush3.bf16.msra.mxu0 %v18242_v4  ;;  %v15181_v14 = vpack.c.bf16 %v13047_v54, %v13047_v54  ;;  %v17295_v27 = vadd.f32 %v16401_v51, %v16161_v10  ;;  %v16402_v26 = vpop.f32.mrb[6].mxu1 }
 0x21d   : > { %v13048_v3 = vmax.f32 %v13016_v28, 0.0  ;;  %v6697_v31 = vshll.u32 %v21032_v22, 16  ;;  %16619 = vmatprep.subr.bf16.mxu0 %v21043_v6  ;;  %v15179_v62 = vpack.c.bf16 %v13045_v48, %v13045_v48  ;;  %v13046_v53 = vmax.f32 %v13014_v29, 0.0  ;;  %v5013_v10 = vpop.f32.mrb[7].mxu1  ;;  %v14159_v29 = vld [vmem:[%s18477_s8 + $0xc8] sm:$0x7] }
 0x21e   : > { %v17296_v41 = vadd.f32 %v5010_v30, %v3328_v39  ;;  %17018 = vmatpush3.bf16.msra.mxu1 %v18243_v1  ;;  %13207 = vst [vmem:[%s19532_s19 + $0x24] sm:$0xf] %v15181_v14  ;;  %v12982_v38 = vmul.f32 %v17295_v27, %v20985_v45  ;;  %v17297_v22 = vadd.f32 %v16402_v26, %v16162_v43  ;;  %v10196_v54 = vrot.slane %v10194_v16, 4 }
 0x21f   : > { %v15182_v4 = vpack.c.bf16 %v13048_v3, %v13048_v3  ;;  %16556 = vmatmul.mubr.bf16.gmra.mrb[80].mxu0 %v20821_v59  ;;  %17051 = vmatprep.subr.bf16.mxu1 %v21058_v36  ;;  %13205 = vst [vmem:[%s19532_s19 + $0x4] sm:$0xf] %v15179_v62  ;;  %v15180_v28 = vpack.c.bf16 %v13046_v53, %v13046_v53  ;;  %v21086_v16 = vrot.slane %v6694_v44, 6  ;;  %v21088_v14 = vrot.slane %v6697_v31, 7 }
 0x220   : > { %v12980_v39 = vmul.f32 %v17296_v41, %v20985_v45  ;;  %v17298_v48 = vadd.f32 %v5013_v10, %v3331_v32  ;;  %16559 = vmatprep.mubr.bf16.mxu0 %v20971_v8  ;;  %v6691_v1 = vor.u32 %v21050_v23, %v21037_v49  ;;  %v13019_v51 = vadd.f32 %v21010_v61, %v12982_v38  ;;  %v16165_v30 = vpop.f32.mrb[40].mxu0  ;;  %v22469_v49 = vld [vmem:[#allocation46_spill] sm:$0xff] }
 0x221   : > { %13208 = vst [vmem:[%s19532_s19 + $0x34] sm:$0xf] %v15182_v4  ;;  %v12983_v43 = vmul.f32 %v17297_v22, %v20985_v45  ;;  %16988 = vmatmul.mubr.bf16.gmra.mrb[48].mxu1 %v20823_v11  ;;  %13206 = vst [vmem:[%s19532_s19 + $0x14] sm:$0xf] %v15180_v28  ;;  %v22470_v23 = vshrl.u32 %v22469_v49, 16  ;;  %v22471_v62 = vshll.u32 %v22469_v49, 16  ;;  %v10198_v31 = vsel %vm20492_vm1, %v10196_v54, %v10197_v56 }
 0x222   : > { %v13017_v3 = vadd.f32 %v21010_v61, %v12980_v39  ;;  %v12981_v27 = vmul.f32 %v17298_v48, %v20985_v45  ;;  %16991 = vmatprep.mubr.bf16.mxu1 %v20952_v21  ;;  %v13051_v41 = vmax.f32 %v13019_v51, 0.0  ;;  %v3344_v26 = vpop.f32.mrb[41].mxu0  ;;  %v6708_v4 = vshrl.u32 %v14159_v29, 16  ;;  %v16405_v10 = vpop.f32.mrb[8].mxu1 }
 0x223   : > { %v6702_v32 = vrot.slane %v22470_v23, 6  ;;  %v6703_v53 = vrot.slane %v22471_v62, 7  ;;  %v13020_v44 = vadd.f32 %v21010_v61, %v12983_v43  ;;  %v16166_v28 = vpop.f32.mrb[42].mxu0  ;;  %v6692_v39 = vsel %vm20462_vm0, %v6683_v55, %v6691_v1  ;;  %v5026_v43 = vpop.f32.mrb[9].mxu1 }
 0x224   : > { %v13049_v38 = vmax.f32 %v13017_v3, 0.0  ;;  %v13018_v22 = vadd.f32 %v21010_v61, %v12981_v27  ;;  %v6711_v48 = vshll.u32 %v14159_v29, 16  ;;  %v15185_v49 = vpack.c.bf16 %v13051_v41, %v13051_v41  ;;  %v3347_v62 = vpop.f32.mrb[43].mxu0  ;;  %v16406_v47 = vpop.f32.mrb[10].mxu1 }
 0x225   : > { %v13052_v23 = vmax.f32 %v13020_v44, 0.0  ;;  %v17299_v51 = vadd.f32 %v16405_v10, %v16165_v30  ;;  %v6700_v56 = vor.u32 %v21088_v14, %v21086_v16  ;;  %v17300_v27 = vadd.f32 %v5026_v43, %v3344_v26  ;;  %v5029_v30 = vpop.f32.mrb[11].mxu1  ;;  %v21112_v44 = vld [vmem:[%s18477_s8 + $0xb4] sm:$0x8] }
 0x226   : > { %v15183_v54 = vpack.c.bf16 %v13049_v38, %v13049_v38  ;;  %v13050_v3 = vmax.f32 %v13018_v22, 0.0  ;;  %v21106_v21 = vor.u32 %v6703_v53, %v6702_v32  ;;  %13211 = vst [vmem:[%s19532_s19 + $0x64] sm:$0xf] %v15185_v49  ;;  %v17301_v29 = vadd.f32 %v16406_v47, %v16166_v28 }
 0x227   : > { %v15186_v55 = vpack.c.bf16 %v13052_v23, %v13052_v23  ;;  %v12986_v1 = vmul.f32 %v17299_v51, %v20985_v45  ;;  %16560 = vmatmul.mubr.bf16.gmra.mrb[84].mxu0 %v20973_v0  ;;  %v6710_v41 = vrot.slane %v6708_v4, 6  ;;  %v12984_v14 = vmul.f32 %v17300_v27, %v20985_v45  ;;  %v18353_v23 = vld [vmem:[%s18477_s8 + $0xb8] sm:$0xf] }
 0x228   : > { %13209 = vst [vmem:[%s19532_s19 + $0x44] sm:$0xf] %v15183_v54  ;;  %v15184_v16 = vpack.c.bf16 %v13050_v3, %v13050_v3  ;;  %v17302_v26 = vadd.f32 %v5029_v30, %v3347_v62  ;;  %16563 = vmatprep.mubr.bf16.mxu0 %v20977_v2  ;;  %v6713_v32 = vrot.slane %v6711_v48, 7  ;;  %v12987_v53 = vmul.f32 %v17301_v29, %v20985_v45  ;;  %v16169_v28 = vpop.f32.mrb[44].mxu0  ;;  %v780_v48 = vld [vmem:[%s18477_s8 + $0xbc] sm:$0x7] }
 0x229   : > { %13212 = vst [vmem:[%s19532_s19 + $0x74] sm:$0xf] %v15186_v55  ;;  %v13023_v47 = vadd.f32 %v21010_v61, %v12986_v1  ;;  %16992 = vmatmul.mubr.bf16.gmra.mrb[52].mxu1 %v20975_v17  ;;  %v21123_v4 = vcombine.low %v21000_v12, %v21014_v58  ;;  %v21126_v38 = vcombine.low %v21064_v20, %v10198_v31  ;;  %v14804_v49 = vrot.slane %v21112_v44, 11  ;;  %v3360_v58 = vpop.f32.mrb[45].mxu0 }
 0x22a   : > { %13210 = vst [vmem:[%s19532_s19 + $0x54] sm:$0xf] %v15184_v16  ;;  %v13021_v22 = vadd.f32 %v21010_v61, %v12984_v14  ;;  %v12985_v10 = vmul.f32 %v17302_v26, %v20985_v45  ;;  %16995 = vmatprep.mubr.bf16.mxu1 %v20996_v35  ;;  %v10201_v51 = vrot.slane %v18353_v23, 7  ;;  %v13024_v12 = vadd.f32 %v21010_v61, %v12987_v53  ;;  %v16409_v27 = vpop.f32.mrb[12].mxu1  ;;  %v16170_v55 = vpop.f32.mrb[46].mxu0 }
 0x22b   : > { %22472 = vst [vmem:[#allocation46_spill] sm:$0xff] %v21123_v4  ;;  %v13055_v43 = vmax.f32 %v13023_v47, 0.0  ;;  %v22473_v20 = vsel %vm20462_vm0, %v21048_v19, %v21026_v5  ;;  %v6701_v62 = vrot.slane %v6700_v56, 4  ;;  %v6706_v1 = vrot.slane %v21106_v21, 4  ;;  %v5042_v14 = vpop.f32.mrb[13].mxu1  ;;  %v3363_v26 = vpop.f32.mrb[47].mxu0 }
 0x22c   : > { %v21141_v31 = vcombine.low %v22473_v20, %v6692_v39  ;;  %v13053_v54 = vmax.f32 %v13021_v22, 0.0  ;;  %v13022_v3 = vadd.f32 %v21010_v61, %v12985_v10  ;;  %v6714_v29 = vor.u32 %v6713_v32, %v6710_v41  ;;  %v16410_v56 = vpop.f32.mrb[14].mxu1 }
 0x22d   : > { %v15189_v30 = vpack.c.bf16 %v13055_v43, %v13055_v43  ;;  %v13056_v44 = vmax.f32 %v13024_v12, 0.0  ;;  %v17303_v16 = vadd.f32 %v16409_v27, %v16169_v28  ;;  %v10204_v47 = vrot.slane %v780_v48, 7  ;;  %v5045_v41 = vpop.f32.mrb[15].mxu1 }
 0x22e   : > { %v15187_v5 = vpack.c.bf16 %v13053_v54, %v13053_v54  ;;  %v13054_v19 = vmax.f32 %v13022_v3, 0.0  ;;  %v17304_v39 = vadd.f32 %v5042_v14, %v3360_v58  ;;  %v10203_v53 = vrot.slane %v10201_v51, 4 }
 0x22f   : > { %13215 = vst [vmem:[%s19532_s19 + $0xa4] sm:$0xf] %v15189_v30  ;;  %v15190_v22 = vpack.c.bf16 %v13056_v44, %v13056_v44  ;;  %v12990_v10 = vmul.f32 %v17303_v16, %v20985_v45  ;;  %v17305_v23 = vadd.f32 %v16410_v56, %v16170_v55  ;;  %16564 = vmatmul.mubr.bf16.gmra.mrb[88].mxu0 %v21019_v7 }
 0x230   : > { %v6705_v32 = vsel %vm20462_vm0, %v6701_v62, %v21106_v21  ;;  %13213 = vst [vmem:[%s19532_s19 + $0x84] sm:$0xf] %v15187_v5  ;;  %v15188_v28 = vpack.c.bf16 %v13054_v19, %v13054_v19  ;;  %v12988_v48 = vmul.f32 %v17304_v39, %v20985_v45  ;;  %v17306_v43 = vadd.f32 %v5045_v41, %v3363_v26  ;;  %v16173_v54 = vpop.f32.mrb[48].mxu0 }
 0x231   : > { %16567 = vmatprep.mubr.bf16.mxu0 %v21141_v31  ;;  %v6715_v12 = vsel %vm20462_vm0, %v6706_v1, %v6714_v29  ;;  %13216 = vst [vmem:[%s19532_s19 + $0xb4] sm:$0xf] %v15190_v22  ;;  %v13027_v58 = vadd.f32 %v21010_v61, %v12990_v10  ;;  %v12991_v20 = vmul.f32 %v17305_v23, %v20985_v45  ;;  %v3376_v29 = vpop.f32.mrb[49].mxu0 }
 0x232   : > { %16996 = vmatmul.mubr.bf16.gmra.mrb[56].mxu1 %v21123_v4  ;;  %13214 = vst [vmem:[%s19532_s19 + $0x94] sm:$0xf] %v15188_v28  ;;  %v13025_v21 = vadd.f32 %v21010_v61, %v12988_v48  ;;  %v12989_v62 = vmul.f32 %v17306_v43, %v20985_v45  ;;  %v10202_v3 = vsel %vm20492_vm1, %v14804_v49, %v10201_v51  ;;  %v16413_v14 = vpop.f32.mrb[16].mxu1  ;;  %v16174_v26 = vpop.f32.mrb[50].mxu0 }
 0x233   : > { %16999 = vmatprep.mubr.bf16.mxu1 %v21126_v38  ;;  %v10205_v27 = vsel %vm20492_vm1, %v10203_v53, %v10204_v47  ;;  %v13059_v55 = vmax.f32 %v13027_v58, 0.0  ;;  %v13028_v1 = vadd.f32 %v21010_v61, %v12991_v20  ;;  %v21169_v30 = vcombine.low %v6705_v32, %v6715_v12  ;;  %v5058_v49 = vpop.f32.mrb[17].mxu1  ;;  %v3379_v51 = vpop.f32.mrb[51].mxu0  ;;  %v22474_v58 = vld [vmem:[#allocation25_spill] sm:$0xff] }
 0x234   : > { %v13057_v44 = vmax.f32 %v13025_v21, 0.0  ;;  %v13026_v16 = vadd.f32 %v21010_v61, %v12989_v62  ;;  %v17307_v39 = vadd.f32 %v16413_v14, %v16173_v54  ;;  %v21172_v56 = vcombine.low %v10202_v3, %v10205_v27  ;;  %v16414_v10 = vpop.f32.mrb[18].mxu1  ;;  %v22475_v27 = vld [vmem:[#allocation30_spill] sm:$0xff] }
 0x235   : > { %v15193_v5 = vpack.c.bf16 %v13059_v55, %v13059_v55  ;;  %v13060_v19 = vmax.f32 %v13028_v1, 0.0  ;;  %v17308_v22 = vadd.f32 %v5058_v49, %v3376_v29  ;;  %v17309_v32 = vadd.f32 %v16414_v10, %v16174_v26  ;;  %v5061_v28 = vpop.f32.mrb[19].mxu1 }
 0x236   : > { %v15191_v47 = vpack.c.bf16 %v13057_v44, %v13057_v44  ;;  %v13058_v53 = vmax.f32 %v13026_v16, 0.0  ;;  %v12994_v41 = vmul.f32 %v17307_v39, %v20985_v45  ;;  %v17310_v12 = vadd.f32 %v5061_v28, %v3379_v51 }
 0x237   : > { %13219 = vst [vmem:[%s19532_s19 + $0xe4] sm:$0xf] %v15193_v5  ;;  %v15194_v23 = vpack.c.bf16 %v13060_v19, %v13060_v19  ;;  %16568 = vmatmul.mubr.bf16.gmra.mrb[92].mxu0 %v21169_v30  ;;  %v12992_v43 = vmul.f32 %v17308_v22, %v20985_v45  ;;  %v12995_v21 = vmul.f32 %v17309_v32, %v20985_v45 }
 0x238   : > { %13217 = vst [vmem:[%s19532_s19 + $0xc4] sm:$0xf] %v15191_v47  ;;  %v15192_v48 = vpack.c.bf16 %v13058_v53, %v13058_v53  ;;  %16587 = vmatprep.mubr.bf16.mxu0 %v22474_v58  ;;  %v13031_v20 = vadd.f32 %v21010_v61, %v12994_v41  ;;  %v12993_v54 = vmul.f32 %v17310_v12, %v20985_v45  ;;  %v16177_v3 = vpop.f32.mrb[52].mxu0  ;;  %v18246_v47 = vld [vmem:[%s22098_s2 + $0x348] sm:$0xff]  }
 0x239   : > { %13220 = vst [vmem:[%s19532_s19 + $0xf4] sm:$0xf] %v15194_v23  ;;  %v13029_v62 = vadd.f32 %v21010_v61, %v12992_v43  ;;  %v13032_v1 = vadd.f32 %v21010_v61, %v12995_v21  ;;  %v3392_v29 = vpop.f32.mrb[53].mxu0  ;;  %v22476_v43 = vld [vmem:[#allocation27_spill] sm:$0xff]  ;;  %v18247_v12 = vld [vmem:[%s22098_s2 + $0x588] sm:$0xff]  }
 0x23a   : > { %17000 = vmatmul.mubr.bf16.gmra.mrb[60].mxu1 %v21172_v56  ;;  %13218 = vst [vmem:[%s19532_s19 + $0xd4] sm:$0xf] %v15192_v48  ;;  %v13063_v55 = vmax.f32 %v13031_v20, 0.0  ;;  %v13030_v16 = vadd.f32 %v21010_v61, %v12993_v54  ;;  %v16417_v14 = vpop.f32.mrb[20].mxu1  ;;  %v16178_v26 = vpop.f32.mrb[54].mxu0 }
 0x23b   : > { %17019 = vmatprep.mubr.bf16.mxu1 %v22475_v27  ;;  %v13061_v44 = vmax.f32 %v13029_v62, 0.0  ;;  %v13064_v19 = vmax.f32 %v13032_v1, 0.0  ;;  %v17311_v39 = vadd.f32 %v16417_v14, %v16177_v3  ;;  %v5074_v49 = vpop.f32.mrb[21].mxu1  ;;  %v3395_v51 = vpop.f32.mrb[55].mxu0  ;;  %v22477_v62 = vld [vmem:[#allocation29_spill] sm:$0xff]  ;;  %v22478_v27 = vld [vmem:[#allocation31_spill] sm:$0xff] }
 0x23c   : > { %v15197_v5 = vpack.c.bf16 %v13063_v55, %v13063_v55  ;;  %v13062_v22 = vmax.f32 %v13030_v16, 0.0  ;;  %v17312_v10 = vadd.f32 %v5074_v49, %v3392_v29  ;;  %v16418_v23 = vpop.f32.mrb[22].mxu1  ;;  %v18248_v55 = vld [vmem:[%s22098_s2 + $0x350] sm:$0xff]  }
 0x23d   : > { %v15195_v53 = vpack.c.bf16 %v13061_v44, %v13061_v44  ;;  %v15198_v41 = vpack.c.bf16 %v13064_v19, %v13064_v19  ;;  %v12998_v32 = vmul.f32 %v17311_v39, %v20985_v45  ;;  %v17313_v28 = vadd.f32 %v16418_v23, %v16178_v26  ;;  %v5077_v48 = vpop.f32.mrb[23].mxu1  ;;  %v22479_v44 = vld [vmem:[#allocation32_spill] sm:$0xff] }
 0x23e   : > { %13223 = vst [vmem:[%s19532_s19 + $0x124] sm:$0xf] %v15197_v5  ;;  %v15196_v58 = vpack.c.bf16 %v13062_v22, %v13062_v22  ;;  %v12996_v20 = vmul.f32 %v17312_v10, %v20985_v45  ;;  %v17314_v21 = vadd.f32 %v5077_v48, %v3395_v51  ;;  %v18249_v5 = vld [vmem:[%s22098_s2 + $0x590] sm:$0xff]  }
 0x23f   : > { %16588 = vmatmul.mubr.bf16.vlgmr.msra.gmra.mrb[64].mxu0 %v22476_v43  ;;  %13221 = vst [vmem:[%s19532_s19 + $0x104] sm:$0xf] %v15195_v53  ;;  %13224 = vst [vmem:[%s19532_s19 + $0x134] sm:$0xf] %v15198_v41  ;;  %v13035_v54 = vadd.f32 %v21010_v61, %v12998_v32  ;;  %v12999_v3 = vmul.f32 %v17313_v28, %v20985_v45  ;;  %v18250_v41 = vld [vmem:[%s22098_s2 + $0x358] sm:$0xff]  }
 0x240   : > { %16620 = vmatpush3.bf16.msra.mxu0 %v21043_v6  ;;  %16591 = vmatprep.mubr.bf16.mxu0 %v22477_v62  ;;  %13222 = vst [vmem:[%s19532_s19 + $0x114] sm:$0xf] %v15196_v58  ;;  %v13033_v1 = vadd.f32 %v21010_v61, %v12996_v20  ;;  %v12997_v29 = vmul.f32 %v17314_v21, %v20985_v45  ;;  %v16181_v6 = vpop.f32.mrb[56].mxu0 }
 0x241   : > { %16621 = vmatprep.subr.bf16.mxu0 %v18246_v47  ;;  %v13067_v16 = vmax.f32 %v13035_v54, 0.0  ;;  %v13036_v14 = vadd.f32 %v21010_v61, %v12999_v3  ;;  %v3408_v26 = vpop.f32.mrb[57].mxu0  ;;  %v22480_v54 = vld [vmem:[#allocation20_spill] sm:$0xff]  ;;  %v18251_v3 = vld [vmem:[%s22098_s2 + $0x598] sm:$0xff]  }
 0x242   : > { %17020 = vmatmul.mubr.bf16.vlgmr.msra.gmra.mrb[32].mxu1 %v22478_v27  ;;  %v13065_v19 = vmax.f32 %v13033_v1, 0.0  ;;  %v13034_v39 = vadd.f32 %v21010_v61, %v12997_v29  ;;  %v16421_v49 = vpop.f32.mrb[24].mxu1  ;;  %v16182_v51 = vpop.f32.mrb[58].mxu0 }
 0x243   : > { %17052 = vmatpush3.bf16.msra.mxu1 %v21058_v36  ;;  %17023 = vmatprep.mubr.bf16.mxu1 %v22479_v44  ;;  %v15201_v36 = vpack.c.bf16 %v13067_v16, %v13067_v16  ;;  %v13068_v53 = vmax.f32 %v13036_v14, 0.0  ;;  %v17315_v22 = vadd.f32 %v16421_v49, %v16181_v6  ;;  %v5090_v10 = vpop.f32.mrb[25].mxu1  ;;  %v3411_v23 = vpop.f32.mrb[59].mxu0  ;;  %v22482_v16 = vld [vmem:[#allocation34_spill] sm:$0xff]  ;;  %v18252_v14 = vld [vmem:[%s22098_s2 + $0x360] sm:$0xff]   ;;  %v22483_v49 = vld [vmem:[#allocation36_spill] sm:$0xff] }
 0x244   : > { %17053 = vmatprep.subr.bf16.mxu1 %v18247_v12  ;;  %16622 = vmatpush3.bf16.msra.mxu0 %v18246_v47  ;;  %v15199_v32 = vpack.c.bf16 %v13065_v19, %v13065_v19  ;;  %v13066_v28 = vmax.f32 %v13034_v39, 0.0  ;;  %v17316_v48 = vadd.f32 %v5090_v10, %v3408_v26  ;;  %v16422_v43 = vpop.f32.mrb[26].mxu1 }
 0x245   : > { %16623 = vmatprep.subr.bf16.mxu0 %v18248_v55  ;;  %13227 = vst [vmem:[%s19532_s19 + $0x164] sm:$0xf] %v15201_v36  ;;  %v15202_v58 = vpack.c.bf16 %v13068_v53, %v13068_v53  ;;  %v13002_v47 = vmul.f32 %v17315_v22, %v20985_v45  ;;  %v17317_v20 = vadd.f32 %v16422_v43, %v16182_v51  ;;  %v5093_v21 = vpop.f32.mrb[27].mxu1  ;;  %v18253_v53 = vld [vmem:[%s22098_s2 + $0x5a0] sm:$0xff]  }
 0x246   : > { %13225 = vst [vmem:[%s19532_s19 + $0x144] sm:$0xf] %v15199_v32  ;;  %v15200_v27 = vpack.c.bf16 %v13066_v28, %v13066_v28  ;;  %v13000_v1 = vmul.f32 %v17316_v48, %v20985_v45  ;;  %v17318_v29 = vadd.f32 %v5093_v21, %v3411_v23 }
 0x247   : > { %17054 = vmatpush3.bf16.msra.mxu1 %v18247_v12  ;;  %16592 = vmatmul.mubr.bf16.gmra.mrb[68].mxu0 %v22480_v54  ;;  %v22481_v12 = vld [vmem:[#allocation33_spill] sm:$0xff]  ;;  %13228 = vst [vmem:[%s19532_s19 + $0x174] sm:$0xf] %v15202_v58  ;;  %v13039_v6 = vadd.f32 %v21010_v61, %v13002_v47  ;;  %v13003_v44 = vmul.f32 %v17317_v20, %v20985_v45  ;;  %v18254_v47 = vld [vmem:[%s22098_s2 + $0x368] sm:$0xff]  }
 0x248   : > { %17055 = vmatprep.subr.bf16.mxu1 %v18249_v5  ;;  %16595 = vmatprep.mubr.bf16.mxu0 %v22481_v12  ;;  %13226 = vst [vmem:[%s19532_s19 + $0x154] sm:$0xf] %v15200_v27  ;;  %v13037_v26 = vadd.f32 %v21010_v61, %v13000_v1  ;;  %v13001_v19 = vmul.f32 %v17318_v29, %v20985_v45  ;;  %v16185_v39 = vpop.f32.mrb[60].mxu0 }
 0x249   : > { %16624 = vmatpush3.bf16.msra.mxu0 %v18248_v55  ;;  %v13071_v55 = vmax.f32 %v13039_v6, 0.0  ;;  %v13040_v51 = vadd.f32 %v21010_v61, %v13003_v44  ;;  %v3424_v36 = vpop.f32.mrb[61].mxu0 }
 0x24a   : > { %17024 = vmatmul.mubr.bf16.gmra.mrb[36].mxu1 %v22482_v16  ;;  %16625 = vmatprep.subr.bf16.mxu0 %v18250_v41  ;;  %v13069_v22 = vmax.f32 %v13037_v26, 0.0  ;;  %v13038_v10 = vadd.f32 %v21010_v61, %v13001_v19  ;;  %v16425_v23 = vpop.f32.mrb[28].mxu1  ;;  %v16186_v32 = vpop.f32.mrb[62].mxu0  ;;  %v22484_v26 = vld [vmem:[#allocation35_spill] sm:$0xff]  ;;  %v18255_v19 = vld [vmem:[%s22098_s2 + $0x5a8] sm:$0xff]  }
 0x24b   : > { %17027 = vmatprep.mubr.bf16.mxu1 %v22483_v49  ;;  %17056 = vmatpush3.bf16.msra.mxu1 %v18249_v5  ;;  %v15205_v28 = vpack.c.bf16 %v13071_v55, %v13071_v55  ;;  %v13072_v48 = vmax.f32 %v13040_v51, 0.0  ;;  %v17319_v43 = vadd.f32 %v16425_v23, %v16185_v39  ;;  %v5106_v5 = vpop.f32.mrb[29].mxu1  ;;  %v3427_v58 = vpop.f32.mrb[63].mxu0  ;;  %v18256_v23 = vld [vmem:[%s22098_s2 + $0x370] sm:$0xff]  }
 0x24c   : > { %17057 = vmatprep.subr.bf16.mxu1 %v18251_v3  ;;  %v15203_v20 = vpack.c.bf16 %v13069_v22, %v13069_v22  ;;  %v13070_v21 = vmax.f32 %v13038_v10, 0.0  ;;  %v17320_v27 = vadd.f32 %v5106_v5, %v3424_v36  ;;  %v16426_v1 = vpop.f32.mrb[30].mxu1  ;;  %v22486_v10 = vld [vmem:[#allocation39_spill] sm:$0xff]  ;;  %v18258_v5 = vld [vmem:[%s22098_s2 + $0x5b0] sm:$0xff]  }
 0x24d   : > { %16626 = vmatpush3.bf16.msra.mxu0 %v18250_v41  ;;  %13231 = vst [vmem:[%s19532_s19 + $0x1a4] sm:$0xf] %v15205_v28  ;;  %v15206_v29 = vpack.c.bf16 %v13072_v48, %v13072_v48  ;;  %v13006_v41 = vmul.f32 %v17319_v43, %v20985_v45  ;;  %v17321_v6 = vadd.f32 %v16426_v1, %v16186_v32  ;;  %v5109_v44 = vpop.f32.mrb[31].mxu1  ;;  %v22487_v48 = vld [vmem:[#allocation43_spill] sm:$0xff] }
 0x24e   : > { %16627 = vmatprep.subr.bf16.mxu0 %v18252_v14  ;;  %13229 = vst [vmem:[%s19532_s19 + $0x184] sm:$0xf] %v15203_v20  ;;  %v15204_v39 = vpack.c.bf16 %v13070_v21, %v13070_v21  ;;  %v13004_v55 = vmul.f32 %v17320_v27, %v20985_v45  ;;  %v17322_v51 = vadd.f32 %v5109_v44, %v3427_v58  ;;  %v22488_v44 = vld [vmem:[#allocation42_spill] sm:$0xff] }
 0x24f   : > { %17058 = vmatpush3.bf16.msra.mxu1 %v18251_v3  ;;  %16596 = vmatmul.mubr.bf16.gmra.mrb[72].mxu0 %v22484_v26  ;;  %v22485_v3 = vld [vmem:[#allocation40_spill] sm:$0xff]  ;;  %13232 = vst [vmem:[%s19532_s19 + $0x1b4] sm:$0xf] %v15206_v29  ;;  %v13043_v36 = vadd.f32 %v21010_v61, %v13006_v41  ;;  %v13007_v22 = vmul.f32 %v17321_v6, %v20985_v45  ;;  %v21281_v41 = vld [vmem:[%s18477_s8 + $0xd0] sm:$0xf] }
 0x250   : > { %17059 = vmatprep.subr.bf16.mxu1 %v18253_v53  ;;  %16599 = vmatprep.mubr.bf16.mxu0 %v22485_v3  ;;  %13230 = vst [vmem:[%s19532_s19 + $0x194] sm:$0xf] %v15204_v39  ;;  %v13041_v32 = vadd.f32 %v21010_v61, %v13004_v55  ;;  %v13005_v28 = vmul.f32 %v17322_v51, %v20985_v45  ;;  %v14116_v29 = vld [vmem:[%s18477_s8 + $0xcc] sm:$0xf] }
 0x251   : > { %16628 = vmatpush3.bf16.msra.mxu0 %v18252_v14  ;;  %v13075_v14 = vmax.f32 %v13043_v36, 0.0  ;;  %v13044_v43 = vadd.f32 %v21010_v61, %v13007_v22  ;;  %v22489_v39 = vld [vmem:[#allocation44_spill] sm:$0xff]  ;;  %v7103_v55 = vshrl.u32 %v14116_v29, 16  ;;  %v7106_v51 = vshll.u32 %v14116_v29, 16 }
 0x252   : > { %17028 = vmatmul.mubr.bf16.gmra.mrb[40].mxu1 %v22486_v10  ;;  %16629 = vmatprep.subr.bf16.mxu0 %v18254_v47  ;;  %v13073_v58 = vmax.f32 %v13041_v32, 0.0  ;;  %v13042_v20 = vadd.f32 %v21010_v61, %v13005_v28  ;;  %v18262_v61 = vld [vmem:[%s22098_s2 + $0x5b8] sm:$0xff]   ;;  %v22262_v36 = vshll.u32 %v21281_v41, 16  ;;  %v22263_v22 = vshrl.u32 %v21281_v41, 16  ;;  %v21297_v32 = vld [vmem:[%s22098_s2 + $0x380] sm:$0xff]   ;;  %v22491_v28 = vld [vmem:[#allocation48_spill] sm:$0xff] }
 0x253   : > { %17031 = vmatprep.mubr.bf16.mxu1 %v22487_v48  ;;  %17060 = vmatpush3.bf16.msra.mxu1 %v18253_v53  ;;  %v15209_v45 = vpack.c.bf16 %v13075_v14, %v13075_v14  ;;  %v13076_v21 = vmax.f32 %v13044_v43, 0.0  ;;  %v18260_v53 = vld [vmem:[%s22098_s2 + $0x378] sm:$0xff]   ;;  %v7105_v43 = vrot.slane %v7103_v55, 4  ;;  %v14121_v48 = vld [vmem:[%s18477_s8 + $0xe0] sm:$0x1] }
 0x254   : > { %17061 = vmatprep.subr.bf16.mxu1 %v18255_v19  ;;  %v15207_v27 = vpack.c.bf16 %v13073_v58, %v13073_v58  ;;  %v13074_v1 = vmax.f32 %v13042_v20, 0.0  ;;  %v14119_v14 = vld [vmem:[%s18477_s8 + $0xd8] sm:$0xf]  ;;  %v7108_v58 = vrot.slane %v7106_v51, 5  ;;  %v7114_v20 = vrot.slane %v22262_v36, 5 }
 0x255   : > { %16630 = vmatpush3.bf16.msra.mxu0 %v18254_v47  ;;  %13235 = vst [vmem:[%s19532_s19 + $0x1e4] sm:$0xf] %v15209_v45  ;;  %v15210_v6 = vpack.c.bf16 %v13076_v21, %v13076_v21  ;;  %v7118_v45 = vrot.slane %v22263_v22, 4  ;;  %v21312_v21 = vld [vmem:[%s18477_s8 + $0xdc] sm:$0xf]  ;;  %v7130_v29 = vshll.u32 %v14119_v14, 16 }
 0x256   : > { %16631 = vmatprep.subr.bf16.mxu0 %v18256_v23  ;;  %13233 = vst [vmem:[%s19532_s19 + $0x1c4] sm:$0xf] %v15207_v27  ;;  %v15208_v47 = vpack.c.bf16 %v13074_v1, %v13074_v1  ;;  %v22492_v27 = vld [vmem:[#allocation47_spill] sm:$0xff]  ;;  %v22493_v1 = vld [vmem:[#allocation49_spill] sm:$0xff]  ;;  %v22494_v55 = vld [vmem:[#allocation50_spill] sm:$0xff]  ;;  %v7109_v51 = vor.u32 %v7108_v58, %v7105_v43 }
 0x257   : > { %17062 = vmatpush3.bf16.msra.mxu1 %v18255_v19  ;;  %16600 = vmatmul.mubr.bf16.gmra.mrb[76].mxu0 %v22488_v44  ;;  %13236 = vst [vmem:[%s19532_s19 + $0x1f4] sm:$0xf] %v15210_v6  ;;  %v22490_v19 = vld [vmem:[#allocation45_spill] sm:$0xff]  ;;  %v22264_v6 = vshll.u32 %v21312_v21, 16  ;;  %v7119_v36 = vor.u32 %v7118_v45, %v7114_v20  ;;  %v22497_v43 = vld [vmem:[#allocation52_spill] sm:$0xff] }
 0x258   : > { %17063 = vmatprep.subr.bf16.mxu1 %v18258_v5  ;;  %16603 = vmatprep.mubr.bf16.mxu0 %v22489_v39  ;;  %13234 = vst [vmem:[%s19532_s19 + $0x1d4] sm:$0xf] %v15208_v47  ;;  %v22265_v47 = vshrl.u32 %v21312_v21, 16  ;;  %v7110_v39 = vrot.slane %v7109_v51, 4 }
 0x259   : > { %16632 = vmatpush3.bf16.msra.mxu0 %v18256_v23  ;;  %v21304_v23 = vld [vmem:[%s22098_s2 + $0x5c0] sm:$0xff]   ;;  %v7120_v44 = vrot.slane %v7119_v36, 4  ;;  %v22500_v36 = vld [vmem:[#allocation56_spill] sm:$0xff] }
 0x25a   : > { %17032 = vmatmul.mubr.bf16.gmra.mrb[44].mxu1 %v22490_v19  ;;  %16633 = vmatprep.subr.bf16.mxu0 %v18260_v53 }
 0x25b   : > { %17035 = vmatprep.mubr.bf16.mxu1 %v22491_v28  ;;  %17064 = vmatpush3.bf16.msra.mxu1 %v18258_v5  ;;  %v14118_v5 = vld [vmem:[%s18477_s8 + $0xd4] sm:$0x1] }
 0x25c   : > { %17065 = vmatprep.subr.bf16.mxu1 %v18262_v61  ;;  %v7122_v22 = vshll.u32 %v14118_v5, 16  ;;  %v22495_v28 = vld [vmem:[#allocation53_spill] sm:$0xff]  ;;  %v7146_v5 = vshll.u32 %v14121_v48, 16  ;;  %v21341_v48 = vld [vmem:[%s18477_s8 + $0xc4] sm:$0xf] }
 0x25d   : > { %16634 = vmatpush3.bf16.msra.mxu0 %v18260_v53  ;;  %v7127_v53 = vshrl.u32 %v14119_v14, 16  ;;  %v7142_v14 = vrot.slane %v22265_v47, 4  ;;  %v744_v47 = vld [vmem:[%s18477_s8 + $0xcc] sm:$0xf] }
 0x25e   : > { %16667 = vmatprep.subr.bf16.mxu0 %v21297_v32  ;;  %v7124_v19 = vrot.slane %v7122_v22, 5  ;;  %v743_v22 = vld [vmem:[%s18477_s8 + $0xc0] sm:$0xf] }
 0x25f   : > { %17066 = vmatpush3.bf16.msra.mxu1 %v18262_v61  ;;  %16604 = vmatmul.mubr.bf16.gmra.mrb[80].mxu0 %v22492_v27  ;;  %v7129_v61 = vrot.slane %v7127_v53, 4  ;;  %v7132_v27 = vrot.slane %v7130_v29, 5  ;;  %v22498_v53 = vld [vmem:[#allocation54_spill] sm:$0xff]  ;;  %v18317_v29 = vld [vmem:[%s22098_s2 + $0x688] sm:$0xff]  }
 0x260   : > { %17099 = vmatprep.subr.bf16.mxu1 %v21304_v23  ;;  %16607 = vmatprep.mubr.bf16.mxu0 %v22493_v1  ;;  %v7138_v1 = vrot.slane %v22264_v6, 5  ;;  %v7115_v6 = vsel %vm19907_vm11, %v7110_v39, %v7114_v20  ;;  %v7125_v51 = vsel %vm19907_vm11, %v7120_v44, %v7124_v19  ;;  %v21347_v39 = vld [vmem:[%s18477_s8 + $0xd0] sm:$0xf]  ;;  %v22501_v19 = vld [vmem:[#allocation55_spill] sm:$0xff] }
 0x261   : > { %v7133_v58 = vor.u32 %v7132_v27, %v7129_v61  ;;  %v7148_v61 = vrot.slane %v7146_v5, 5  ;;  %v21350_v44 = vcombine.low %v744_v47, %v21347_v39  ;;  %v21364_v5 = vld [vmem:[%s18477_s8 + $0xdc] sm:$0xf] }
 0x262   : > { %17036 = vmatmul.mubr.bf16.gmra.mrb[48].mxu1 %v22494_v55  ;;  %v22496_v55 = vld [vmem:[#allocation51_spill] sm:$0xff]  ;;  %v7143_v45 = vor.u32 %v7142_v14, %v7138_v1  ;;  %v21344_v14 = vcombine.low %v743_v22, %v21341_v48  ;;  %v18266_v22 = vld [vmem:[%s22098_s2 + $0x5c8] sm:$0xff]  }
 0x263   : > { %17039 = vmatprep.mubr.bf16.mxu1 %v22495_v28 }
 0x264   : > { %v7144_v27 = vrot.slane %v7143_v45, 4 }
 0x267   : > { %16608 = vmatmul.mubr.bf16.gmra.mrb[84].mxu0 %v22496_v55  ;;  %v21338_v55 = vcombine.low %v7115_v6, %v7125_v51  ;;  %v7149_v6 = vsel %vm19907_vm11, %v7144_v27, %v7148_v61  ;;  %v22502_v51 = vld [vmem:[#allocation4_spill] sm:$0xff]  ;;  %v22504_v27 = vld [vmem:[#allocation5_spill] sm:$0xff] }
 0x268   : > { %16611 = vmatprep.mubr.bf16.mxu0 %v22497_v43  ;;  %v7134_v43 = vrot.slane %v7133_v58, 4  ;;  %v745_v58 = vld [vmem:[%s18477_s8 + $0xd8] sm:$0xf]  ;;  %v18267_v61 = vld [vmem:[%s22098_s2 + $0x390] sm:$0xff]  }
 0x269   : > { %v21367_v47 = vcombine.low %v745_v58, %v21364_v5  ;;  %v22506_v58 = vld [vmem:[#allocation7_spill] sm:$0xff] }
 0x26a   : > { %17040 = vmatmul.mubr.bf16.gmra.mrb[52].mxu1 %v22498_v53  ;;  %v7139_v20 = vsel %vm19907_vm11, %v7134_v43, %v7138_v1  ;;  %v18265_v1 = vld [vmem:[%s22098_s2 + $0x388] sm:$0xff]  }
 0x26b   : > { %17043 = vmatprep.mubr.bf16.mxu1 %v22500_v36  ;;  %v21361_v45 = vcombine.low %v7139_v20, %v7149_v6  ;;  %v22503_v43 = vld [vmem:[#allocation8_spill] sm:$0xff]  ;;  %v18268_v20 = vld [vmem:[%s22098_s2 + $0x5d0] sm:$0xff]   ;;  %v22505_v6 = vld [vmem:[#allocation6_spill] sm:$0xff] }
 0x26f   : > { %16612 = vmatmul.mubr.bf16.gmra.mrb[88].mxu0 %v22501_v19 }
 0x270   : > { %16615 = vmatprep.mubr.bf16.mxu0 %v21338_v55 }
 0x272   : > { %17044 = vmatmul.mubr.bf16.gmra.mrb[56].mxu1 %v21344_v14 }
 0x273   : > { %17047 = vmatprep.mubr.bf16.mxu1 %v21350_v44 }
 0x277   : > { %16616 = vmatmul.mubr.bf16.gmra.mrb[92].mxu0 %v21361_v45 }
 0x278   : > { %16635 = vmatprep.mubr.bf16.mxu0 %v22502_v51 }
 0x27a   : > { %17048 = vmatmul.mubr.bf16.gmra.mrb[60].mxu1 %v21367_v47 }
 0x27b   : > { %17067 = vmatprep.mubr.bf16.mxu1 %v22502_v51  ;;  %v18271_v51 = vld [vmem:[%s22098_s2 + $0x3a0] sm:$0xff]  }
 0x27f   : > { %16636 = vmatmul.mubr.bf16.vlgmr.msra.gmra.mrb[64].mxu0 %v22503_v43 }
 0x280   : > { %16668 = vmatpush3.bf16.msra.mxu0 %v21297_v32  ;;  %16639 = vmatprep.mubr.bf16.mxu0 %v22504_v27  ;;  %v18269_v32 = vld [vmem:[%s22098_s2 + $0x398] sm:$0xff]  }
 0x281   : > { %16669 = vmatprep.subr.bf16.mxu0 %v18265_v1 }
 0x282   : > { %17068 = vmatmul.mubr.bf16.vlgmr.msra.gmra.mrb[32].mxu1 %v22503_v43  ;;  %v18273_v43 = vld [vmem:[%s22098_s2 + $0x3a8] sm:$0xff]  }
 0x283   : > { %17100 = vmatpush3.bf16.msra.mxu1 %v21304_v23  ;;  %17071 = vmatprep.mubr.bf16.mxu1 %v22504_v27  ;;  %v18270_v23 = vld [vmem:[%s22098_s2 + $0x5d8] sm:$0xff]  }
 0x284   : > { %17101 = vmatprep.subr.bf16.mxu1 %v18266_v22  ;;  %16670 = vmatpush3.bf16.msra.mxu0 %v18265_v1  ;;  %v18272_v1 = vld [vmem:[%s22098_s2 + $0x5e0] sm:$0xff]  }
 0x285   : > { %16671 = vmatprep.subr.bf16.mxu0 %v18267_v61 }
 0x287   : > { %17102 = vmatpush3.bf16.msra.mxu1 %v18266_v22  ;;  %16640 = vmatmul.mubr.bf16.gmra.mrb[68].mxu0 %v22505_v6  ;;  %v22507_v22 = vld [vmem:[#allocation9_spill] sm:$0xff] }
 0x288   : > { %17103 = vmatprep.subr.bf16.mxu1 %v18268_v20  ;;  %16643 = vmatprep.mubr.bf16.mxu0 %v22506_v58 }
 0x289   : > { %16672 = vmatpush3.bf16.msra.mxu0 %v18267_v61  ;;  %v18274_v61 = vld [vmem:[%s22098_s2 + $0x5e8] sm:$0xff]  }
 0x28a   : > { %17072 = vmatmul.mubr.bf16.gmra.mrb[36].mxu1 %v22505_v6  ;;  %16673 = vmatprep.subr.bf16.mxu0 %v18269_v32 }
 0x28b   : > { %17075 = vmatprep.mubr.bf16.mxu1 %v22506_v58  ;;  %17104 = vmatpush3.bf16.msra.mxu1 %v18268_v20  ;;  %v22508_v20 = vld [vmem:[#allocation10_spill] sm:$0xff]  ;;  %v22511_v58 = vld [vmem:[#allocation13_spill] sm:$0xff] }
 0x28c   : > { %17105 = vmatprep.subr.bf16.mxu1 %v18270_v23 }
 0x28d   : > { %16674 = vmatpush3.bf16.msra.mxu0 %v18269_v32  ;;  %v18275_v32 = vld [vmem:[%s22098_s2 + $0x3b0] sm:$0xff]  }
 0x28e   : > { %16675 = vmatprep.subr.bf16.mxu0 %v18271_v51 }
 0x28f   : > { %17106 = vmatpush3.bf16.msra.mxu1 %v18270_v23  ;;  %16644 = vmatmul.mubr.bf16.gmra.mrb[72].mxu0 %v22507_v22  ;;  %v18276_v23 = vld [vmem:[%s22098_s2 + $0x5f0] sm:$0xff]  }
 0x290   : > { %17107 = vmatprep.subr.bf16.mxu1 %v18272_v1  ;;  %16647 = vmatprep.mubr.bf16.mxu0 %v22508_v20 }
 0x291   : > { %16676 = vmatpush3.bf16.msra.mxu0 %v18271_v51  ;;  %v18277_v51 = vld [vmem:[%s22098_s2 + $0x3b8] sm:$0xff]  }
 0x292   : > { %17076 = vmatmul.mubr.bf16.gmra.mrb[40].mxu1 %v22507_v22  ;;  %16677 = vmatprep.subr.bf16.mxu0 %v18273_v43  ;;  %v22509_v22 = vld [vmem:[#allocation11_spill] sm:$0xff] }
 0x293   : > { %17079 = vmatprep.mubr.bf16.mxu1 %v22508_v20  ;;  %17108 = vmatpush3.bf16.msra.mxu1 %v18272_v1  ;;  %v18278_v20 = vld [vmem:[%s22098_s2 + $0x5f8] sm:$0xff]   ;;  %v22510_v1 = vld [vmem:[#allocation12_spill] sm:$0xff] }
 0x294   : > { %17109 = vmatprep.subr.bf16.mxu1 %v18274_v61 }
 0x295   : > { %16678 = vmatpush3.bf16.msra.mxu0 %v18273_v43  ;;  %v18279_v43 = vld [vmem:[%s22098_s2 + $0x3c0] sm:$0xff]  }
 0x296   : > { %16679 = vmatprep.subr.bf16.mxu0 %v18275_v32 }
 0x297   : > { %17110 = vmatpush3.bf16.msra.mxu1 %v18274_v61  ;;  %16648 = vmatmul.mubr.bf16.gmra.mrb[76].mxu0 %v22509_v22  ;;  %v18280_v61 = vld [vmem:[%s22098_s2 + $0x600] sm:$0xff]  }
 0x298   : > { %17111 = vmatprep.subr.bf16.mxu1 %v18276_v23  ;;  %16651 = vmatprep.mubr.bf16.mxu0 %v22510_v1 }
 0x299   : > { %16680 = vmatpush3.bf16.msra.mxu0 %v18275_v32  ;;  %v22512_v32 = vld [vmem:[#allocation14_spill] sm:$0xff] }
 0x29a   : > { %17080 = vmatmul.mubr.bf16.gmra.mrb[44].mxu1 %v22509_v22  ;;  %16681 = vmatprep.subr.bf16.mxu0 %v18277_v51  ;;  %v22513_v22 = vld [vmem:[#allocation15_spill] sm:$0xff] }
 0x29b   : > { %17083 = vmatprep.mubr.bf16.mxu1 %v22510_v1  ;;  %17112 = vmatpush3.bf16.msra.mxu1 %v18276_v23  ;;  %v22515_v23 = vld [vmem:[#allocation19_spill] sm:$0xff] }
 0x29c   : > { %17113 = vmatprep.subr.bf16.mxu1 %v18278_v20 }
 0x29d   : > { %16682 = vmatpush3.bf16.msra.mxu0 %v18277_v51  ;;  %v18281_v51 = vld [vmem:[%s22098_s2 + $0x3c8] sm:$0xff]  }
 0x29e   : > { %16715 = vmatprep.subr.bf16.mxu0 %v18279_v43 }
 0x29f   : > { %17114 = vmatpush3.bf16.msra.mxu1 %v18278_v20  ;;  %16652 = vmatmul.mubr.bf16.gmra.mrb[80].mxu0 %v22511_v58  ;;  %v22514_v20 = vld [vmem:[#allocation18_spill] sm:$0xff] }
 0x2a0   : > { %17147 = vmatprep.subr.bf16.mxu1 %v18280_v61  ;;  %16655 = vmatprep.mubr.bf16.mxu0 %v22512_v32 }
 0x2a2   : > { %17084 = vmatmul.mubr.bf16.gmra.mrb[48].mxu1 %v22511_v58 }
 0x2a3   : > { %17087 = vmatprep.mubr.bf16.mxu1 %v22512_v32 }
 0x2a7   : > { %16656 = vmatmul.mubr.bf16.gmra.mrb[84].mxu0 %v22513_v22 }
 0x2a8   : > { %16659 = vmatprep.mubr.bf16.mxu0 %v22438_v40 }
 0x2aa   : > { %17088 = vmatmul.mubr.bf16.gmra.mrb[52].mxu1 %v22513_v22 }
 0x2ab   : > { %17091 = vmatprep.mubr.bf16.mxu1 %v22438_v40 }
 0x2af   : > { %16660 = vmatmul.mubr.bf16.gmra.mrb[88].mxu0 %v22440_v57 }
 0x2b0   : > { %16663 = vmatprep.mubr.bf16.mxu0 %v22514_v20 }
 0x2b2   : > { %17092 = vmatmul.mubr.bf16.gmra.mrb[56].mxu1 %v22440_v57  ;;  %v18282_v57 = vld [vmem:[%s22098_s2 + $0x608] sm:$0xff]  }
 0x2b3   : > { %17095 = vmatprep.mubr.bf16.mxu1 %v22514_v20 }
 0x2b7   : > { %16664 = vmatmul.mubr.bf16.gmra.mrb[92].mxu0 %v22515_v23 }
 0x2b8   : > { %16683 = vmatprep.mubr.bf16.mxu0 %v20583_v46  ;;  %v18283_v46 = vld [vmem:[%s22098_s2 + $0x3d0] sm:$0xff]  }
 0x2ba   : > { %17096 = vmatmul.mubr.bf16.gmra.mrb[60].mxu1 %v22515_v23 }
 0x2bb   : > { %17115 = vmatprep.mubr.bf16.mxu1 %v20700_v24  ;;  %v18285_v24 = vld [vmem:[%s22098_s2 + $0x3d8] sm:$0xff]  }
 0x2bf   : > { %16684 = vmatmul.mubr.bf16.vlgmr.msra.gmra.mrb[64].mxu0 %v20627_v50  ;;  %v18284_v50 = vld [vmem:[%s22098_s2 + $0x610] sm:$0xff]  }
 0x2c0   : > { %16716 = vmatpush3.bf16.msra.mxu0 %v18279_v43  ;;  %16687 = vmatprep.mubr.bf16.mxu0 %v20702_v37  ;;  %v18289_v43 = vld [vmem:[%s22098_s2 + $0x3e8] sm:$0xff]   ;;  %v784_v37 = vld [vmem:[%s18477_s8 + $0xd4] sm:$0x7] }
 0x2c1   : > { %16717 = vmatprep.subr.bf16.mxu0 %v18281_v51 }
 0x2c2   : > { %17116 = vmatmul.mubr.bf16.vlgmr.msra.gmra.mrb[32].mxu1 %v20704_v15  ;;  %v18286_v15 = vld [vmem:[%s22098_s2 + $0x618] sm:$0xff]  }
 0x2c3   : > { %17148 = vmatpush3.bf16.msra.mxu1 %v18280_v61  ;;  %17119 = vmatprep.mubr.bf16.mxu1 %v20709_v13  ;;  %v18287_v13 = vld [vmem:[%s22098_s2 + $0x3e0] sm:$0xff]   ;;  %v18290_v61 = vld [vmem:[%s22098_s2 + $0x628] sm:$0xff]  }
 0x2c4   : > { %17149 = vmatprep.subr.bf16.mxu1 %v18282_v57  ;;  %16718 = vmatpush3.bf16.msra.mxu0 %v18281_v51  ;;  %v18291_v51 = vld [vmem:[%s22098_s2 + $0x3f0] sm:$0xff]  }
 0x2c5   : > { %16719 = vmatprep.subr.bf16.mxu0 %v18283_v46 }
 0x2c7   : > { %17150 = vmatpush3.bf16.msra.mxu1 %v18282_v57  ;;  %16688 = vmatmul.mubr.bf16.gmra.mrb[68].mxu0 %v20706_v60  ;;  %v18288_v57 = vld [vmem:[%s22098_s2 + $0x620] sm:$0xff]  }
 0x2c8   : > { %17151 = vmatprep.subr.bf16.mxu1 %v18284_v50  ;;  %16691 = vmatprep.mubr.bf16.mxu0 %v20744_v9  ;;  %v783_v9 = vld [vmem:[%s18477_s8 + $0xcc] sm:$0x8] }
 0x2c9   : > { %16720 = vmatpush3.bf16.msra.mxu0 %v18283_v46  ;;  %v18292_v46 = vld [vmem:[%s22098_s2 + $0x630] sm:$0xff]  }
 0x2ca   : > { %17120 = vmatmul.mubr.bf16.gmra.mrb[36].mxu1 %v20717_v52  ;;  %16721 = vmatprep.subr.bf16.mxu0 %v18285_v24 }
 0x2cb   : > { %17123 = vmatprep.mubr.bf16.mxu1 %v20815_v63  ;;  %17152 = vmatpush3.bf16.msra.mxu1 %v18284_v50  ;;  %v14160_v50 = vld [vmem:[%s18477_s8 + $0xcc] sm:$0xc]  ;;  %v782_v63 = vld [vmem:[%s18477_s8 + $0xc8] sm:$0x7] }
 0x2cc   : > { %17153 = vmatprep.subr.bf16.mxu1 %v18286_v15 }
 0x2cd   : > { %16722 = vmatpush3.bf16.msra.mxu0 %v18285_v24  ;;  %v18293_v24 = vld [vmem:[%s22098_s2 + $0x3f8] sm:$0xff]  }
 0x2ce   : > { %16723 = vmatprep.subr.bf16.mxu0 %v18287_v13 }
 0x2cf   : > { %17154 = vmatpush3.bf16.msra.mxu1 %v18286_v15  ;;  %16692 = vmatmul.mubr.bf16.gmra.mrb[72].mxu0 %v20806_v42  ;;  %v18294_v15 = vld [vmem:[%s22098_s2 + $0x638] sm:$0xff]   ;;  %v22518_v42 = vshll.u32 %v21281_v41, 16 }
 0x2d0   : > { %17155 = vmatprep.subr.bf16.mxu1 %v18288_v57  ;;  %16695 = vmatprep.mubr.bf16.mxu0 %v20817_v25 }
 0x2d1   : > { %16724 = vmatpush3.bf16.msra.mxu0 %v18287_v13  ;;  %v7803_v13 = vshrl.u32 %v14160_v50, 16 }
 0x2d2   : > { %17124 = vmatmul.mubr.bf16.gmra.mrb[40].mxu1 %v20819_v33  ;;  %16725 = vmatprep.subr.bf16.mxu0 %v18289_v43  ;;  %v7812_v33 = vrot.slane %v22518_v42, 7 }
 0x2d3   : > { %17127 = vmatprep.mubr.bf16.mxu1 %v20823_v11  ;;  %17156 = vmatpush3.bf16.msra.mxu1 %v18288_v57  ;;  %v7806_v57 = vshll.u32 %v14160_v50, 16  ;;  %v14162_v11 = vld [vmem:[%s18477_s8 + $0xd8] sm:$0xc] }
 0x2d4   : > { %17157 = vmatprep.subr.bf16.mxu1 %v18290_v61 }
 0x2d5   : > { %16726 = vmatpush3.bf16.msra.mxu0 %v18289_v43  ;;  %v22516_v43 = vld [vmem:[#allocation38_spill] sm:$0xff]  ;;  %v7808_v50 = vrot.slane %v7806_v57, 7  ;;  %v7829_v57 = vshll.u32 %v14162_v11, 16 }
 0x2d6   : > { %16727 = vmatprep.subr.bf16.mxu0 %v18291_v51 }
 0x2d7   : > { %17158 = vmatpush3.bf16.msra.mxu1 %v18290_v61  ;;  %16696 = vmatmul.mubr.bf16.gmra.mrb[76].mxu0 %v20821_v59  ;;  %v21516_v61 = vld [vmem:[%s22098_s2 + $0x400] sm:$0xff]   ;;  %v14161_v59 = vld [vmem:[%s18477_s8 + $0xd4] sm:$0x7]  ;;  %v7831_v52 = vrot.slane %v7829_v57, 7  ;;  %v11272_v57 = vrot.slane %v784_v37, 7 }
 0x2d8   : > { %17159 = vmatprep.subr.bf16.mxu1 %v18292_v46  ;;  %16699 = vmatprep.mubr.bf16.mxu0 %v20971_v8  ;;  %v21523_v8 = vld [vmem:[%s22098_s2 + $0x640] sm:$0xff]  }
 0x2d9   : > { %16728 = vmatpush3.bf16.msra.mxu0 %v18291_v51  ;;  %v7805_v51 = vrot.slane %v7803_v13, 6  ;;  %v7826_v13 = vshrl.u32 %v14162_v11, 16  ;;  %v11269_v11 = vrot.slane %v21347_v39, 7  ;;  %v14897_v39 = vrot.slane %v783_v9, 11 }
 0x2da   : > { %17128 = vmatmul.mubr.bf16.gmra.mrb[44].mxu1 %v22516_v43  ;;  %16729 = vmatprep.subr.bf16.mxu0 %v18293_v24  ;;  %v22517_v43 = vshrl.u32 %v21281_v41, 16 }
 0x2db   : > { %17131 = vmatprep.mubr.bf16.mxu1 %v20975_v17  ;;  %17160 = vmatpush3.bf16.msra.mxu1 %v18292_v46  ;;  %v7817_v17 = vshrl.u32 %v14161_v59, 16  ;;  %v7820_v46 = vshll.u32 %v14161_v59, 16  ;;  %v7809_v42 = vor.u32 %v7808_v50, %v7805_v51  ;;  %v7828_v60 = vrot.slane %v7826_v13, 6 }
 0x2dc   : > { %17161 = vmatprep.subr.bf16.mxu1 %v18294_v15  ;;  %v7811_v25 = vrot.slane %v22517_v43, 6  ;;  %v14163_v43 = vld [vmem:[%s18477_s8 + $0xe0] sm:$0x7]  ;;  %v11271_v13 = vrot.slane %v11269_v11, 4 }
 0x2dd   : > { %16730 = vmatpush3.bf16.msra.mxu0 %v18293_v24  ;;  %v7819_v24 = vrot.slane %v7817_v17, 6  ;;  %v7822_v59 = vrot.slane %v7820_v46, 7  ;;  %v7840_v17 = vshrl.u32 %v14163_v43, 16  ;;  %v7843_v51 = vshll.u32 %v14163_v43, 16 }
 0x2de   : > { %16763 = vmatprep.subr.bf16.mxu0 %v21516_v61  ;;  %v7813_v41 = vor.u32 %v7812_v33, %v7811_v25  ;;  %v22520_v25 = vshll.u32 %v21312_v21, 16  ;;  %v7810_v50 = vrot.slane %v7809_v42, 4 }
 0x2df   : > { %17162 = vmatpush3.bf16.msra.mxu1 %v18294_v15  ;;  %16700 = vmatmul.mubr.bf16.gmra.mrb[80].mxu0 %v20973_v0  ;;  %v781_v15 = vld [vmem:[%s18477_s8 + $0xc0] sm:$0x8]  ;;  %v11262_v0 = vrot.slane %v21341_v48, 7  ;;  %v11265_v48 = vrot.slane %v782_v63, 7  ;;  %v7845_v40 = vrot.slane %v7843_v51, 7 }
 0x2e0   : > { %17195 = vmatprep.subr.bf16.mxu1 %v21523_v8  ;;  %16703 = vmatprep.mubr.bf16.mxu0 %v20977_v2  ;;  %v22519_v2 = vshrl.u32 %v21312_v21, 16  ;;  %v7835_v33 = vrot.slane %v22520_v25, 7  ;;  %v7815_v46 = vrot.slane %v7813_v41, 4  ;;  %v14896_v23 = vrot.slane %v781_v15, 11 }
 0x2e1   : > { %v11264_v20 = vrot.slane %v11262_v0, 4  ;;  %v7842_v25 = vrot.slane %v7840_v17, 6  ;;  %v7814_v42 = vsel %vm20462_vm0, %v7810_v50, %v7813_v41  ;;  %v785_v41 = vld [vmem:[%s18477_s8 + $0xd8] sm:$0x8] }
 0x2e2   : > { %17132 = vmatmul.mubr.bf16.gmra.mrb[48].mxu1 %v20996_v35  ;;  %v7834_v35 = vrot.slane %v22519_v2, 6  ;;  %v7832_v2 = vor.u32 %v7831_v52, %v7828_v60  ;;  %v11263_v37 = vsel %vm20492_vm1, %v14896_v23, %v11262_v0  ;;  %v11276_v60 = vrot.slane %v21364_v5, 7 }
 0x2e3   : > { %17135 = vmatprep.mubr.bf16.mxu1 %v21123_v4  ;;  %v7823_v4 = vor.u32 %v7822_v59, %v7819_v24  ;;  %v11266_v9 = vsel %vm20492_vm1, %v11264_v20, %v11265_v48  ;;  %v11270_v52 = vsel %vm20492_vm1, %v14897_v39, %v11269_v11  ;;  %v786_v24 = vld [vmem:[%s18477_s8 + $0xe0] sm:$0x7]  ;;  %v7846_v15 = vor.u32 %v7845_v40, %v7842_v25  ;;  %v18297_v48 = vld [vmem:[%s22098_s2 + $0x408] sm:$0xff]   ;;  %v22526_v25 = vld [vmem:[#allocation50_spill] sm:$0xff] }
 0x2e4   : > { %v7836_v21 = vor.u32 %v7835_v33, %v7834_v35  ;;  %v11273_v35 = vsel %vm20492_vm1, %v11271_v13, %v11272_v57  ;;  %v21568_v33 = vcombine.low %v11263_v37, %v11266_v9  ;;  %v14898_v20 = vrot.slane %v785_v41, 11  ;;  %v18298_v39 = vld [vmem:[%s22098_s2 + $0x648] sm:$0xff]   ;;  %v14122_v37 = vld [vmem:[%s18477_s8 + $0xe4] sm:$0xf] }
 0x2e5   : > { %v7824_v63 = vsel %vm20462_vm0, %v7815_v46, %v7823_v4  ;;  %v7833_v4 = vrot.slane %v7832_v2, 4  ;;  %v21570_v0 = vcombine.low %v11270_v52, %v11273_v35  ;;  %v11278_v23 = vrot.slane %v11276_v60, 4  ;;  %v18306_v13 = vld [vmem:[%s22098_s2 + $0x668] sm:$0xff]   ;;  %v18313_v52 = vld [vmem:[%s22098_s2 + $0x678] sm:$0xff]   ;;  %v22528_v35 = vld [vmem:[#allocation49_spill] sm:$0xff] }
 0x2e6   : > { %v21566_v59 = vcombine.low %v7814_v42, %v7824_v63  ;;  %v7838_v43 = vrot.slane %v7836_v21, 4  ;;  %v11279_v5 = vrot.slane %v786_v24, 7  ;;  %v11277_v40 = vsel %vm20492_vm1, %v14898_v20, %v11276_v60  ;;  %v22524_v57 = vld [vmem:[#allocation44_spill] sm:$0xff]  ;;  %v18309_v42 = vld [vmem:[%s22098_s2 + $0x670] sm:$0xff]   ;;  %v18311_v63 = vld [vmem:[%s22098_s2 + $0x438] sm:$0xff]  }
 0x2e7   : > { %16704 = vmatmul.mubr.bf16.gmra.mrb[84].mxu0 %v21019_v7  ;;  %v7837_v11 = vsel %vm20462_vm0, %v7833_v4, %v7836_v21  ;;  %v22525_v2 = vld [vmem:[#allocation48_spill] sm:$0xff]  ;;  %v18307_v21 = vld [vmem:[%s22098_s2 + $0x430] sm:$0xff]   ;;  %v22527_v60 = vld [vmem:[#allocation47_spill] sm:$0xff]  ;;  %v8179_v41 = vshrl.u32 %v14122_v37, 16  ;;  %v8182_v24 = vshll.u32 %v14122_v37, 16 }
 0x2e8   : > { %16707 = vmatprep.mubr.bf16.mxu0 %v21141_v31  ;;  %v7847_v17 = vsel %vm20462_vm0, %v7838_v43, %v7846_v15  ;;  %v11280_v51 = vsel %vm20492_vm1, %v11278_v23, %v11279_v5  ;;  %v21647_v9 = vld [vmem:[%s18477_s8 + $0xe8] sm:$0xf]  ;;  %v21660_v15 = vld [vmem:[%s22098_s2 + $0x440] sm:$0xff]   ;;  %v14125_v20 = vld [vmem:[%s18477_s8 + $0xf0] sm:$0xf] }
 0x2e9   : > { %v21584_v50 = vcombine.low %v7837_v11, %v7847_v17  ;;  %v21586_v46 = vcombine.low %v11277_v40, %v11280_v51  ;;  %v8188_v4 = vshll.u32 %v21647_v9, 16  ;;  %v8192_v43 = vshrl.u32 %v21647_v9, 16  ;;  %v21674_v40 = vld [vmem:[%s18477_s8 + $0xf4] sm:$0xf]  ;;  %v22529_v51 = vld [vmem:[#allocation51_spill] sm:$0xff] }
 0x2ea   : > { %17136 = vmatmul.mubr.bf16.gmra.mrb[52].mxu1 %v21126_v38  ;;  %v8181_v23 = vrot.slane %v8179_v41, 4  ;;  %v8184_v5 = vrot.slane %v8182_v24, 5  ;;  %v746_v37 = vld [vmem:[%s18477_s8 + $0xe4] sm:$0xf]  ;;  %v21704_v24 = vld [vmem:[%s18477_s8 + $0xe8] sm:$0xf] }
 0x2eb   : > { %17139 = vmatprep.mubr.bf16.mxu1 %v21172_v56  ;;  %v8190_v11 = vrot.slane %v8188_v4, 5  ;;  %v8194_v17 = vrot.slane %v8192_v43, 4  ;;  %v787_v9 = vld [vmem:[%s18477_s8 + $0xe4] sm:$0x8] }
 0x2ef   : > { %16708 = vmatmul.mubr.bf16.gmra.mrb[88].mxu0 %v21169_v30 }
 0x2f0   : > { %16711 = vmatprep.mubr.bf16.mxu0 %v21566_v59 }
 0x2f2   : > { %17140 = vmatmul.mubr.bf16.gmra.mrb[56].mxu1 %v21568_v33 }
 0x2f3   : > { %17143 = vmatprep.mubr.bf16.mxu1 %v21570_v0 }
 0x2f7   : > { %16712 = vmatmul.mubr.bf16.gmra.mrb[92].mxu0 %v21584_v50 }
 0x2f8   : > { %16731 = vmatprep.mubr.bf16.mxu0 %v22477_v62  ;;  %v18299_v62 = vld [vmem:[%s22098_s2 + $0x410] sm:$0xff]  }
 0x2fa   : > { %17144 = vmatmul.mubr.bf16.gmra.mrb[60].mxu1 %v21586_v46 }
 0x2fb   : > { %17163 = vmatprep.mubr.bf16.mxu1 %v22482_v16  ;;  %v22521_v16 = vld [vmem:[#allocation43_spill] sm:$0xff] }
 0x2ff   : > { %16732 = vmatmul.mubr.bf16.vlgmr.msra.gmra.mrb[64].mxu0 %v22480_v54  ;;  %v18300_v54 = vld [vmem:[%s22098_s2 + $0x650] sm:$0xff]  }
 0x300   : > { %16764 = vmatpush3.bf16.msra.mxu0 %v21516_v61  ;;  %16735 = vmatprep.mubr.bf16.mxu0 %v22481_v12  ;;  %v18301_v12 = vld [vmem:[%s22098_s2 + $0x418] sm:$0xff]  }
 0x301   : > { %16765 = vmatprep.subr.bf16.mxu0 %v18297_v48  ;;  %v22523_v61 = vld [vmem:[#allocation42_spill] sm:$0xff] }
 0x302   : > { %17164 = vmatmul.mubr.bf16.vlgmr.msra.gmra.mrb[32].mxu1 %v22483_v49  ;;  %v18303_v49 = vld [vmem:[%s22098_s2 + $0x420] sm:$0xff]  }
 0x303   : > { %17196 = vmatpush3.bf16.msra.mxu1 %v21523_v8  ;;  %17167 = vmatprep.mubr.bf16.mxu1 %v22486_v10  ;;  %v18302_v8 = vld [vmem:[%s22098_s2 + $0x658] sm:$0xff]   ;;  %v22522_v10 = vld [vmem:[#allocation45_spill] sm:$0xff] }
 0x304   : > { %17197 = vmatprep.subr.bf16.mxu1 %v18298_v39  ;;  %16766 = vmatpush3.bf16.msra.mxu0 %v18297_v48  ;;  %v22530_v48 = vld [vmem:[#allocation52_spill] sm:$0xff] }
 0x305   : > { %16767 = vmatprep.subr.bf16.mxu0 %v18299_v62 }
 0x307   : > { %17198 = vmatpush3.bf16.msra.mxu1 %v18298_v39  ;;  %16736 = vmatmul.mubr.bf16.gmra.mrb[68].mxu0 %v22484_v26  ;;  %v18304_v26 = vld [vmem:[%s22098_s2 + $0x660] sm:$0xff]   ;;  %v8203_v39 = vshrl.u32 %v14125_v20, 16 }
 0x308   : > { %17199 = vmatprep.subr.bf16.mxu1 %v18300_v54  ;;  %16739 = vmatprep.mubr.bf16.mxu0 %v22485_v3  ;;  %v18305_v3 = vld [vmem:[%s22098_s2 + $0x428] sm:$0xff]  }
 0x309   : > { %16768 = vmatpush3.bf16.msra.mxu0 %v18299_v62  ;;  %v8206_v62 = vshll.u32 %v14125_v20, 16 }
 0x30a   : > { %17168 = vmatmul.mubr.bf16.gmra.mrb[36].mxu1 %v22521_v16  ;;  %16769 = vmatprep.subr.bf16.mxu0 %v18301_v12  ;;  %v8195_v16 = vor.u32 %v8194_v17, %v8190_v11 }
 0x30b   : > { %17171 = vmatprep.mubr.bf16.mxu1 %v22522_v10  ;;  %17200 = vmatpush3.bf16.msra.mxu1 %v18300_v54  ;;  %v8212_v54 = vshll.u32 %v21674_v40, 16  ;;  %v8205_v10 = vrot.slane %v8203_v39, 4  ;;  %v22533_v39 = vld [vmem:[#allocation10_spill] sm:$0xff] }
 0x30c   : > { %17201 = vmatprep.subr.bf16.mxu1 %v18302_v8 }
 0x30d   : > { %16770 = vmatpush3.bf16.msra.mxu0 %v18301_v12  ;;  %v8216_v12 = vshrl.u32 %v21674_v40, 16 }
 0x30e   : > { %16771 = vmatprep.subr.bf16.mxu0 %v18303_v49 }
 0x30f   : > { %17202 = vmatpush3.bf16.msra.mxu1 %v18302_v8  ;;  %16740 = vmatmul.mubr.bf16.gmra.mrb[72].mxu0 %v22523_v61  ;;  %v8185_v8 = vor.u32 %v8184_v5, %v8181_v23  ;;  %v8218_v61 = vrot.slane %v8216_v12, 4  ;;  %v21714_v5 = vld [vmem:[%s18477_s8 + $0x100] sm:$0xf] }
 0x310   : > { %17203 = vmatprep.subr.bf16.mxu1 %v18304_v26  ;;  %16743 = vmatprep.mubr.bf16.mxu0 %v22524_v57  ;;  %v8196_v57 = vrot.slane %v8195_v16, 4  ;;  %v18323_v16 = vld [vmem:[%s22098_s2 + $0x6a0] sm:$0xff]  }
 0x311   : > { %16772 = vmatpush3.bf16.msra.mxu0 %v18303_v49 }
 0x312   : > { %17172 = vmatmul.mubr.bf16.gmra.mrb[40].mxu1 %v22525_v2  ;;  %16773 = vmatprep.subr.bf16.mxu0 %v18305_v3 }
 0x313   : > { %17175 = vmatprep.mubr.bf16.mxu1 %v22526_v25  ;;  %17204 = vmatpush3.bf16.msra.mxu1 %v18304_v26  ;;  %v8208_v26 = vrot.slane %v8206_v62, 5  ;;  %v18322_v62 = vld [vmem:[%s22098_s2 + $0x460] sm:$0xff]  }
 0x314   : > { %17205 = vmatprep.subr.bf16.mxu1 %v18306_v13 }
 0x315   : > { %16774 = vmatpush3.bf16.msra.mxu0 %v18305_v3  ;;  %v8214_v3 = vrot.slane %v8212_v54, 5 }
 0x316   : > { %16775 = vmatprep.subr.bf16.mxu0 %v18307_v21 }
 0x317   : > { %17206 = vmatpush3.bf16.msra.mxu1 %v18306_v13  ;;  %16744 = vmatmul.mubr.bf16.gmra.mrb[76].mxu0 %v22527_v60  ;;  %v8186_v13 = vrot.slane %v8185_v8, 4  ;;  %v21700_v60 = vld [vmem:[%s18477_s8 + $0xf4] sm:$0xf]  ;;  %v22534_v8 = vld [vmem:[#allocation11_spill] sm:$0xff] }
 0x318   : > { %17207 = vmatprep.subr.bf16.mxu1 %v18309_v42  ;;  %16747 = vmatprep.mubr.bf16.mxu0 %v22528_v35 }
 0x319   : > { %16776 = vmatpush3.bf16.msra.mxu0 %v18307_v21  ;;  %v8219_v21 = vor.u32 %v8218_v61, %v8214_v3  ;;  %v18328_v61 = vld [vmem:[%s22098_s2 + $0x478] sm:$0xff]  }
 0x31a   : > { %17176 = vmatmul.mubr.bf16.gmra.mrb[44].mxu1 %v22495_v28  ;;  %16777 = vmatprep.subr.bf16.mxu0 %v18311_v63  ;;  %v21666_v28 = vld [vmem:[%s22098_s2 + $0x680] sm:$0xff]  }
 0x31b   : > { %17179 = vmatprep.mubr.bf16.mxu1 %v22498_v53  ;;  %17208 = vmatpush3.bf16.msra.mxu1 %v18309_v42  ;;  %v14124_v53 = vld [vmem:[%s18477_s8 + $0xec] sm:$0x1]  ;;  %v8191_v42 = vsel %vm19907_vm11, %v8186_v13, %v8190_v11  ;;  %v8220_v35 = vrot.slane %v8219_v21, 4  ;;  %v748_v11 = vld [vmem:[%s18477_s8 + $0xfc] sm:$0xf] }
 0x31c   : > { %17209 = vmatprep.subr.bf16.mxu1 %v18313_v52  ;;  %v8198_v49 = vshll.u32 %v14124_v53, 16  ;;  %v14944_v53 = vcombine.low %v748_v11, %v21714_v5  ;;  %v18329_v13 = vld [vmem:[%s22098_s2 + $0x6b8] sm:$0xff]  }
 0x31d   : > { %16778 = vmatpush3.bf16.msra.mxu0 %v18311_v63 }
 0x31e   : > { %16811 = vmatprep.subr.bf16.mxu0 %v21660_v15  ;;  %v8200_v2 = vrot.slane %v8198_v49, 5  ;;  %v18324_v49 = vld [vmem:[%s22098_s2 + $0x468] sm:$0xff]  }
 0x31f   : > { %17210 = vmatpush3.bf16.msra.mxu1 %v18313_v52  ;;  %16748 = vmatmul.mubr.bf16.gmra.mrb[80].mxu0 %v22529_v51  ;;  %v22531_v51 = vld [vmem:[#allocation7_spill] sm:$0xff] }
 0x320   : > { %17243 = vmatprep.subr.bf16.mxu1 %v21666_v28  ;;  %16751 = vmatprep.mubr.bf16.mxu0 %v22530_v48  ;;  %v8201_v63 = vsel %vm19907_vm11, %v8196_v57, %v8200_v2  ;;  %v22532_v48 = vld [vmem:[#allocation9_spill] sm:$0xff] }
 0x322   : > { %17180 = vmatmul.mubr.bf16.gmra.mrb[48].mxu1 %v22500_v36  ;;  %v14127_v36 = vld [vmem:[%s18477_s8 + $0xf8] sm:$0x1] }
 0x323   : > { %17183 = vmatprep.mubr.bf16.mxu1 %v21344_v14  ;;  %v8209_v14 = vor.u32 %v8208_v26, %v8205_v10  ;;  %v8222_v25 = vshll.u32 %v14127_v36, 16  ;;  %v18325_v10 = vld [vmem:[%s22098_s2 + $0x6a8] sm:$0xff]   ;;  %v18326_v26 = vld [vmem:[%s22098_s2 + $0x470] sm:$0xff]   ;;  %v8569_v36 = vshll.u32 %v21700_v60, 16 }
 0x325   : > { %v8210_v52 = vrot.slane %v8209_v14, 4  ;;  %v8224_v41 = vrot.slane %v8222_v25, 5  ;;  %v531_v14 = vld [vmem:[%s18477_s8 + $0xf8] sm:$0x3] }
 0x327   : > { %16752 = vmatmul.mubr.bf16.gmra.mrb[84].mxu0 %v22501_v19  ;;  %v747_v19 = vld [vmem:[%s18477_s8 + $0xf0] sm:$0xf]  ;;  %v8225_v23 = vsel %vm19907_vm11, %v8220_v35, %v8224_v41 }
 0x328   : > { %16755 = vmatprep.mubr.bf16.mxu0 %v21338_v55  ;;  %v14663_v55 = vcombine.low %v8191_v42, %v8201_v63  ;;  %v14943_v20 = vcombine.low %v747_v19, %v21700_v60  ;;  %v532_v42 = vld [vmem:[%s18477_s8 + $0xfc] sm:$0xe]  ;;  %v8571_v63 = vrot.slane %v8569_v36, 6  ;;  %v8579_v19 = vshll.u32 %v531_v14, 16  ;;  %v22536_v41 = vld [vmem:[#allocation17_spill] sm:$0xff] }
 0x329   : > { %v11959_v35 = vshll.u32 %v532_v42, 16 }
 0x32a   : > { %17184 = vmatmul.mubr.bf16.gmra.mrb[52].mxu1 %v21350_v44  ;;  %v14942_v44 = vcombine.low %v746_v37, %v21704_v24  ;;  %v8576_v37 = vshrl.u32 %v531_v14, 16  ;;  %v8581_v11 = vrot.slane %v8579_v19, 6  ;;  %v22546_v19 = vld [vmem:[#allocation59_spill] sm:$0xff] }
 0x32b   : > { %17187 = vmatprep.mubr.bf16.mxu1 %v21367_v47  ;;  %v8215_v47 = vsel %vm19907_vm11, %v8210_v52, %v8214_v3  ;;  %v18327_v3 = vld [vmem:[%s22098_s2 + $0x6b0] sm:$0xff]   ;;  %v11956_v52 = vshrl.u32 %v532_v42, 16 }
 0x32c   : > { %v14664_v17 = vcombine.low %v8215_v47, %v8225_v23  ;;  %v22542_v42 = vld [vmem:[#allocation57_spill] sm:$0xff] }
 0x32f   : > { %16756 = vmatmul.mubr.bf16.gmra.mrb[88].mxu0 %v21361_v45  ;;  %v18316_v45 = vld [vmem:[%s22098_s2 + $0x448] sm:$0xff]  }
 0x330   : > { %16759 = vmatprep.mubr.bf16.mxu0 %v14663_v55  ;;  %v22535_v55 = vld [vmem:[#allocation16_spill] sm:$0xff] }
 0x332   : > { %17188 = vmatmul.mubr.bf16.gmra.mrb[56].mxu1 %v14942_v44  ;;  %v11965_v44 = vshrl.u32 %v21714_v5, 16 }
 0x333   : > { %17191 = vmatprep.mubr.bf16.mxu1 %v14943_v20  ;;  %v11968_v20 = vshll.u32 %v21714_v5, 16 }
 0x337   : > { %16760 = vmatmul.mubr.bf16.gmra.mrb[92].mxu0 %v14664_v17  ;;  %v534_v17 = vld [vmem:[%s18477_s8 + $0x104] sm:$0x3] }
 0x338   : > { %16779 = vmatprep.mubr.bf16.mxu0 %v22504_v27  ;;  %v18318_v27 = vld [vmem:[%s22098_s2 + $0x450] sm:$0xff]  }
 0x33a   : > { %17192 = vmatmul.mubr.bf16.gmra.mrb[60].mxu1 %v14944_v53  ;;  %v11958_v53 = vrot.slane %v11956_v52, 5  ;;  %v22548_v52 = vld [vmem:[#allocation58_spill] sm:$0xff] }
 0x33b   : > { %17211 = vmatprep.mubr.bf16.mxu1 %v22505_v6 }
 0x33f   : > { %16780 = vmatmul.mubr.bf16.vlgmr.msra.gmra.mrb[64].mxu0 %v22505_v6  ;;  %v18319_v6 = vld [vmem:[%s22098_s2 + $0x690] sm:$0xff]  }
 0x340   : > { %16812 = vmatpush3.bf16.msra.mxu0 %v21660_v15  ;;  %16783 = vmatprep.mubr.bf16.mxu0 %v22531_v51  ;;  %v18320_v15 = vld [vmem:[%s22098_s2 + $0x458] sm:$0xff]  }
 0x341   : > { %16813 = vmatprep.subr.bf16.mxu0 %v18316_v45 }
 0x342   : > { %17212 = vmatmul.mubr.bf16.vlgmr.msra.gmra.mrb[32].mxu1 %v22531_v51  ;;  %v11970_v51 = vrot.slane %v11968_v20, 6  ;;  %v22552_v20 = vld [vmem:[#allocation62_spill] sm:$0xff] }
 0x343   : > { %17244 = vmatpush3.bf16.msra.mxu1 %v21666_v28  ;;  %17215 = vmatprep.mubr.bf16.mxu1 %v22532_v48  ;;  %v18321_v28 = vld [vmem:[%s22098_s2 + $0x698] sm:$0xff]  }
 0x344   : > { %17245 = vmatprep.subr.bf16.mxu1 %v18317_v29  ;;  %16814 = vmatpush3.bf16.msra.mxu0 %v18316_v45  ;;  %v11961_v45 = vrot.slane %v11959_v35, 6  ;;  %v22549_v35 = vld [vmem:[#allocation61_spill] sm:$0xff] }
 0x345   : > { %16815 = vmatprep.subr.bf16.mxu0 %v18318_v27 }
 0x347   : > { %17246 = vmatpush3.bf16.msra.mxu1 %v18317_v29  ;;  %16784 = vmatmul.mubr.bf16.gmra.mrb[68].mxu0 %v22532_v48  ;;  %v11967_v29 = vrot.slane %v11965_v44, 5  ;;  %v11978_v48 = vshll.u32 %v534_v17, 16  ;;  %v22551_v44 = vld [vmem:[#allocation60_spill] sm:$0xff] }
 0x348   : > { %17247 = vmatprep.subr.bf16.mxu1 %v18319_v6  ;;  %16787 = vmatprep.mubr.bf16.mxu0 %v22533_v39 }
 0x349   : > { %16816 = vmatpush3.bf16.msra.mxu0 %v18318_v27  ;;  %v11975_v27 = vshrl.u32 %v534_v17, 16  ;;  %v22556_v17 = vld [vmem:[#allocation65_spill] sm:$0xff] }
 0x34a   : > { %17216 = vmatmul.mubr.bf16.gmra.mrb[36].mxu1 %v22533_v39  ;;  %16817 = vmatprep.subr.bf16.mxu0 %v18320_v15  ;;  %v22537_v39 = vld [vmem:[#allocation18_spill] sm:$0xff] }
 0x34b   : > { %17219 = vmatprep.mubr.bf16.mxu1 %v22534_v8  ;;  %17248 = vmatpush3.bf16.msra.mxu1 %v18319_v6 }
 0x34c   : > { %17249 = vmatprep.subr.bf16.mxu1 %v18321_v28 }
 0x34d   : > { %16818 = vmatpush3.bf16.msra.mxu0 %v18320_v15 }
 0x34e   : > { %16819 = vmatprep.subr.bf16.mxu0 %v18322_v62 }
 0x34f   : > { %17250 = vmatpush3.bf16.msra.mxu1 %v18321_v28  ;;  %16788 = vmatmul.mubr.bf16.gmra.mrb[72].mxu0 %v22534_v8  ;;  %v11962_v8 = vor.u32 %v11961_v45, %v11958_v53 }
 0x350   : > { %17251 = vmatprep.subr.bf16.mxu1 %v18323_v16  ;;  %16791 = vmatprep.mubr.bf16.mxu0 %v22510_v1 }
 0x351   : > { %16820 = vmatpush3.bf16.msra.mxu0 %v18322_v62  ;;  %v22538_v62 = vld [vmem:[#allocation19_spill] sm:$0xff] }
 0x352   : > { %17220 = vmatmul.mubr.bf16.gmra.mrb[40].mxu1 %v22510_v1  ;;  %16821 = vmatprep.subr.bf16.mxu0 %v18324_v49  ;;  %v529_v1 = vld [vmem:[%s18477_s8 + $0xf0] sm:$0xe] }
 0x353   : > { %17223 = vmatprep.mubr.bf16.mxu1 %v22511_v58  ;;  %17252 = vmatpush3.bf16.msra.mxu1 %v18323_v16  ;;  %v8557_v57 = vshrl.u32 %v529_v1, 16  ;;  %v8560_v2 = vshll.u32 %v529_v1, 16  ;;  %v11971_v16 = vor.u32 %v11970_v51, %v11967_v29  ;;  %v22557_v29 = vld [vmem:[#allocation46_spill] sm:$0xff]  ;;  %v14165_v51 = vld [vmem:[%s18477_s8 + $0xec] sm:$0x7] }
 0x354   : > { %17253 = vmatprep.subr.bf16.mxu1 %v18325_v10 }
 0x355   : > { %16822 = vmatpush3.bf16.msra.mxu0 %v18324_v49  ;;  %v8559_v21 = vrot.slane %v8557_v57, 5  ;;  %v8562_v25 = vrot.slane %v8560_v2, 6  ;;  %v11977_v49 = vrot.slane %v11975_v27, 5  ;;  %v11973_v57 = vrot.slane %v11971_v16, 4 }
 0x356   : > { %16823 = vmatprep.subr.bf16.mxu0 %v18326_v26 }
 0x357   : > { %17254 = vmatpush3.bf16.msra.mxu1 %v18325_v10  ;;  %16792 = vmatmul.mubr.bf16.gmra.mrb[76].mxu0 %v22511_v58  ;;  %v8566_v58 = vshrl.u32 %v21700_v60, 16  ;;  %v8563_v47 = vor.u32 %v8562_v25, %v8559_v21  ;;  %v11980_v10 = vrot.slane %v11978_v48, 6  ;;  %v22541_v25 = vld [vmem:[#allocation22_spill] sm:$0xff] }
 0x358   : > { %17255 = vmatprep.subr.bf16.mxu1 %v18327_v3  ;;  %16795 = vmatprep.mubr.bf16.mxu0 %v22512_v32 }
 0x359   : > { %16824 = vmatpush3.bf16.msra.mxu0 %v18326_v26  ;;  %v8564_v6 = vrot.slane %v8563_v47, 4  ;;  %v11981_v2 = vor.u32 %v11980_v10, %v11977_v49  ;;  %v22553_v47 = vld [vmem:[#allocation64_spill] sm:$0xff]  ;;  %v14167_v26 = vld [vmem:[%s18477_s8 + $0xf8] sm:$0x7] }
 0x35a   : > { %17224 = vmatmul.mubr.bf16.gmra.mrb[44].mxu1 %v22512_v32  ;;  %16825 = vmatprep.subr.bf16.mxu0 %v18328_v61  ;;  %v8568_v32 = vrot.slane %v8566_v58, 5  ;;  %v22540_v58 = vld [vmem:[#allocation21_spill] sm:$0xff] }
 0x35b   : > { %17227 = vmatprep.mubr.bf16.mxu1 %v22513_v22  ;;  %17256 = vmatpush3.bf16.msra.mxu1 %v18327_v3  ;;  %v11982_v14 = vsel %vm18506_vm2, %v11973_v57, %v11981_v2  ;;  %v790_v57 = vld [vmem:[%s18477_s8 + $0xf8] sm:$0x7]  ;;  %v8948_v2 = vshrl.u32 %v14167_v26, 16 }
 0x35c   : > { %17257 = vmatprep.subr.bf16.mxu1 %v18329_v13  ;;  %v8572_v23 = vor.u32 %v8571_v63, %v8568_v32  ;;  %v22543_v32 = vld [vmem:[#allocation23_spill] sm:$0xff]  ;;  %v22544_v63 = vld [vmem:[#allocation26_spill] sm:$0xff] }
 0x35d   : > { %16826 = vmatpush3.bf16.msra.mxu0 %v18328_v61 }
 0x35e   : > { %v8574_v15 = vrot.slane %v8572_v23, 4  ;;  %v8573_v3 = vsel %vm18506_vm2, %v8564_v6, %v8572_v23  ;;  %v22554_v23 = vld [vmem:[#allocation41_spill] sm:$0xff] }
 0x35f   : > { %17258 = vmatpush3.bf16.msra.mxu1 %v18329_v13  ;;  %16796 = vmatmul.mubr.bf16.gmra.mrb[80].mxu0 %v22513_v22  ;;  %v8578_v22 = vrot.slane %v8576_v37, 5  ;;  %v11963_v13 = vrot.slane %v11962_v8, 4  ;;  %v22545_v37 = vld [vmem:[#allocation37_spill] sm:$0xff] }
 0x360   : > { %16799 = vmatprep.mubr.bf16.mxu0 %v22535_v55  ;;  %v14166_v6 = vld [vmem:[%s18477_s8 + $0xf0] sm:$0xc] }
 0x361   : > { %v8582_v28 = vor.u32 %v8581_v11, %v8578_v22  ;;  %v11972_v36 = vsel %vm18506_vm2, %v11963_v13, %v11971_v16  ;;  %v14164_v22 = vld [vmem:[%s18477_s8 + $0xe4] sm:$0xc]  ;;  %v8934_v8 = vshrl.u32 %v14166_v6, 16 }
 0x362   : > { %17228 = vmatmul.mubr.bf16.gmra.mrb[48].mxu1 %v22535_v55  ;;  %v14969_v21 = vcombine.low %v11972_v36, %v11982_v14  ;;  %v22547_v55 = vld [vmem:[#allocation28_spill] sm:$0xff]  ;;  %v22555_v11 = vld [vmem:[#allocation63_spill] sm:$0xff]  ;;  %v8911_v53 = vshrl.u32 %v14164_v22, 16  ;;  %v8914_v45 = vshll.u32 %v14164_v22, 16 }
 0x363   : > { %17231 = vmatprep.mubr.bf16.mxu1 %v22536_v41  ;;  %v8583_v61 = vsel %vm18506_vm2, %v8574_v15, %v8582_v28  ;;  %v8919_v15 = vrot.slane %v8192_v43, 6  ;;  %v8920_v28 = vrot.slane %v8188_v4, 7  ;;  %v788_v4 = vld [vmem:[%s18477_s8 + $0xec] sm:$0x7] }
 0x364   : > { %v14689_v1 = vcombine.low %v8573_v3, %v8583_v61  ;;  %v8913_v27 = vrot.slane %v8911_v53, 6  ;;  %v8916_v48 = vrot.slane %v8914_v45, 7  ;;  %v12317_v3 = vrot.slane %v21704_v24, 7  ;;  %v789_v61 = vld [vmem:[%s18477_s8 + $0xf0] sm:$0x8] }
 0x365   : > { %v8921_v49 = vor.u32 %v8920_v28, %v8919_v15  ;;  %v12320_v24 = vrot.slane %v788_v4, 7 }
 0x366   : > { %v8917_v16 = vor.u32 %v8916_v48, %v8913_v27 }
 0x367   : > { %16800 = vmatmul.mubr.bf16.gmra.mrb[84].mxu0 %v22536_v41  ;;  %v22550_v41 = vld [vmem:[#allocation38_spill] sm:$0xff] }
 0x368   : > { %16803 = vmatprep.mubr.bf16.mxu0 %v22537_v39  ;;  %v8918_v36 = vrot.slane %v8917_v16, 4 }
 0x36a   : > { %17232 = vmatmul.mubr.bf16.gmra.mrb[52].mxu1 %v22537_v39  ;;  %v8925_v39 = vshrl.u32 %v14165_v51, 16 }
 0x36b   : > { %17235 = vmatprep.mubr.bf16.mxu1 %v22538_v62 }
 0x36c   : > { %v8927_v10 = vrot.slane %v8925_v39, 6 }
 0x36f   : > { %16804 = vmatmul.mubr.bf16.gmra.mrb[88].mxu0 %v22538_v62  ;;  %v8928_v62 = vshll.u32 %v14165_v51, 16 }
 0x370   : > { %16807 = vmatprep.mubr.bf16.mxu0 %v22540_v58 }
 0x371   : > { %v8930_v43 = vrot.slane %v8928_v62, 7  ;;  %v21894_v62 = vld [vmem:[%s22100_s4 + $0x3] ss:$0 sm:$0xff] }
 0x372   : > { %17236 = vmatmul.mubr.bf16.gmra.mrb[56].mxu1 %v22540_v58  ;;  %v8951_v58 = vshll.u32 %v14167_v26, 16 }
 0x373   : > { %17239 = vmatprep.mubr.bf16.mxu1 %v14689_v1  ;;  %v8931_v14 = vor.u32 %v8930_v43, %v8927_v10 }
 0x377   : > { %16808 = vmatmul.mubr.bf16.gmra.mrb[92].mxu0 %v14689_v1  ;;  %v8936_v1 = vrot.slane %v8934_v8, 6 }
 0x378   : > { %16827 = vmatprep.mubr.bf16.mxu0 %v22541_v25  ;;  %v12319_v25 = vrot.slane %v12317_v3, 4 }
 0x37a   : > { %17240 = vmatmul.mubr.bf16.gmra.mrb[60].mxu1 %v14969_v21  ;;  %v14978_v21 = vrot.slane %v787_v9, 11 }
 0x37b   : > { %17259 = vmatprep.mubr.bf16.mxu1 %v22542_v42 }
 0x37f   : > { %16828 = vmatmul.mubr.bf16.vlgmr.msra.gmra.mrb[64].mxu0 %v22543_v32  ;;  %v12327_v32 = vrot.slane %v790_v57, 7 }
 0x380   : > { %16831 = vmatprep.mubr.bf16.mxu0 %v22544_v63  ;;  %v8953_v63 = vrot.slane %v8951_v58, 7 }
 0x382   : > { %17260 = vmatmul.mubr.bf16.vlgmr.msra.gmra.mrb[32].mxu1 %v22545_v37  ;;  %v8922_v37 = vsel %vm20462_vm0, %v8918_v36, %v8921_v49 }
 0x383   : > { %17263 = vmatprep.mubr.bf16.mxu1 %v22546_v19 }
 0x387   : > { %16832 = vmatmul.mubr.bf16.gmra.mrb[68].mxu0 %v22547_v55  ;;  %v12331_v55 = vrot.slane %v21714_v5, 7 }
 0x388   : > { %16835 = vmatprep.mubr.bf16.mxu0 %v22548_v52 }
 0x38a   : > { %17264 = vmatmul.mubr.bf16.gmra.mrb[36].mxu1 %v22549_v35  ;;  %v791_v35 = vld [vmem:[%s18477_s8 + $0xfc] sm:$0x8] }
 0x38b   : > { %17267 = vmatprep.mubr.bf16.mxu1 %v22550_v41  ;;  %v792_v41 = vld [vmem:[%s18477_s8 + $0x104] sm:$0x7] }
 0x38c   : > { %v12334_v53 = vrot.slane %v792_v41, 7 }
 0x38f   : > { %16836 = vmatmul.mubr.bf16.gmra.mrb[72].mxu0 %v22551_v44 }
 0x390   : > { %16839 = vmatprep.mubr.bf16.mxu0 %v22552_v20 }
 0x392   : > { %17268 = vmatmul.mubr.bf16.gmra.mrb[40].mxu1 %v22553_v47 }
 0x393   : > { %17271 = vmatprep.mubr.bf16.mxu1 %v22554_v23 }
 0x397   : > { %16840 = vmatmul.mubr.bf16.gmra.mrb[76].mxu0 %v22555_v11  ;;  %v14980_v11 = vrot.slane %v791_v35, 11 }
 0x398   : > { %16843 = vmatprep.mubr.bf16.mxu0 %v22556_v17  ;;  %v12333_v17 = vrot.slane %v12331_v55, 4 }
 0x39a   : > { %17272 = vmatmul.mubr.bf16.gmra.mrb[44].mxu1 %v22557_v29  ;;  %v12332_v29 = vsel %vm20492_vm1, %v14980_v11, %v12331_v55  ;;  %v12335_v51 = vsel %vm20492_vm1, %v12333_v17, %v12334_v53 }
 0x39b   : > { %17275 = vmatprep.mubr.bf16.mxu1 %v21126_v38  ;;  %v8937_v38 = vshll.u32 %v14166_v6, 16  ;;  %v14999_v48 = vcombine.low %v12332_v29, %v12335_v51 }
 0x39d   : > { %v8939_v13 = vrot.slane %v8937_v38, 7 }
 0x39f   : > { %16844 = vmatmul.mubr.bf16.gmra.mrb[80].mxu0 %v21019_v7  ;;  %v12324_v7 = vrot.slane %v21700_v60, 7  ;;  %v14979_v60 = vrot.slane %v789_v61, 11 }
 0x3a0   : > { %16847 = vmatprep.mubr.bf16.mxu0 %v21141_v31  ;;  %v8942_v31 = vrot.slane %v8216_v12, 6  ;;  %v8940_v12 = vor.u32 %v8939_v13, %v8936_v1 }
 0x3a1   : > { %v12326_v42 = vrot.slane %v12324_v7, 4  ;;  %v12325_v52 = vsel %vm20492_vm1, %v14979_v60, %v12324_v7 }
 0x3a2   : > { %17276 = vmatmul.mubr.bf16.gmra.mrb[48].mxu1 %v21172_v56  ;;  %v8943_v56 = vrot.slane %v8212_v54, 7  ;;  %v8950_v54 = vrot.slane %v8948_v2, 6  ;;  %v8941_v20 = vrot.slane %v8940_v12, 4 }
 0x3a3   : > { %17279 = vmatprep.mubr.bf16.mxu1 %v21568_v33  ;;  %v8923_v33 = vrot.slane %v8921_v49, 4 }
 0x3a4   : > { %v8944_v40 = vor.u32 %v8943_v56, %v8942_v31 }
 0x3a5   : > { %v8932_v19 = vsel %vm20462_vm0, %v8923_v33, %v8931_v14 }
 0x3a6   : > { %v14714_v44 = vcombine.low %v8922_v37, %v8932_v19  ;;  %v8946_v47 = vrot.slane %v8944_v40, 4  ;;  %v8945_v5 = vsel %vm20462_vm0, %v8941_v20, %v8944_v40 }
 0x3a7   : > { %16848 = vmatmul.mubr.bf16.gmra.mrb[84].mxu0 %v21169_v30  ;;  %v12318_v30 = vsel %vm20492_vm1, %v14978_v21, %v12317_v3 }
 0x3a8   : > { %16851 = vmatprep.mubr.bf16.mxu0 %v21566_v59  ;;  %v12321_v59 = vsel %vm20492_vm1, %v12319_v25, %v12320_v24 }
 0x3a9   : > { %v14997_v23 = vcombine.low %v12318_v30, %v12321_v59 }
 0x3aa   : > { %17280 = vmatmul.mubr.bf16.gmra.mrb[52].mxu1 %v21570_v0  ;;  %v12328_v0 = vsel %vm20492_vm1, %v12326_v42, %v12327_v32 }
 0x3ab   : > { %17283 = vmatprep.mubr.bf16.mxu1 %v21586_v46  ;;  %v8954_v46 = vor.u32 %v8953_v63, %v8950_v54  ;;  %v14998_v22 = vcombine.low %v12325_v52, %v12328_v0 }
 0x3ad   : > { %v8955_v45 = vsel %vm20462_vm0, %v8946_v47, %v8954_v46 }
 0x3ae   : > { %v14715_v27 = vcombine.low %v8945_v5, %v8955_v45 }
 0x3af   : > { %16852 = vmatmul.mubr.bf16.gmra.mrb[88].mxu0 %v21584_v50  ;;  %v21878_v50 = vld [vmem:[%s22099_s3 + $0x2] ss:$0 sm:$0xff] }
 0x3b0   : > { %16855 = vmatprep.mubr.bf16.mxu0 %v14714_v44 }
 0x3b2   : > { %17284 = vmatmul.mubr.bf16.gmra.mrb[56].mxu1 %v14997_v23 }
 0x3b3   : > { %17287 = vmatprep.mubr.bf16.mxu1 %v14998_v22 }
 0x3b7   : > { %16856 = vmatmul.mubr.bf16.gmra.mrb[92].mxu0 %v14715_v27 }
 0x3ba   : > { %17288 = vmatmul.mubr.bf16.gmra.mrb[60].mxu1 %v14999_v48 }
 0x452   : > { %v16829_v6 = vpop.f32.mrb[64].mxu0 }
 0x453   : > { %v13276_v15 = vmul.f32 %v16829_v6, %v21878_v50  ;;  %v9063_v28 = vpop.f32.mrb[65].mxu0 }
 0x454   : > { %v13274_v8 = vmul.f32 %v21878_v50, %v9063_v28  ;;  %v16830_v38 = vpop.f32.mrb[66].mxu0 }
 0x455   : > { %v17261_v39 = vpop.f32.mrb[32].mxu1  ;;  %v13313_v16 = vadd.f32 %v21883_v18, %v13276_v15  ;;  %v13277_v43 = vmul.f32 %v16830_v38, %v21878_v50  ;;  %v9066_v26 = vpop.f32.mrb[67].mxu0 }
 0x456   : > { %v13574_v49 = vmul.f32 %v17261_v39, %v21888_v34  ;;  %v12447_v10 = vpop.f32.mrb[33].mxu1  ;;  %v13311_v9 = vadd.f32 %v21883_v18, %v13274_v8  ;;  %v13275_v61 = vmul.f32 %v21878_v50, %v9066_v26 }
 0x457   : > { %v13572_v4 = vmul.f32 %v21888_v34, %v12447_v10  ;;  %v17262_v3 = vpop.f32.mrb[34].mxu1  ;;  %v13345_v7 = vmax.f32 %v13313_v16, 0.0  ;;  %v13314_v13 = vadd.f32 %v21883_v18, %v13277_v43 }
 0x458   : > { %v13611_v1 = vadd.f32 %v21894_v62, %v13574_v49  ;;  %v13575_v57 = vmul.f32 %v17262_v3, %v21888_v34  ;;  %v12450_v31 = vpop.f32.mrb[35].mxu1  ;;  %v13343_v56 = vmax.f32 %v13311_v9, 0.0  ;;  %v13312_v58 = vadd.f32 %v21883_v18, %v13275_v61 }
 0x459   : > { %v13609_v2 = vadd.f32 %v21894_v62, %v13572_v4  ;;  %v13573_v36 = vmul.f32 %v21888_v34, %v12450_v31  ;;  %v15213_v33 = vpack.c.bf16 %v13345_v7, %v13345_v7  ;;  %v13346_v21 = vmax.f32 %v13314_v13, 0.0 }
 0x45a   : > { %v13643_v14 = vmax.f32 %v13611_v1, 0.0  ;;  %v13612_v25 = vadd.f32 %v21894_v62, %v13575_v57  ;;  %v15211_v24 = vpack.c.bf16 %v13343_v56, %v13343_v56  ;;  %v13344_v42 = vmax.f32 %v13312_v58, 0.0  ;;  %v16833_v12 = vpop.f32.mrb[68].mxu0 }
 0x45b   : > { %v13641_v60 = vmax.f32 %v13609_v2, 0.0  ;;  %v13610_v32 = vadd.f32 %v21894_v62, %v13573_v36  ;;  %13505 = vst [vmem:[%s19532_s19 + $0x28] sm:$0xf] %v15213_v33  ;;  %v15214_v54 = vpack.c.bf16 %v13346_v21, %v13346_v21  ;;  %v13280_v37 = vmul.f32 %v16833_v12, %v21878_v50  ;;  %v9079_v19 = vpop.f32.mrb[69].mxu0 }
 0x45c   : > { %v15245_v40 = vpack.c.bf16 %v13643_v14, %v13643_v14  ;;  %v13644_v63 = vmax.f32 %v13612_v25, 0.0  ;;  %13503 = vst [vmem:[%s19532_s19 + $0x8] sm:$0xf] %v15211_v24  ;;  %v15212_v59 = vpack.c.bf16 %v13344_v42, %v13344_v42  ;;  %v13278_v0 = vmul.f32 %v21878_v50, %v9079_v19  ;;  %v16834_v35 = vpop.f32.mrb[70].mxu0 }
 0x45d   : > { %v15243_v30 = vpack.c.bf16 %v13641_v60, %v13641_v60  ;;  %v13642_v55 = vmax.f32 %v13610_v32, 0.0  ;;  %v17265_v52 = vpop.f32.mrb[36].mxu1  ;;  %13506 = vst [vmem:[%s19532_s19 + $0x38] sm:$0xf] %v15214_v54  ;;  %v13317_v44 = vadd.f32 %v21883_v18, %v13280_v37  ;;  %v13281_v46 = vmul.f32 %v16834_v35, %v21878_v50  ;;  %v9082_v23 = vpop.f32.mrb[71].mxu0 }
 0x45e   : > { %13803 = vst [vmem:[%s19532_s19 + $0x2c] sm:$0xf] %v15245_v40  ;;  %v15246_v41 = vpack.c.bf16 %v13644_v63, %v13644_v63  ;;  %v13578_v20 = vmul.f32 %v17265_v52, %v21888_v34  ;;  %v12463_v47 = vpop.f32.mrb[37].mxu1  ;;  %13504 = vst [vmem:[%s19532_s19 + $0x18] sm:$0xf] %v15212_v59  ;;  %v13315_v11 = vadd.f32 %v21883_v18, %v13278_v0 }
 0x45f   : > { %13801 = vst [vmem:[%s19532_s19 + $0xc] sm:$0xf] %v15243_v30  ;;  %v15244_v22 = vpack.c.bf16 %v13642_v55, %v13642_v55  ;;  %v13576_v17 = vmul.f32 %v21888_v34, %v12463_v47  ;;  %v17266_v53 = vpop.f32.mrb[38].mxu1  ;;  %v13279_v5 = vmul.f32 %v21878_v50, %v9082_v23  ;;  %v13349_v45 = vmax.f32 %v13317_v44, 0.0 }
 0x460   : > { %13804 = vst [vmem:[%s19532_s19 + $0x3c] sm:$0xf] %v15246_v41  ;;  %v13615_v29 = vadd.f32 %v21894_v62, %v13578_v20  ;;  %v13318_v51 = vadd.f32 %v21883_v18, %v13281_v46  ;;  %v13579_v27 = vmul.f32 %v17266_v53, %v21888_v34  ;;  %v12466_v48 = vpop.f32.mrb[39].mxu1  ;;  %v13347_v6 = vmax.f32 %v13315_v11, 0.0 }
 0x461   : > { %13802 = vst [vmem:[%s19532_s19 + $0x1c] sm:$0xf] %v15244_v22  ;;  %v13613_v15 = vadd.f32 %v21894_v62, %v13576_v17  ;;  %v13316_v28 = vadd.f32 %v21883_v18, %v13279_v5  ;;  %v13577_v39 = vmul.f32 %v21888_v34, %v12466_v48  ;;  %v15217_v8 = vpack.c.bf16 %v13349_v45, %v13349_v45 }
 0x462   : > { %v13647_v38 = vmax.f32 %v13615_v29, 0.0  ;;  %v13350_v16 = vmax.f32 %v13318_v51, 0.0  ;;  %v13616_v49 = vadd.f32 %v21894_v62, %v13579_v27  ;;  %v15215_v10 = vpack.c.bf16 %v13347_v6, %v13347_v6  ;;  %v16837_v4 = vpop.f32.mrb[72].mxu0 }
 0x463   : > { %v13645_v43 = vmax.f32 %v13613_v15, 0.0  ;;  %v13348_v26 = vmax.f32 %v13316_v28, 0.0  ;;  %v13614_v9 = vadd.f32 %v21894_v62, %v13577_v39  ;;  %13509 = vst [vmem:[%s19532_s19 + $0x68] sm:$0xf] %v15217_v8  ;;  %v13284_v1 = vmul.f32 %v16837_v4, %v21878_v50  ;;  %v9095_v13 = vpop.f32.mrb[73].mxu0 }
 0x464   : > { %v15249_v3 = vpack.c.bf16 %v13647_v38, %v13647_v38  ;;  %v15218_v61 = vpack.c.bf16 %v13350_v16, %v13350_v16  ;;  %v13648_v7 = vmax.f32 %v13616_v49, 0.0  ;;  %13507 = vst [vmem:[%s19532_s19 + $0x48] sm:$0xf] %v15215_v10  ;;  %v13282_v58 = vmul.f32 %v21878_v50, %v9095_v13  ;;  %v16838_v36 = vpop.f32.mrb[74].mxu0 }
 0x465   : > { %v15247_v57 = vpack.c.bf16 %v13645_v43, %v13645_v43  ;;  %v15216_v31 = vpack.c.bf16 %v13348_v26, %v13348_v26  ;;  %v13646_v56 = vmax.f32 %v13614_v9, 0.0  ;;  %v17269_v2 = vpop.f32.mrb[40].mxu1  ;;  %v13321_v14 = vadd.f32 %v21883_v18, %v13284_v1  ;;  %v9098_v60 = vpop.f32.mrb[75].mxu0 }
 0x466   : > { %13807 = vst [vmem:[%s19532_s19 + $0x6c] sm:$0xf] %v15249_v3  ;;  %13510 = vst [vmem:[%s19532_s19 + $0x78] sm:$0xf] %v15218_v61  ;;  %v15250_v33 = vpack.c.bf16 %v13648_v7, %v13648_v7  ;;  %v13582_v21 = vmul.f32 %v17269_v2, %v21888_v34  ;;  %v12479_v25 = vpop.f32.mrb[41].mxu1  ;;  %v13285_v24 = vmul.f32 %v16838_v36, %v21878_v50 }
 0x467   : > { %13805 = vst [vmem:[%s19532_s19 + $0x4c] sm:$0xf] %v15247_v57  ;;  %13508 = vst [vmem:[%s19532_s19 + $0x58] sm:$0xf] %v15216_v31  ;;  %v15248_v42 = vpack.c.bf16 %v13646_v56, %v13646_v56  ;;  %v13319_v32 = vadd.f32 %v21883_v18, %v13282_v58  ;;  %v13580_v12 = vmul.f32 %v21888_v34, %v12479_v25  ;;  %v17270_v40 = vpop.f32.mrb[42].mxu1  ;;  %v13353_v63 = vmax.f32 %v13321_v14, 0.0 }
 0x468   : > { %v13283_v54 = vmul.f32 %v21878_v50, %v9098_v60  ;;  %13808 = vst [vmem:[%s19532_s19 + $0x7c] sm:$0xf] %v15250_v33  ;;  %v13619_v37 = vadd.f32 %v21894_v62, %v13582_v21  ;;  %v13322_v19 = vadd.f32 %v21883_v18, %v13285_v24  ;;  %v13583_v30 = vmul.f32 %v17270_v40, %v21888_v34  ;;  %v12482_v59 = vpop.f32.mrb[43].mxu1 }
 0x469   : > { %13806 = vst [vmem:[%s19532_s19 + $0x5c] sm:$0xf] %v15248_v42  ;;  %v13351_v55 = vmax.f32 %v13319_v32, 0.0  ;;  %v13617_v52 = vadd.f32 %v21894_v62, %v13580_v12  ;;  %v13581_v35 = vmul.f32 %v21888_v34, %v12482_v59  ;;  %v15221_v41 = vpack.c.bf16 %v13353_v63, %v13353_v63 }
 0x46a   : > { %v13320_v0 = vadd.f32 %v21883_v18, %v13283_v54  ;;  %v13651_v44 = vmax.f32 %v13619_v37, 0.0  ;;  %v13354_v20 = vmax.f32 %v13322_v19, 0.0  ;;  %v13620_v47 = vadd.f32 %v21894_v62, %v13583_v30  ;;  %v16841_v17 = vpop.f32.mrb[76].mxu0 }
 0x46b   : > { %v15219_v46 = vpack.c.bf16 %v13351_v55, %v13351_v55  ;;  %v13649_v23 = vmax.f32 %v13617_v52, 0.0  ;;  %v13618_v11 = vadd.f32 %v21894_v62, %v13581_v35  ;;  %13513 = vst [vmem:[%s19532_s19 + $0xa8] sm:$0xf] %v15221_v41  ;;  %v13288_v29 = vmul.f32 %v16841_v17, %v21878_v50  ;;  %v9111_v51 = vpop.f32.mrb[77].mxu0 }
 0x46c   : > { %v13352_v22 = vmax.f32 %v13320_v0, 0.0  ;;  %v15253_v53 = vpack.c.bf16 %v13651_v44, %v13651_v44  ;;  %v15222_v5 = vpack.c.bf16 %v13354_v20, %v13354_v20  ;;  %v13652_v45 = vmax.f32 %v13620_v47, 0.0  ;;  %v16842_v39 = vpop.f32.mrb[78].mxu0 }
 0x46d   : > { %13511 = vst [vmem:[%s19532_s19 + $0x88] sm:$0xf] %v15219_v46  ;;  %v15251_v27 = vpack.c.bf16 %v13649_v23, %v13649_v23  ;;  %v13650_v6 = vmax.f32 %v13618_v11, 0.0  ;;  %v17273_v15 = vpop.f32.mrb[44].mxu1  ;;  %v13286_v28 = vmul.f32 %v21878_v50, %v9111_v51  ;;  %v13325_v38 = vadd.f32 %v21883_v18, %v13288_v29  ;;  %v9114_v43 = vpop.f32.mrb[79].mxu0 }
 0x46e   : > { %v15220_v48 = vpack.c.bf16 %v13352_v22, %v13352_v22  ;;  %13811 = vst [vmem:[%s19532_s19 + $0xac] sm:$0xf] %v15253_v53  ;;  %13514 = vst [vmem:[%s19532_s19 + $0xb8] sm:$0xf] %v15222_v5  ;;  %v15254_v8 = vpack.c.bf16 %v13652_v45, %v13652_v45  ;;  %v13586_v16 = vmul.f32 %v17273_v15, %v21888_v34  ;;  %v12495_v49 = vpop.f32.mrb[45].mxu1 }
 0x46f   : > { %v13289_v10 = vmul.f32 %v16842_v39, %v21878_v50  ;;  %13809 = vst [vmem:[%s19532_s19 + $0x8c] sm:$0xf] %v15251_v27  ;;  %v15252_v26 = vpack.c.bf16 %v13650_v6, %v13650_v6  ;;  %v13323_v9 = vadd.f32 %v21883_v18, %v13286_v28  ;;  %v13584_v4 = vmul.f32 %v21888_v34, %v12495_v49  ;;  %v17274_v3 = vpop.f32.mrb[46].mxu1 }
 0x470   : > { %13512 = vst [vmem:[%s19532_s19 + $0x98] sm:$0xf] %v15220_v48  ;;  %v13287_v61 = vmul.f32 %v21878_v50, %v9114_v43  ;;  %13812 = vst [vmem:[%s19532_s19 + $0xbc] sm:$0xf] %v15254_v8  ;;  %v13357_v7 = vmax.f32 %v13325_v38, 0.0  ;;  %v13623_v1 = vadd.f32 %v21894_v62, %v13586_v16  ;;  %v13587_v57 = vmul.f32 %v17274_v3, %v21888_v34  ;;  %v12498_v31 = vpop.f32.mrb[47].mxu1 }
 0x471   : > { %v13326_v13 = vadd.f32 %v21883_v18, %v13289_v10  ;;  %13810 = vst [vmem:[%s19532_s19 + $0x9c] sm:$0xf] %v15252_v26  ;;  %v13355_v56 = vmax.f32 %v13323_v9, 0.0  ;;  %v13621_v2 = vadd.f32 %v21894_v62, %v13584_v4  ;;  %v13585_v36 = vmul.f32 %v21888_v34, %v12498_v31 }
 0x472   : > { %v13324_v58 = vadd.f32 %v21883_v18, %v13287_v61  ;;  %v15225_v33 = vpack.c.bf16 %v13357_v7, %v13357_v7  ;;  %v13655_v14 = vmax.f32 %v13623_v1, 0.0  ;;  %v13624_v25 = vadd.f32 %v21894_v62, %v13587_v57  ;;  %v16845_v12 = vpop.f32.mrb[80].mxu0 }
 0x473   : > { %v13358_v21 = vmax.f32 %v13326_v13, 0.0  ;;  %v15223_v24 = vpack.c.bf16 %v13355_v56, %v13355_v56  ;;  %v13653_v60 = vmax.f32 %v13621_v2, 0.0  ;;  %v13622_v32 = vadd.f32 %v21894_v62, %v13585_v36  ;;  %v9127_v19 = vpop.f32.mrb[81].mxu0 }
 0x474   : > { %v13356_v42 = vmax.f32 %v13324_v58, 0.0  ;;  %13517 = vst [vmem:[%s19532_s19 + $0xe8] sm:$0xf] %v15225_v33  ;;  %v15257_v40 = vpack.c.bf16 %v13655_v14, %v13655_v14  ;;  %v13656_v63 = vmax.f32 %v13624_v25, 0.0  ;;  %v13292_v37 = vmul.f32 %v16845_v12, %v21878_v50  ;;  %v16846_v35 = vpop.f32.mrb[82].mxu0 }
 0x475   : > { %v15226_v54 = vpack.c.bf16 %v13358_v21, %v13358_v21  ;;  %13515 = vst [vmem:[%s19532_s19 + $0xc8] sm:$0xf] %v15223_v24  ;;  %v15255_v30 = vpack.c.bf16 %v13653_v60, %v13653_v60  ;;  %v13654_v55 = vmax.f32 %v13622_v32, 0.0  ;;  %v17277_v52 = vpop.f32.mrb[48].mxu1  ;;  %v13290_v0 = vmul.f32 %v21878_v50, %v9127_v19  ;;  %v9130_v23 = vpop.f32.mrb[83].mxu0 }
 0x476   : > { %v15224_v59 = vpack.c.bf16 %v13356_v42, %v13356_v42  ;;  %13815 = vst [vmem:[%s19532_s19 + $0xec] sm:$0xf] %v15257_v40  ;;  %v15258_v41 = vpack.c.bf16 %v13656_v63, %v13656_v63  ;;  %v13329_v44 = vadd.f32 %v21883_v18, %v13292_v37  ;;  %v13590_v20 = vmul.f32 %v17277_v52, %v21888_v34  ;;  %v12511_v47 = vpop.f32.mrb[49].mxu1 }
 0x477   : > { %13518 = vst [vmem:[%s19532_s19 + $0xf8] sm:$0xf] %v15226_v54  ;;  %v13293_v46 = vmul.f32 %v16846_v35, %v21878_v50  ;;  %13813 = vst [vmem:[%s19532_s19 + $0xcc] sm:$0xf] %v15255_v30  ;;  %v15256_v22 = vpack.c.bf16 %v13654_v55, %v13654_v55  ;;  %v13327_v11 = vadd.f32 %v21883_v18, %v13290_v0  ;;  %v17278_v53 = vpop.f32.mrb[50].mxu1 }
 0x478   : > { %13516 = vst [vmem:[%s19532_s19 + $0xd8] sm:$0xf] %v15224_v59  ;;  %v13588_v17 = vmul.f32 %v21888_v34, %v12511_v47  ;;  %v13291_v5 = vmul.f32 %v21878_v50, %v9130_v23  ;;  %13816 = vst [vmem:[%s19532_s19 + $0xfc] sm:$0xf] %v15258_v41  ;;  %v13361_v45 = vmax.f32 %v13329_v44, 0.0  ;;  %v13627_v29 = vadd.f32 %v21894_v62, %v13590_v20  ;;  %v12514_v48 = vpop.f32.mrb[51].mxu1 }
 0x479   : > { %v13330_v51 = vadd.f32 %v21883_v18, %v13293_v46  ;;  %v13591_v27 = vmul.f32 %v17278_v53, %v21888_v34  ;;  %13814 = vst [vmem:[%s19532_s19 + $0xdc] sm:$0xf] %v15256_v22  ;;  %v13359_v6 = vmax.f32 %v13327_v11, 0.0  ;;  %v13589_v39 = vmul.f32 %v21888_v34, %v12514_v48 }
 0x47a   : > { %v13625_v15 = vadd.f32 %v21894_v62, %v13588_v17  ;;  %v13328_v28 = vadd.f32 %v21883_v18, %v13291_v5  ;;  %v15229_v8 = vpack.c.bf16 %v13361_v45, %v13361_v45  ;;  %v13659_v38 = vmax.f32 %v13627_v29, 0.0  ;;  %v16849_v4 = vpop.f32.mrb[84].mxu0 }
 0x47b   : > { %v13362_v16 = vmax.f32 %v13330_v51, 0.0  ;;  %v13628_v49 = vadd.f32 %v21894_v62, %v13591_v27  ;;  %v15227_v10 = vpack.c.bf16 %v13359_v6, %v13359_v6  ;;  %v13626_v9 = vadd.f32 %v21894_v62, %v13589_v39  ;;  %v9143_v13 = vpop.f32.mrb[85].mxu0 }
 0x47c   : > { %v13657_v43 = vmax.f32 %v13625_v15, 0.0  ;;  %v13360_v26 = vmax.f32 %v13328_v28, 0.0  ;;  %13521 = vst [vmem:[%s19532_s19 + $0x128] sm:$0xf] %v15229_v8  ;;  %v15261_v3 = vpack.c.bf16 %v13659_v38, %v13659_v38  ;;  %v13296_v1 = vmul.f32 %v16849_v4, %v21878_v50  ;;  %v16850_v36 = vpop.f32.mrb[86].mxu0 }
 0x47d   : > { %v15230_v61 = vpack.c.bf16 %v13362_v16, %v13362_v16  ;;  %v13660_v7 = vmax.f32 %v13628_v49, 0.0  ;;  %13519 = vst [vmem:[%s19532_s19 + $0x108] sm:$0xf] %v15227_v10  ;;  %v13658_v56 = vmax.f32 %v13626_v9, 0.0  ;;  %v17281_v2 = vpop.f32.mrb[52].mxu1  ;;  %v13294_v58 = vmul.f32 %v21878_v50, %v9143_v13  ;;  %v9146_v60 = vpop.f32.mrb[87].mxu0 }
 0x47e   : > { %v15259_v57 = vpack.c.bf16 %v13657_v43, %v13657_v43  ;;  %v15228_v31 = vpack.c.bf16 %v13360_v26, %v13360_v26  ;;  %13819 = vst [vmem:[%s19532_s19 + $0x12c] sm:$0xf] %v15261_v3  ;;  %v13333_v14 = vadd.f32 %v21883_v18, %v13296_v1  ;;  %v13594_v21 = vmul.f32 %v17281_v2, %v21888_v34  ;;  %v12527_v25 = vpop.f32.mrb[53].mxu1 }
 0x47f   : > { %13522 = vst [vmem:[%s19532_s19 + $0x138] sm:$0xf] %v15230_v61  ;;  %v15262_v33 = vpack.c.bf16 %v13660_v7, %v13660_v7  ;;  %v13297_v24 = vmul.f32 %v16850_v36, %v21878_v50  ;;  %v15260_v42 = vpack.c.bf16 %v13658_v56, %v13658_v56  ;;  %v13331_v32 = vadd.f32 %v21883_v18, %v13294_v58  ;;  %v17282_v40 = vpop.f32.mrb[54].mxu1 }
 0x480   : > { %13817 = vst [vmem:[%s19532_s19 + $0x10c] sm:$0xf] %v15259_v57  ;;  %13520 = vst [vmem:[%s19532_s19 + $0x118] sm:$0xf] %v15228_v31  ;;  %v13592_v12 = vmul.f32 %v21888_v34, %v12527_v25  ;;  %v13295_v54 = vmul.f32 %v21878_v50, %v9146_v60  ;;  %v13365_v63 = vmax.f32 %v13333_v14, 0.0  ;;  %v13631_v37 = vadd.f32 %v21894_v62, %v13594_v21  ;;  %v12530_v59 = vpop.f32.mrb[55].mxu1 }
 0x481   : > { %13820 = vst [vmem:[%s19532_s19 + $0x13c] sm:$0xf] %v15262_v33  ;;  %v13334_v19 = vadd.f32 %v21883_v18, %v13297_v24  ;;  %v13595_v30 = vmul.f32 %v17282_v40, %v21888_v34  ;;  %13818 = vst [vmem:[%s19532_s19 + $0x11c] sm:$0xf] %v15260_v42  ;;  %v13363_v55 = vmax.f32 %v13331_v32, 0.0  ;;  %v13593_v35 = vmul.f32 %v21888_v34, %v12530_v59 }
 0x482   : > { %v13629_v52 = vadd.f32 %v21894_v62, %v13592_v12  ;;  %v13332_v0 = vadd.f32 %v21883_v18, %v13295_v54  ;;  %v15233_v41 = vpack.c.bf16 %v13365_v63, %v13365_v63  ;;  %v13663_v44 = vmax.f32 %v13631_v37, 0.0  ;;  %v16853_v17 = vpop.f32.mrb[88].mxu0 }
 0x483   : > { %v13366_v20 = vmax.f32 %v13334_v19, 0.0  ;;  %v13632_v47 = vadd.f32 %v21894_v62, %v13595_v30  ;;  %v15231_v46 = vpack.c.bf16 %v13363_v55, %v13363_v55  ;;  %v13630_v11 = vadd.f32 %v21894_v62, %v13593_v35  ;;  %v9159_v51 = vpop.f32.mrb[89].mxu0 }
 0x484   : > { %v13661_v23 = vmax.f32 %v13629_v52, 0.0  ;;  %v13364_v22 = vmax.f32 %v13332_v0, 0.0  ;;  %13525 = vst [vmem:[%s19532_s19 + $0x168] sm:$0xf] %v15233_v41  ;;  %v15265_v53 = vpack.c.bf16 %v13663_v44, %v13663_v44  ;;  %v13300_v29 = vmul.f32 %v16853_v17, %v21878_v50  ;;  %v16854_v39 = vpop.f32.mrb[90].mxu0 }
 0x485   : > { %v15234_v5 = vpack.c.bf16 %v13366_v20, %v13366_v20  ;;  %v13664_v45 = vmax.f32 %v13632_v47, 0.0  ;;  %13523 = vst [vmem:[%s19532_s19 + $0x148] sm:$0xf] %v15231_v46  ;;  %v13662_v6 = vmax.f32 %v13630_v11, 0.0  ;;  %v17285_v15 = vpop.f32.mrb[56].mxu1  ;;  %v13298_v28 = vmul.f32 %v21878_v50, %v9159_v51  ;;  %v9162_v43 = vpop.f32.mrb[91].mxu0 }
 0x486   : > { %v15263_v27 = vpack.c.bf16 %v13661_v23, %v13661_v23  ;;  %v15232_v48 = vpack.c.bf16 %v13364_v22, %v13364_v22  ;;  %13823 = vst [vmem:[%s19532_s19 + $0x16c] sm:$0xf] %v15265_v53  ;;  %v13337_v38 = vadd.f32 %v21883_v18, %v13300_v29  ;;  %v13598_v16 = vmul.f32 %v17285_v15, %v21888_v34  ;;  %v12543_v49 = vpop.f32.mrb[57].mxu1 }
 0x487   : > { %13526 = vst [vmem:[%s19532_s19 + $0x178] sm:$0xf] %v15234_v5  ;;  %v15266_v8 = vpack.c.bf16 %v13664_v45, %v13664_v45  ;;  %v13301_v10 = vmul.f32 %v16854_v39, %v21878_v50  ;;  %v15264_v26 = vpack.c.bf16 %v13662_v6, %v13662_v6  ;;  %v13335_v9 = vadd.f32 %v21883_v18, %v13298_v28  ;;  %v17286_v3 = vpop.f32.mrb[58].mxu1 }
 0x488   : > { %13821 = vst [vmem:[%s19532_s19 + $0x14c] sm:$0xf] %v15263_v27  ;;  %13524 = vst [vmem:[%s19532_s19 + $0x158] sm:$0xf] %v15232_v48  ;;  %v13596_v4 = vmul.f32 %v21888_v34, %v12543_v49  ;;  %v13299_v61 = vmul.f32 %v21878_v50, %v9162_v43  ;;  %v13369_v7 = vmax.f32 %v13337_v38, 0.0  ;;  %v13635_v1 = vadd.f32 %v21894_v62, %v13598_v16  ;;  %v12546_v31 = vpop.f32.mrb[59].mxu1 }
 0x489   : > { %13824 = vst [vmem:[%s19532_s19 + $0x17c] sm:$0xf] %v15266_v8  ;;  %v13338_v13 = vadd.f32 %v21883_v18, %v13301_v10  ;;  %v13599_v57 = vmul.f32 %v17286_v3, %v21888_v34  ;;  %13822 = vst [vmem:[%s19532_s19 + $0x15c] sm:$0xf] %v15264_v26  ;;  %v13367_v56 = vmax.f32 %v13335_v9, 0.0  ;;  %v13597_v36 = vmul.f32 %v21888_v34, %v12546_v31 }
 0x48a   : > { %v13633_v2 = vadd.f32 %v21894_v62, %v13596_v4  ;;  %v13336_v58 = vadd.f32 %v21883_v18, %v13299_v61  ;;  %v15237_v33 = vpack.c.bf16 %v13369_v7, %v13369_v7  ;;  %v13667_v14 = vmax.f32 %v13635_v1, 0.0  ;;  %v16857_v12 = vpop.f32.mrb[92].mxu0 }
 0x48b   : > { %v13370_v21 = vmax.f32 %v13338_v13, 0.0  ;;  %v13636_v25 = vadd.f32 %v21894_v62, %v13599_v57  ;;  %v15235_v24 = vpack.c.bf16 %v13367_v56, %v13367_v56  ;;  %v13634_v32 = vadd.f32 %v21894_v62, %v13597_v36  ;;  %v9175_v19 = vpop.f32.mrb[93].mxu0 }
 0x48c   : > { %v13665_v60 = vmax.f32 %v13633_v2, 0.0  ;;  %v13368_v42 = vmax.f32 %v13336_v58, 0.0  ;;  %13529 = vst [vmem:[%s19532_s19 + $0x1a8] sm:$0xf] %v15237_v33  ;;  %v15269_v40 = vpack.c.bf16 %v13667_v14, %v13667_v14  ;;  %v13304_v37 = vmul.f32 %v16857_v12, %v21878_v50  ;;  %v16858_v35 = vpop.f32.mrb[94].mxu0 }
 0x48d   : > { %v15238_v54 = vpack.c.bf16 %v13370_v21, %v13370_v21  ;;  %v13668_v63 = vmax.f32 %v13636_v25, 0.0  ;;  %13527 = vst [vmem:[%s19532_s19 + $0x188] sm:$0xf] %v15235_v24  ;;  %v13666_v55 = vmax.f32 %v13634_v32, 0.0  ;;  %v17289_v52 = vpop.f32.mrb[60].mxu1  ;;  %v13302_v0 = vmul.f32 %v21878_v50, %v9175_v19  ;;  %v9178_v23 = vpop.f32.mrb[95].mxu0 }
 0x48e   : > { %v15267_v30 = vpack.c.bf16 %v13665_v60, %v13665_v60  ;;  %v15236_v59 = vpack.c.bf16 %v13368_v42, %v13368_v42  ;;  %13827 = vst [vmem:[%s19532_s19 + $0x1ac] sm:$0xf] %v15269_v40  ;;  %v13341_v44 = vadd.f32 %v21883_v18, %v13304_v37  ;;  %v13602_v20 = vmul.f32 %v17289_v52, %v21888_v34  ;;  %v12559_v47 = vpop.f32.mrb[61].mxu1 }
 0x48f   : > { %13530 = vst [vmem:[%s19532_s19 + $0x1b8] sm:$0xf] %v15238_v54  ;;  %v15270_v41 = vpack.c.bf16 %v13668_v63, %v13668_v63  ;;  %v13305_v46 = vmul.f32 %v16858_v35, %v21878_v50  ;;  %v15268_v22 = vpack.c.bf16 %v13666_v55, %v13666_v55  ;;  %v13339_v11 = vadd.f32 %v21883_v18, %v13302_v0  ;;  %v17290_v53 = vpop.f32.mrb[62].mxu1 }
 0x490   : > { %13825 = vst [vmem:[%s19532_s19 + $0x18c] sm:$0xf] %v15267_v30  ;;  %13528 = vst [vmem:[%s19532_s19 + $0x198] sm:$0xf] %v15236_v59  ;;  %v13600_v17 = vmul.f32 %v21888_v34, %v12559_v47  ;;  %v13303_v5 = vmul.f32 %v21878_v50, %v9178_v23  ;;  %v13373_v45 = vmax.f32 %v13341_v44, 0.0  ;;  %v13639_v29 = vadd.f32 %v21894_v62, %v13602_v20  ;;  %v12562_v48 = vpop.f32.mrb[63].mxu1 }
 0x491   : > { %13828 = vst [vmem:[%s19532_s19 + $0x1bc] sm:$0xf] %v15270_v41  ;;  %v13342_v51 = vadd.f32 %v21883_v18, %v13305_v46  ;;  %v13603_v27 = vmul.f32 %v17290_v53, %v21888_v34  ;;  %13826 = vst [vmem:[%s19532_s19 + $0x19c] sm:$0xf] %v15268_v22  ;;  %v13371_v6 = vmax.f32 %v13339_v11, 0.0  ;;  %v13601_v39 = vmul.f32 %v21888_v34, %v12562_v48 }
 0x492   : > { %v13637_v15 = vadd.f32 %v21894_v62, %v13600_v17  ;;  %v13340_v28 = vadd.f32 %v21883_v18, %v13303_v5  ;;  %v15241_v50 = vpack.c.bf16 %v13373_v45, %v13373_v45  ;;  %v13671_v8 = vmax.f32 %v13639_v29, 0.0 }
 0x493   : > { %v13374_v38 = vmax.f32 %v13342_v51, 0.0  ;;  %v13640_v16 = vadd.f32 %v21894_v62, %v13603_v27  ;;  %v15239_v49 = vpack.c.bf16 %v13371_v6, %v13371_v6  ;;  %v13638_v26 = vadd.f32 %v21894_v62, %v13601_v39 }
 0x494   : > { %v13669_v10 = vmax.f32 %v13637_v15, 0.0  ;;  %v13372_v43 = vmax.f32 %v13340_v28, 0.0  ;;  %13533 = vst [vmem:[%s19532_s19 + $0x1e8] sm:$0xf] %v15241_v50  ;;  %v15273_v18 = vpack.c.bf16 %v13671_v8, %v13671_v8 }
 0x495   : > { %v15242_v9 = vpack.c.bf16 %v13374_v38, %v13374_v38  ;;  %v13672_v34 = vmax.f32 %v13640_v16, 0.0  ;;  %13531 = vst [vmem:[%s19532_s19 + $0x1c8] sm:$0xf] %v15239_v49  ;;  %v13670_v61 = vmax.f32 %v13638_v26, 0.0 }
 0x496   : > { %v15271_v4 = vpack.c.bf16 %v13669_v10, %v13669_v10  ;;  %v15240_v3 = vpack.c.bf16 %v13372_v43, %v13372_v43  ;;  %13831 = vst [vmem:[%s19532_s19 + $0x1ec] sm:$0xf] %v15273_v18 }
 0x497   : > { %13534 = vst [vmem:[%s19532_s19 + $0x1f8] sm:$0xf] %v15242_v9  ;;  %v15274_v7 = vpack.c.bf16 %v13672_v34, %v13672_v34  ;;  %v15272_v1 = vpack.c.bf16 %v13670_v61, %v13670_v61 }
 0x498   : > { %13829 = vst [vmem:[%s19532_s19 + $0x1cc] sm:$0xf] %v15271_v4  ;;  %13532 = vst [vmem:[%s19532_s19 + $0x1d8] sm:$0xf] %v15240_v3 }
 0x499   : > { %13832 = vst [vmem:[%s19532_s19 + $0x1fc] sm:$0xf] %v15274_v7  ;;  %13830 = vst [vmem:[%s19532_s19 + $0x1dc] sm:$0xf] %v15272_v1 }
 0x49a PF: > { %s17_s23 = sadd.s32 1, %s18380_s23   ;;  %s22558_s21 = smov %s18376_s22 }
 0x49b   : > { %p14_p5 = scmp.ge.s32.totalorder %s17_s23, 4   ;;  %s22559_s22 = smov %s22561_s24 }
 0x49d   :  { %16 = sbr.rel (!%p14_p5) target bundleno = 2 (0x2), region = 127 }

</bundles_post_ra>
